<compile_context>
chip_gen: v7x
topology: tpu7x:2x2x1
jax: 0.10.0
libtpu: 0.0.40
codegen_flags: <defaults>
</compile_context>

<pallas_src>
import jax
import jax.numpy as jnp
import numpy as np
from jax import lax
from jax.experimental import pallas as pl
from jax.experimental.pallas import tpu as pltpu

CIN = 4
COUT = 32
H, W = 60, 80                  # spatial size implied by the module (60//2, 80//2)
HP, WP = H // 2, W // 2        # MaxPool2d(2) output: 30 x 40
FLAT = COUT * HP * WP          # 38400
HIDDEN = 128

KIN = 9 * CIN                  # 36 im2col values per conv output pixel
NTAPS = 4                      # 2x2 pool-window taps
PIX = 4                        # pooled pixels packed per kernel row (WP % PIX == 0)
WG = WP // PIX                 # 10 pixel-groups per pooled row
ROWS_PER_IMG = HP * WG         # 300 kernel rows per image
CONV_K = PIX * KIN             # 144 (per-tap contraction dim)
POOL_N = PIX * COUT            # 128 (lane-dense pooled output columns)

NK = 2                         # FC1 K-tiles (FLAT % NK == 0, tk multiple of 128)
VMEM_LIMIT = 32 * 1024 * 1024  # safe on v5e/v6e/v7x; all tiles sized well below it


def _hidden_splits():
    # Split the 128 hidden units across TensorCores only where two exist (v7x);
    # on single-TC chips (v5e/v6e) NJ=1 keeps the w1 RHS lane-dense.
    try:
        kind = jax.devices()[0].device_kind.lower()
    except Exception:
        return 1
    return 2 if ("v7" in kind or "7x" in kind) else 1


NJ = _hidden_splits()


# ---------------------------------------------------------------------------
# Kernel 1: conv (per-tap packed im2col matmuls) -> MaxPool2d(2) (elementwise
# max over taps) -> +bias -> ReLU, all fused.  Output is a lane-dense
# (rows, 128) bf16 slab whose column order is p*32 + c (w' = g*4 + p).
# ---------------------------------------------------------------------------
def conv_pool_kernel(x_ref, w_ref, b_ref, o_ref):
    w = w_ref[...]
    y = jnp.dot(x_ref[0], w, preferred_element_type=jnp.float32)
    for t in range(1, NTAPS):
        y = jnp.maximum(y, jnp.dot(x_ref[t], w,
                                   preferred_element_type=jnp.float32))
    # relu(max_t(y_t) + b) == maxpool(relu(y_t + b)): bias is tap-invariant.
    o_ref[...] = jnp.maximum(y + b_ref[...], 0.0).astype(o_ref.dtype)


# ---------------------------------------------------------------------------
# Kernel 2: Linear(38400->128) + ReLU + Linear(128->A), K-tiled with a VMEM
# f32 accumulator; grid = (NJ hidden slices [parallel], NK K-tiles [arbitrary]).
# Each j produces a partial logit slab (its HIDDEN//NJ units through FC2);
# b2 is folded in by the j == 0 partial.
# ---------------------------------------------------------------------------
def fc_kernel(x_ref, w1_ref, b1_ref, w2_ref, b2_ref, o_ref, acc_ref):
    j = pl.program_id(0)
    k = pl.program_id(1)

    @pl.when(k == 0)
    def _():
        acc_ref[...] = jnp.zeros_like(acc_ref)

    acc_ref[...] += jnp.dot(x_ref[...], w1_ref[0],
                            preferred_element_type=jnp.float32)

    @pl.when(k == pl.num_programs(1) - 1)
    def _():
        h = jnp.maximum(acc_ref[...] + b1_ref[0], 0.0)
        logits = jnp.dot(h, w2_ref[0], preferred_element_type=jnp.float32)
        logits = logits + (j == 0).astype(jnp.float32) * b2_ref[...]
        o_ref[0] = logits.astype(o_ref.dtype)


# ---------------------------------------------------------------------------
# One-time parameter re-layout (hoisted out of the per-call path).
# ---------------------------------------------------------------------------
def prepare_params(params):
    num_actions = params["w2"].shape[0]

    # conv weight (Cout, Cin, kh, kw) -> (kh*kw*Cin, Cout), matching patch order.
    wc_mat = jnp.transpose(params["wc"], (2, 3, 1, 0)).reshape(KIN, COUT)

    # Block-diagonal over the PIX pooled pixels packed into one kernel row:
    #   input col = p*KIN + j  ->  output col = p*COUT + c   (shared by all taps)
    wc_blk = jnp.zeros((CONV_K, POOL_N), jnp.float32)
    for p in range(PIX):
        wc_blk = wc_blk.at[p * KIN:(p + 1) * KIN,
                           p * COUT:(p + 1) * COUT].set(wc_mat)
    wc_blk = wc_blk.astype(jnp.bfloat16)
    bc_blk = jnp.tile(params["bc"], PIX).reshape(1, POOL_N)   # post-pool bias, f32

    # fc1 weight permuted to the (h', w', c) flatten order produced by the conv
    # kernel (PyTorch flattens (c, h', w')); split into NJ HBM-contiguous hidden
    # slices; stored bf16 (streaming w1 from HBM dominates the forward).
    w1_k = jnp.transpose(params["w1"].reshape(HIDDEN, COUT, HP, WP),
                         (2, 3, 1, 0)).reshape(FLAT, HIDDEN)
    w1_j = jnp.transpose(w1_k.reshape(FLAT, NJ, HIDDEN // NJ),
                         (1, 0, 2)).astype(jnp.bfloat16)
    b1_j = params["b1"].reshape(NJ, 1, HIDDEN // NJ)
    w2_j = params["w2"].T.reshape(NJ, HIDDEN // NJ, num_actions)
    b2 = params["b2"].reshape(1, num_actions)

    return {"wc_blk": wc_blk, "bc_blk": bc_blk,
            "w1_j": w1_j, "b1_j": b1_j, "w2_j": w2_j, "b2": b2}


def _conv_tiling(rtot):
    # >= 4 grid steps (pipeline overlap + both v7x TCs); tile rows multiple of 8.
    steps = max(4, -(-rtot // 512))
    tile = -(-rtot // steps)
    tile = -(-tile // 8) * 8
    return tile, steps, tile * steps


# ---------------------------------------------------------------------------
# Forward pass (jit this; `prep` comes from prepare_params, computed once).
# ---------------------------------------------------------------------------
def qfunction_forward(x_nchw, prep):
    N = x_nchw.shape[0]
    A = prep["w2_j"].shape[-1]

    # --- im2col + 2x2-window packing glue (pure layout, fused by XLA) -------
    x = jnp.transpose(x_nchw, (0, 2, 3, 1)).astype(jnp.bfloat16)      # (N,60,80,4)
    xp = jnp.pad(x, ((0, 0), (1, 1), (1, 1), (0, 0)))                 # (N,62,82,4)
    taps9 = [xp[:, dh:dh + H, dw:dw + W, :]
             for dh in range(3) for dw in range(3)]
    patches = jnp.concatenate(taps9, axis=-1)                         # (N,60,80,36)
    pool_taps = jnp.stack([patches[:, a::2, b::2, :]
                           for a in (0, 1) for b in (0, 1)], axis=0)  # (4,N,30,40,36)
    packed = pool_taps.reshape(NTAPS, N, HP, WG, PIX, KIN)
    packed = packed.reshape(NTAPS, N * ROWS_PER_IMG, CONV_K)          # (4, N*300, 144)

    rtot = N * ROWS_PER_IMG
    tile_r, steps, rtot_pad = _conv_tiling(rtot)
    if rtot_pad != rtot:                         # pad rows so tile_r % 8 == 0 always
        packed = jnp.pad(packed, ((0, 0), (0, rtot_pad - rtot), (0, 0)))

    conv_cost = pl.CostEstimate(
        flops=2 * rtot_pad * NTAPS * CONV_K * POOL_N,
        transcendentals=0,
        bytes_accessed=2 * (NTAPS * rtot_pad * CONV_K + CONV_K * POOL_N
                            + rtot_pad * POOL_N) + 4 * POOL_N)

    pooled = pl.pallas_call(
        conv_pool_kernel,
        out_shape=jax.ShapeDtypeStruct((rtot_pad, POOL_N), jnp.bfloat16),
        grid_spec=pltpu.PrefetchScalarGridSpec(
            num_scalar_prefetch=0,
            grid=(steps,),
            in_specs=[pl.BlockSpec((NTAPS, tile_r, CONV_K), lambda i: (0, i, 0)),
                      pl.BlockSpec((CONV_K, POOL_N), lambda i: (0, 0)),
                      pl.BlockSpec((1, POOL_N), lambda i: (0, 0))],
            out_specs=pl.BlockSpec((tile_r, POOL_N), lambda i: (i, 0)),
        ),
        compiler_params=pltpu.CompilerParams(
            dimension_semantics=("parallel",),
            vmem_limit_bytes=VMEM_LIMIT),
        cost_estimate=conv_cost,
    )(packed, prep["wc_blk"], prep["bc_blk"])

    # (rtot, 128) -> (N, 38400) is layout-preserving; its column order
    # h'*1280 + w'*32 + c matches the w1_j permutation in prepare_params.
    flat = (pooled if rtot_pad == rtot else pooled[:rtot]).reshape(N, FLAT)

    tk = FLAT // NK                                                   # 19200
    fc_cost = pl.CostEstimate(
        flops=2 * N * FLAT * HIDDEN + 2 * N * HIDDEN * A,
        transcendentals=0,
        bytes_accessed=2 * (N * FLAT + FLAT * HIDDEN)
                       + 4 * (HIDDEN + HIDDEN * A + A + NJ * N * A))

    partials = pl.pallas_call(
        fc_kernel,
        out_shape=jax.ShapeDtypeStruct((NJ, N, A), jnp.float32),
        grid_spec=pltpu.PrefetchScalarGridSpec(
            num_scalar_prefetch=0,
            grid=(NJ, NK),
            in_specs=[pl.BlockSpec((N, tk), lambda j, k: (0, k)),
                      pl.BlockSpec((1, tk, HIDDEN // NJ), lambda j, k: (j, k, 0)),
                      pl.BlockSpec((1, 1, HIDDEN // NJ), lambda j, k: (j, 0, 0)),
                      pl.BlockSpec((1, HIDDEN // NJ, A), lambda j, k: (j, 0, 0)),
                      pl.BlockSpec((1, A), lambda j, k: (0, 0))],
            out_specs=pl.BlockSpec((1, N, A), lambda j, k: (j, 0, 0)),
            scratch_shapes=[pltpu.VMEM((N, HIDDEN // NJ), jnp.float32)],
        ),
        compiler_params=pltpu.CompilerParams(
            dimension_semantics=("parallel", "arbitrary"),
            vmem_limit_bytes=VMEM_LIMIT),
        cost_estimate=fc_cost,
    )(flat, prep["w1_j"], prep["b1_j"], prep["w2_j"], prep["b2"])

    if NJ == 1:
        return partials[0]
    return partials[0] + partials[1]


# ---------------------------------------------------------------------------
# Deterministic synthetic parameters (shapes from QFunction.__init__)
# ---------------------------------------------------------------------------
def init_params(key, num_actions):
    ks = jax.random.split(key, 6)
    s = 0.02
    return {
        "wc": s * jax.random.normal(ks[0], (COUT, CIN, 3, 3), jnp.float32),
        "bc": s * jax.random.normal(ks[1], (COUT,), jnp.float32),
        "w1": s * jax.random.normal(ks[2], (HIDDEN, FLAT), jnp.float32),
        "b1": s * jax.random.normal(ks[3], (HIDDEN,), jnp.float32),
        "w2": s * jax.random.normal(ks[4], (num_actions, HIDDEN), jnp.float32),
        "b2": s * jax.random.normal(ks[5], (num_actions,), jnp.float32),
    }


# Pure-JAX f32 reference with PyTorch NCHW semantics (for verification only).
def reference_forward(x_nchw, params):
    y = lax.conv_general_dilated(x_nchw, params["wc"], (1, 1),
                                 ((1, 1), (1, 1)),
                                 dimension_numbers=("NCHW", "OIHW", "NCHW"),
                                 precision=lax.Precision.HIGHEST)
    y = y + params["bc"][None, :, None, None]
    y = jnp.maximum(y, 0.0)
    y = lax.reduce_window(y, -jnp.inf, lax.max, (1, 1, 2, 2), (1, 1, 2, 2),
                          "VALID")
    flat = y.reshape(y.shape[0], -1)
    h = jnp.maximum(jnp.dot(flat, params["w1"].T,
                            precision=lax.Precision.HIGHEST) + params["b1"], 0.0)
    return jnp.dot(h, params["w2"].T,
                   precision=lax.Precision.HIGHEST) + params["b2"]


if __name__ == "__main__":
    num_actions = 8
    key = jax.random.PRNGKey(0)
    kx, kp = jax.random.split(key)

    # PyTorch-style NCHW input; 60x80 spatial is required by the module's Linear.
    x = jax.random.normal(kx, (2, CIN, H, W), jnp.float32)
    params = init_params(kp, num_actions)

    # One-time weight re-layout (kept OFF the per-call hot path) + jitted fwd.
    prep = prepare_params(params)
    fwd = jax.jit(qfunction_forward)

    out = jax.block_until_ready(fwd(x, prep))

    # Tolerance reflects bf16 storage of w1 / activations (f32 accumulation).
    ref = reference_forward(x, params)
    np.testing.assert_allclose(np.asarray(out), np.asarray(ref),
                               rtol=5e-3, atol=5e-3)
    print("KERNEL_OK")
</pallas_src>

<mosaic_0001>
module attributes {stable_mosaic.version = 11 : i64} {
  func.func @conv_pool_kernel(%arg0: i32, %arg1: memref<4x152x144xbf16, #tpu.memory_space<vmem>>, %arg2: memref<144x128xbf16, #tpu.memory_space<vmem>>, %arg3: memref<1x128xf32, #tpu.memory_space<vmem>>, %arg4: memref<152x128xbf16, #tpu.memory_space<vmem>>) attributes {dimension_semantics = [#tpu.dimension_semantics<parallel>], iteration_bounds = array<i64: 4>, scalar_prefetch = 0 : i64, scratch_operands = 0 : i64, tpu.core_type = #tpu.core_type<tc>, window_params = [{transform_indices = @transform_0, window_bounds = array<i64: 4, 152, 144>}, {pipeline_mode = #tpu.pipeline_mode<synchronous>, transform_indices = @transform_1, window_bounds = array<i64: 144, 128>}, {pipeline_mode = #tpu.pipeline_mode<synchronous>, transform_indices = @transform_2, window_bounds = array<i64: 1, 128>}, {transform_indices = @transform_3, window_bounds = array<i64: 152, 128>}]} {
    %c0 = arith.constant 0 : index
    %c0_0 = arith.constant 0 : index
    %0 = vector.load %arg2[%c0, %c0_0] : memref<144x128xbf16, #tpu.memory_space<vmem>>, vector<144x128xbf16>
    %c0_1 = arith.constant 0 : index
    %c0_2 = arith.constant 0 : index
    %c0_3 = arith.constant 0 : index
    %1 = vector.load %arg1[%c0_1, %c0_2, %c0_3] : memref<4x152x144xbf16, #tpu.memory_space<vmem>>, vector<1x152x144xbf16>
    %2 = vector.shape_cast %1 : vector<1x152x144xbf16> to vector<152x144xbf16>
    %cst = arith.constant dense<0.000000e+00> : vector<152x128xf32>
    %3 = tpu.matmul %2, %0, %cst {dimension_numbers = #tpu.dot_dimension_numbers<[1], [0], [0], [1], [0, 0, 1, 1], [], []>} : vector<152x144xbf16>, vector<144x128xbf16>, vector<152x128xf32> -> vector<152x128xf32>
    %c1 = arith.constant 1 : index
    %c0_4 = arith.constant 0 : index
    %c0_5 = arith.constant 0 : index
    %4 = vector.load %arg1[%c1, %c0_4, %c0_5] : memref<4x152x144xbf16, #tpu.memory_space<vmem>>, vector<1x152x144xbf16>
    %5 = vector.shape_cast %4 : vector<1x152x144xbf16> to vector<152x144xbf16>
    %cst_6 = arith.constant dense<0.000000e+00> : vector<152x128xf32>
    %6 = tpu.matmul %5, %0, %cst_6 {dimension_numbers = #tpu.dot_dimension_numbers<[1], [0], [0], [1], [0, 0, 1, 1], [], []>} : vector<152x144xbf16>, vector<144x128xbf16>, vector<152x128xf32> -> vector<152x128xf32>
    %7 = arith.maximumf %3, %6 : vector<152x128xf32>
    %c2 = arith.constant 2 : index
    %c0_7 = arith.constant 0 : index
    %c0_8 = arith.constant 0 : index
    %8 = vector.load %arg1[%c2, %c0_7, %c0_8] : memref<4x152x144xbf16, #tpu.memory_space<vmem>>, vector<1x152x144xbf16>
    %9 = vector.shape_cast %8 : vector<1x152x144xbf16> to vector<152x144xbf16>
    %cst_9 = arith.constant dense<0.000000e+00> : vector<152x128xf32>
    %10 = tpu.matmul %9, %0, %cst_9 {dimension_numbers = #tpu.dot_dimension_numbers<[1], [0], [0], [1], [0, 0, 1, 1], [], []>} : vector<152x144xbf16>, vector<144x128xbf16>, vector<152x128xf32> -> vector<152x128xf32>
    %11 = arith.maximumf %7, %10 : vector<152x128xf32>
    %c3 = arith.constant 3 : index
    %c0_10 = arith.constant 0 : index
    %c0_11 = arith.constant 0 : index
    %12 = vector.load %arg1[%c3, %c0_10, %c0_11] : memref<4x152x144xbf16, #tpu.memory_space<vmem>>, vector<1x152x144xbf16>
    %13 = vector.shape_cast %12 : vector<1x152x144xbf16> to vector<152x144xbf16>
    %cst_12 = arith.constant dense<0.000000e+00> : vector<152x128xf32>
    %14 = tpu.matmul %13, %0, %cst_12 {dimension_numbers = #tpu.dot_dimension_numbers<[1], [0], [0], [1], [0, 0, 1, 1], [], []>} : vector<152x144xbf16>, vector<144x128xbf16>, vector<152x128xf32> -> vector<152x128xf32>
    %15 = arith.maximumf %11, %14 : vector<152x128xf32>
    %c0_13 = arith.constant 0 : index
    %c0_14 = arith.constant 0 : index
    %16 = vector.load %arg3[%c0_13, %c0_14] : memref<1x128xf32, #tpu.memory_space<vmem>>, vector<1x128xf32>
    %17 = vector.broadcast %16 : vector<1x128xf32> to vector<152x128xf32>
    %18 = arith.addf %15, %17 : vector<152x128xf32>
    %cst_15 = arith.constant 0.000000e+00 : f32
    %19 = vector.broadcast %cst_15 : f32 to vector<152x128xf32>
    %20 = arith.maximumf %18, %19 : vector<152x128xf32>
    %21 = arith.truncf %20 : vector<152x128xf32> to vector<152x128xbf16>
    %c0_16 = arith.constant 0 : index
    %c0_17 = arith.constant 0 : index
    %22 = vector.load %arg4[%c0_16, %c0_17] : memref<152x128xbf16, #tpu.memory_space<vmem>>, vector<152x128xbf16>
    tpu.vector_store %arg4[%c0_16, %c0_17], %21 {strides = array<i32>} : memref<152x128xbf16, #tpu.memory_space<vmem>>, vector<152x128xbf16>,
    return
  }
  func.func @transform_0(%arg0: i32) -> (i32, i32, i32) {
    %c0_i32 = arith.constant 0 : i32
    %c0_i32_0 = arith.constant 0 : i32
    %c0_i32_1 = arith.constant 0 : i32
    return %c0_i32, %arg0, %c0_i32_0 : i32, i32, i32
  }
  func.func @transform_1(%arg0: i32) -> (i32, i32) {
    %c0_i32 = arith.constant 0 : i32
    %c0_i32_0 = arith.constant 0 : i32
    %c0_i32_1 = arith.constant 0 : i32
    return %c0_i32, %c0_i32_0 : i32, i32
  }
  func.func @transform_2(%arg0: i32) -> (i32, i32) {
    %c0_i32 = arith.constant 0 : i32
    %c0_i32_0 = arith.constant 0 : i32
    %c0_i32_1 = arith.constant 0 : i32
    return %c0_i32, %c0_i32_0 : i32, i32
  }
  func.func @transform_3(%arg0: i32) -> (i32, i32) {
    %c0_i32 = arith.constant 0 : i32
    %c0_i32_0 = arith.constant 0 : i32
    return %arg0, %c0_i32 : i32, i32
  }
}

module attributes {stable_mosaic.version = 11 : i64} {
  func.func @fc_kernel(%arg0: i32, %arg1: i32, %arg2: memref<2x19200xbf16, #tpu.memory_space<vmem>>, %arg3: memref<1x19200x128xbf16, #tpu.memory_space<vmem>>, %arg4: memref<1x1x128xf32, #tpu.memory_space<vmem>>, %arg5: memref<1x128x8xf32, #tpu.memory_space<vmem>>, %arg6: memref<1x8xf32, #tpu.memory_space<vmem>>, %arg7: memref<1x2x8xf32, #tpu.memory_space<vmem>>, %arg8: memref<2x128xf32, #tpu.memory_space<vmem>>) attributes {dimension_semantics = [#tpu.dimension_semantics<parallel>, #tpu.dimension_semantics<arbitrary>], iteration_bounds = array<i64: 1, 2>, scalar_prefetch = 0 : i64, scratch_operands = 1 : i64, tpu.core_type = #tpu.core_type<tc>, window_params = [{transform_indices = @transform_0, window_bounds = array<i64: 2, 19200>}, {transform_indices = @transform_1, window_bounds = array<i64: 1, 19200, 128>}, {transform_indices = @transform_2, window_bounds = array<i64: 1, 1, 128>}, {transform_indices = @transform_3, window_bounds = array<i64: 1, 128, 8>}, {pipeline_mode = #tpu.pipeline_mode<synchronous>, transform_indices = @transform_4, window_bounds = array<i64: 1, 8>}, {transform_indices = @transform_5, window_bounds = array<i64: 1, 2, 8>}]} {
    %c0_i32 = arith.constant 0 : i32
    %0 = arith.cmpi eq, %arg1, %c0_i32 : i32
    %1 = arith.extui %0 : i1 to i32
    %c0_i32_0 = arith.constant 0 : i32
    %2 = arith.cmpi ne, %1, %c0_i32_0 : i32
    scf.if %2 {
      %cst_10 = arith.constant 0.000000e+00 : f32
      %13 = vector.broadcast %cst_10 : f32 to vector<2x128xf32>
      %c0_11 = arith.constant 0 : index
      %c0_12 = arith.constant 0 : index
      %14 = vector.load %arg8[%c0_11, %c0_12] : memref<2x128xf32, #tpu.memory_space<vmem>>, vector<2x128xf32>
      tpu.vector_store %arg8[%c0_11, %c0_12], %13 {strides = array<i32>} : memref<2x128xf32, #tpu.memory_space<vmem>>, vector<2x128xf32>,
    } else {
    }
    %c0 = arith.constant 0 : index
    %c0_1 = arith.constant 0 : index
    %3 = vector.load %arg8[%c0, %c0_1] : memref<2x128xf32, #tpu.memory_space<vmem>>, vector<2x128xf32>
    %c0_2 = arith.constant 0 : index
    %c0_3 = arith.constant 0 : index
    %4 = vector.load %arg2[%c0_2, %c0_3] : memref<2x19200xbf16, #tpu.memory_space<vmem>>, vector<2x19200xbf16>
    %c0_4 = arith.constant 0 : index
    %c0_5 = arith.constant 0 : index
    %c0_6 = arith.constant 0 : index
    %5 = vector.load %arg3[%c0_4, %c0_5, %c0_6] : memref<1x19200x128xbf16, #tpu.memory_space<vmem>>, vector<1x19200x128xbf16>
    %6 = vector.shape_cast %5 : vector<1x19200x128xbf16> to vector<19200x128xbf16>
    %cst = arith.constant dense<0.000000e+00> : vector<2x128xf32>
    %7 = tpu.matmul %4, %6, %cst {dimension_numbers = #tpu.dot_dimension_numbers<[1], [0], [0], [1], [0, 0, 1, 1], [], []>} : vector<2x19200xbf16>, vector<19200x128xbf16>, vector<2x128xf32> -> vector<2x128xf32>
    %8 = arith.addf %3, %7 : vector<2x128xf32>
    %c0_7 = arith.constant 0 : index
    %c0_8 = arith.constant 0 : index
    %9 = vector.load %arg8[%c0_7, %c0_8] : memref<2x128xf32, #tpu.memory_space<vmem>>, vector<2x128xf32>
    tpu.vector_store %arg8[%c0_7, %c0_8], %8 {strides = array<i32>} : memref<2x128xf32, #tpu.memory_space<vmem>>, vector<2x128xf32>,
    %c1_i32 = arith.constant 1 : i32
    %10 = arith.cmpi eq, %arg1, %c1_i32 : i32
    %11 = arith.extui %10 : i1 to i32
    %c0_i32_9 = arith.constant 0 : i32
    %12 = arith.cmpi ne, %11, %c0_i32_9 : i32
    scf.if %12 {
      %c0_10 = arith.constant 0 : index
      %c0_11 = arith.constant 0 : index
      %13 = vector.load %arg8[%c0_10, %c0_11] : memref<2x128xf32, #tpu.memory_space<vmem>>, vector<2x128xf32>
      %c0_12 = arith.constant 0 : index
      %c0_13 = arith.constant 0 : index
      %c0_14 = arith.constant 0 : index
      %14 = vector.load %arg4[%c0_12, %c0_13, %c0_14] : memref<1x1x128xf32, #tpu.memory_space<vmem>>, vector<1x1x128xf32>
      %15 = vector.shape_cast %14 : vector<1x1x128xf32> to vector<1x128xf32>
      %16 = vector.broadcast %15 : vector<1x128xf32> to vector<2x128xf32>
      %17 = arith.addf %13, %16 : vector<2x128xf32>
      %cst_15 = arith.constant 0.000000e+00 : f32
      %18 = vector.broadcast %cst_15 : f32 to vector<2x128xf32>
      %19 = arith.maximumf %17, %18 : vector<2x128xf32>
      %c0_16 = arith.constant 0 : index
      %c0_17 = arith.constant 0 : index
      %c0_18 = arith.constant 0 : index
      %20 = vector.load %arg5[%c0_16, %c0_17, %c0_18] : memref<1x128x8xf32, #tpu.memory_space<vmem>>, vector<1x128x8xf32>
      %21 = vector.shape_cast %20 : vector<1x128x8xf32> to vector<128x8xf32>
      %cst_19 = arith.constant dense<0.000000e+00> : vector<2x8xf32>
      %22 = tpu.matmul %19, %21, %cst_19 {dimension_numbers = #tpu.dot_dimension_numbers<[1], [0], [0], [1], [0, 0, 1, 1], [], []>} : vector<2x128xf32>, vector<128x8xf32>, vector<2x8xf32> -> vector<2x8xf32>
      %c0_i32_20 = arith.constant 0 : i32
      %23 = arith.cmpi eq, %arg0, %c0_i32_20 : i32
      %24 = arith.extui %23 : i1 to i32
      %25 = arith.sitofp %24 : i32 to f32
      %c0_21 = arith.constant 0 : index
      %c0_22 = arith.constant 0 : index
      %26 = vector.load %arg6[%c0_21, %c0_22] : memref<1x8xf32, #tpu.memory_space<vmem>>, vector<1x8xf32>
      %27 = vector.broadcast %25 : f32 to vector<1x8xf32>
      %28 = arith.mulf %27, %26 : vector<1x8xf32>
      %29 = vector.broadcast %28 : vector<1x8xf32> to vector<2x8xf32>
      %30 = arith.addf %22, %29 : vector<2x8xf32>
      %c0_23 = arith.constant 0 : index
      %c0_24 = arith.constant 0 : index
      %c0_25 = arith.constant 0 : index
      %31 = vector.load %arg7[%c0_23, %c0_24, %c0_25] : memref<1x2x8xf32, #tpu.memory_space<vmem>>, vector<1x2x8xf32>
      %32 = vector.shape_cast %31 : vector<1x2x8xf32> to vector<2x8xf32>
      %33 = vector.shape_cast %30 : vector<2x8xf32> to vector<1x2x8xf32>
      tpu.vector_store %arg7[%c0_23, %c0_24, %c0_25], %33 {strides = array<i32>} : memref<1x2x8xf32, #tpu.memory_space<vmem>>, vector<1x2x8xf32>,
    } else {
    }
    return
  }
  func.func @transform_0(%arg0: i32, %arg1: i32) -> (i32, i32) {
    %c0_i32 = arith.constant 0 : i32
    %c0_i32_0 = arith.constant 0 : i32
    return %c0_i32, %arg1 : i32, i32
  }
  func.func @transform_1(%arg0: i32, %arg1: i32) -> (i32, i32, i32) {
    %c0_i32 = arith.constant 0 : i32
    %c0_i32_0 = arith.constant 0 : i32
    return %arg0, %arg1, %c0_i32 : i32, i32, i32
  }
  func.func @transform_2(%arg0: i32, %arg1: i32) -> (i32, i32, i32) {
    %c0_i32 = arith.constant 0 : i32
    %c0_i32_0 = arith.constant 0 : i32
    %c0_i32_1 = arith.constant 0 : i32
    return %arg0, %c0_i32, %c0_i32_0 : i32, i32, i32
  }
  func.func @transform_3(%arg0: i32, %arg1: i32) -> (i32, i32, i32) {
    %c0_i32 = arith.constant 0 : i32
    %c0_i32_0 = arith.constant 0 : i32
    %c0_i32_1 = arith.constant 0 : i32
    return %arg0, %c0_i32, %c0_i32_0 : i32, i32, i32
  }
  func.func @transform_4(%arg0: i32, %arg1: i32) -> (i32, i32) {
    %c0_i32 = arith.constant 0 : i32
    %c0_i32_0 = arith.constant 0 : i32
    %c0_i32_1 = arith.constant 0 : i32
    return %c0_i32, %c0_i32_0 : i32, i32
  }
  func.func @transform_5(%arg0: i32, %arg1: i32) -> (i32, i32, i32) {
    %c0_i32 = arith.constant 0 : i32
    %c0_i32_0 = arith.constant 0 : i32
    %c0_i32_1 = arith.constant 0 : i32
    return %arg0, %c0_i32, %c0_i32_0 : i32, i32, i32
  }
}

</mosaic_0001>

<bundles_post_ra>
// kernel: qfunction_forward.2
= control target key start
LH: loop header
LB: loop body
LE: loop exit
PB: predicated region body
PF: predicated region fallthrough
CT: control target
= control target key end

     0   :  { %s2326_s12 = smov 0   ;;  %s2328_s13 = smov 0   ;;  %s2970_s0 = inlined_call_operand.vmem [shape: bf16[4,608,144], index: 0, kind: input, shape index: {}]   ;;  %s2971_s1 = inlined_call_operand.vmem [shape: bf16[144,128], index: 1, kind: input, shape index: {}]   ;;  %s2972_s2 = inlined_call_operand.vmem [shape: f32[1,128], index: 2, kind: input, shape index: {}]   ;;  %s2973_s3 = inlined_call_operand.vmem [shape: bf16[608,128], index: 3, kind: output, shape index: {}]  }
   0x1   :  { %s2330_s14 = smov 0  }
   0x2 LB: > { %s1838_s15 = sadd.s32 4294967295, %s2303_s14   ;;  %s2343_s16 = sadd.s32 1, %s2303_s14   ;;  %s2303_s14 = sphi %s2330_s14, %s2982_s14   ;;  %s2299_s13 = sphi %s2328_s13, %s2981_s13   ;;  %s2295_s12 = sphi %s2326_s12, %s2980_s12  }
   0x3   : > { %s17_s17 = ssub.s32 %s2303_s14, %s2343_s16  ;;  %s20_s18 = sadd.s32 1, %s2299_s13 }
   0x4   : > { %p18_p0 = scmp.eq.s32.totalorder %s17_s17, 0  ;;  %p27_p1 = scmp.ne.s32.totalorder %s2299_s13, %s2295_s12 }
   0x5   : > { %p28_p2 = scmp.eq.s32.totalorder %s2303_s14, 0  ;;  %p1841_p4 = scmp.ge.s32.totalorder %s2303_s14, 4 }
   0x6   : > { %s2352_s19 = scalar_select %p18_p0, %s2299_s13, %s20_s18  }
   0x7   : > { %p29_p3 = por %p28_p2, %p27_p1  ;;  %127 = sbr.rel (%p1841_p4) target bundleno = 57 (0x39), region = 24 }
   0xe   : > { %130 = sbr.rel (!%p29_p3) target bundleno = 57 (0x39), region = 28  ;;  %s132_s20 = sand.u32 (%p29_p3), 1, %s2299_s13  }
   0xf   : > { %s2120_s21 = smul.u32 (%p29_p3), 152, %s2303_s14 }
  0x10   : > { %s2129_s22 = smul.u32 (%p29_p3), 608, %s132_s20 }
  0x11   : > { %s2360_s25 = scalar_lea.vmem (%p29_p3), %s2970_s0, %s2120_s21 }
  0x12   : > { %v316_v0 = vld [vmem:[%s2360_s25] sm:$0xff] (%p29_p3)  ;;  %v318_v1 = vld [vmem:[%s2360_s25 + $0x8] sm:$0xff] (%p29_p3)  ;;  %v320_v2 = vld [vmem:[%s2360_s25 + $0x10] sm:$0xff] (%p29_p3)  ;;  %s2365_s26 = scalar_lea.vmem (%p29_p3), [#allocation2], %s2129_s22 }
  0x13   : > { %317 = vst [vmem:[%s2365_s26] sm:$0xff] (%p29_p3), %v316_v0  ;;  %319 = vst [vmem:[%s2365_s26 + $0x8] sm:$0xff] (%p29_p3), %v318_v1  ;;  %v322_v3 = vld [vmem:[%s2360_s25 + $0x18] sm:$0xff] (%p29_p3)  ;;  %v324_v4 = vld [vmem:[%s2360_s25 + $0x20] sm:$0xff] (%p29_p3) }
  0x14   : > { %321 = vst [vmem:[%s2365_s26 + $0x10] sm:$0xff] (%p29_p3), %v320_v2  ;;  %v326_v5 = vld [vmem:[%s2360_s25 + $0x28] sm:$0xff] (%p29_p3)  ;;  %323 = vst [vmem:[%s2365_s26 + $0x18] sm:$0xff] (%p29_p3), %v322_v3  ;;  %v328_v6 = vld [vmem:[%s2360_s25 + $0x30] sm:$0xff] (%p29_p3) }
  0x15   : > { %325 = vst [vmem:[%s2365_s26 + $0x20] sm:$0xff] %v324_v4  ;;  %327 = vst [vmem:[%s2365_s26 + $0x28] sm:$0xff] %v326_v5  ;;  %v330_v7 = vld [vmem:[%s2360_s25 + $0x38] sm:$0xff]  ;;  %v332_v8 = vld [vmem:[%s2360_s25 + $0x40] sm:$0xff] }
  0x16   : > { %329 = vst [vmem:[%s2365_s26 + $0x30] sm:$0xff] %v328_v6  ;;  %331 = vst [vmem:[%s2365_s26 + $0x38] sm:$0xff] %v330_v7  ;;  %v334_v9 = vld [vmem:[%s2360_s25 + $0x48] sm:$0xff]  ;;  %v336_v10 = vld [vmem:[%s2360_s25 + $0x50] sm:$0xff] }
  0x17   : > { %333 = vst [vmem:[%s2365_s26 + $0x40] sm:$0xff] %v332_v8  ;;  %v338_v11 = vld [vmem:[%s2360_s25 + $0x58] sm:$0xff]  ;;  %335 = vst [vmem:[%s2365_s26 + $0x48] sm:$0xff] %v334_v9  ;;  %v340_v12 = vld [vmem:[%s2360_s25 + $0x60] sm:$0xff] }
  0x18   : > { %337 = vst [vmem:[%s2365_s26 + $0x50] sm:$0xff] %v336_v10  ;;  %339 = vst [vmem:[%s2365_s26 + $0x58] sm:$0xff] %v338_v11  ;;  %v342_v13 = vld [vmem:[%s2360_s25 + $0x68] sm:$0xff]  ;;  %v344_v14 = vld [vmem:[%s2360_s25 + $0x70] sm:$0xff] }
  0x19   : > { %341 = vst [vmem:[%s2365_s26 + $0x60] sm:$0xff] %v340_v12  ;;  %343 = vst [vmem:[%s2365_s26 + $0x68] sm:$0xff] %v342_v13  ;;  %v346_v15 = vld [vmem:[%s2360_s25 + $0x78] sm:$0xff]  ;;  %v348_v16 = vld [vmem:[%s2360_s25 + $0x80] sm:$0xff] }
  0x1a   : > { %345 = vst [vmem:[%s2365_s26 + $0x70] sm:$0xff] %v344_v14  ;;  %v350_v17 = vld [vmem:[%s2360_s25 + $0x88] sm:$0xff]  ;;  %347 = vst [vmem:[%s2365_s26 + $0x78] sm:$0xff] %v346_v15  ;;  %v352_v18 = vld [vmem:[%s2360_s25 + $0x90] sm:$0xff] }
  0x1b   : > { %349 = vst [vmem:[%s2365_s26 + $0x80] sm:$0xff] %v348_v16  ;;  %351 = vst [vmem:[%s2365_s26 + $0x88] sm:$0xff] %v350_v17  ;;  %v354_v19 = vld [vmem:[%s2360_s25 + $0x260] sm:$0xff]  ;;  %v356_v20 = vld [vmem:[%s2360_s25 + $0x268] sm:$0xff] }
  0x1c   : > { %353 = vst [vmem:[%s2365_s26 + $0x90] sm:$0xff] %v352_v18  ;;  %355 = vst [vmem:[%s2365_s26 + $0x98] sm:$0xff] %v354_v19  ;;  %v358_v21 = vld [vmem:[%s2360_s25 + $0x270] sm:$0xff]  ;;  %v360_v22 = vld [vmem:[%s2360_s25 + $0x278] sm:$0xff] }
  0x1d   : > { %357 = vst [vmem:[%s2365_s26 + $0xa0] sm:$0xff] %v356_v20  ;;  %v362_v23 = vld [vmem:[%s2360_s25 + $0x280] sm:$0xff]  ;;  %359 = vst [vmem:[%s2365_s26 + $0xa8] sm:$0xff] %v358_v21  ;;  %v364_v24 = vld [vmem:[%s2360_s25 + $0x288] sm:$0xff] }
  0x1e   : > { %361 = vst [vmem:[%s2365_s26 + $0xb0] sm:$0xff] %v360_v22  ;;  %363 = vst [vmem:[%s2365_s26 + $0xb8] sm:$0xff] %v362_v23  ;;  %v366_v25 = vld [vmem:[%s2360_s25 + $0x290] sm:$0xff]  ;;  %v368_v26 = vld [vmem:[%s2360_s25 + $0x298] sm:$0xff] }
  0x1f   : > { %365 = vst [vmem:[%s2365_s26 + $0xc0] sm:$0xff] %v364_v24  ;;  %367 = vst [vmem:[%s2365_s26 + $0xc8] sm:$0xff] %v366_v25  ;;  %v370_v27 = vld [vmem:[%s2360_s25 + $0x2a0] sm:$0xff]  ;;  %v372_v28 = vld [vmem:[%s2360_s25 + $0x2a8] sm:$0xff] }
  0x20   : > { %369 = vst [vmem:[%s2365_s26 + $0xd0] sm:$0xff] %v368_v26  ;;  %v374_v29 = vld [vmem:[%s2360_s25 + $0x2b0] sm:$0xff]  ;;  %371 = vst [vmem:[%s2365_s26 + $0xd8] sm:$0xff] %v370_v27  ;;  %v376_v30 = vld [vmem:[%s2360_s25 + $0x2b8] sm:$0xff] }
  0x21   : > { %373 = vst [vmem:[%s2365_s26 + $0xe0] sm:$0xff] %v372_v28  ;;  %375 = vst [vmem:[%s2365_s26 + $0xe8] sm:$0xff] %v374_v29  ;;  %v378_v31 = vld [vmem:[%s2360_s25 + $0x2c0] sm:$0xff]  ;;  %v380_v32 = vld [vmem:[%s2360_s25 + $0x2c8] sm:$0xff] }
  0x22   : > { %377 = vst [vmem:[%s2365_s26 + $0xf0] sm:$0xff] %v376_v30  ;;  %379 = vst [vmem:[%s2365_s26 + $0xf8] sm:$0xff] %v378_v31  ;;  %v382_v33 = vld [vmem:[%s2360_s25 + $0x2d0] sm:$0xff]  ;;  %v384_v34 = vld [vmem:[%s2360_s25 + $0x2d8] sm:$0xff] }
  0x23   : > { %381 = vst [vmem:[%s2365_s26 + $0x100] sm:$0xff] %v380_v32  ;;  %v386_v35 = vld [vmem:[%s2360_s25 + $0x2e0] sm:$0xff]  ;;  %383 = vst [vmem:[%s2365_s26 + $0x108] sm:$0xff] %v382_v33  ;;  %v388_v36 = vld [vmem:[%s2360_s25 + $0x2e8] sm:$0xff] }
  0x24   : > { %385 = vst [vmem:[%s2365_s26 + $0x110] sm:$0xff] %v384_v34  ;;  %387 = vst [vmem:[%s2365_s26 + $0x118] sm:$0xff] %v386_v35  ;;  %v390_v37 = vld [vmem:[%s2360_s25 + $0x2f0] sm:$0xff]  ;;  %v392_v38 = vld [vmem:[%s2360_s25 + $0x4c0] sm:$0xff] }
  0x25   : > { %389 = vst [vmem:[%s2365_s26 + $0x120] sm:$0xff] %v388_v36  ;;  %391 = vst [vmem:[%s2365_s26 + $0x128] sm:$0xff] %v390_v37  ;;  %v394_v39 = vld [vmem:[%s2360_s25 + $0x4c8] sm:$0xff]  ;;  %v396_v40 = vld [vmem:[%s2360_s25 + $0x4d0] sm:$0xff] }
  0x26   : > { %393 = vst [vmem:[%s2365_s26 + $0x130] sm:$0xff] %v392_v38  ;;  %v398_v41 = vld [vmem:[%s2360_s25 + $0x4d8] sm:$0xff]  ;;  %395 = vst [vmem:[%s2365_s26 + $0x138] sm:$0xff] %v394_v39  ;;  %v400_v42 = vld [vmem:[%s2360_s25 + $0x4e0] sm:$0xff] }
  0x27   : > { %397 = vst [vmem:[%s2365_s26 + $0x140] sm:$0xff] %v396_v40  ;;  %399 = vst [vmem:[%s2365_s26 + $0x148] sm:$0xff] %v398_v41  ;;  %v402_v43 = vld [vmem:[%s2360_s25 + $0x4e8] sm:$0xff]  ;;  %v404_v44 = vld [vmem:[%s2360_s25 + $0x4f0] sm:$0xff] }
  0x28   : > { %401 = vst [vmem:[%s2365_s26 + $0x150] sm:$0xff] %v400_v42  ;;  %403 = vst [vmem:[%s2365_s26 + $0x158] sm:$0xff] %v402_v43  ;;  %v406_v45 = vld [vmem:[%s2360_s25 + $0x4f8] sm:$0xff]  ;;  %v408_v46 = vld [vmem:[%s2360_s25 + $0x500] sm:$0xff] }
  0x29   : > { %405 = vst [vmem:[%s2365_s26 + $0x160] sm:$0xff] %v404_v44  ;;  %v410_v47 = vld [vmem:[%s2360_s25 + $0x508] sm:$0xff]  ;;  %407 = vst [vmem:[%s2365_s26 + $0x168] sm:$0xff] %v406_v45  ;;  %v412_v48 = vld [vmem:[%s2360_s25 + $0x510] sm:$0xff] }
  0x2a   : > { %409 = vst [vmem:[%s2365_s26 + $0x170] sm:$0xff] %v408_v46  ;;  %411 = vst [vmem:[%s2365_s26 + $0x178] sm:$0xff] %v410_v47  ;;  %v414_v49 = vld [vmem:[%s2360_s25 + $0x518] sm:$0xff]  ;;  %v416_v50 = vld [vmem:[%s2360_s25 + $0x520] sm:$0xff] }
  0x2b   : > { %413 = vst [vmem:[%s2365_s26 + $0x180] sm:$0xff] %v412_v48  ;;  %415 = vst [vmem:[%s2365_s26 + $0x188] sm:$0xff] %v414_v49  ;;  %v418_v51 = vld [vmem:[%s2360_s25 + $0x528] sm:$0xff]  ;;  %v420_v52 = vld [vmem:[%s2360_s25 + $0x530] sm:$0xff] }
  0x2c   : > { %417 = vst [vmem:[%s2365_s26 + $0x190] sm:$0xff] %v416_v50  ;;  %v422_v53 = vld [vmem:[%s2360_s25 + $0x538] sm:$0xff]  ;;  %419 = vst [vmem:[%s2365_s26 + $0x198] sm:$0xff] %v418_v51  ;;  %v424_v54 = vld [vmem:[%s2360_s25 + $0x540] sm:$0xff] }
  0x2d   : > { %421 = vst [vmem:[%s2365_s26 + $0x1a0] sm:$0xff] %v420_v52  ;;  %423 = vst [vmem:[%s2365_s26 + $0x1a8] sm:$0xff] %v422_v53  ;;  %v426_v55 = vld [vmem:[%s2360_s25 + $0x548] sm:$0xff]  ;;  %v428_v56 = vld [vmem:[%s2360_s25 + $0x550] sm:$0xff] }
  0x2e   : > { %425 = vst [vmem:[%s2365_s26 + $0x1b0] sm:$0xff] %v424_v54  ;;  %427 = vst [vmem:[%s2365_s26 + $0x1b8] sm:$0xff] %v426_v55  ;;  %v430_v57 = vld [vmem:[%s2360_s25 + $0x720] sm:$0xff]  ;;  %v432_v58 = vld [vmem:[%s2360_s25 + $0x728] sm:$0xff] }
  0x2f   : > { %429 = vst [vmem:[%s2365_s26 + $0x1c0] sm:$0xff] %v428_v56  ;;  %v434_v59 = vld [vmem:[%s2360_s25 + $0x730] sm:$0xff]  ;;  %431 = vst [vmem:[%s2365_s26 + $0x1c8] sm:$0xff] %v430_v57  ;;  %v436_v60 = vld [vmem:[%s2360_s25 + $0x738] sm:$0xff] }
  0x30   : > { %433 = vst [vmem:[%s2365_s26 + $0x1d0] sm:$0xff] %v432_v58  ;;  %435 = vst [vmem:[%s2365_s26 + $0x1d8] sm:$0xff] %v434_v59  ;;  %v438_v61 = vld [vmem:[%s2360_s25 + $0x740] sm:$0xff]  ;;  %v440_v62 = vld [vmem:[%s2360_s25 + $0x748] sm:$0xff] }
  0x31   : > { %437 = vst [vmem:[%s2365_s26 + $0x1e0] sm:$0xff] %v436_v60  ;;  %439 = vst [vmem:[%s2365_s26 + $0x1e8] sm:$0xff] %v438_v61  ;;  %v442_v63 = vld [vmem:[%s2360_s25 + $0x750] sm:$0xff]  ;;  %v444_v0 = vld [vmem:[%s2360_s25 + $0x758] sm:$0xff] }
  0x32   : > { %441 = vst [vmem:[%s2365_s26 + $0x1f0] sm:$0xff] %v440_v62  ;;  %v446_v1 = vld [vmem:[%s2360_s25 + $0x760] sm:$0xff]  ;;  %443 = vst [vmem:[%s2365_s26 + $0x1f8] sm:$0xff] %v442_v63  ;;  %v448_v2 = vld [vmem:[%s2360_s25 + $0x768] sm:$0xff] }
  0x33   : > { %445 = vst [vmem:[%s2365_s26 + $0x200] sm:$0xff] %v444_v0  ;;  %447 = vst [vmem:[%s2365_s26 + $0x208] sm:$0xff] %v446_v1  ;;  %v450_v3 = vld [vmem:[%s2360_s25 + $0x770] sm:$0xff]  ;;  %v452_v4 = vld [vmem:[%s2360_s25 + $0x778] sm:$0xff] }
  0x34   : > { %449 = vst [vmem:[%s2365_s26 + $0x210] sm:$0xff] %v448_v2  ;;  %451 = vst [vmem:[%s2365_s26 + $0x218] sm:$0xff] %v450_v3  ;;  %v454_v5 = vld [vmem:[%s2360_s25 + $0x780] sm:$0xff]  ;;  %v456_v6 = vld [vmem:[%s2360_s25 + $0x788] sm:$0xff] }
  0x35   : > { %453 = vst [vmem:[%s2365_s26 + $0x220] sm:$0xff] %v452_v4  ;;  %v458_v7 = vld [vmem:[%s2360_s25 + $0x790] sm:$0xff]  ;;  %455 = vst [vmem:[%s2365_s26 + $0x228] sm:$0xff] %v454_v5  ;;  %v460_v8 = vld [vmem:[%s2360_s25 + $0x798] sm:$0xff] }
  0x36   : > { %457 = vst [vmem:[%s2365_s26 + $0x230] sm:$0xff] %v456_v6  ;;  %459 = vst [vmem:[%s2365_s26 + $0x238] sm:$0xff] %v458_v7  ;;  %v462_v9 = vld [vmem:[%s2360_s25 + $0x7a0] sm:$0xff]  ;;  %v464_v10 = vld [vmem:[%s2360_s25 + $0x7a8] sm:$0xff] }
  0x37   : > { %461 = vst [vmem:[%s2365_s26 + $0x240] sm:$0xff] %v460_v8  ;;  %463 = vst [vmem:[%s2365_s26 + $0x248] sm:$0xff] %v462_v9  ;;  %v466_v11 = vld [vmem:[%s2360_s25 + $0x7b0] sm:$0xff] }
  0x38   : > { %465 = vst [vmem:[%s2365_s26 + $0x250] sm:$0xff] %v464_v10  ;;  %467 = vst [vmem:[%s2365_s26 + $0x258] sm:$0xff] %v466_v11 }
  0x39 PF: > { %p1844_p5 = scmp.ge.s32.totalorder %s2303_s14, 1  ;;  %p472_p6 = scmp.lt.s32.totalorder %s2303_s14, 5 }
  0x3b   : > { %p473_p7 = pnand %p1844_p5, %p472_p6 }
  0x3c   : > { %v2156_v12 = vld [vmem:[%s2971_s1] sm:$0xff] (!%p473_p7)   ;;  %v2305_v13 = vmov (!%p473_p7), 0   ;;  %s479_s29 = sand.u32 (!%p473_p7), 1, %s2295_s12   ;;  %v2527_v14 = vld [vmem:[%s2971_s1 + $0x8] sm:$0xff] (!%p473_p7)   ;;  %v2536_v15 = vld [vmem:[%s2971_s1 + $0x10] sm:$0xff] (!%p473_p7)   ;;  %vm688_vm0 = vcmask (!%p473_p7), 130048  }
  0x3d   : > { %476 = sbr.rel (%p473_p7) target bundleno = 472 (0x1d8), region = 66  ;;  %719 = vmatprep.subr.bf16.mxu0 (!%p473_p7), %v2305_v13  ;;  %968 = vmatprep.subr.bf16.mxu1 (!%p473_p7), %v2305_v13  ;;  %v2543_v16 = vld [vmem:[%s2971_s1 + $0x18] sm:$0xff] (!%p473_p7)   ;;  %v2560_v19 = vld [vmem:[%s2971_s1 + $0x20] sm:$0xff] (!%p473_p7)   ;;  %v2569_v20 = vld [vmem:[%s2971_s1 + $0x28] sm:$0xff] (!%p473_p7)  }
  0x3e   : > { %720 = vmatpush1.bf16.msra.mxu0 (!%p473_p7), %v2156_v12  ;;  %969 = vmatpush1.bf16.msra.mxu1 (!%p473_p7), %v2156_v12  ;;  %s2130_s5 = smul.u32 (!%p473_p7), 608, %s479_s29  ;;  %v2578_v21 = vld [vmem:[%s2971_s1 + $0x30] sm:$0xff] (!%p473_p7)   ;;  %v2587_v22 = vld [vmem:[%s2971_s1 + $0x38] sm:$0xff] (!%p473_p7)   ;;  %v2596_v23 = vld [vmem:[%s2971_s1 + $0x40] sm:$0xff] (!%p473_p7)  }
  0x3f   : > { %721 = vmatprep.subr.bf16.mxu0 (!%p473_p7), %v2305_v13  ;;  %970 = vmatprep.subr.bf16.mxu1 (!%p473_p7), %v2305_v13  ;;  %s503_s26 = smul.u32 (!%p473_p7), 19, %s1838_s15 }
  0x40   : > { %s2545_s10 = scalar_lea.vmem (!%p473_p7), [#allocation2], %s2130_s5 }
  0x41   : > { %v2167_v17 = vld [vmem:[%s2545_s10 + $0x4] ss:$8 sps:$4 sm:$0xff] (!%p473_p7)   ;;  %v2165_v24 = vld [vmem:[%s2545_s10] ss:$8 sps:$4 sm:$0xff] (!%p473_p7)   ;;  %v2171_v26 = vld [vmem:[%s2545_s10 + $0x14] ss:$8 sps:$4 sm:$0xff] (!%p473_p7)  }
  0x42   : > { %722 = vmatpush1.bf16.msra.mxu0 (!%p473_p7), %v2527_v14  ;;  %971 = vmatpush1.bf16.msra.mxu1 (!%p473_p7), %v2527_v14  ;;  %v2170_v18 = vld [vmem:[%s2545_s10 + $0x9c] ss:$8 sps:$4 sm:$0xff] (!%p473_p7)   ;;  %v2168_v25 = vld [vmem:[%s2545_s10 + $0x98] ss:$8 sps:$4 sm:$0xff] (!%p473_p7)   ;;  %v2173_v27 = vld [vmem:[%s2545_s10 + $0xac] ss:$8 sps:$4 sm:$0xff] (!%p473_p7)  }
  0x43   : > { %723 = vmatprep.subr.bf16.mxu0 (!%p473_p7), %v2305_v13  ;;  %972 = vmatprep.subr.bf16.mxu1 (!%p473_p7), %v2305_v13  ;;  %v2175_v28 = vld [vmem:[%s2545_s10 + $0x10] ss:$8 sps:$4 sm:$0xff] (!%p473_p7)   ;;  %v2177_v30 = vld [vmem:[%s2545_s10 + $0x24] ss:$8 sps:$4 sm:$0xff] (!%p473_p7)   ;;  %v2181_v32 = vld [vmem:[%s2545_s10 + $0x20] ss:$8 sps:$4 sm:$0xff] (!%p473_p7)  }
  0x44   : > { %1875 = vmatprep.mubr.msk.bf16.mxu0 %vm688_vm0, %v2167_v17  ;;  %1924 = vmatprep.mubr.msk.bf16.mxu1 %vm688_vm0, %v2170_v18  ;;  %v2176_v29 = vld [vmem:[%s2545_s10 + $0xa8] ss:$8 sps:$4 sm:$0xff]   ;;  %v2179_v31 = vld [vmem:[%s2545_s10 + $0xbc] ss:$8 sps:$4 sm:$0xff]   ;;  %v2182_v33 = vld [vmem:[%s2545_s10 + $0xb8] ss:$8 sps:$4 sm:$0xff]  }
  0x45   : > { %v2183_v34 = vld [vmem:[%s2545_s10 + $0x34] ss:$8 sps:$4 sm:$0xff]   ;;  %v2187_v36 = vld [vmem:[%s2545_s10 + $0x30] ss:$8 sps:$4 sm:$0xff]   ;;  %v2189_v38 = vld [vmem:[%s2545_s10 + $0x44] ss:$8 sps:$4 sm:$0xff]  }
  0x46   : > { %724 = vmatpush1.bf16.msra.mxu0 %v2536_v15  ;;  %973 = vmatpush1.bf16.msra.mxu1 %v2536_v15  ;;  %v2185_v35 = vld [vmem:[%s2545_s10 + $0xcc] ss:$8 sps:$4 sm:$0xff]   ;;  %v2188_v37 = vld [vmem:[%s2545_s10 + $0xc8] ss:$8 sps:$4 sm:$0xff]   ;;  %v2191_v39 = vld [vmem:[%s2545_s10 + $0xdc] ss:$8 sps:$4 sm:$0xff]  }
  0x47   : > { %725 = vmatprep.subr.bf16.mxu0 %v2305_v13  ;;  %974 = vmatprep.subr.bf16.mxu1 %v2305_v13  ;;  %v2193_v40 = vld [vmem:[%s2545_s10 + $0x40] ss:$8 sps:$4 sm:$0xff]   ;;  %v2195_v42 = vld [vmem:[%s2545_s10 + $0x54] ss:$8 sps:$4 sm:$0xff]   ;;  %v2199_v44 = vld [vmem:[%s2545_s10 + $0x50] ss:$8 sps:$4 sm:$0xff]  }
  0x48   : > { %v2194_v41 = vld [vmem:[%s2545_s10 + $0xd8] ss:$8 sps:$4 sm:$0xff]   ;;  %v2197_v43 = vld [vmem:[%s2545_s10 + $0xec] ss:$8 sps:$4 sm:$0xff]   ;;  %v2200_v45 = vld [vmem:[%s2545_s10 + $0xe8] ss:$8 sps:$4 sm:$0xff]  }
  0x49   : > { %v2201_v46 = vld [vmem:[%s2545_s10 + $0x64] ss:$8 sps:$4 sm:$0xff]   ;;  %v2205_v48 = vld [vmem:[%s2545_s10 + $0x60] ss:$8 sps:$4 sm:$0xff]   ;;  %v2207_v50 = vld [vmem:[%s2545_s10 + $0x74] ss:$8 sps:$4 sm:$0xff]  }
  0x4a   : > { %726 = vmatpush1.bf16.msra.mxu0 %v2543_v16  ;;  %975 = vmatpush1.bf16.msra.mxu1 %v2543_v16  ;;  %v2203_v47 = vld [vmem:[%s2545_s10 + $0xfc] ss:$8 sps:$4 sm:$0xff]   ;;  %v2206_v49 = vld [vmem:[%s2545_s10 + $0xf8] ss:$8 sps:$4 sm:$0xff]   ;;  %v2209_v51 = vld [vmem:[%s2545_s10 + $0x10c] ss:$8 sps:$4 sm:$0xff]  }
  0x4b   : > { %727 = vmatprep.subr.bf16.mxu0 %v2305_v13  ;;  %976 = vmatprep.subr.bf16.mxu1 %v2305_v13  ;;  %v2211_v52 = vld [vmem:[%s2545_s10 + $0x70] ss:$8 sps:$4 sm:$0xff]   ;;  %v2213_v54 = vld [vmem:[%s2545_s10 + $0x84] ss:$8 sps:$4 sm:$0xff]   ;;  %v2217_v58 = vld [vmem:[%s2545_s10 + $0x80] ss:$8 sps:$4 sm:$0xff]  }
  0x4c   : > { %v2212_v53 = vld [vmem:[%s2545_s10 + $0x108] ss:$8 sps:$4 sm:$0xff]   ;;  %v2215_v55 = vld [vmem:[%s2545_s10 + $0x11c] ss:$8 sps:$4 sm:$0xff]   ;;  %v2218_v59 = vld [vmem:[%s2545_s10 + $0x118] ss:$8 sps:$4 sm:$0xff]  }
  0x4d   : > { %v546_v56 = vld [vmem:[%s2545_s10 + $0x90] sm:$0xff]  ;;  %v1903_v57 = vld [vmem:[%s2545_s10 + $0x128] sm:$0xff]  ;;  %v2231_v5 = vld [vmem:[%s2545_s10 + $0x1dc] ss:$8 sps:$4 sm:$0xff]   ;;  %p504_p8 = scmp.lt.s32.totalorder %s503_s26, 75 }
  0x4e   : > { %728 = vmatpush1.bf16.msra.mxu0 %v2560_v19  ;;  %977 = vmatpush1.bf16.msra.mxu1 %v2560_v19  ;;  %v1865_v60 = vcombine.high %v546_v56, %v546_v56  ;;  %v1923_v61 = vcombine.high %v1903_v57, %v1903_v57  ;;  %v1864_v62 = vcombine.low %v546_v56, %v546_v56  ;;  %v2225_v0 = vld [vmem:[%s2545_s10 + $0x134] ss:$8 sps:$4 sm:$0xff]   ;;  %v2223_v2 = vld [vmem:[%s2545_s10 + $0x130] ss:$8 sps:$4 sm:$0xff]   ;;  %v2229_v4 = vld [vmem:[%s2545_s10 + $0x144] ss:$8 sps:$4 sm:$0xff]  }
  0x4f   : > { %729 = vmatprep.subr.bf16.mxu0 %v2305_v13  ;;  %978 = vmatprep.subr.bf16.mxu1 %v2305_v13  ;;  %v1922_v63 = vcombine.low %v1903_v57, %v1903_v57  ;;  %v2228_v1 = vld [vmem:[%s2545_s10 + $0x1cc] ss:$8 sps:$4 sm:$0xff]   ;;  %v2226_v3 = vld [vmem:[%s2545_s10 + $0x1c8] ss:$8 sps:$4 sm:$0xff]   ;;  %v2234_v7 = vld [vmem:[%s2545_s10 + $0x1d8] ss:$8 sps:$4 sm:$0xff]  }
  0x50   : > { %v2233_v6 = vld [vmem:[%s2545_s10 + $0x140] ss:$8 sps:$4 sm:$0xff]   ;;  %v2235_v8 = vld [vmem:[%s2545_s10 + $0x154] ss:$8 sps:$4 sm:$0xff]   ;;  %v2239_v10 = vld [vmem:[%s2545_s10 + $0x150] ss:$8 sps:$4 sm:$0xff]  }
  0x51   : > { %v2237_v9 = vld [vmem:[%s2545_s10 + $0x1ec] ss:$8 sps:$4 sm:$0xff]   ;;  %v2240_v11 = vld [vmem:[%s2545_s10 + $0x1e8] ss:$8 sps:$4 sm:$0xff]   ;;  %s2984_s26 = smov (!%p504_p8, %s503_s26), 75 }
  0x52   : > { %730 = vmatpush1.bf16.msra.mxu0 %v2569_v20  ;;  %979 = vmatpush1.bf16.msra.mxu1 %v2569_v20  ;;  %v2249_v17 = vld [vmem:[%s2545_s10 + $0x20c] ss:$8 sps:$4 sm:$0xff]   ;;  %v2251_v18 = vld [vmem:[%s2545_s10 + $0x170] ss:$8 sps:$4 sm:$0xff]   ;;  %s1845_s14 = sshll.u32 %s2984_s26, 2 }
  0x53   : > { %731 = vmatprep.subr.bf16.mxu0 %v2305_v13  ;;  %980 = vmatprep.subr.bf16.mxu1 %v2305_v13  ;;  %s2883_s30 = scalar_lea.vmem %s2973_s3, %s1845_s14 }
  0x56   : > { %732 = vmatpush1.bf16.msra.mxu0 %v2578_v21  ;;  %981 = vmatpush1.bf16.msra.mxu1 %v2578_v21 }
  0x57   : > { %733 = vmatprep.subr.bf16.mxu0 %v2305_v13  ;;  %982 = vmatprep.subr.bf16.mxu1 %v2305_v13 }
  0x5a   : > { %734 = vmatpush1.bf16.msra.mxu0 %v2587_v22  ;;  %983 = vmatpush1.bf16.msra.mxu1 %v2587_v22 }
  0x5b   : > { %735 = vmatprep.subr.bf16.mxu0 %v2305_v13  ;;  %984 = vmatprep.subr.bf16.mxu1 %v2305_v13 }
  0x5e   : > { %736 = vmatpush1.bf16.msra.mxu0 %v2596_v23  ;;  %985 = vmatpush1.bf16.msra.mxu1 %v2596_v23 }
  0x5f   : > { %1236 = vmatprep.subr.bf16.mxu0 %v2305_v13  ;;  %1504 = vmatprep.subr.bf16.mxu1 %v2305_v13 }
  0x61   : > { %752 = vmatmul.mubr.bf16.vlgmr.msra.gmra.mrb[0].mxu0 %v2165_v24  ;;  %1001 = vmatmul.mubr.bf16.vlgmr.msra.gmra.mrb[0].mxu1 %v2168_v25  ;;  %v2259_v24 = vld [vmem:[%s2545_s10 + $0x194] ss:$8 sps:$4 sm:$0xff]  }
  0x62   : > { %1237 = vmatpush1.bf16.msra.mxu0 %v2156_v12  ;;  %1505 = vmatpush1.bf16.msra.mxu1 %v2156_v12  ;;  %v2241_v12 = vld [vmem:[%s2545_s10 + $0x164] ss:$8 sps:$4 sm:$0xff]  }
  0x63   : > { %1876 = vmatprep.mubr.msk.bf16.mxu0 %vm688_vm0, %v2171_v26  ;;  %1925 = vmatprep.mubr.msk.bf16.mxu1 %vm688_vm0, %v2173_v27  ;;  %v2261_v25 = vld [vmem:[%s2545_s10 + $0x22c] ss:$8 sps:$4 sm:$0xff]   ;;  %v2263_v26 = vld [vmem:[%s2545_s10 + $0x190] ss:$8 sps:$4 sm:$0xff]  }
  0x64   : > { %1238 = vmatprep.subr.bf16.mxu0 %v2305_v13  ;;  %1506 = vmatprep.subr.bf16.mxu1 %v2305_v13  ;;  %v2264_v27 = vld [vmem:[%s2545_s10 + $0x228] ss:$8 sps:$4 sm:$0xff]  }
  0x66   : > { %1239 = vmatpush1.bf16.msra.mxu0 %v2527_v14  ;;  %1507 = vmatpush1.bf16.msra.mxu1 %v2527_v14  ;;  %v2245_v14 = vld [vmem:[%s2545_s10 + $0x160] ss:$8 sps:$4 sm:$0xff]  }
  0x67   : > { %1240 = vmatprep.subr.bf16.mxu0 %v2305_v13  ;;  %1508 = vmatprep.subr.bf16.mxu1 %v2305_v13 }
  0x69   : > { %760 = vmatmul.mubr.bf16.gmra.mrb[4].mxu0 %v2175_v28  ;;  %1009 = vmatmul.mubr.bf16.gmra.mrb[4].mxu1 %v2176_v29  ;;  %v2265_v28 = vld [vmem:[%s2545_s10 + $0x1a4] ss:$8 sps:$4 sm:$0xff]  }
  0x6a   : > { %1877 = vmatprep.mubr.msk.bf16.mxu0 %vm688_vm0, %v2177_v30  ;;  %1926 = vmatprep.mubr.msk.bf16.mxu1 %vm688_vm0, %v2179_v31  ;;  %v2267_v29 = vld [vmem:[%s2545_s10 + $0x23c] ss:$8 sps:$4 sm:$0xff]   ;;  %v2269_v30 = vld [vmem:[%s2545_s10 + $0x1a0] ss:$8 sps:$4 sm:$0xff]  }
  0x6b   : > { %1241 = vmatpush1.bf16.msra.mxu0 %v2536_v15  ;;  %1509 = vmatpush1.bf16.msra.mxu1 %v2536_v15  ;;  %v2246_v15 = vld [vmem:[%s2545_s10 + $0x1f8] ss:$8 sps:$4 sm:$0xff]  }
  0x6c   : > { %1242 = vmatprep.subr.bf16.mxu0 %v2305_v13  ;;  %1510 = vmatprep.subr.bf16.mxu1 %v2305_v13  ;;  %v2270_v31 = vld [vmem:[%s2545_s10 + $0x238] ss:$8 sps:$4 sm:$0xff]  }
  0x6f   : > { %1243 = vmatpush1.bf16.msra.mxu0 %v2543_v16  ;;  %1511 = vmatpush1.bf16.msra.mxu1 %v2543_v16  ;;  %v2247_v16 = vld [vmem:[%s2545_s10 + $0x174] ss:$8 sps:$4 sm:$0xff]  }
  0x70   : > { %1244 = vmatprep.subr.bf16.mxu0 %v2305_v13  ;;  %1512 = vmatprep.subr.bf16.mxu1 %v2305_v13 }
  0x71   : > { %768 = vmatmul.mubr.bf16.gmra.mrb[8].mxu0 %v2181_v32  ;;  %1017 = vmatmul.mubr.bf16.gmra.mrb[8].mxu1 %v2182_v33  ;;  %v2271_v32 = vld [vmem:[%s2545_s10 + $0x1b4] ss:$8 sps:$4 sm:$0xff]  }
  0x72   : > { %1878 = vmatprep.mubr.msk.bf16.mxu0 %vm688_vm0, %v2183_v34  ;;  %1927 = vmatprep.mubr.msk.bf16.mxu1 %vm688_vm0, %v2185_v35  ;;  %v2273_v33 = vld [vmem:[%s2545_s10 + $0x24c] ss:$8 sps:$4 sm:$0xff]   ;;  %v1952_v34 = vld [vmem:[%s2545_s10 + $0x1c0] sm:$0xff]  ;;  %v2001_v35 = vld [vmem:[%s2545_s10 + $0x258] sm:$0xff] }
  0x73   : > { %1245 = vmatpush1.bf16.msra.mxu0 %v2560_v19  ;;  %1513 = vmatpush1.bf16.msra.mxu1 %v2560_v19  ;;  %v2252_v19 = vld [vmem:[%s2545_s10 + $0x208] ss:$8 sps:$4 sm:$0xff]  }
  0x74   : > { %1246 = vmatprep.subr.bf16.mxu0 %v2305_v13  ;;  %1514 = vmatprep.subr.bf16.mxu1 %v2305_v13 }
  0x77   : > { %1247 = vmatpush1.bf16.msra.mxu0 %v2569_v20  ;;  %1515 = vmatpush1.bf16.msra.mxu1 %v2569_v20  ;;  %v2253_v20 = vld [vmem:[%s2545_s10 + $0x184] ss:$8 sps:$4 sm:$0xff]  }
  0x78   : > { %1248 = vmatprep.subr.bf16.mxu0 %v2305_v13  ;;  %1516 = vmatprep.subr.bf16.mxu1 %v2305_v13 }
  0x79   : > { %776 = vmatmul.mubr.bf16.gmra.mrb[12].mxu0 %v2187_v36  ;;  %1025 = vmatmul.mubr.bf16.gmra.mrb[12].mxu1 %v2188_v37  ;;  %v2275_v36 = vld [vmem:[%s2545_s10 + $0x1b0] ss:$8 sps:$4 sm:$0xff]  }
  0x7a   : > { %1879 = vmatprep.mubr.msk.bf16.mxu0 %vm688_vm0, %v2189_v38  ;;  %1928 = vmatprep.mubr.msk.bf16.mxu1 %vm688_vm0, %v2191_v39  ;;  %v2276_v37 = vld [vmem:[%s2545_s10 + $0x248] ss:$8 sps:$4 sm:$0xff]   ;;  %v1972_v38 = vcombine.high %v1952_v34, %v1952_v34  ;;  %v2021_v39 = vcombine.high %v2001_v35, %v2001_v35 }
  0x7b   : > { %1249 = vmatpush1.bf16.msra.mxu0 %v2578_v21  ;;  %1517 = vmatpush1.bf16.msra.mxu1 %v2578_v21  ;;  %v2255_v21 = vld [vmem:[%s2545_s10 + $0x21c] ss:$8 sps:$4 sm:$0xff]  }
  0x7c   : > { %1250 = vmatprep.subr.bf16.mxu0 %v2305_v13  ;;  %1518 = vmatprep.subr.bf16.mxu1 %v2305_v13 }
  0x7f   : > { %1251 = vmatpush1.bf16.msra.mxu0 %v2587_v22  ;;  %1519 = vmatpush1.bf16.msra.mxu1 %v2587_v22  ;;  %v2257_v22 = vld [vmem:[%s2545_s10 + $0x180] ss:$8 sps:$4 sm:$0xff]  }
  0x80   : > { %1252 = vmatprep.subr.bf16.mxu0 %v2305_v13  ;;  %1520 = vmatprep.subr.bf16.mxu1 %v2305_v13  ;;  %v2243_v13 = vld [vmem:[%s2545_s10 + $0x1fc] ss:$8 sps:$4 sm:$0xff]  }
  0x81   : > { %784 = vmatmul.mubr.bf16.gmra.mrb[16].mxu0 %v2193_v40  ;;  %1033 = vmatmul.mubr.bf16.gmra.mrb[16].mxu1 %v2194_v41  ;;  %v1971_v40 = vcombine.low %v1952_v34, %v1952_v34  ;;  %v2020_v41 = vcombine.low %v2001_v35, %v2001_v35 }
  0x82   : > { %1880 = vmatprep.mubr.msk.bf16.mxu0 %vm688_vm0, %v2195_v42  ;;  %1929 = vmatprep.mubr.msk.bf16.mxu1 %vm688_vm0, %v2197_v43 }
  0x83   : > { %1253 = vmatpush1.bf16.msra.mxu0 %v2596_v23  ;;  %1521 = vmatpush1.bf16.msra.mxu1 %v2596_v23  ;;  %v2258_v23 = vld [vmem:[%s2545_s10 + $0x218] ss:$8 sps:$4 sm:$0xff]  }
  0x89   : > { %792 = vmatmul.mubr.bf16.gmra.mrb[20].mxu0 %v2199_v44  ;;  %1041 = vmatmul.mubr.bf16.gmra.mrb[20].mxu1 %v2200_v45 }
  0x8a   : > { %1881 = vmatprep.mubr.msk.bf16.mxu0 %vm688_vm0, %v2201_v46  ;;  %1930 = vmatprep.mubr.msk.bf16.mxu1 %vm688_vm0, %v2203_v47 }
  0x91   : > { %800 = vmatmul.mubr.bf16.gmra.mrb[24].mxu0 %v2205_v48  ;;  %1049 = vmatmul.mubr.bf16.gmra.mrb[24].mxu1 %v2206_v49 }
  0x92   : > { %1882 = vmatprep.mubr.msk.bf16.mxu0 %vm688_vm0, %v2207_v50  ;;  %1931 = vmatprep.mubr.msk.bf16.mxu1 %vm688_vm0, %v2209_v51 }
  0x99   : > { %808 = vmatmul.mubr.bf16.gmra.mrb[28].mxu0 %v2211_v52  ;;  %1057 = vmatmul.mubr.bf16.gmra.mrb[28].mxu1 %v2212_v53 }
  0x9a   : > { %1883 = vmatprep.mubr.msk.bf16.mxu0 %vm688_vm0, %v2213_v54  ;;  %1932 = vmatprep.mubr.msk.bf16.mxu1 %vm688_vm0, %v2215_v55 }
  0xa1   : > { %816 = vmatmul.mubr.bf16.gmra.mrb[32].mxu0 %v2217_v58  ;;  %1065 = vmatmul.mubr.bf16.gmra.mrb[32].mxu1 %v2218_v59 }
  0xa2   : > { %1884 = vmatprep.mubr.msk.bf16.mxu0 %vm688_vm0, %v1865_v60  ;;  %1933 = vmatprep.mubr.msk.bf16.mxu1 %vm688_vm0, %v1923_v61 }
  0xa9   : > { %824 = vmatmul.mubr.bf16.gmra.mrb[36].mxu0 %v1864_v62  ;;  %1073 = vmatmul.mubr.bf16.gmra.mrb[36].mxu1 %v1922_v63 }
  0xaa   : > { %1973 = vmatprep.mubr.msk.bf16.mxu0 %vm688_vm0, %v2225_v0  ;;  %2022 = vmatprep.mubr.msk.bf16.mxu1 %vm688_vm0, %v2228_v1 }
  0xb1   : > { %1269 = vmatmul.mubr.bf16.vlgmr.msra.gmra.mrb[40].mxu0 %v2223_v2  ;;  %1537 = vmatmul.mubr.bf16.vlgmr.msra.gmra.mrb[40].mxu1 %v2226_v3 }
  0xb2   : > { %1974 = vmatprep.mubr.msk.bf16.mxu0 %vm688_vm0, %v2229_v4  ;;  %2023 = vmatprep.mubr.msk.bf16.mxu1 %vm688_vm0, %v2231_v5 }
  0xb9   : > { %1277 = vmatmul.mubr.bf16.gmra.mrb[44].mxu0 %v2233_v6  ;;  %1545 = vmatmul.mubr.bf16.gmra.mrb[44].mxu1 %v2234_v7 }
  0xba   : > { %1975 = vmatprep.mubr.msk.bf16.mxu0 %vm688_vm0, %v2235_v8  ;;  %2024 = vmatprep.mubr.msk.bf16.mxu1 %vm688_vm0, %v2237_v9 }
  0xc1   : > { %1285 = vmatmul.mubr.bf16.gmra.mrb[48].mxu0 %v2239_v10  ;;  %1553 = vmatmul.mubr.bf16.gmra.mrb[48].mxu1 %v2240_v11 }
  0xc2   : > { %1976 = vmatprep.mubr.msk.bf16.mxu0 %vm688_vm0, %v2241_v12  ;;  %2025 = vmatprep.mubr.msk.bf16.mxu1 %vm688_vm0, %v2243_v13 }
  0xc9   : > { %1293 = vmatmul.mubr.bf16.gmra.mrb[52].mxu0 %v2245_v14  ;;  %1561 = vmatmul.mubr.bf16.gmra.mrb[52].mxu1 %v2246_v15 }
  0xca   : > { %1977 = vmatprep.mubr.msk.bf16.mxu0 %vm688_vm0, %v2247_v16  ;;  %2026 = vmatprep.mubr.msk.bf16.mxu1 %vm688_vm0, %v2249_v17 }
  0xd1   : > { %1301 = vmatmul.mubr.bf16.gmra.mrb[56].mxu0 %v2251_v18  ;;  %1569 = vmatmul.mubr.bf16.gmra.mrb[56].mxu1 %v2252_v19 }
  0xd2   : > { %1978 = vmatprep.mubr.msk.bf16.mxu0 %vm688_vm0, %v2253_v20  ;;  %2027 = vmatprep.mubr.msk.bf16.mxu1 %vm688_vm0, %v2255_v21 }
  0xd9   : > { %1309 = vmatmul.mubr.bf16.gmra.mrb[60].mxu0 %v2257_v22  ;;  %1577 = vmatmul.mubr.bf16.gmra.mrb[60].mxu1 %v2258_v23 }
  0xda   : > { %1979 = vmatprep.mubr.msk.bf16.mxu0 %vm688_vm0, %v2259_v24  ;;  %2028 = vmatprep.mubr.msk.bf16.mxu1 %vm688_vm0, %v2261_v25 }
  0xe1   : > { %1317 = vmatmul.mubr.bf16.gmra.mrb[64].mxu0 %v2263_v26  ;;  %1585 = vmatmul.mubr.bf16.gmra.mrb[64].mxu1 %v2264_v27 }
  0xe2   : > { %1980 = vmatprep.mubr.msk.bf16.mxu0 %vm688_vm0, %v2265_v28  ;;  %2029 = vmatprep.mubr.msk.bf16.mxu1 %vm688_vm0, %v2267_v29 }
  0xe9   : > { %1325 = vmatmul.mubr.bf16.gmra.mrb[68].mxu0 %v2269_v30  ;;  %1593 = vmatmul.mubr.bf16.gmra.mrb[68].mxu1 %v2270_v31 }
  0xea   : > { %1981 = vmatprep.mubr.msk.bf16.mxu0 %vm688_vm0, %v2271_v32  ;;  %2030 = vmatprep.mubr.msk.bf16.mxu1 %vm688_vm0, %v2273_v33 }
  0xf1   : > { %1333 = vmatmul.mubr.bf16.gmra.mrb[72].mxu0 %v2275_v36  ;;  %1601 = vmatmul.mubr.bf16.gmra.mrb[72].mxu1 %v2276_v37 }
  0xf2   : > { %1982 = vmatprep.mubr.msk.bf16.mxu0 %vm688_vm0, %v1972_v38  ;;  %2031 = vmatprep.mubr.msk.bf16.mxu1 %vm688_vm0, %v2021_v39 }
  0xf9   : > { %1341 = vmatmul.mubr.bf16.gmra.mrb[76].mxu0 %v1971_v40  ;;  %1609 = vmatmul.mubr.bf16.gmra.mrb[76].mxu1 %v2020_v41 }
 0x134   : > { %v2748_v42 = vpop.f32.mrb[0].mxu0  ;;  %v2750_v43 = vpop.f32.mrb[0].mxu1 }
 0x135   : > { %v1080_v44 = vmax.f32 %v2748_v42, %v2750_v43  ;;  %v755_v45 = vpop.f32.mrb[1].mxu0  ;;  %v1004_v46 = vpop.f32.mrb[1].mxu1 }
 0x136   : > { %v2754_v47 = vpop.f32.mrb[2].mxu0  ;;  %v2756_v48 = vpop.f32.mrb[2].mxu1 }
 0x137   : > { %v1081_v49 = vmax.f32 %v2754_v47, %v2756_v48  ;;  %v758_v50 = vpop.f32.mrb[3].mxu0  ;;  %v1007_v51 = vpop.f32.mrb[3].mxu1 }
 0x13c   : > { %v2760_v52 = vpop.f32.mrb[4].mxu0  ;;  %v2762_v53 = vpop.f32.mrb[4].mxu1 }
 0x13d   : > { %v1082_v54 = vmax.f32 %v2760_v52, %v2762_v53  ;;  %v763_v55 = vpop.f32.mrb[5].mxu0  ;;  %v1012_v56 = vpop.f32.mrb[5].mxu1 }
 0x13e   : > { %v2766_v57 = vpop.f32.mrb[6].mxu0  ;;  %v2768_v58 = vpop.f32.mrb[6].mxu1 }
 0x13f   : > { %v1083_v59 = vmax.f32 %v2766_v57, %v2768_v58  ;;  %v766_v60 = vpop.f32.mrb[7].mxu0  ;;  %v1015_v61 = vpop.f32.mrb[7].mxu1 }
 0x144   : > { %v2772_v62 = vpop.f32.mrb[8].mxu0  ;;  %v2774_v63 = vpop.f32.mrb[8].mxu1 }
 0x145   : > { %v1084_v0 = vmax.f32 %v2772_v62, %v2774_v63  ;;  %v771_v1 = vpop.f32.mrb[9].mxu0  ;;  %v1020_v2 = vpop.f32.mrb[9].mxu1 }
 0x146   : > { %v2778_v3 = vpop.f32.mrb[10].mxu0  ;;  %v2780_v4 = vpop.f32.mrb[10].mxu1 }
 0x147   : > { %v1085_v5 = vmax.f32 %v2778_v3, %v2780_v4  ;;  %v774_v6 = vpop.f32.mrb[11].mxu0  ;;  %v1023_v7 = vpop.f32.mrb[11].mxu1 }
 0x14c   : > { %v2784_v8 = vpop.f32.mrb[12].mxu0  ;;  %v2786_v9 = vpop.f32.mrb[12].mxu1 }
 0x14d   : > { %v1086_v10 = vmax.f32 %v2784_v8, %v2786_v9  ;;  %v779_v11 = vpop.f32.mrb[13].mxu0  ;;  %v1028_v12 = vpop.f32.mrb[13].mxu1 }
 0x14e   : > { %v2790_v13 = vpop.f32.mrb[14].mxu0  ;;  %v2792_v14 = vpop.f32.mrb[14].mxu1 }
 0x14f   : > { %v1087_v15 = vmax.f32 %v2790_v13, %v2792_v14  ;;  %v782_v16 = vpop.f32.mrb[15].mxu0  ;;  %v1031_v17 = vpop.f32.mrb[15].mxu1 }
 0x154   : > { %v2796_v18 = vpop.f32.mrb[16].mxu0  ;;  %v2798_v19 = vpop.f32.mrb[16].mxu1 }
 0x155   : > { %v1088_v20 = vmax.f32 %v2796_v18, %v2798_v19  ;;  %v787_v21 = vpop.f32.mrb[17].mxu0  ;;  %v1036_v22 = vpop.f32.mrb[17].mxu1 }
 0x156   : > { %v2802_v23 = vpop.f32.mrb[18].mxu0  ;;  %v2804_v24 = vpop.f32.mrb[18].mxu1 }
 0x157   : > { %v1089_v25 = vmax.f32 %v2802_v23, %v2804_v24  ;;  %v790_v26 = vpop.f32.mrb[19].mxu0  ;;  %v1039_v27 = vpop.f32.mrb[19].mxu1 }
 0x15c   : > { %v2808_v28 = vpop.f32.mrb[20].mxu0  ;;  %v2810_v29 = vpop.f32.mrb[20].mxu1 }
 0x15d   : > { %v1090_v30 = vmax.f32 %v2808_v28, %v2810_v29  ;;  %v795_v31 = vpop.f32.mrb[21].mxu0  ;;  %v1044_v32 = vpop.f32.mrb[21].mxu1 }
 0x15e   : > { %v2814_v33 = vpop.f32.mrb[22].mxu0  ;;  %v2816_v34 = vpop.f32.mrb[22].mxu1 }
 0x15f   : > { %v1091_v35 = vmax.f32 %v2814_v33, %v2816_v34  ;;  %v798_v36 = vpop.f32.mrb[23].mxu0  ;;  %v1047_v37 = vpop.f32.mrb[23].mxu1 }
 0x164   : > { %v2820_v38 = vpop.f32.mrb[24].mxu0  ;;  %v2822_v39 = vpop.f32.mrb[24].mxu1 }
 0x165   : > { %v1092_v40 = vmax.f32 %v2820_v38, %v2822_v39  ;;  %v803_v41 = vpop.f32.mrb[25].mxu0  ;;  %v1052_v45 = vpop.f32.mrb[25].mxu1 }
 0x166   : > { %v2826_v46 = vpop.f32.mrb[26].mxu0  ;;  %v2828_v50 = vpop.f32.mrb[26].mxu1 }
 0x167   : > { %v806_v55 = vpop.f32.mrb[27].mxu0  ;;  %v1055_v56 = vpop.f32.mrb[27].mxu1 }
 0x16c   : > { %v2832_v60 = vpop.f32.mrb[28].mxu0  ;;  %v2834_v61 = vpop.f32.mrb[28].mxu1 }
 0x16d   : > { %v811_v2 = vpop.f32.mrb[29].mxu0  ;;  %v1060_v6 = vpop.f32.mrb[29].mxu1 }
 0x16e   : > { %v2838_v7 = vpop.f32.mrb[30].mxu0  ;;  %v2840_v11 = vpop.f32.mrb[30].mxu1 }
 0x16f   : > { %v814_v16 = vpop.f32.mrb[31].mxu0  ;;  %v1063_v17 = vpop.f32.mrb[31].mxu1 }
 0x174   : > { %v2844_v21 = vpop.f32.mrb[32].mxu0  ;;  %v2846_v22 = vpop.f32.mrb[32].mxu1 }
 0x175   : > { %v819_v27 = vpop.f32.mrb[33].mxu0  ;;  %v1068_v31 = vpop.f32.mrb[33].mxu1 }
 0x176   : > { %v2850_v32 = vpop.f32.mrb[34].mxu0  ;;  %v2852_v36 = vpop.f32.mrb[34].mxu1 }
 0x177   : > { %v822_v41 = vpop.f32.mrb[35].mxu0  ;;  %v1071_v45 = vpop.f32.mrb[35].mxu1 }
 0x17c   : > { %v2856_v55 = vpop.f32.mrb[36].mxu0  ;;  %v2858_v56 = vpop.f32.mrb[36].mxu1 }
 0x17d   : > { %v827_v6 = vpop.f32.mrb[37].mxu0  ;;  %v1076_v16 = vpop.f32.mrb[37].mxu1 }
 0x17e   : > { %v828_v17 = vpop.f32.mrb[38].mxu0  ;;  %v1077_v27 = vpop.f32.mrb[38].mxu1  ;;  %v2870_v6 = vld [vmem:[%s2972_s2] ss:$0 sm:$0xff] }
 0x17f   : > { %v829_v31 = vpop.f32.mrb[39].mxu0  ;;  %v1078_v26 = vpop.f32.mrb[39].mxu1 }
 0x184   : > { %v1270_v12 = vpop.f32.mrb[40].mxu0  ;;  %v1538_v37 = vpop.f32.mrb[40].mxu1 }
 0x185   : > { %v1348_v41 = vmax.f32 %v1080_v44, %v1270_v12  ;;  %v1272_v45 = vpop.f32.mrb[41].mxu0  ;;  %v1540_v1 = vpop.f32.mrb[41].mxu1 }
 0x186   : > { %v1273_v16 = vpop.f32.mrb[42].mxu0  ;;  %v1541_v17 = vpop.f32.mrb[42].mxu1 }
 0x187   : > { %v1616_v27 = vmax.f32 %v1348_v41, %v1538_v37  ;;  %v1349_v26 = vmax.f32 %v1081_v49, %v1273_v16  ;;  %v1275_v31 = vpop.f32.mrb[43].mxu0  ;;  %v1543_v2 = vpop.f32.mrb[43].mxu1 }
 0x189   : > { %v1642_v42 = vadd.f32 %v2870_v6, %v1616_v27  ;;  %v1617_v43 = vmax.f32 %v1349_v26, %v1541_v17 }
 0x18b   : > { %v1643_v44 = vadd.f32 %v2870_v6, %v1617_v43  ;;  %v1661_v45 = vmax.f32 %v1642_v42, 0.0 }
 0x18c   : > { %v1278_v1 = vpop.f32.mrb[44].mxu0  ;;  %v1546_v12 = vpop.f32.mrb[44].mxu1 }
 0x18d   : > { %v1662_v51 = vmax.f32 %v1643_v44, 0.0  ;;  %v1350_v37 = vmax.f32 %v1082_v54, %v1278_v1  ;;  %v1280_v41 = vpop.f32.mrb[45].mxu0  ;;  %v1548_v47 = vpop.f32.mrb[45].mxu1 }
 0x18e   : > { %v1281_v48 = vpop.f32.mrb[46].mxu0  ;;  %v1549_v49 = vpop.f32.mrb[46].mxu1 }
 0x18f   : > { %v2078_v2 = vpack.c.bf16 %v1662_v51, %v1661_v45  ;;  %v1618_v16 = vmax.f32 %v1350_v37, %v1546_v12  ;;  %v1351_v17 = vmax.f32 %v1083_v59, %v1281_v48  ;;  %v1283_v27 = vpop.f32.mrb[47].mxu0  ;;  %v1551_v26 = vpop.f32.mrb[47].mxu1 }
 0x191   : > { %2079 = vst [vmem:[%s2883_s30] sm:$0xff] %v2078_v2   ;;  %v1644_v52 = vadd.f32 %v2870_v6, %v1618_v16  ;;  %v1619_v53 = vmax.f32 %v1351_v17, %v1549_v49 }
 0x193   : > { %v1645_v54 = vadd.f32 %v2870_v6, %v1619_v53  ;;  %v1663_v43 = vmax.f32 %v1644_v52, 0.0 }
 0x194   : > { %v1286_v31 = vpop.f32.mrb[48].mxu0  ;;  %v1554_v42 = vpop.f32.mrb[48].mxu1 }
 0x195   : > { %v1664_v44 = vmax.f32 %v1645_v54, 0.0  ;;  %v1352_v51 = vmax.f32 %v1084_v0, %v1286_v31  ;;  %v1288_v1 = vpop.f32.mrb[49].mxu0  ;;  %v1556_v57 = vpop.f32.mrb[49].mxu1 }
 0x196   : > { %v1289_v58 = vpop.f32.mrb[50].mxu0  ;;  %v1557_v59 = vpop.f32.mrb[50].mxu1 }
 0x197   : > { %v2083_v12 = vpack.c.bf16 %v1664_v44, %v1663_v43  ;;  %v1620_v45 = vmax.f32 %v1352_v51, %v1554_v42  ;;  %v1353_v37 = vmax.f32 %v1085_v5, %v1289_v58  ;;  %v1291_v41 = vpop.f32.mrb[51].mxu0  ;;  %v1559_v47 = vpop.f32.mrb[51].mxu1 }
 0x199   : > { %2121 = vst [vmem:[%s2883_s30 + $0x8] sm:$0xff] %v2083_v12   ;;  %v1646_v48 = vadd.f32 %v2870_v6, %v1620_v45  ;;  %v1621_v49 = vmax.f32 %v1353_v37, %v1557_v59 }
 0x19b   : > { %v1647_v62 = vadd.f32 %v2870_v6, %v1621_v49  ;;  %v1665_v2 = vmax.f32 %v1646_v48, 0.0 }
 0x19c   : > { %v1294_v63 = vpop.f32.mrb[52].mxu0  ;;  %v1562_v0 = vpop.f32.mrb[52].mxu1 }
 0x19d   : > { %v1666_v16 = vmax.f32 %v1647_v62, 0.0  ;;  %v1354_v17 = vmax.f32 %v1086_v10, %v1294_v63  ;;  %v1296_v27 = vpop.f32.mrb[53].mxu0  ;;  %v1564_v3 = vpop.f32.mrb[53].mxu1 }
 0x19e   : > { %v1297_v4 = vpop.f32.mrb[54].mxu0  ;;  %v1565_v5 = vpop.f32.mrb[54].mxu1 }
 0x19f   : > { %v2088_v26 = vpack.c.bf16 %v1666_v16, %v1665_v2  ;;  %v1622_v52 = vmax.f32 %v1354_v17, %v1562_v0  ;;  %v1355_v53 = vmax.f32 %v1087_v15, %v1297_v4  ;;  %v1299_v54 = vpop.f32.mrb[55].mxu0  ;;  %v1567_v31 = vpop.f32.mrb[55].mxu1 }
 0x1a1   : > { %2122 = vst [vmem:[%s2883_s30 + $0x10] sm:$0xff] %v2088_v26   ;;  %v1648_v42 = vadd.f32 %v2870_v6, %v1622_v52  ;;  %v1623_v43 = vmax.f32 %v1355_v53, %v1565_v5 }
 0x1a3   : > { %v1649_v8 = vadd.f32 %v2870_v6, %v1623_v43  ;;  %v1667_v44 = vmax.f32 %v1648_v42, 0.0  ;;  %v2974_v42 = vmax.f32 %v2826_v46, %v2828_v50 }
 0x1a4   : > { %v1302_v9 = vpop.f32.mrb[56].mxu0  ;;  %v1570_v10 = vpop.f32.mrb[56].mxu1 }
 0x1a5   : > { %v1668_v51 = vmax.f32 %v1649_v8, 0.0  ;;  %v1356_v1 = vmax.f32 %v1088_v20, %v1302_v9  ;;  %v1304_v57 = vpop.f32.mrb[57].mxu0  ;;  %v1572_v13 = vpop.f32.mrb[57].mxu1 }
 0x1a6   : > { %v1305_v14 = vpop.f32.mrb[58].mxu0  ;;  %v1573_v15 = vpop.f32.mrb[58].mxu1  ;;  %v2975_v57 = vmax.f32 %v2832_v60, %v2834_v61 }
 0x1a7   : > { %v2093_v58 = vpack.c.bf16 %v1668_v51, %v1667_v44  ;;  %v1624_v59 = vmax.f32 %v1356_v1, %v1570_v10  ;;  %v1357_v12 = vmax.f32 %v1089_v25, %v1305_v14  ;;  %v1307_v45 = vpop.f32.mrb[59].mxu0  ;;  %v1575_v37 = vpop.f32.mrb[59].mxu1 }
 0x1a9   : > { %2123 = vst [vmem:[%s2883_s30 + $0x18] sm:$0xff] %v2093_v58   ;;  %v1650_v41 = vadd.f32 %v2870_v6, %v1624_v59  ;;  %v1625_v47 = vmax.f32 %v1357_v12, %v1573_v15  ;;  %v2976_v12 = vmax.f32 %v2838_v7, %v2840_v11 }
 0x1ab   : > { %v1651_v18 = vadd.f32 %v2870_v6, %v1625_v47  ;;  %v1669_v48 = vmax.f32 %v1650_v41, 0.0 }
 0x1ac   : > { %v1310_v19 = vpop.f32.mrb[60].mxu0  ;;  %v1578_v20 = vpop.f32.mrb[60].mxu1 }
 0x1ad   : > { %v1670_v49 = vmax.f32 %v1651_v18, 0.0  ;;  %v1358_v62 = vmax.f32 %v1090_v30, %v1310_v19  ;;  %v1312_v63 = vpop.f32.mrb[61].mxu0  ;;  %v1580_v23 = vpop.f32.mrb[61].mxu1 }
 0x1ae   : > { %v1313_v24 = vpop.f32.mrb[62].mxu0  ;;  %v1581_v25 = vpop.f32.mrb[62].mxu1 }
 0x1af   : > { %v2098_v0 = vpack.c.bf16 %v1670_v49, %v1669_v48  ;;  %v1626_v2 = vmax.f32 %v1358_v62, %v1578_v20  ;;  %v1359_v16 = vmax.f32 %v1091_v35, %v1313_v24  ;;  %v1315_v17 = vpop.f32.mrb[63].mxu0  ;;  %v1583_v27 = vpop.f32.mrb[63].mxu1  ;;  %v2977_v49 = vmax.f32 %v2844_v21, %v2846_v22 }
 0x1b1   : > { %2124 = vst [vmem:[%s2883_s30 + $0x20] sm:$0xff] %v2098_v0   ;;  %v1652_v3 = vadd.f32 %v2870_v6, %v1626_v2  ;;  %v1627_v4 = vmax.f32 %v1359_v16, %v1581_v25  ;;  %v2978_v0 = vmax.f32 %v2850_v32, %v2852_v36 }
 0x1b3   : > { %v1653_v28 = vadd.f32 %v2870_v6, %v1627_v4  ;;  %v1671_v5 = vmax.f32 %v1652_v3, 0.0 }
 0x1b4   : > { %v1318_v29 = vpop.f32.mrb[64].mxu0  ;;  %v1586_v30 = vpop.f32.mrb[64].mxu1 }
 0x1b5   : > { %v1672_v26 = vmax.f32 %v1653_v28, 0.0  ;;  %v1360_v52 = vmax.f32 %v1092_v40, %v1318_v29  ;;  %v1320_v53 = vpop.f32.mrb[65].mxu0  ;;  %v1588_v33 = vpop.f32.mrb[65].mxu1 }
 0x1b6   : > { %v1321_v34 = vpop.f32.mrb[66].mxu0  ;;  %v1589_v35 = vpop.f32.mrb[66].mxu1 }
 0x1b7   : > { %v2103_v54 = vpack.c.bf16 %v1672_v26, %v1671_v5  ;;  %v1628_v31 = vmax.f32 %v1360_v52, %v1586_v30  ;;  %v1361_v43 = vmax.f32 %v2974_v42, %v1321_v34  ;;  %v1323_v8 = vpop.f32.mrb[67].mxu0  ;;  %v1591_v9 = vpop.f32.mrb[67].mxu1  ;;  %v2979_v30 = vmax.f32 %v2856_v55, %v2858_v56 }
 0x1b9   : > { %2125 = vst [vmem:[%s2883_s30 + $0x28] sm:$0xff] %v2103_v54   ;;  %v1654_v10 = vadd.f32 %v2870_v6, %v1628_v31  ;;  %v1629_v44 = vmax.f32 %v1361_v43, %v1589_v35 }
 0x1bb   : > { %v1655_v38 = vadd.f32 %v2870_v6, %v1629_v44  ;;  %v1673_v51 = vmax.f32 %v1654_v10, 0.0 }
 0x1bc   : > { %v1326_v39 = vpop.f32.mrb[68].mxu0  ;;  %v1594_v40 = vpop.f32.mrb[68].mxu1 }
 0x1bd   : > { %v1674_v1 = vmax.f32 %v1655_v38, 0.0  ;;  %v1362_v13 = vmax.f32 %v2975_v57, %v1326_v39  ;;  %v1328_v14 = vpop.f32.mrb[69].mxu0  ;;  %v1596_v46 = vpop.f32.mrb[69].mxu1 }
 0x1be   : > { %v1329_v50 = vpop.f32.mrb[70].mxu0  ;;  %v1597_v15 = vpop.f32.mrb[70].mxu1 }
 0x1bf   : > { %v2108_v58 = vpack.c.bf16 %v1674_v1, %v1673_v51  ;;  %v1630_v59 = vmax.f32 %v1362_v13, %v1594_v40  ;;  %v1363_v45 = vmax.f32 %v2976_v12, %v1329_v50  ;;  %v1331_v37 = vpop.f32.mrb[71].mxu0  ;;  %v1599_v41 = vpop.f32.mrb[71].mxu1 }
 0x1c1   : > { %2126 = vst [vmem:[%s2883_s30 + $0x30] sm:$0xff] %v2108_v58   ;;  %v1656_v47 = vadd.f32 %v2870_v6, %v1630_v59  ;;  %v1631_v18 = vmax.f32 %v1363_v45, %v1597_v15 }
 0x1c3   : > { %v1657_v60 = vadd.f32 %v2870_v6, %v1631_v18  ;;  %v1675_v20 = vmax.f32 %v1656_v47, 0.0 }
 0x1c4   : > { %v1334_v61 = vpop.f32.mrb[72].mxu0  ;;  %v1602_v19 = vpop.f32.mrb[72].mxu1 }
 0x1c5   : > { %v1676_v48 = vmax.f32 %v1657_v60, 0.0  ;;  %v1364_v62 = vmax.f32 %v2977_v49, %v1334_v61  ;;  %v1336_v63 = vpop.f32.mrb[73].mxu0  ;;  %v1604_v7 = vpop.f32.mrb[73].mxu1 }
 0x1c6   : > { %v1337_v11 = vpop.f32.mrb[74].mxu0  ;;  %v1605_v23 = vpop.f32.mrb[74].mxu1 }
 0x1c7   : > { %v2113_v24 = vpack.c.bf16 %v1676_v48, %v1675_v20  ;;  %v1632_v25 = vmax.f32 %v1364_v62, %v1602_v19  ;;  %v1365_v2 = vmax.f32 %v2978_v0, %v1337_v11  ;;  %v1339_v16 = vpop.f32.mrb[75].mxu0  ;;  %v1607_v17 = vpop.f32.mrb[75].mxu1 }
 0x1c9   : > { %2127 = vst [vmem:[%s2883_s30 + $0x38] sm:$0xff] %v2113_v24   ;;  %v1658_v27 = vadd.f32 %v2870_v6, %v1632_v25  ;;  %v1633_v3 = vmax.f32 %v1365_v2, %v1605_v23 }
 0x1cb   : > { %v1659_v21 = vadd.f32 %v2870_v6, %v1633_v3  ;;  %v1677_v28 = vmax.f32 %v1658_v27, 0.0 }
 0x1cc   : > { %v1342_v22 = vpop.f32.mrb[76].mxu0  ;;  %v1610_v4 = vpop.f32.mrb[76].mxu1 }
 0x1cd   : > { %v1678_v29 = vmax.f32 %v1659_v21, 0.0  ;;  %v1366_v5 = vmax.f32 %v2979_v30, %v1342_v22  ;;  %v1344_v32 = vpop.f32.mrb[77].mxu0  ;;  %v1612_v36 = vpop.f32.mrb[77].mxu1 }
 0x1ce   : > { %v1345_v26 = vpop.f32.mrb[78].mxu0  ;;  %v1613_v52 = vpop.f32.mrb[78].mxu1 }
 0x1cf   : > { %v2118_v53 = vpack.c.bf16 %v1678_v29, %v1677_v28  ;;  %v1634_v33 = vmax.f32 %v1366_v5, %v1610_v4  ;;  %v1346_v34 = vpop.f32.mrb[79].mxu0  ;;  %v1614_v35 = vpop.f32.mrb[79].mxu1 }
 0x1d1   : > { %2128 = vst [vmem:[%s2883_s30 + $0x40] sm:$0xff] %v2118_v53   ;;  %v1660_v54 = vadd.f32 %v2870_v6, %v1634_v33 }
 0x1d3   : > { %v1679_v31 = vmax.f32 %v1660_v54, 0.0 }
 0x1d5   : > { %v2074_v42 = vpack.c.bf16 %v1679_v31, %v1679_v31 }
 0x1d7   : > { %1775 = vst [vmem:[%s2883_s30 + $0x48] sm:$0xf] %v2074_v42 }
 0x1d8 PF: > { %p10_p9 = scmp.ge.s32.totalorder %s2343_s16, 6   ;;  %s2980_s12 = smov %s2299_s13 }
 0x1d9   : > { %s2981_s13 = smov %s2352_s19  ;;  %s2982_s14 = smov %s2343_s16 }
 0x1da   :  { %12 = sbr.rel (!%p10_p9) target bundleno = 2 (0x2), region = 108 }

// kernel: qfunction_forward.3
= control target key start
LH: loop header
LB: loop body
LE: loop exit
PB: predicated region body
PF: predicated region fallthrough
CT: control target
= control target key end

     0   :  { %10 = vsyncpa [#allocation4], 0  ;;  %s18524_s18 = smov 0   ;;  %s18526_s19 = smov 0   ;;  %s20162_s0 = inlined_call_operand.vmem [shape: bf16[2,38400], index: 0, kind: input, shape index: {}]   ;;  %s20163_s1 = inlined_call_operand.vmem [shape: bf16[1,38400,128], index: 1, kind: input, shape index: {}]   ;;  %s20164_s2 = inlined_call_operand.vmem [shape: f32[1,1,128], index: 2, kind: input, shape index: {}]   ;;  %s20165_s3 = inlined_call_operand.vmem [shape: f32[1,128,8], index: 3, kind: input, shape index: {}]   ;;  %s20166_s4 = inlined_call_operand.vmem [shape: f32[1,8], index: 4, kind: input, shape index: {}]   ;;  %s20167_s5 = inlined_call_operand.hbm [shape: f32[1,2,8], index: 5, kind: output, shape index: {}]  }
   0x1   :  { %s18528_s20 = smov 0  }
   0x2 LB: > { %s14238_s21 = sadd.s32 4294967295, %s18486_s20   ;;  %s25_s22 = sadd.s32 1, %s18482_s19  ;;  %s18486_s20 = sphi %s18528_s20, %s16_s20   ;;  %s18482_s19 = sphi %s18526_s19, %s20170_s19   ;;  %s18478_s18 = sphi %s18524_s18, %s20169_s18  }
   0x3   : > { %p26_p0 = scmp.ge.s32.totalorder %s25_s22, 2  ;;  %p14243_p1 = scmp.ge.s32.totalorder %s18486_s20, 1 }
   0x4   : > { %p235_p2 = scmp.lt.s32.totalorder %s18486_s20, 3 }
   0x5   : > { %s20172_s22 = smov (%p26_p0, %s25_s22), 0 }
   0x6   : > { %p236_p3 = pnand %p14243_p1, %p235_p2 }
   0x7   : > { %s274_s23 = smul.u32 (!%p236_p3), 150, %s18478_s18  ;;  %p14245_p6 = scmp.ne.s32.totalorder (!%p236_p3), %s18478_s18, 0 }
   0x8   : > { %239 = sbr.rel (%p236_p3) target bundleno = 1713 (0x6b1), region = 40 }
   0x9   : > { %s279_s24 = smul.u32 (!%p236_p3), 2400, %s18478_s18  ;;  %p275_p4 = scmp.lt.s32.totalorder (!%p236_p3), %s274_s23, 299 }
   0xb   : > { %p282_p5 = scmp.lt.s32.totalorder (!%p236_p3), %s279_s24, 4799 }
   0xf   : > { %s20174_s23 = smov (!%p275_p4, %s274_s23), 299  ;;  %s20176_s24 = smov (!%p282_p5, %s279_s24), 4799 }
  0x10   : > { %s18550_s27 = scalar_lea.vmem %s20162_s0, %s20174_s23  ;;  %s14244_s28 = sshll.u32 %s20176_s24, 2  ;;  %v18488_v0 = vmov (!%p14245_p6), 0.0  }
  0x11   : > { %s18555_s6 = scalar_lea.vmem %s20163_s1, %s14244_s28  ;;  %301 = sbr.rel (%p14245_p6) target bundleno = 24 (0x18), region = 44  ;;  %302 = vst [vmem:[#allocation2] sm:$0x3] (!%p14245_p6), %v18488_v0 }
  0x18 PF: > { %v17215_v1 = vld [vmem:[%s18555_s6 + $0x40] sm:$0xff]   ;;  %v17219_v5 = vld [vmem:[%s18555_s6 + $0x48] sm:$0xff]   ;;  %v17223_v9 = vld [vmem:[%s18555_s6 + $0x50] sm:$0xff]   ;;  %v2746_v30 = vlaneseq  ;;  %v18489_v36 = vmov 1966171168   ;;  %p15446_p7 = scmp.ne.s32.totalorder %s18478_s18, 1 }
  0x19   : > { %v17216_v2 = vld [vmem:[%s18555_s6 + $0xc0] sm:$0xff]   ;;  %15453 = vmatprep.subr.bf16.mxu0 %v17215_v1  ;;  %v17220_v6 = vld [vmem:[%s18555_s6 + $0xc8] sm:$0xff]   ;;  %v17224_v10 = vld [vmem:[%s18555_s6 + $0xd0] sm:$0xff]   ;;  %v2744_v37 = vunpack.c.l.s4 %v18489_v36  ;;  %vm18491_vm0 = vmmov (!%p15446_p7), 0   ;;  %vm14135_vm1 = vcmask (!%p15446_p7), 58368  }
  0x1a   : > { %v17217_v3 = vld [vmem:[%s18555_s6] sm:$0xff]   ;;  %15475 = vmatprep.subr.bf16.mxu1 %v17216_v2  ;;  %v17221_v7 = vld [vmem:[%s18555_s6 + $0x8] sm:$0xff]   ;;  %v17225_v11 = vld [vmem:[%s18555_s6 + $0x10] sm:$0xff]   ;;  %v2747_v34 = vshrl.u32 %v2746_v30, 7 }
  0x1b   : > { %v17218_v4 = vld [vmem:[%s18555_s6 + $0x80] sm:$0xff]   ;;  %15454 = vmatpush3.bf16.msra.mxu0 %v17217_v3  ;;  %v17222_v8 = vld [vmem:[%s18555_s6 + $0x88] sm:$0xff]   ;;  %v17226_v12 = vld [vmem:[%s18555_s6 + $0x90] sm:$0xff]   ;;  %v2745_v40 = vunpack.c.0.s8 %v2744_v37 }
  0x1c   : > { %15476 = vmatpush3.bf16.msra.mxu1 %v17218_v4  ;;  %15455 = vmatprep.subr.bf16.mxu0 %v17219_v5  ;;  %v17227_v13 = vld [vmem:[%s18555_s6 + $0x58] sm:$0xff]   ;;  %v17231_v17 = vld [vmem:[%s18555_s6 + $0x60] sm:$0xff]   ;;  %v17235_v21 = vld [vmem:[%s18555_s6 + $0x68] sm:$0xff]  }
  0x1d   : > { %15477 = vmatprep.subr.bf16.mxu1 %v17220_v6  ;;  %v17228_v14 = vld [vmem:[%s18555_s6 + $0xd8] sm:$0xff]   ;;  %v17232_v18 = vld [vmem:[%s18555_s6 + $0xe0] sm:$0xff]   ;;  %v17236_v22 = vld [vmem:[%s18555_s6 + $0xe8] sm:$0xff]   ;;  %v18593_v42 = vsub.s32 %v2745_v40, %v2747_v34 }
  0x1e   : > { %v17229_v15 = vld [vmem:[%s18555_s6 + $0x18] sm:$0xff]   ;;  %v17233_v19 = vld [vmem:[%s18555_s6 + $0x20] sm:$0xff]   ;;  %v17237_v23 = vld [vmem:[%s18555_s6 + $0x28] sm:$0xff]  }
  0x1f   : > { %15456 = vmatpush3.bf16.msra.mxu0 %v17221_v7  ;;  %v17230_v16 = vld [vmem:[%s18555_s6 + $0x98] sm:$0xff]   ;;  %v17234_v20 = vld [vmem:[%s18555_s6 + $0xa0] sm:$0xff]   ;;  %v17238_v24 = vld [vmem:[%s18555_s6 + $0xa8] sm:$0xff]  }
  0x20   : > { %15478 = vmatpush3.bf16.msra.mxu1 %v17222_v8  ;;  %15457 = vmatprep.subr.bf16.mxu0 %v17223_v9  ;;  %v17239_v25 = vld [vmem:[%s18555_s6 + $0x70] sm:$0xff]   ;;  %v17243_v29 = vld [vmem:[%s18555_s6 + $0x78] sm:$0xff]   ;;  %v17248_v35 = vld [vmem:[%s18555_s6 + $0x140] sm:$0xff]  }
  0x21   : > { %15479 = vmatprep.subr.bf16.mxu1 %v17224_v10  ;;  %v17240_v26 = vld [vmem:[%s18555_s6 + $0xf0] sm:$0xff]   ;;  %v17244_v31 = vld [vmem:[%s18555_s6 + $0xf8] sm:$0xff]   ;;  %v304_v38 = vld [vmem:[%s18550_s27] sm:$0xff] }
  0x22   : > { %v17241_v27 = vld [vmem:[%s18555_s6 + $0x30] sm:$0xff]   ;;  %v17245_v32 = vld [vmem:[%s18555_s6 + $0x38] sm:$0xff]   ;;  %v2742_v39 = vcombine.high %v304_v38, %v304_v38  ;;  %v17250_v41 = vld [vmem:[%s18555_s6 + $0x1c0] sm:$0xff]   ;;  %v2749_v43 = vrot.slane %v304_v38, %v18593_v42 }
  0x23   : > { %15458 = vmatpush3.bf16.msra.mxu0 %v17225_v11  ;;  %v17242_v28 = vld [vmem:[%s18555_s6 + $0xb0] sm:$0xff]   ;;  %v17246_v33 = vld [vmem:[%s18555_s6 + $0xb8] sm:$0xff]   ;;  %v17249_v48 = vld [vmem:[%s18555_s6 + $0x100] sm:$0xff]  }
  0x24   : > { %15480 = vmatpush3.bf16.msra.mxu1 %v17226_v12  ;;  %15459 = vmatprep.subr.bf16.mxu0 %v17227_v13  ;;  %v18597_v44 = vrot.slane %v2742_v39, %v18593_v42  ;;  %v2757_v45 = vcombine.high %v2749_v43, %v2749_v43  ;;  %v2765_v46 = vrot.slane %v2749_v43, %v18593_v42  ;;  %v17251_v50 = vld [vmem:[%s18555_s6 + $0x180] sm:$0xff]   ;;  %v17252_v53 = vld [vmem:[%s18555_s6 + $0x148] sm:$0xff]   ;;  %v17256_v59 = vld [vmem:[%s18555_s6 + $0x150] sm:$0xff]  }
  0x25   : > { %15481 = vmatprep.subr.bf16.mxu1 %v17228_v14  ;;  %v17253_v55 = vld [vmem:[%s18555_s6 + $0x108] sm:$0xff]   ;;  %v17257_v60 = vld [vmem:[%s18555_s6 + $0x110] sm:$0xff]   ;;  %v17260_v63 = vld [vmem:[%s18555_s6 + $0x158] sm:$0xff]  }
  0x26   : > { %v2758_v47 = vcombine.high %v18597_v44, %v18597_v44  ;;  %v2779_v49 = vrot.slane %v2757_v45, %v18593_v42  ;;  %v2787_v52 = vcombine.high %v2765_v46, %v2765_v46  ;;  %v17254_v56 = vld [vmem:[%s18555_s6 + $0x1c8] sm:$0xff]   ;;  %v17258_v61 = vld [vmem:[%s18555_s6 + $0x1d0] sm:$0xff]   ;;  %v17261_v0 = vld [vmem:[%s18555_s6 + $0x118] sm:$0xff]  }
  0x27   : > { %15460 = vmatpush3.bf16.msra.mxu0 %v17229_v15  ;;  %v17255_v58 = vld [vmem:[%s18555_s6 + $0x188] sm:$0xff]   ;;  %v17259_v62 = vld [vmem:[%s18555_s6 + $0x190] sm:$0xff]   ;;  %v17262_v1 = vld [vmem:[%s18555_s6 + $0x1d8] sm:$0xff]  }
  0x28   : > { %15482 = vmatpush3.bf16.msra.mxu1 %v17230_v16  ;;  %15461 = vmatprep.subr.bf16.mxu0 %v17231_v17  ;;  %v2786_v51 = vrot.slane %v2758_v47, %v18593_v42  ;;  %v2789_v54 = vcombine.high %v2779_v49, %v2779_v49  ;;  %v17263_v2 = vld [vmem:[%s18555_s6 + $0x198] sm:$0xff]   ;;  %v17264_v3 = vld [vmem:[%s18555_s6 + $0x160] sm:$0xff]   ;;  %v17268_v7 = vld [vmem:[%s18555_s6 + $0x168] sm:$0xff]  }
  0x29   : > { %15483 = vmatprep.subr.bf16.mxu1 %v17232_v18  ;;  %11053 = vmatprep.mubr.bf16.mxu0 %v2779_v49  ;;  %v17265_v4 = vld [vmem:[%s18555_s6 + $0x120] sm:$0xff]   ;;  %v17269_v8 = vld [vmem:[%s18555_s6 + $0x128] sm:$0xff]   ;;  %v17272_v11 = vld [vmem:[%s18555_s6 + $0x170] sm:$0xff]  }
  0x2a   : > { %v2790_v57 = vcombine.high %v2786_v51, %v2786_v51  ;;  %11093 = vmatprep.mubr.bf16.mxu1 %v2789_v54  ;;  %v17266_v5 = vld [vmem:[%s18555_s6 + $0x1e0] sm:$0xff]   ;;  %v17270_v9 = vld [vmem:[%s18555_s6 + $0x1e8] sm:$0xff]   ;;  %v17273_v12 = vld [vmem:[%s18555_s6 + $0x130] sm:$0xff]  }
  0x2b   : > { %15462 = vmatpush3.bf16.msra.mxu0 %v17233_v19  ;;  %v17267_v6 = vld [vmem:[%s18555_s6 + $0x1a0] sm:$0xff]   ;;  %v17271_v10 = vld [vmem:[%s18555_s6 + $0x1a8] sm:$0xff]   ;;  %v17274_v13 = vld [vmem:[%s18555_s6 + $0x1f0] sm:$0xff]   ;;  %v2772_v19 = vrot.slane %v18597_v44, %v18593_v42 }
  0x2c   : > { %15484 = vmatpush3.bf16.msra.mxu1 %v17234_v20  ;;  %15463 = vmatprep.subr.bf16.mxu0 %v17235_v21  ;;  %v17275_v14 = vld [vmem:[%s18555_s6 + $0x1b0] sm:$0xff]   ;;  %v17276_v15 = vld [vmem:[%s18555_s6 + $0x178] sm:$0xff]   ;;  %v17280_v20 = vld [vmem:[%s18555_s6 + $0x240] sm:$0xff]  }
  0x2d   : > { %15485 = vmatprep.subr.bf16.mxu1 %v17236_v22  ;;  %v17277_v16 = vld [vmem:[%s18555_s6 + $0x138] sm:$0xff]   ;;  %v17281_v21 = vld [vmem:[%s18555_s6 + $0x200] sm:$0xff]   ;;  %v17289_v30 = vld [vmem:[%s18555_s6 + $0x210] sm:$0xff]  }
  0x2e   : > { %v17278_v17 = vld [vmem:[%s18555_s6 + $0x1f8] sm:$0xff]   ;;  %v17282_v22 = vld [vmem:[%s18555_s6 + $0x2c0] sm:$0xff]   ;;  %v17301_v43 = vld [vmem:[%s18555_s6 + $0x228] sm:$0xff]  }
  0x2f   : > { %15464 = vmatpush3.bf16.msra.mxu0 %v17237_v23  ;;  %v17279_v18 = vld [vmem:[%s18555_s6 + $0x1b8] sm:$0xff]   ;;  %v17283_v23 = vld [vmem:[%s18555_s6 + $0x280] sm:$0xff]   ;;  %v17302_v44 = vld [vmem:[%s18555_s6 + $0x2e8] sm:$0xff]  }
  0x30   : > { %15486 = vmatpush3.bf16.msra.mxu1 %v17238_v24  ;;  %15465 = vmatprep.subr.bf16.mxu0 %v17239_v25  ;;  %v2788_v24 = vcombine.high %v2772_v19, %v2772_v19  ;;  %v17284_v25 = vld [vmem:[%s18555_s6 + $0x248] sm:$0xff]   ;;  %v17293_v34 = vld [vmem:[%s18555_s6 + $0x218] sm:$0xff]   ;;  %v17296_v37 = vld [vmem:[%s18555_s6 + $0x260] sm:$0xff]  }
  0x31   : > { %15487 = vmatprep.subr.bf16.mxu1 %v17240_v26  ;;  %v17285_v26 = vld [vmem:[%s18555_s6 + $0x208] sm:$0xff]   ;;  %v17295_v36 = vld [vmem:[%s18555_s6 + $0x298] sm:$0xff]   ;;  %v17297_v38 = vld [vmem:[%s18555_s6 + $0x220] sm:$0xff]  }
  0x32   : > { %v17298_v39 = vld [vmem:[%s18555_s6 + $0x2e0] sm:$0xff]   ;;  %v17303_v45 = vld [vmem:[%s18555_s6 + $0x2a8] sm:$0xff]   ;;  %v17304_v47 = vld [vmem:[%s18555_s6 + $0x270] sm:$0xff]  }
  0x33   : > { %15466 = vmatpush3.bf16.msra.mxu0 %v17241_v27  ;;  %v17286_v27 = vld [vmem:[%s18555_s6 + $0x2c8] sm:$0xff]   ;;  %v17299_v40 = vld [vmem:[%s18555_s6 + $0x2a0] sm:$0xff]   ;;  %v17307_v54 = vld [vmem:[%s18555_s6 + $0x2b0] sm:$0xff]  }
  0x34   : > { %15488 = vmatpush3.bf16.msra.mxu1 %v17242_v28  ;;  %15467 = vmatprep.subr.bf16.mxu0 %v17243_v29  ;;  %v17287_v28 = vld [vmem:[%s18555_s6 + $0x288] sm:$0xff]   ;;  %v17288_v29 = vld [vmem:[%s18555_s6 + $0x250] sm:$0xff]  }
  0x35   : > { %15489 = vmatprep.subr.bf16.mxu1 %v17244_v31  ;;  %v17290_v31 = vld [vmem:[%s18555_s6 + $0x2d0] sm:$0xff]  }
  0x37   : > { %15468 = vmatpush3.bf16.msra.mxu0 %v17245_v32  ;;  %v17291_v32 = vld [vmem:[%s18555_s6 + $0x290] sm:$0xff]  }
  0x38   : > { %15490 = vmatpush3.bf16.msra.mxu1 %v17246_v33  ;;  %15497 = vmatprep.subr.bf16.mxu0 %v17248_v35  ;;  %v17292_v33 = vld [vmem:[%s18555_s6 + $0x258] sm:$0xff]  }
  0x39   : > { %15519 = vmatprep.subr.bf16.mxu1 %v17250_v41  ;;  %v17294_v35 = vld [vmem:[%s18555_s6 + $0x2d8] sm:$0xff]   ;;  %v17300_v41 = vld [vmem:[%s18555_s6 + $0x268] sm:$0xff]  }
  0x3a   : > { %11054 = vmatmul.mubr.bf16.vlgmr.msra.gmra.mrb[0].mxu0 %v2765_v46  ;;  %v305_v46 = vld [vmem:[%s18550_s27 + $0x8] sm:$0xff] }
  0x3b   : > { %15498 = vmatpush3.bf16.msra.mxu0 %v17249_v48  ;;  %11094 = vmatmul.mubr.bf16.vlgmr.msra.gmra.mrb[0].mxu1 %v2787_v52  ;;  %v2798_v48 = vrot.slane %v305_v46, %v18593_v42  ;;  %v2791_v49 = vcombine.high %v305_v46, %v305_v46  ;;  %v17354_v46 = vld [vmem:[%s18555_s6 + $0x410] sm:$0xff]  }
  0x3c   : > { %15499 = vmatprep.subr.bf16.mxu0 %v17252_v53  ;;  %15520 = vmatpush3.bf16.msra.mxu1 %v17251_v50  ;;  %v17305_v50 = vld [vmem:[%s18555_s6 + $0x230] sm:$0xff]  }
  0x3d   : > { %11133 = vmatprep.mubr.bf16.mxu0 %v2786_v51  ;;  %15521 = vmatprep.subr.bf16.mxu1 %v17254_v56  ;;  %v17306_v51 = vld [vmem:[%s18555_s6 + $0x2f0] sm:$0xff]   ;;  %v2806_v52 = vcombine.high %v2798_v48, %v2798_v48  ;;  %v18666_v53 = vrot.slane %v2791_v49, %v18593_v42  ;;  %v17357_v49 = vld [vmem:[%s18555_s6 + $0x458] sm:$0xff]  }
  0x3e   : > { %11173 = vmatprep.mubr.bf16.mxu1 %v2790_v57  ;;  %v17309_v57 = vld [vmem:[%s18555_s6 + $0x238] sm:$0xff]  }
  0x3f   : > { %15500 = vmatpush3.bf16.msra.mxu0 %v17253_v55  ;;  %v17308_v55 = vld [vmem:[%s18555_s6 + $0x278] sm:$0xff]   ;;  %v2828_v56 = vrot.slane %v2806_v52, %v18593_v42 }
  0x40   : > { %15501 = vmatprep.subr.bf16.mxu0 %v17256_v59  ;;  %15522 = vmatpush3.bf16.msra.mxu1 %v17255_v58  ;;  %v2807_v58 = vcombine.high %v18666_v53, %v18666_v53  ;;  %v17310_v59 = vld [vmem:[%s18555_s6 + $0x2f8] sm:$0xff]  }
  0x41   : > { %15523 = vmatprep.subr.bf16.mxu1 %v17258_v61  ;;  %v17311_v61 = vld [vmem:[%s18555_s6 + $0x2b8] sm:$0xff]  }
  0x42   : > { %v17360_v52 = vld [vmem:[%s18555_s6 + $0x498] sm:$0xff]  }
  0x43   : > { %15502 = vmatpush3.bf16.msra.mxu0 %v17257_v60  ;;  %v2838_v60 = vcombine.high %v2828_v56, %v2828_v56 }
  0x44   : > { %15503 = vmatprep.subr.bf16.mxu0 %v17260_v63  ;;  %15524 = vmatpush3.bf16.msra.mxu1 %v17259_v62  ;;  %v2814_v62 = vrot.slane %v2798_v48, %v18593_v42  ;;  %v17312_v63 = vld [vmem:[%s18555_s6 + $0x340] sm:$0xff]   ;;  %v17356_v48 = vld [vmem:[%s18555_s6 + $0x490] sm:$0xff]  }
  0x45   : > { %15525 = vmatprep.subr.bf16.mxu1 %v17262_v1  ;;  %v2835_v1 = vrot.slane %v2807_v58, %v18593_v42  ;;  %v17366_v58 = vld [vmem:[%s18555_s6 + $0x428] sm:$0xff]  }
  0x47   : > { %15504 = vmatpush3.bf16.msra.mxu0 %v17261_v0  ;;  %v17313_v0 = vld [vmem:[%s18555_s6 + $0x300] sm:$0xff]  }
  0x48   : > { %15505 = vmatprep.subr.bf16.mxu0 %v17264_v3  ;;  %15526 = vmatpush3.bf16.msra.mxu1 %v17263_v2  ;;  %v17314_v2 = vld [vmem:[%s18555_s6 + $0x3c0] sm:$0xff]  }
  0x49   : > { %15527 = vmatprep.subr.bf16.mxu1 %v17266_v5  ;;  %v17315_v3 = vld [vmem:[%s18555_s6 + $0x380] sm:$0xff]   ;;  %v17316_v5 = vld [vmem:[%s18555_s6 + $0x348] sm:$0xff]  }
  0x4b   : > { %15506 = vmatpush3.bf16.msra.mxu0 %v17265_v4  ;;  %v2836_v4 = vcombine.high %v2814_v62, %v2814_v62 }
  0x4c   : > { %15507 = vmatprep.subr.bf16.mxu0 %v17268_v7  ;;  %15528 = vmatpush3.bf16.msra.mxu1 %v17267_v6  ;;  %v17317_v6 = vld [vmem:[%s18555_s6 + $0x308] sm:$0xff]   ;;  %v2839_v7 = vcombine.high %v2835_v1, %v2835_v1 }
  0x4d   : > { %15529 = vmatprep.subr.bf16.mxu1 %v17270_v9  ;;  %v17319_v9 = vld [vmem:[%s18555_s6 + $0x388] sm:$0xff]  }
  0x4f   : > { %15508 = vmatpush3.bf16.msra.mxu0 %v17269_v8  ;;  %v17318_v8 = vld [vmem:[%s18555_s6 + $0x3c8] sm:$0xff]  }
  0x50   : > { %15509 = vmatprep.subr.bf16.mxu0 %v17272_v11  ;;  %15530 = vmatpush3.bf16.msra.mxu1 %v17271_v10  ;;  %v17320_v10 = vld [vmem:[%s18555_s6 + $0x350] sm:$0xff]  }
  0x51   : > { %15531 = vmatprep.subr.bf16.mxu1 %v17274_v13  ;;  %v17321_v11 = vld [vmem:[%s18555_s6 + $0x310] sm:$0xff]  }
  0x52   : > { %v17323_v13 = vld [vmem:[%s18555_s6 + $0x390] sm:$0xff]  }
  0x53   : > { %15510 = vmatpush3.bf16.msra.mxu0 %v17273_v12  ;;  %v17322_v12 = vld [vmem:[%s18555_s6 + $0x3d0] sm:$0xff]  }
  0x54   : > { %15511 = vmatprep.subr.bf16.mxu0 %v17276_v15  ;;  %15532 = vmatpush3.bf16.msra.mxu1 %v17275_v14  ;;  %v17324_v14 = vld [vmem:[%s18555_s6 + $0x358] sm:$0xff]  }
  0x55   : > { %15533 = vmatprep.subr.bf16.mxu1 %v17278_v17  ;;  %v17325_v15 = vld [vmem:[%s18555_s6 + $0x318] sm:$0xff]  }
  0x56   : > { %v17327_v17 = vld [vmem:[%s18555_s6 + $0x398] sm:$0xff]  }
  0x57   : > { %15512 = vmatpush3.bf16.msra.mxu0 %v17277_v16  ;;  %v17326_v16 = vld [vmem:[%s18555_s6 + $0x3d8] sm:$0xff]  }
  0x58   : > { %15541 = vmatprep.subr.bf16.mxu0 %v17280_v20  ;;  %15534 = vmatpush3.bf16.msra.mxu1 %v17279_v18  ;;  %v17328_v18 = vld [vmem:[%s18555_s6 + $0x360] sm:$0xff]  }
  0x59   : > { %15563 = vmatprep.subr.bf16.mxu1 %v17282_v22  ;;  %v17330_v20 = vld [vmem:[%s18555_s6 + $0x3e0] sm:$0xff]   ;;  %v17332_v22 = vld [vmem:[%s18555_s6 + $0x368] sm:$0xff]  }
  0x5a   : > { %11134 = vmatmul.mubr.bf16.vlgmr.msra.gmra.mrb[4].mxu0 %v2772_v19  ;;  %v17329_v19 = vld [vmem:[%s18555_s6 + $0x320] sm:$0xff]  }
  0x5b   : > { %15542 = vmatpush3.bf16.msra.mxu0 %v17281_v21  ;;  %11174 = vmatmul.mubr.bf16.vlgmr.msra.gmra.mrb[4].mxu1 %v2788_v24  ;;  %v17331_v21 = vld [vmem:[%s18555_s6 + $0x3a0] sm:$0xff]   ;;  %v17334_v24 = vld [vmem:[%s18555_s6 + $0x3e8] sm:$0xff]  }
  0x5c   : > { %15543 = vmatprep.subr.bf16.mxu0 %v17284_v25  ;;  %15564 = vmatpush3.bf16.msra.mxu1 %v17283_v23  ;;  %v17333_v23 = vld [vmem:[%s18555_s6 + $0x328] sm:$0xff]  }
  0x5d   : > { %15565 = vmatprep.subr.bf16.mxu1 %v17286_v27  ;;  %11213 = vmatprep.mubr.bf16.mxu0 %v2828_v56  ;;  %v17335_v25 = vld [vmem:[%s18555_s6 + $0x3a8] sm:$0xff]   ;;  %v17337_v27 = vld [vmem:[%s18555_s6 + $0x330] sm:$0xff]   ;;  %v17364_v56 = vld [vmem:[%s18555_s6 + $0x4a0] sm:$0xff]  }
  0x5e   : > { %11253 = vmatprep.mubr.bf16.mxu1 %v2838_v60  ;;  %v17368_v60 = vld [vmem:[%s18555_s6 + $0x4a8] sm:$0xff]  }
  0x5f   : > { %15544 = vmatpush3.bf16.msra.mxu0 %v17285_v26  ;;  %v17336_v26 = vld [vmem:[%s18555_s6 + $0x370] sm:$0xff]  }
  0x60   : > { %15545 = vmatprep.subr.bf16.mxu0 %v17288_v29  ;;  %15566 = vmatpush3.bf16.msra.mxu1 %v17287_v28  ;;  %v17338_v28 = vld [vmem:[%s18555_s6 + $0x3f0] sm:$0xff]  }
  0x61   : > { %15567 = vmatprep.subr.bf16.mxu1 %v17290_v31  ;;  %v17339_v29 = vld [vmem:[%s18555_s6 + $0x3b0] sm:$0xff]   ;;  %v17341_v31 = vld [vmem:[%s18555_s6 + $0x338] sm:$0xff]  }
  0x63   : > { %15546 = vmatpush3.bf16.msra.mxu0 %v17289_v30  ;;  %v17340_v30 = vld [vmem:[%s18555_s6 + $0x378] sm:$0xff]  }
  0x64   : > { %15547 = vmatprep.subr.bf16.mxu0 %v17292_v33  ;;  %15568 = vmatpush3.bf16.msra.mxu1 %v17291_v32  ;;  %v17342_v32 = vld [vmem:[%s18555_s6 + $0x3f8] sm:$0xff]  }
  0x65   : > { %15569 = vmatprep.subr.bf16.mxu1 %v17294_v35  ;;  %v17344_v33 = vld [vmem:[%s18555_s6 + $0x3b8] sm:$0xff]   ;;  %v17345_v35 = vld [vmem:[%s18555_s6 + $0x440] sm:$0xff]  }
  0x67   : > { %15548 = vmatpush3.bf16.msra.mxu0 %v17293_v34  ;;  %v2821_v34 = vrot.slane %v18666_v53, %v18593_v42  ;;  %v17361_v53 = vld [vmem:[%s18555_s6 + $0x460] sm:$0xff]  }
  0x68   : > { %15549 = vmatprep.subr.bf16.mxu0 %v17296_v37  ;;  %15570 = vmatpush3.bf16.msra.mxu1 %v17295_v36  ;;  %v17346_v36 = vld [vmem:[%s18555_s6 + $0x400] sm:$0xff]  }
  0x69   : > { %15571 = vmatprep.subr.bf16.mxu1 %v17298_v39  ;;  %v17347_v37 = vld [vmem:[%s18555_s6 + $0x4c0] sm:$0xff]   ;;  %v2837_v39 = vcombine.high %v2821_v34, %v2821_v34 }
  0x6b   : > { %15550 = vmatpush3.bf16.msra.mxu0 %v17297_v38  ;;  %v17348_v38 = vld [vmem:[%s18555_s6 + $0x480] sm:$0xff]  }
  0x6c   : > { %15551 = vmatprep.subr.bf16.mxu0 %v17300_v41  ;;  %15572 = vmatpush3.bf16.msra.mxu1 %v17299_v40  ;;  %v17349_v40 = vld [vmem:[%s18555_s6 + $0x448] sm:$0xff]  }
  0x6d   : > { %15573 = vmatprep.subr.bf16.mxu1 %v17302_v44  ;;  %v17350_v41 = vld [vmem:[%s18555_s6 + $0x408] sm:$0xff]  }
  0x6e   : > { %v17352_v44 = vld [vmem:[%s18555_s6 + $0x488] sm:$0xff]  }
  0x6f   : > { %15552 = vmatpush3.bf16.msra.mxu0 %v17301_v43  ;;  %v17351_v43 = vld [vmem:[%s18555_s6 + $0x4c8] sm:$0xff]  }
  0x70   : > { %15553 = vmatprep.subr.bf16.mxu0 %v17304_v47  ;;  %15574 = vmatpush3.bf16.msra.mxu1 %v17303_v45  ;;  %v17353_v45 = vld [vmem:[%s18555_s6 + $0x450] sm:$0xff]  }
  0x71   : > { %15575 = vmatprep.subr.bf16.mxu1 %v17306_v51  ;;  %v17355_v47 = vld [vmem:[%s18555_s6 + $0x4d0] sm:$0xff]   ;;  %v17359_v51 = vld [vmem:[%s18555_s6 + $0x4d8] sm:$0xff]  }
  0x73   : > { %15554 = vmatpush3.bf16.msra.mxu0 %v17305_v50  ;;  %v17358_v50 = vld [vmem:[%s18555_s6 + $0x418] sm:$0xff]  }
  0x74   : > { %15555 = vmatprep.subr.bf16.mxu0 %v17308_v55  ;;  %15576 = vmatpush3.bf16.msra.mxu1 %v17307_v54  ;;  %v17362_v54 = vld [vmem:[%s18555_s6 + $0x420] sm:$0xff]  }
  0x75   : > { %15577 = vmatprep.subr.bf16.mxu1 %v17310_v59  ;;  %v17363_v55 = vld [vmem:[%s18555_s6 + $0x4e0] sm:$0xff]   ;;  %v17367_v59 = vld [vmem:[%s18555_s6 + $0x4e8] sm:$0xff]  }
  0x77   : > { %15556 = vmatpush3.bf16.msra.mxu0 %v17309_v57  ;;  %v17365_v57 = vld [vmem:[%s18555_s6 + $0x468] sm:$0xff]  }
  0x78   : > { %15585 = vmatprep.subr.bf16.mxu0 %v17312_v63  ;;  %15578 = vmatpush3.bf16.msra.mxu1 %v17311_v61  ;;  %v306_v61 = vld [vmem:[%s18550_s27 + $0x10] sm:$0xff] }
  0x79   : > { %15607 = vmatprep.subr.bf16.mxu1 %v17314_v2  ;;  %v2847_v63 = vrot.slane %v306_v61, %v18593_v42  ;;  %v17371_v2 = vld [vmem:[%s18555_s6 + $0x4f0] sm:$0xff]  }
  0x7a   : > { %11214 = vmatmul.mubr.bf16.vlgmr.msra.gmra.mrb[8].mxu0 %v2814_v62  ;;  %v17369_v62 = vld [vmem:[%s18555_s6 + $0x470] sm:$0xff]  }
  0x7b   : > { %15586 = vmatpush3.bf16.msra.mxu0 %v17313_v0  ;;  %11293 = vmatprep.mubr.bf16.mxu0 %v2835_v1  ;;  %v2840_v0 = vcombine.high %v306_v61, %v306_v61  ;;  %v17370_v1 = vld [vmem:[%s18555_s6 + $0x430] sm:$0xff]  }
  0x7c   : > { %11254 = vmatmul.mubr.bf16.vlgmr.msra.gmra.mrb[8].mxu1 %v2836_v4  ;;  %15587 = vmatprep.subr.bf16.mxu0 %v17316_v5  ;;  %v17372_v5 = vld [vmem:[%s18555_s6 + $0x4b0] sm:$0xff]  }
  0x7d   : > { %15608 = vmatpush3.bf16.msra.mxu1 %v17315_v3  ;;  %11333 = vmatprep.mubr.bf16.mxu1 %v2839_v7  ;;  %v2855_v3 = vcombine.high %v2847_v63, %v2847_v63  ;;  %v18742_v4 = vrot.slane %v2840_v0, %v18593_v42  ;;  %v17419_v61 = vld [vmem:[%s18555_s6 + $0x610] sm:$0xff]   ;;  %v17422_v0 = vld [vmem:[%s18555_s6 + $0x658] sm:$0xff]  }
  0x7e   : > { %15609 = vmatprep.subr.bf16.mxu1 %v17318_v8  ;;  %v17374_v8 = vld [vmem:[%s18555_s6 + $0x438] sm:$0xff]  }
  0x7f   : > { %15588 = vmatpush3.bf16.msra.mxu0 %v17317_v6  ;;  %v17373_v6 = vld [vmem:[%s18555_s6 + $0x478] sm:$0xff]   ;;  %v2877_v7 = vrot.slane %v2855_v3, %v18593_v42 }
  0x80   : > { %15589 = vmatprep.subr.bf16.mxu0 %v17320_v10  ;;  %v17375_v10 = vld [vmem:[%s18555_s6 + $0x4f8] sm:$0xff]  }
  0x81   : > { %15610 = vmatpush3.bf16.msra.mxu1 %v17319_v9  ;;  %v2856_v9 = vcombine.high %v18742_v4, %v18742_v4  ;;  %v17425_v3 = vld [vmem:[%s18555_s6 + $0x698] sm:$0xff]  }
  0x82   : > { %15611 = vmatprep.subr.bf16.mxu1 %v17322_v12  ;;  %v17376_v12 = vld [vmem:[%s18555_s6 + $0x4b8] sm:$0xff]  }
  0x83   : > { %15590 = vmatpush3.bf16.msra.mxu0 %v17321_v11  ;;  %v2887_v11 = vcombine.high %v2877_v7, %v2877_v7 }
  0x84   : > { %15591 = vmatprep.subr.bf16.mxu0 %v17324_v14  ;;  %v17377_v14 = vld [vmem:[%s18555_s6 + $0x540] sm:$0xff]  }
  0x85   : > { %15612 = vmatpush3.bf16.msra.mxu1 %v17323_v13  ;;  %v2863_v13 = vrot.slane %v2847_v63, %v18593_v42  ;;  %v17421_v63 = vld [vmem:[%s18555_s6 + $0x690] sm:$0xff]  }
  0x86   : > { %15613 = vmatprep.subr.bf16.mxu1 %v17326_v16  ;;  %v2884_v16 = vrot.slane %v2856_v9, %v18593_v42  ;;  %v17431_v9 = vld [vmem:[%s18555_s6 + $0x628] sm:$0xff]  }
  0x87   : > { %15592 = vmatpush3.bf16.msra.mxu0 %v17325_v15  ;;  %v17378_v15 = vld [vmem:[%s18555_s6 + $0x500] sm:$0xff]  }
  0x88   : > { %15593 = vmatprep.subr.bf16.mxu0 %v17328_v18  ;;  %v17380_v18 = vld [vmem:[%s18555_s6 + $0x580] sm:$0xff]  }
  0x89   : > { %15614 = vmatpush3.bf16.msra.mxu1 %v17327_v17  ;;  %v17379_v17 = vld [vmem:[%s18555_s6 + $0x5c0] sm:$0xff]  }
  0x8a   : > { %15615 = vmatprep.subr.bf16.mxu1 %v17330_v20  ;;  %v17381_v20 = vld [vmem:[%s18555_s6 + $0x548] sm:$0xff]  }
  0x8b   : > { %15594 = vmatpush3.bf16.msra.mxu0 %v17329_v19  ;;  %v2885_v19 = vcombine.high %v2863_v13, %v2863_v13 }
  0x8c   : > { %15595 = vmatprep.subr.bf16.mxu0 %v17332_v22  ;;  %v2888_v22 = vcombine.high %v2884_v16, %v2884_v16 }
  0x8d   : > { %15616 = vmatpush3.bf16.msra.mxu1 %v17331_v21  ;;  %v17382_v21 = vld [vmem:[%s18555_s6 + $0x508] sm:$0xff]  }
  0x8e   : > { %15617 = vmatprep.subr.bf16.mxu1 %v17334_v24  ;;  %v17384_v24 = vld [vmem:[%s18555_s6 + $0x588] sm:$0xff]  }
  0x8f   : > { %15596 = vmatpush3.bf16.msra.mxu0 %v17333_v23  ;;  %v17383_v23 = vld [vmem:[%s18555_s6 + $0x5c8] sm:$0xff]  }
  0x90   : > { %15597 = vmatprep.subr.bf16.mxu0 %v17336_v26  ;;  %v17386_v26 = vld [vmem:[%s18555_s6 + $0x510] sm:$0xff]  }
  0x91   : > { %15618 = vmatpush3.bf16.msra.mxu1 %v17335_v25  ;;  %v17385_v25 = vld [vmem:[%s18555_s6 + $0x550] sm:$0xff]  }
  0x92   : > { %15619 = vmatprep.subr.bf16.mxu1 %v17338_v28  ;;  %v17388_v28 = vld [vmem:[%s18555_s6 + $0x590] sm:$0xff]  }
  0x93   : > { %15598 = vmatpush3.bf16.msra.mxu0 %v17337_v27  ;;  %v17387_v27 = vld [vmem:[%s18555_s6 + $0x5d0] sm:$0xff]  }
  0x94   : > { %15599 = vmatprep.subr.bf16.mxu0 %v17340_v30  ;;  %v17390_v30 = vld [vmem:[%s18555_s6 + $0x518] sm:$0xff]  }
  0x95   : > { %15620 = vmatpush3.bf16.msra.mxu1 %v17339_v29  ;;  %v17389_v29 = vld [vmem:[%s18555_s6 + $0x558] sm:$0xff]  }
  0x96   : > { %15621 = vmatprep.subr.bf16.mxu1 %v17342_v32  ;;  %v17392_v32 = vld [vmem:[%s18555_s6 + $0x598] sm:$0xff]  }
  0x97   : > { %15600 = vmatpush3.bf16.msra.mxu0 %v17341_v31  ;;  %v17391_v31 = vld [vmem:[%s18555_s6 + $0x5d8] sm:$0xff]  }
  0x98   : > { %15629 = vmatprep.subr.bf16.mxu0 %v17345_v35  ;;  %v17395_v35 = vld [vmem:[%s18555_s6 + $0x5e0] sm:$0xff]  }
  0x99   : > { %15622 = vmatpush3.bf16.msra.mxu1 %v17344_v33  ;;  %v17393_v33 = vld [vmem:[%s18555_s6 + $0x560] sm:$0xff]  }
  0x9a   : > { %11294 = vmatmul.mubr.bf16.vlgmr.msra.gmra.mrb[12].mxu0 %v2821_v34  ;;  %15651 = vmatprep.subr.bf16.mxu1 %v17347_v37  ;;  %v17394_v34 = vld [vmem:[%s18555_s6 + $0x520] sm:$0xff]   ;;  %v17397_v37 = vld [vmem:[%s18555_s6 + $0x568] sm:$0xff]  }
  0x9b   : > { %15630 = vmatpush3.bf16.msra.mxu0 %v17346_v36  ;;  %11373 = vmatprep.mubr.bf16.mxu0 %v2877_v7  ;;  %v17396_v36 = vld [vmem:[%s18555_s6 + $0x5a0] sm:$0xff]  }
  0x9c   : > { %11334 = vmatmul.mubr.bf16.vlgmr.msra.gmra.mrb[12].mxu1 %v2837_v39  ;;  %15631 = vmatprep.subr.bf16.mxu0 %v17349_v40  ;;  %v17399_v39 = vld [vmem:[%s18555_s6 + $0x5e8] sm:$0xff]   ;;  %v17429_v7 = vld [vmem:[%s18555_s6 + $0x6a0] sm:$0xff]  }
  0x9d   : > { %15652 = vmatpush3.bf16.msra.mxu1 %v17348_v38  ;;  %11413 = vmatprep.mubr.bf16.mxu1 %v2887_v11  ;;  %v17398_v38 = vld [vmem:[%s18555_s6 + $0x528] sm:$0xff]  }
  0x9e   : > { %15653 = vmatprep.subr.bf16.mxu1 %v17351_v43  ;;  %v17400_v40 = vld [vmem:[%s18555_s6 + $0x5a8] sm:$0xff]   ;;  %v17402_v43 = vld [vmem:[%s18555_s6 + $0x530] sm:$0xff]  }
  0x9f   : > { %15632 = vmatpush3.bf16.msra.mxu0 %v17350_v41  ;;  %v17401_v41 = vld [vmem:[%s18555_s6 + $0x570] sm:$0xff]   ;;  %v17433_v11 = vld [vmem:[%s18555_s6 + $0x6a8] sm:$0xff]  }
  0xa0   : > { %15633 = vmatprep.subr.bf16.mxu0 %v17353_v45  ;;  %v17404_v45 = vld [vmem:[%s18555_s6 + $0x5b0] sm:$0xff]  }
  0xa1   : > { %15654 = vmatpush3.bf16.msra.mxu1 %v17352_v44  ;;  %v17403_v44 = vld [vmem:[%s18555_s6 + $0x5f0] sm:$0xff]  }
  0xa2   : > { %15655 = vmatprep.subr.bf16.mxu1 %v17355_v47  ;;  %v17406_v47 = vld [vmem:[%s18555_s6 + $0x538] sm:$0xff]  }
  0xa3   : > { %15634 = vmatpush3.bf16.msra.mxu0 %v17354_v46  ;;  %v17405_v46 = vld [vmem:[%s18555_s6 + $0x578] sm:$0xff]  }
  0xa4   : > { %15635 = vmatprep.subr.bf16.mxu0 %v17357_v49  ;;  %v17409_v49 = vld [vmem:[%s18555_s6 + $0x5b8] sm:$0xff]  }
  0xa5   : > { %15656 = vmatpush3.bf16.msra.mxu1 %v17356_v48  ;;  %v17407_v48 = vld [vmem:[%s18555_s6 + $0x5f8] sm:$0xff]  }
  0xa6   : > { %15657 = vmatprep.subr.bf16.mxu1 %v17359_v51  ;;  %v17410_v51 = vld [vmem:[%s18555_s6 + $0x640] sm:$0xff]  }
  0xa7   : > { %15636 = vmatpush3.bf16.msra.mxu0 %v17358_v50  ;;  %v2870_v50 = vrot.slane %v18742_v4, %v18593_v42  ;;  %v17426_v4 = vld [vmem:[%s18555_s6 + $0x660] sm:$0xff]  }
  0xa8   : > { %15637 = vmatprep.subr.bf16.mxu0 %v17361_v53  ;;  %v17412_v53 = vld [vmem:[%s18555_s6 + $0x6c0] sm:$0xff]  }
  0xa9   : > { %15658 = vmatpush3.bf16.msra.mxu1 %v17360_v52  ;;  %v17411_v52 = vld [vmem:[%s18555_s6 + $0x600] sm:$0xff]  }
  0xaa   : > { %15659 = vmatprep.subr.bf16.mxu1 %v17363_v55  ;;  %v2886_v55 = vcombine.high %v2870_v50, %v2870_v50 }
  0xab   : > { %15638 = vmatpush3.bf16.msra.mxu0 %v17362_v54  ;;  %v17413_v54 = vld [vmem:[%s18555_s6 + $0x680] sm:$0xff]  }
  0xac   : > { %15639 = vmatprep.subr.bf16.mxu0 %v17365_v57  ;;  %v17415_v57 = vld [vmem:[%s18555_s6 + $0x608] sm:$0xff]  }
  0xad   : > { %15660 = vmatpush3.bf16.msra.mxu1 %v17364_v56  ;;  %v17414_v56 = vld [vmem:[%s18555_s6 + $0x648] sm:$0xff]  }
  0xae   : > { %15661 = vmatprep.subr.bf16.mxu1 %v17367_v59  ;;  %v17417_v59 = vld [vmem:[%s18555_s6 + $0x688] sm:$0xff]  }
  0xaf   : > { %15640 = vmatpush3.bf16.msra.mxu0 %v17366_v58  ;;  %v17416_v58 = vld [vmem:[%s18555_s6 + $0x6c8] sm:$0xff]  }
  0xb0   : > { %15641 = vmatprep.subr.bf16.mxu0 %v17369_v62  ;;  %v17420_v62 = vld [vmem:[%s18555_s6 + $0x6d0] sm:$0xff]  }
  0xb1   : > { %15662 = vmatpush3.bf16.msra.mxu1 %v17368_v60  ;;  %v17418_v60 = vld [vmem:[%s18555_s6 + $0x650] sm:$0xff]  }
  0xb2   : > { %15663 = vmatprep.subr.bf16.mxu1 %v17371_v2  ;;  %v17424_v2 = vld [vmem:[%s18555_s6 + $0x6d8] sm:$0xff]  }
  0xb3   : > { %15642 = vmatpush3.bf16.msra.mxu0 %v17370_v1  ;;  %v17423_v1 = vld [vmem:[%s18555_s6 + $0x618] sm:$0xff]  }
  0xb4   : > { %15643 = vmatprep.subr.bf16.mxu0 %v17373_v6  ;;  %v17428_v6 = vld [vmem:[%s18555_s6 + $0x6e0] sm:$0xff]  }
  0xb5   : > { %15664 = vmatpush3.bf16.msra.mxu1 %v17372_v5  ;;  %v17427_v5 = vld [vmem:[%s18555_s6 + $0x620] sm:$0xff]  }
  0xb6   : > { %15665 = vmatprep.subr.bf16.mxu1 %v17375_v10  ;;  %v17432_v10 = vld [vmem:[%s18555_s6 + $0x6e8] sm:$0xff]  }
  0xb7   : > { %15644 = vmatpush3.bf16.msra.mxu0 %v17374_v8  ;;  %v17430_v8 = vld [vmem:[%s18555_s6 + $0x668] sm:$0xff]  }
  0xb8   : > { %15673 = vmatprep.subr.bf16.mxu0 %v17377_v14  ;;  %v17435_v14 = vld [vmem:[%s18555_s6 + $0x630] sm:$0xff]  }
  0xb9   : > { %15666 = vmatpush3.bf16.msra.mxu1 %v17376_v12  ;;  %v17434_v12 = vld [vmem:[%s18555_s6 + $0x670] sm:$0xff]  }
  0xba   : > { %11374 = vmatmul.mubr.bf16.vlgmr.msra.gmra.mrb[16].mxu0 %v2863_v13  ;;  %15695 = vmatprep.subr.bf16.mxu1 %v17379_v17  ;;  %v307_v13 = vld [vmem:[%s18550_s27 + $0x18] sm:$0xff]  ;;  %v17436_v17 = vld [vmem:[%s18555_s6 + $0x6f0] sm:$0xff]  }
  0xbb   : > { %15674 = vmatpush3.bf16.msra.mxu0 %v17378_v15  ;;  %11453 = vmatprep.mubr.bf16.mxu0 %v2884_v16  ;;  %v2896_v15 = vrot.slane %v307_v13, %v18593_v42  ;;  %v2889_v16 = vcombine.high %v307_v13, %v307_v13  ;;  %v17475_v13 = vld [vmem:[%s18555_s6 + $0x840] sm:$0xff]  }
  0xbc   : > { %11414 = vmatmul.mubr.bf16.vlgmr.msra.gmra.mrb[16].mxu1 %v2885_v19  ;;  %15675 = vmatprep.subr.bf16.mxu0 %v17381_v20 }
  0xbd   : > { %15696 = vmatpush3.bf16.msra.mxu1 %v17380_v18  ;;  %11493 = vmatprep.mubr.bf16.mxu1 %v2888_v22  ;;  %v17437_v18 = vld [vmem:[%s18555_s6 + $0x6b0] sm:$0xff]   ;;  %v2904_v19 = vcombine.high %v2896_v15, %v2896_v15  ;;  %v18819_v20 = vrot.slane %v2889_v16, %v18593_v42  ;;  %v17439_v22 = vld [vmem:[%s18555_s6 + $0x638] sm:$0xff]   ;;  %v17478_v16 = vld [vmem:[%s18555_s6 + $0x880] sm:$0xff]  }
  0xbe   : > { %15697 = vmatprep.subr.bf16.mxu1 %v17383_v23 }
  0xbf   : > { %15676 = vmatpush3.bf16.msra.mxu0 %v17382_v21  ;;  %v17438_v21 = vld [vmem:[%s18555_s6 + $0x678] sm:$0xff]   ;;  %v2926_v23 = vrot.slane %v2904_v19, %v18593_v42  ;;  %v17480_v19 = vld [vmem:[%s18555_s6 + $0x808] sm:$0xff]  }
  0xc0   : > { %15677 = vmatprep.subr.bf16.mxu0 %v17385_v25  ;;  %v17440_v25 = vld [vmem:[%s18555_s6 + $0x6f8] sm:$0xff]  }
  0xc1   : > { %15698 = vmatpush3.bf16.msra.mxu1 %v17384_v24  ;;  %v2905_v24 = vcombine.high %v18819_v20, %v18819_v20 }
  0xc2   : > { %15699 = vmatprep.subr.bf16.mxu1 %v17387_v27  ;;  %v2936_v27 = vcombine.high %v2926_v23, %v2926_v23 }
  0xc3   : > { %15678 = vmatpush3.bf16.msra.mxu0 %v17386_v26  ;;  %v17441_v26 = vld [vmem:[%s18555_s6 + $0x6b8] sm:$0xff]  }
  0xc4   : > { %15679 = vmatprep.subr.bf16.mxu0 %v17389_v29  ;;  %v17442_v29 = vld [vmem:[%s18555_s6 + $0x740] sm:$0xff]  }
  0xc5   : > { %15700 = vmatpush3.bf16.msra.mxu1 %v17388_v28  ;;  %v2912_v28 = vrot.slane %v2896_v15, %v18593_v42  ;;  %v17477_v15 = vld [vmem:[%s18555_s6 + $0x8c0] sm:$0xff]  }
  0xc6   : > { %15701 = vmatprep.subr.bf16.mxu1 %v17391_v31  ;;  %v2933_v31 = vrot.slane %v2905_v24, %v18593_v42  ;;  %v17485_v24 = vld [vmem:[%s18555_s6 + $0x8d0] sm:$0xff]  }
  0xc7   : > { %15680 = vmatpush3.bf16.msra.mxu0 %v17390_v30  ;;  %v17443_v30 = vld [vmem:[%s18555_s6 + $0x700] sm:$0xff]  }
  0xc8   : > { %15681 = vmatprep.subr.bf16.mxu0 %v17393_v33  ;;  %v17445_v33 = vld [vmem:[%s18555_s6 + $0x780] sm:$0xff]  }
  0xc9   : > { %15702 = vmatpush3.bf16.msra.mxu1 %v17392_v32  ;;  %v17444_v32 = vld [vmem:[%s18555_s6 + $0x7c0] sm:$0xff]  }
  0xca   : > { %15703 = vmatprep.subr.bf16.mxu1 %v17395_v35  ;;  %v17446_v35 = vld [vmem:[%s18555_s6 + $0x748] sm:$0xff]  }
  0xcb   : > { %15682 = vmatpush3.bf16.msra.mxu0 %v17394_v34  ;;  %v2934_v34 = vcombine.high %v2912_v28, %v2912_v28 }
  0xcc   : > { %15683 = vmatprep.subr.bf16.mxu0 %v17397_v37  ;;  %v2937_v37 = vcombine.high %v2933_v31, %v2933_v31 }
  0xcd   : > { %15704 = vmatpush3.bf16.msra.mxu1 %v17396_v36  ;;  %v17447_v36 = vld [vmem:[%s18555_s6 + $0x708] sm:$0xff]  }
  0xce   : > { %15705 = vmatprep.subr.bf16.mxu1 %v17399_v39  ;;  %v17449_v39 = vld [vmem:[%s18555_s6 + $0x788] sm:$0xff]  }
  0xcf   : > { %15684 = vmatpush3.bf16.msra.mxu0 %v17398_v38  ;;  %v17448_v38 = vld [vmem:[%s18555_s6 + $0x7c8] sm:$0xff]  }
  0xd0   : > { %15685 = vmatprep.subr.bf16.mxu0 %v17401_v41  ;;  %v17451_v41 = vld [vmem:[%s18555_s6 + $0x710] sm:$0xff]  }
  0xd1   : > { %15706 = vmatpush3.bf16.msra.mxu1 %v17400_v40  ;;  %v17450_v40 = vld [vmem:[%s18555_s6 + $0x750] sm:$0xff]  }
  0xd2   : > { %15707 = vmatprep.subr.bf16.mxu1 %v17403_v44  ;;  %v17453_v44 = vld [vmem:[%s18555_s6 + $0x790] sm:$0xff]  }
  0xd3   : > { %15686 = vmatpush3.bf16.msra.mxu0 %v17402_v43  ;;  %v17452_v43 = vld [vmem:[%s18555_s6 + $0x7d0] sm:$0xff]  }
  0xd4   : > { %15687 = vmatprep.subr.bf16.mxu0 %v17405_v46  ;;  %v17455_v46 = vld [vmem:[%s18555_s6 + $0x718] sm:$0xff]  }
  0xd5   : > { %15708 = vmatpush3.bf16.msra.mxu1 %v17404_v45  ;;  %v17454_v45 = vld [vmem:[%s18555_s6 + $0x758] sm:$0xff]  }
  0xd6   : > { %15709 = vmatprep.subr.bf16.mxu1 %v17407_v48  ;;  %v17457_v48 = vld [vmem:[%s18555_s6 + $0x798] sm:$0xff]  }
  0xd7   : > { %15688 = vmatpush3.bf16.msra.mxu0 %v17406_v47  ;;  %v17456_v47 = vld [vmem:[%s18555_s6 + $0x7d8] sm:$0xff]  }
  0xd8   : > { %15717 = vmatprep.subr.bf16.mxu0 %v17410_v51  ;;  %v17460_v51 = vld [vmem:[%s18555_s6 + $0x7e0] sm:$0xff]  }
  0xd9   : > { %15710 = vmatpush3.bf16.msra.mxu1 %v17409_v49  ;;  %v17458_v49 = vld [vmem:[%s18555_s6 + $0x760] sm:$0xff]  }
  0xda   : > { %11454 = vmatmul.mubr.bf16.vlgmr.msra.gmra.mrb[20].mxu0 %v2870_v50  ;;  %15739 = vmatprep.subr.bf16.mxu1 %v17412_v53  ;;  %v17459_v50 = vld [vmem:[%s18555_s6 + $0x720] sm:$0xff]   ;;  %v17462_v53 = vld [vmem:[%s18555_s6 + $0x768] sm:$0xff]  }
  0xdb   : > { %15718 = vmatpush3.bf16.msra.mxu0 %v17411_v52  ;;  %11533 = vmatprep.mubr.bf16.mxu0 %v2926_v23  ;;  %v17461_v52 = vld [vmem:[%s18555_s6 + $0x7a0] sm:$0xff]   ;;  %v17484_v23 = vld [vmem:[%s18555_s6 + $0x810] sm:$0xff]  }
  0xdc   : > { %11494 = vmatmul.mubr.bf16.vlgmr.msra.gmra.mrb[20].mxu1 %v2886_v55  ;;  %15719 = vmatprep.subr.bf16.mxu0 %v17414_v56  ;;  %v17464_v55 = vld [vmem:[%s18555_s6 + $0x7e8] sm:$0xff]  }
  0xdd   : > { %15740 = vmatpush3.bf16.msra.mxu1 %v17413_v54  ;;  %11573 = vmatprep.mubr.bf16.mxu1 %v2936_v27  ;;  %v17463_v54 = vld [vmem:[%s18555_s6 + $0x728] sm:$0xff]   ;;  %v17488_v27 = vld [vmem:[%s18555_s6 + $0x818] sm:$0xff]  }
  0xde   : > { %15741 = vmatprep.subr.bf16.mxu1 %v17416_v58  ;;  %v17465_v56 = vld [vmem:[%s18555_s6 + $0x7a8] sm:$0xff]  }
  0xdf   : > { %15720 = vmatpush3.bf16.msra.mxu0 %v17415_v57  ;;  %v17466_v57 = vld [vmem:[%s18555_s6 + $0x770] sm:$0xff]  }
  0xe0   : > { %15721 = vmatprep.subr.bf16.mxu0 %v17418_v60 }
  0xe1   : > { %15742 = vmatpush3.bf16.msra.mxu1 %v17417_v59  ;;  %v17467_v59 = vld [vmem:[%s18555_s6 + $0x730] sm:$0xff]  }
  0xe2   : > { %15743 = vmatprep.subr.bf16.mxu1 %v17420_v62 }
  0xe3   : > { %15722 = vmatpush3.bf16.msra.mxu0 %v17419_v61  ;;  %v17468_v61 = vld [vmem:[%s18555_s6 + $0x7f0] sm:$0xff]  }
  0xe4   : > { %15723 = vmatprep.subr.bf16.mxu0 %v17422_v0 }
  0xe5   : > { %15744 = vmatpush3.bf16.msra.mxu1 %v17421_v63 }
  0xe6   : > { %15745 = vmatprep.subr.bf16.mxu1 %v17424_v2  ;;  %v17470_v2 = vld [vmem:[%s18555_s6 + $0x778] sm:$0xff]  }
  0xe7   : > { %15724 = vmatpush3.bf16.msra.mxu0 %v17423_v1  ;;  %v17469_v1 = vld [vmem:[%s18555_s6 + $0x7b0] sm:$0xff]  }
  0xe8   : > { %15725 = vmatprep.subr.bf16.mxu0 %v17426_v4 }
  0xe9   : > { %15746 = vmatpush3.bf16.msra.mxu1 %v17425_v3 }
  0xea   : > { %15747 = vmatprep.subr.bf16.mxu1 %v17428_v6  ;;  %v17471_v6 = vld [vmem:[%s18555_s6 + $0x738] sm:$0xff]  }
  0xeb   : > { %15726 = vmatpush3.bf16.msra.mxu0 %v17427_v5 }
  0xec   : > { %15727 = vmatprep.subr.bf16.mxu0 %v17430_v8  ;;  %v17472_v8 = vld [vmem:[%s18555_s6 + $0x7f8] sm:$0xff]  }
  0xed   : > { %15748 = vmatpush3.bf16.msra.mxu1 %v17429_v7 }
  0xee   : > { %15749 = vmatprep.subr.bf16.mxu1 %v17432_v10 }
  0xef   : > { %15728 = vmatpush3.bf16.msra.mxu0 %v17431_v9 }
  0xf0   : > { %15729 = vmatprep.subr.bf16.mxu0 %v17434_v12  ;;  %v2919_v12 = vrot.slane %v18819_v20, %v18593_v42  ;;  %v17481_v20 = vld [vmem:[%s18555_s6 + $0x8c8] sm:$0xff]  }
  0xf1   : > { %15750 = vmatpush3.bf16.msra.mxu1 %v17433_v11  ;;  %v17474_v11 = vld [vmem:[%s18555_s6 + $0x7b8] sm:$0xff]  }
  0xf2   : > { %15751 = vmatprep.subr.bf16.mxu1 %v17436_v17  ;;  %v2935_v17 = vcombine.high %v2919_v12, %v2919_v12 }
  0xf3   : > { %15730 = vmatpush3.bf16.msra.mxu0 %v17435_v14  ;;  %v17476_v14 = vld [vmem:[%s18555_s6 + $0x800] sm:$0xff]  }
  0xf4   : > { %15731 = vmatprep.subr.bf16.mxu0 %v17438_v21  ;;  %v17482_v21 = vld [vmem:[%s18555_s6 + $0x888] sm:$0xff]  }
  0xf5   : > { %15752 = vmatpush3.bf16.msra.mxu1 %v17437_v18  ;;  %v17479_v18 = vld [vmem:[%s18555_s6 + $0x848] sm:$0xff]  }
  0xf6   : > { %15753 = vmatprep.subr.bf16.mxu1 %v17440_v25  ;;  %v17486_v25 = vld [vmem:[%s18555_s6 + $0x890] sm:$0xff]  }
  0xf7   : > { %15732 = vmatpush3.bf16.msra.mxu0 %v17439_v22  ;;  %v17483_v22 = vld [vmem:[%s18555_s6 + $0x850] sm:$0xff]  }
  0xf8   : > { %15761 = vmatprep.subr.bf16.mxu0 %v17442_v29  ;;  %v17490_v29 = vld [vmem:[%s18555_s6 + $0x898] sm:$0xff]  }
  0xf9   : > { %15754 = vmatpush3.bf16.msra.mxu1 %v17441_v26  ;;  %v17487_v26 = vld [vmem:[%s18555_s6 + $0x858] sm:$0xff]  }
  0xfa   : > { %11534 = vmatmul.mubr.bf16.vlgmr.msra.gmra.mrb[24].mxu0 %v2912_v28  ;;  %15783 = vmatprep.subr.bf16.mxu1 %v17444_v32  ;;  %v17489_v28 = vld [vmem:[%s18555_s6 + $0x8d8] sm:$0xff]   ;;  %v17493_v32 = vld [vmem:[%s18555_s6 + $0x8e0] sm:$0xff]  }
  0xfb   : > { %15762 = vmatpush3.bf16.msra.mxu0 %v17443_v30  ;;  %11613 = vmatprep.mubr.bf16.mxu0 %v2933_v31  ;;  %v17491_v30 = vld [vmem:[%s18555_s6 + $0x860] sm:$0xff]  }
  0xfc   : > { %11574 = vmatmul.mubr.bf16.vlgmr.msra.gmra.mrb[24].mxu1 %v2934_v34  ;;  %15763 = vmatprep.subr.bf16.mxu0 %v17446_v35  ;;  %v17492_v31 = vld [vmem:[%s18555_s6 + $0x820] sm:$0xff]   ;;  %v17495_v34 = vld [vmem:[%s18555_s6 + $0x868] sm:$0xff]  }
  0xfd   : > { %15784 = vmatpush3.bf16.msra.mxu1 %v17445_v33  ;;  %11653 = vmatprep.mubr.bf16.mxu1 %v2937_v37  ;;  %v17494_v33 = vld [vmem:[%s18555_s6 + $0x8a0] sm:$0xff]   ;;  %v17496_v35 = vld [vmem:[%s18555_s6 + $0x828] sm:$0xff]  }
  0xfe   : > { %15785 = vmatprep.subr.bf16.mxu1 %v17448_v38  ;;  %v17498_v37 = vld [vmem:[%s18555_s6 + $0x8a8] sm:$0xff]   ;;  %v17499_v38 = vld [vmem:[%s18555_s6 + $0x870] sm:$0xff]  }
  0xff   : > { %15764 = vmatpush3.bf16.msra.mxu0 %v17447_v36  ;;  %v17497_v36 = vld [vmem:[%s18555_s6 + $0x8e8] sm:$0xff]  }
 0x100   : > { %15765 = vmatprep.subr.bf16.mxu0 %v17450_v40 }
 0x101   : > { %15786 = vmatpush3.bf16.msra.mxu1 %v17449_v39  ;;  %v308_v39 = vld [vmem:[%s18550_s27 + $0x20] sm:$0xff] }
 0x102   : > { %15787 = vmatprep.subr.bf16.mxu1 %v17452_v43  ;;  %v2945_v43 = vrot.slane %v308_v39, %v18593_v42 }
 0x103   : > { %15766 = vmatpush3.bf16.msra.mxu0 %v17451_v41  ;;  %v17500_v41 = vld [vmem:[%s18555_s6 + $0x830] sm:$0xff]  }
 0x104   : > { %15767 = vmatprep.subr.bf16.mxu0 %v17454_v45 }
 0x105   : > { %15788 = vmatpush3.bf16.msra.mxu1 %v17453_v44  ;;  %v2938_v44 = vcombine.high %v308_v39, %v308_v39  ;;  %v17534_v39 = vld [vmem:[%s18555_s6 + $0x9b0] sm:$0xff]  }
 0x106   : > { %15789 = vmatprep.subr.bf16.mxu1 %v17456_v47 }
 0x107   : > { %15768 = vmatpush3.bf16.msra.mxu0 %v17455_v46  ;;  %v17501_v46 = vld [vmem:[%s18555_s6 + $0x8f0] sm:$0xff]  }
 0x108   : > { %15769 = vmatprep.subr.bf16.mxu0 %v17458_v49 }
 0x109   : > { %15790 = vmatpush3.bf16.msra.mxu1 %v17457_v48 }
 0x10a   : > { %15791 = vmatprep.subr.bf16.mxu1 %v17460_v51  ;;  %v18896_v51 = vrot.slane %v2938_v44, %v18593_v42 }
 0x10b   : > { %15770 = vmatpush3.bf16.msra.mxu0 %v17459_v50  ;;  %v2953_v50 = vcombine.high %v2945_v43, %v2945_v43 }
 0x10c   : > { %15771 = vmatprep.subr.bf16.mxu0 %v17462_v53 }
 0x10d   : > { %v15469_v58 = vpop.f32.mrb[0].mxu0  ;;  %15792 = vmatpush3.bf16.msra.mxu1 %v17461_v52 }
 0x10e   : > { %v15470_v60 = vpop.f32.mrb[1].mxu0  ;;  %15793 = vmatprep.subr.bf16.mxu1 %v17464_v55  ;;  %v15491_v62 = vpop.f32.mrb[0].mxu1  ;;  %v17503_v55 = vld [vmem:[%s18555_s6 + $0x878] sm:$0xff]  }
 0x10f   : > { %v15471_v63 = vadd.f32 %v15470_v60, %v15469_v58  ;;  %v15472_v0 = vpop.f32.mrb[2].mxu0  ;;  %15772 = vmatpush3.bf16.msra.mxu0 %v17463_v54  ;;  %v15492_v3 = vpop.f32.mrb[1].mxu1  ;;  %v17502_v54 = vld [vmem:[%s18555_s6 + $0x8b0] sm:$0xff]   ;;  %v17504_v58 = vld [vmem:[%s18555_s6 + $0x838] sm:$0xff]  }
 0x110   : > { %v15473_v4 = vpop.f32.mrb[3].mxu0  ;;  %15773 = vmatprep.subr.bf16.mxu0 %v17466_v57  ;;  %v15493_v5 = vadd.f32 %v15492_v3, %v15491_v62  ;;  %v15494_v7 = vpop.f32.mrb[2].mxu1  ;;  %v17505_v60 = vld [vmem:[%s18555_s6 + $0x8f8] sm:$0xff]   ;;  %v2954_v62 = vcombine.high %v18896_v51, %v18896_v51  ;;  %v2961_v3 = vrot.slane %v2945_v43, %v18593_v42 }
 0x111   : > { %15794 = vmatpush3.bf16.msra.mxu1 %v17465_v56  ;;  %v15495_v9 = vpop.f32.mrb[3].mxu1  ;;  %v17506_v0 = vld [vmem:[%s18555_s6 + $0x8b8] sm:$0xff]   ;;  %v17507_v4 = vld [vmem:[%s18555_s6 + $0x940] sm:$0xff]  }
 0x112   : > { %15795 = vmatprep.subr.bf16.mxu1 %v17468_v61  ;;  %v18861_v10 = vadd.f32 %v15493_v5, %v15471_v63  ;;  %v17508_v5 = vld [vmem:[%s18555_s6 + $0x900] sm:$0xff]   ;;  %v2983_v9 = vcombine.high %v2961_v3, %v2961_v3 }
 0x113   : > { %15774 = vmatpush3.bf16.msra.mxu0 %v17467_v59  ;;  %v2975_v59 = vrot.slane %v2953_v50, %v18593_v42  ;;  %v17509_v7 = vld [vmem:[%s18555_s6 + $0x9c0] sm:$0xff]  }
 0x114   : > { %15775 = vmatprep.subr.bf16.mxu0 %v17470_v2 }
 0x115   : > { %15796 = vmatpush3.bf16.msra.mxu1 %v17469_v1  ;;  %v2985_v1 = vcombine.high %v2975_v59, %v2975_v59 }
 0x116   : > { %15797 = vmatprep.subr.bf16.mxu1 %v17472_v8  ;;  %v17510_v8 = vld [vmem:[%s18555_s6 + $0x980] sm:$0xff]  }
 0x117   : > { %15776 = vmatpush3.bf16.msra.mxu0 %v17471_v6  ;;  %v2982_v6 = vrot.slane %v2954_v62, %v18593_v42  ;;  %v17548_v62 = vld [vmem:[%s18555_s6 + $0xa50] sm:$0xff]  }
 0x118   : > { %15805 = vmatprep.subr.bf16.mxu0 %v17475_v13  ;;  %v17513_v13 = vld [vmem:[%s18555_s6 + $0x9c8] sm:$0xff]  }
 0x119   : > { %15798 = vmatpush3.bf16.msra.mxu1 %v17474_v11  ;;  %v17512_v11 = vld [vmem:[%s18555_s6 + $0x908] sm:$0xff]  }
 0x11a   : > { %11614 = vmatmul.mubr.bf16.vlgmr.msra.gmra.mrb[28].mxu0 %v2919_v12  ;;  %15827 = vmatprep.subr.bf16.mxu1 %v17477_v15  ;;  %v2986_v12 = vcombine.high %v2982_v6, %v2982_v6  ;;  %v17515_v15 = vld [vmem:[%s18555_s6 + $0x950] sm:$0xff]  }
 0x11b   : > { %15806 = vmatpush3.bf16.msra.mxu0 %v17476_v14  ;;  %11693 = vmatprep.mubr.bf16.mxu0 %v2975_v59  ;;  %v17514_v14 = vld [vmem:[%s18555_s6 + $0x988] sm:$0xff]  }
 0x11c   : > { %11654 = vmatmul.mubr.bf16.vlgmr.msra.gmra.mrb[28].mxu1 %v2935_v17  ;;  %15807 = vmatprep.subr.bf16.mxu0 %v17479_v18  ;;  %v17517_v17 = vld [vmem:[%s18555_s6 + $0x9d0] sm:$0xff]   ;;  %v17544_v59 = vld [vmem:[%s18555_s6 + $0xa48] sm:$0xff]  }
 0x11d   : > { %15828 = vmatpush3.bf16.msra.mxu1 %v17478_v16  ;;  %11733 = vmatprep.mubr.bf16.mxu1 %v2985_v1  ;;  %v17516_v16 = vld [vmem:[%s18555_s6 + $0x910] sm:$0xff]  }
 0x11e   : > { %15829 = vmatprep.subr.bf16.mxu1 %v17481_v20  ;;  %v17518_v18 = vld [vmem:[%s18555_s6 + $0x990] sm:$0xff]   ;;  %v17520_v20 = vld [vmem:[%s18555_s6 + $0x918] sm:$0xff]  }
 0x11f   : > { %15808 = vmatpush3.bf16.msra.mxu0 %v17480_v19  ;;  %v17519_v19 = vld [vmem:[%s18555_s6 + $0x958] sm:$0xff]   ;;  %v17551_v1 = vld [vmem:[%s18555_s6 + $0xa90] sm:$0xff]  }
 0x120   : > { %15809 = vmatprep.subr.bf16.mxu0 %v17483_v22  ;;  %v17522_v22 = vld [vmem:[%s18555_s6 + $0x998] sm:$0xff]  }
 0x121   : > { %15830 = vmatpush3.bf16.msra.mxu1 %v17482_v21  ;;  %v17521_v21 = vld [vmem:[%s18555_s6 + $0x9d8] sm:$0xff]  }
 0x122   : > { %15831 = vmatprep.subr.bf16.mxu1 %v17485_v24  ;;  %v17524_v24 = vld [vmem:[%s18555_s6 + $0x920] sm:$0xff]  }
 0x123   : > { %15810 = vmatpush3.bf16.msra.mxu0 %v17484_v23  ;;  %v17523_v23 = vld [vmem:[%s18555_s6 + $0x960] sm:$0xff]  }
 0x124   : > { %15811 = vmatprep.subr.bf16.mxu0 %v17487_v26  ;;  %v17526_v26 = vld [vmem:[%s18555_s6 + $0x9a0] sm:$0xff]  }
 0x125   : > { %15832 = vmatpush3.bf16.msra.mxu1 %v17486_v25  ;;  %v17525_v25 = vld [vmem:[%s18555_s6 + $0x9e0] sm:$0xff]  }
 0x126   : > { %15833 = vmatprep.subr.bf16.mxu1 %v17489_v28  ;;  %v17528_v28 = vld [vmem:[%s18555_s6 + $0x928] sm:$0xff]  }
 0x127   : > { %15812 = vmatpush3.bf16.msra.mxu0 %v17488_v27  ;;  %v17527_v27 = vld [vmem:[%s18555_s6 + $0x968] sm:$0xff]  }
 0x128   : > { %15813 = vmatprep.subr.bf16.mxu0 %v17491_v30  ;;  %v17530_v30 = vld [vmem:[%s18555_s6 + $0x9a8] sm:$0xff]  }
 0x129   : > { %15834 = vmatpush3.bf16.msra.mxu1 %v17490_v29  ;;  %v17529_v29 = vld [vmem:[%s18555_s6 + $0x9e8] sm:$0xff]  }
 0x12a   : > { %15835 = vmatprep.subr.bf16.mxu1 %v17493_v32 }
 0x12b   : > { %15814 = vmatpush3.bf16.msra.mxu0 %v17492_v31  ;;  %v17531_v31 = vld [vmem:[%s18555_s6 + $0x970] sm:$0xff]  }
 0x12c   : > { %15815 = vmatprep.subr.bf16.mxu0 %v17495_v34 }
 0x12d   : > { %v15513_v40 = vpop.f32.mrb[4].mxu0  ;;  %15836 = vmatpush3.bf16.msra.mxu1 %v17494_v33  ;;  %v17532_v33 = vld [vmem:[%s18555_s6 + $0x930] sm:$0xff]  }
 0x12e   : > { %v15514_v45 = vpop.f32.mrb[5].mxu0  ;;  %15837 = vmatprep.subr.bf16.mxu1 %v17497_v36  ;;  %v15535_v49 = vpop.f32.mrb[4].mxu1 }
 0x12f   : > { %v15515_v47 = vadd.f32 %v15514_v45, %v15513_v40  ;;  %v15516_v48 = vpop.f32.mrb[6].mxu0  ;;  %15816 = vmatpush3.bf16.msra.mxu0 %v17496_v35  ;;  %v15536_v53 = vpop.f32.mrb[5].mxu1  ;;  %v17533_v35 = vld [vmem:[%s18555_s6 + $0x9f0] sm:$0xff]   ;;  %v17535_v40 = vld [vmem:[%s18555_s6 + $0x978] sm:$0xff]  }
 0x130   : > { %v15517_v52 = vpop.f32.mrb[7].mxu0  ;;  %15817 = vmatprep.subr.bf16.mxu0 %v17499_v38  ;;  %v15537_v57 = vadd.f32 %v15536_v53, %v15535_v49  ;;  %v15538_v61 = vpop.f32.mrb[6].mxu1  ;;  %v17537_v48 = vld [vmem:[%s18555_s6 + $0x9f8] sm:$0xff]   ;;  %v2968_v53 = vrot.slane %v18896_v51, %v18593_v42  ;;  %v17546_v51 = vld [vmem:[%s18555_s6 + $0xac8] sm:$0xff]  }
 0x131   : > { %v11136_v56 = vadd.f32 %v15515_v47, %v18861_v10  ;;  %15838 = vmatpush3.bf16.msra.mxu1 %v17498_v37  ;;  %v15539_v2 = vpop.f32.mrb[7].mxu1  ;;  %v17511_v10 = vld [vmem:[%s18555_s6 + $0x948] sm:$0xff]   ;;  %v17539_v52 = vld [vmem:[%s18555_s6 + $0x9b8] sm:$0xff]  }
 0x132   : > { %15839 = vmatprep.subr.bf16.mxu1 %v17501_v46  ;;  %v17536_v46 = vld [vmem:[%s18555_s6 + $0x938] sm:$0xff]   ;;  %v17547_v61 = vld [vmem:[%s18555_s6 + $0xa88] sm:$0xff]  }
 0x133   : > { %v18906_v63 = vadd.f32 %v15537_v57, %v11136_v56  ;;  %15818 = vmatpush3.bf16.msra.mxu0 %v17500_v41  ;;  %v17542_v56 = vld [vmem:[%s18555_s6 + $0xac0] sm:$0xff]   ;;  %v17552_v2 = vld [vmem:[%s18555_s6 + $0xa58] sm:$0xff]  }
 0x134   : > { %15819 = vmatprep.subr.bf16.mxu0 %v17503_v55  ;;  %v17541_v55 = vld [vmem:[%s18555_s6 + $0xa00] sm:$0xff]  }
 0x135   : > { %15840 = vmatpush3.bf16.msra.mxu1 %v17502_v54  ;;  %v17540_v54 = vld [vmem:[%s18555_s6 + $0xa40] sm:$0xff]  }
 0x136   : > { %15841 = vmatprep.subr.bf16.mxu1 %v17505_v60  ;;  %v17543_v57 = vld [vmem:[%s18555_s6 + $0xa80] sm:$0xff]   ;;  %v17545_v60 = vld [vmem:[%s18555_s6 + $0xa08] sm:$0xff]  }
 0x137   : > { %15820 = vmatpush3.bf16.msra.mxu0 %v17504_v58  ;;  %v2984_v58 = vcombine.high %v2968_v53, %v2968_v53 }
 0x138   : > { %15849 = vmatprep.subr.bf16.mxu0 %v17507_v4  ;;  %v17554_v4 = vld [vmem:[%s18555_s6 + $0xad8] sm:$0xff]  }
 0x139   : > { %15842 = vmatpush3.bf16.msra.mxu1 %v17506_v0  ;;  %v17550_v0 = vld [vmem:[%s18555_s6 + $0xad0] sm:$0xff]  }
 0x13a   : > { %11694 = vmatmul.mubr.bf16.vlgmr.msra.gmra.mrb[32].mxu0 %v2961_v3  ;;  %15871 = vmatprep.subr.bf16.mxu1 %v17509_v7  ;;  %v17553_v3 = vld [vmem:[%s18555_s6 + $0xa18] sm:$0xff]   ;;  %v17557_v7 = vld [vmem:[%s18555_s6 + $0xa20] sm:$0xff]  }
 0x13b   : > { %15850 = vmatpush3.bf16.msra.mxu0 %v17508_v5  ;;  %11773 = vmatprep.mubr.bf16.mxu0 %v2982_v6  ;;  %v17555_v5 = vld [vmem:[%s18555_s6 + $0xa98] sm:$0xff]   ;;  %v17556_v6 = vld [vmem:[%s18555_s6 + $0xa60] sm:$0xff]  }
 0x13c   : > { %11734 = vmatmul.mubr.bf16.vlgmr.msra.gmra.mrb[32].mxu1 %v2983_v9  ;;  %15851 = vmatprep.subr.bf16.mxu0 %v17511_v10  ;;  %v17559_v9 = vld [vmem:[%s18555_s6 + $0xaa0] sm:$0xff]   ;;  %v17560_v10 = vld [vmem:[%s18555_s6 + $0xa68] sm:$0xff]  }
 0x13d   : > { %15872 = vmatpush3.bf16.msra.mxu1 %v17510_v8  ;;  %11813 = vmatprep.mubr.bf16.mxu1 %v2986_v12  ;;  %v17558_v8 = vld [vmem:[%s18555_s6 + $0xae0] sm:$0xff]   ;;  %v17562_v12 = vld [vmem:[%s18555_s6 + $0xae8] sm:$0xff]  }
 0x13e   : > { %15873 = vmatprep.subr.bf16.mxu1 %v17513_v13  ;;  %v17563_v13 = vld [vmem:[%s18555_s6 + $0xaa8] sm:$0xff]  }
 0x13f   : > { %15852 = vmatpush3.bf16.msra.mxu0 %v17512_v11  ;;  %v17561_v11 = vld [vmem:[%s18555_s6 + $0xa28] sm:$0xff]  }
 0x140   : > { %15853 = vmatprep.subr.bf16.mxu0 %v17515_v15 }
 0x141   : > { %15874 = vmatpush3.bf16.msra.mxu1 %v17514_v14  ;;  %v17564_v14 = vld [vmem:[%s18555_s6 + $0xa70] sm:$0xff]  }
 0x142   : > { %15875 = vmatprep.subr.bf16.mxu1 %v17517_v17  ;;  %v309_v17 = vld [vmem:[%s18550_s27 + $0x28] sm:$0xff] }
 0x143   : > { %15854 = vmatpush3.bf16.msra.mxu0 %v17516_v16  ;;  %v17565_v16 = vld [vmem:[%s18555_s6 + $0xa30] sm:$0xff]  }
 0x144   : > { %15855 = vmatprep.subr.bf16.mxu0 %v17519_v19  ;;  %v17566_v19 = vld [vmem:[%s18555_s6 + $0xaf0] sm:$0xff]  }
 0x145   : > { %15876 = vmatpush3.bf16.msra.mxu1 %v17518_v18 }
 0x146   : > { %15877 = vmatprep.subr.bf16.mxu1 %v17521_v21  ;;  %v2987_v21 = vcombine.high %v309_v17, %v309_v17 }
 0x147   : > { %15856 = vmatpush3.bf16.msra.mxu0 %v17520_v20  ;;  %v2994_v20 = vrot.slane %v309_v17, %v18593_v42 }
 0x148   : > { %15857 = vmatprep.subr.bf16.mxu0 %v17523_v23 }
 0x149   : > { %15878 = vmatpush3.bf16.msra.mxu1 %v17522_v22 }
 0x14a   : > { %15879 = vmatprep.subr.bf16.mxu1 %v17525_v25 }
 0x14b   : > { %15858 = vmatpush3.bf16.msra.mxu0 %v17524_v24 }
 0x14c   : > { %15859 = vmatprep.subr.bf16.mxu0 %v17527_v27  ;;  %v17567_v27 = vld [vmem:[%s18555_s6 + $0xab0] sm:$0xff]  }
 0x14d   : > { %v15557_v32 = vpop.f32.mrb[8].mxu0  ;;  %15880 = vmatpush3.bf16.msra.mxu1 %v17526_v26 }
 0x14e   : > { %v15558_v34 = vpop.f32.mrb[9].mxu0  ;;  %15881 = vmatprep.subr.bf16.mxu1 %v17529_v29  ;;  %v3002_v29 = vcombine.high %v2994_v20, %v2994_v20 }
 0x14f   : > { %v15559_v36 = vadd.f32 %v15558_v34, %v15557_v32  ;;  %v15560_v37 = vpop.f32.mrb[10].mxu0  ;;  %v15579_v38 = vpop.f32.mrb[8].mxu1  ;;  %15860 = vmatpush3.bf16.msra.mxu0 %v17528_v28  ;;  %v17568_v28 = vld [vmem:[%s18555_s6 + $0xa78] sm:$0xff]  }
 0x150   : > { %v15561_v41 = vpop.f32.mrb[11].mxu0  ;;  %v15580_v43 = vpop.f32.mrb[9].mxu1  ;;  %15861 = vmatprep.subr.bf16.mxu0 %v17531_v31  ;;  %v17570_v34 = vld [vmem:[%s18555_s6 + $0xaf8] sm:$0xff]  }
 0x151   : > { %v11216_v44 = vadd.f32 %v15559_v36, %v18906_v63  ;;  %v15581_v45 = vadd.f32 %v15580_v43, %v15579_v38  ;;  %15882 = vmatpush3.bf16.msra.mxu1 %v17530_v30  ;;  %v15582_v47 = vpop.f32.mrb[10].mxu1  ;;  %v17549_v63 = vld [vmem:[%s18555_s6 + $0xa10] sm:$0xff]   ;;  %v18980_v30 = vrot.slane %v2987_v21, %v18593_v42  ;;  %v3010_v41 = vrot.slane %v2994_v20, %v18593_v42  ;;  %v17572_v43 = vld [vmem:[%s18555_s6 + $0xb40] sm:$0xff]   ;;  %v17601_v21 = vld [vmem:[%s18555_s6 + $0xb38] sm:$0xff]  }
 0x152   : > { %15883 = vmatprep.subr.bf16.mxu1 %v17533_v35  ;;  %v15583_v49 = vpop.f32.mrb[11].mxu1  ;;  %v3024_v35 = vrot.slane %v3002_v29, %v18593_v42  ;;  %v17574_v47 = vld [vmem:[%s18555_s6 + $0xbc0] sm:$0xff]  }
 0x153   : > { %v18943_v50 = vadd.f32 %v15581_v45, %v11216_v44  ;;  %15862 = vmatpush3.bf16.msra.mxu0 %v17532_v33  ;;  %v17569_v33 = vld [vmem:[%s18555_s6 + $0xa38] sm:$0xff]   ;;  %v3003_v37 = vcombine.high %v18980_v30, %v18980_v30  ;;  %v17573_v45 = vld [vmem:[%s18555_s6 + $0xb00] sm:$0xff]   ;;  %v3032_v49 = vcombine.high %v3010_v41, %v3010_v41 }
 0x154   : > { %15863 = vmatprep.subr.bf16.mxu0 %v17535_v40  ;;  %v3034_v44 = vcombine.high %v3024_v35, %v3024_v35  ;;  %v17606_v29 = vld [vmem:[%s18555_s6 + $0xc00] sm:$0xff]  }
 0x155   : > { %15884 = vmatpush3.bf16.msra.mxu1 %v17534_v39  ;;  %v17571_v39 = vld [vmem:[%s18555_s6 + $0xab8] sm:$0xff]  }
 0x156   : > { %15885 = vmatprep.subr.bf16.mxu1 %v17537_v48  ;;  %v17575_v48 = vld [vmem:[%s18555_s6 + $0xb80] sm:$0xff]  }
 0x157   : > { %15864 = vmatpush3.bf16.msra.mxu0 %v17536_v46  ;;  %v3031_v46 = vrot.slane %v3003_v37, %v18593_v42  ;;  %v17613_v37 = vld [vmem:[%s18555_s6 + $0xc50] sm:$0xff]  }
 0x158   : > { %15893 = vmatprep.subr.bf16.mxu0 %v17540_v54  ;;  %v17578_v54 = vld [vmem:[%s18555_s6 + $0xbc8] sm:$0xff]  }
 0x159   : > { %15886 = vmatpush3.bf16.msra.mxu1 %v17539_v52  ;;  %v17577_v52 = vld [vmem:[%s18555_s6 + $0xb08] sm:$0xff]  }
 0x15a   : > { %11774 = vmatmul.mubr.bf16.vlgmr.msra.gmra.mrb[36].mxu0 %v2968_v53  ;;  %15915 = vmatprep.subr.bf16.mxu1 %v17542_v56  ;;  %v3035_v53 = vcombine.high %v3031_v46, %v3031_v46  ;;  %v17580_v56 = vld [vmem:[%s18555_s6 + $0xb50] sm:$0xff]  }
 0x15b   : > { %15894 = vmatpush3.bf16.msra.mxu0 %v17541_v55  ;;  %11853 = vmatprep.mubr.bf16.mxu0 %v3024_v35  ;;  %v17579_v55 = vld [vmem:[%s18555_s6 + $0xb88] sm:$0xff]  }
 0x15c   : > { %11814 = vmatmul.mubr.bf16.vlgmr.msra.gmra.mrb[36].mxu1 %v2984_v58  ;;  %15895 = vmatprep.subr.bf16.mxu0 %v17544_v59  ;;  %v17582_v58 = vld [vmem:[%s18555_s6 + $0xbd0] sm:$0xff]   ;;  %v17610_v35 = vld [vmem:[%s18555_s6 + $0xc08] sm:$0xff]  }
 0x15d   : > { %15916 = vmatpush3.bf16.msra.mxu1 %v17543_v57  ;;  %11893 = vmatprep.mubr.bf16.mxu1 %v3034_v44  ;;  %v17581_v57 = vld [vmem:[%s18555_s6 + $0xb10] sm:$0xff]   ;;  %v17619_v44 = vld [vmem:[%s18555_s6 + $0xcd8] sm:$0xff]  }
 0x15e   : > { %15917 = vmatprep.subr.bf16.mxu1 %v17546_v51  ;;  %v17583_v59 = vld [vmem:[%s18555_s6 + $0xb90] sm:$0xff]   ;;  %v17585_v51 = vld [vmem:[%s18555_s6 + $0xb18] sm:$0xff]  }
 0x15f   : > { %15896 = vmatpush3.bf16.msra.mxu0 %v17545_v60  ;;  %v17584_v60 = vld [vmem:[%s18555_s6 + $0xb58] sm:$0xff]  }
 0x160   : > { %15897 = vmatprep.subr.bf16.mxu0 %v17548_v62  ;;  %v17587_v62 = vld [vmem:[%s18555_s6 + $0xb98] sm:$0xff]  }
 0x161   : > { %15918 = vmatpush3.bf16.msra.mxu1 %v17547_v61  ;;  %v17586_v61 = vld [vmem:[%s18555_s6 + $0xbd8] sm:$0xff]  }
 0x162   : > { %15919 = vmatprep.subr.bf16.mxu1 %v17550_v0  ;;  %v17589_v0 = vld [vmem:[%s18555_s6 + $0xb20] sm:$0xff]  }
 0x163   : > { %15898 = vmatpush3.bf16.msra.mxu0 %v17549_v63  ;;  %v17588_v63 = vld [vmem:[%s18555_s6 + $0xb60] sm:$0xff]  }
 0x164   : > { %15899 = vmatprep.subr.bf16.mxu0 %v17552_v2  ;;  %v17591_v2 = vld [vmem:[%s18555_s6 + $0xba0] sm:$0xff]  }
 0x165   : > { %15920 = vmatpush3.bf16.msra.mxu1 %v17551_v1  ;;  %v17590_v1 = vld [vmem:[%s18555_s6 + $0xbe0] sm:$0xff]  }
 0x166   : > { %15921 = vmatprep.subr.bf16.mxu1 %v17554_v4  ;;  %v17593_v4 = vld [vmem:[%s18555_s6 + $0xb28] sm:$0xff]  }
 0x167   : > { %15900 = vmatpush3.bf16.msra.mxu0 %v17553_v3  ;;  %v17592_v3 = vld [vmem:[%s18555_s6 + $0xb68] sm:$0xff]  }
 0x168   : > { %15901 = vmatprep.subr.bf16.mxu0 %v17556_v6  ;;  %v17595_v6 = vld [vmem:[%s18555_s6 + $0xba8] sm:$0xff]  }
 0x169   : > { %15922 = vmatpush3.bf16.msra.mxu1 %v17555_v5  ;;  %v17594_v5 = vld [vmem:[%s18555_s6 + $0xbe8] sm:$0xff]  }
 0x16a   : > { %15923 = vmatprep.subr.bf16.mxu1 %v17558_v8 }
 0x16b   : > { %15902 = vmatpush3.bf16.msra.mxu0 %v17557_v7  ;;  %v17596_v7 = vld [vmem:[%s18555_s6 + $0xb70] sm:$0xff]  }
 0x16c   : > { %15903 = vmatprep.subr.bf16.mxu0 %v17560_v10 }
 0x16d   : > { %v15601_v15 = vpop.f32.mrb[12].mxu0  ;;  %15924 = vmatpush3.bf16.msra.mxu1 %v17559_v9  ;;  %v17597_v9 = vld [vmem:[%s18555_s6 + $0xb30] sm:$0xff]  }
 0x16e   : > { %v15602_v18 = vpop.f32.mrb[13].mxu0  ;;  %15925 = vmatprep.subr.bf16.mxu1 %v17562_v12 }
 0x16f   : > { %v15603_v22 = vadd.f32 %v15602_v18, %v15601_v15  ;;  %v15604_v23 = vpop.f32.mrb[14].mxu0  ;;  %v15623_v24 = vpop.f32.mrb[12].mxu1  ;;  %15904 = vmatpush3.bf16.msra.mxu0 %v17561_v11  ;;  %v17598_v11 = vld [vmem:[%s18555_s6 + $0xbf0] sm:$0xff]  }
 0x170   : > { %v15605_v25 = vpop.f32.mrb[15].mxu0  ;;  %v15624_v26 = vpop.f32.mrb[13].mxu1  ;;  %15905 = vmatprep.subr.bf16.mxu0 %v17564_v14  ;;  %v17599_v15 = vld [vmem:[%s18555_s6 + $0xbb0] sm:$0xff]   ;;  %v17602_v23 = vld [vmem:[%s18555_s6 + $0xbf8] sm:$0xff]  }
 0x171   : > { %v11296_v31 = vadd.f32 %v15603_v22, %v18943_v50  ;;  %v15625_v32 = vadd.f32 %v15624_v26, %v15623_v24  ;;  %15926 = vmatpush3.bf16.msra.mxu1 %v17563_v13  ;;  %v15626_v36 = vpop.f32.mrb[14].mxu1  ;;  %v17576_v50 = vld [vmem:[%s18555_s6 + $0xb48] sm:$0xff]   ;;  %v17604_v26 = vld [vmem:[%s18555_s6 + $0xbb8] sm:$0xff]  }
 0x172   : > { %15927 = vmatprep.subr.bf16.mxu1 %v17566_v19  ;;  %v15627_v40 = vpop.f32.mrb[15].mxu1  ;;  %v17612_v36 = vld [vmem:[%s18555_s6 + $0xc88] sm:$0xff]  }
 0x173   : > { %v18988_v38 = vadd.f32 %v15625_v32, %v11296_v31  ;;  %15906 = vmatpush3.bf16.msra.mxu0 %v17565_v16  ;;  %v17600_v16 = vld [vmem:[%s18555_s6 + $0xb78] sm:$0xff]   ;;  %v17607_v31 = vld [vmem:[%s18555_s6 + $0xcc0] sm:$0xff]   ;;  %v17616_v40 = vld [vmem:[%s18555_s6 + $0xc90] sm:$0xff]  }
 0x174   : > { %15907 = vmatprep.subr.bf16.mxu0 %v17568_v28  ;;  %v17605_v28 = vld [vmem:[%s18555_s6 + $0xc40] sm:$0xff]  }
 0x175   : > { %15928 = vmatpush3.bf16.msra.mxu1 %v17567_v27  ;;  %v3017_v27 = vrot.slane %v18980_v30, %v18593_v42  ;;  %v17608_v32 = vld [vmem:[%s18555_s6 + $0xc80] sm:$0xff]   ;;  %v17611_v30 = vld [vmem:[%s18555_s6 + $0xcc8] sm:$0xff]  }
 0x176   : > { %15929 = vmatprep.subr.bf16.mxu1 %v17570_v34  ;;  %v17609_v34 = vld [vmem:[%s18555_s6 + $0xc48] sm:$0xff]  }
 0x177   : > { %15908 = vmatpush3.bf16.msra.mxu0 %v17569_v33  ;;  %v3033_v33 = vcombine.high %v3017_v27, %v3017_v27 }
 0x178   : > { %15937 = vmatprep.subr.bf16.mxu0 %v17572_v43  ;;  %v17618_v43 = vld [vmem:[%s18555_s6 + $0xc18] sm:$0xff]  }
 0x179   : > { %15930 = vmatpush3.bf16.msra.mxu1 %v17571_v39  ;;  %v17615_v39 = vld [vmem:[%s18555_s6 + $0xcd0] sm:$0xff]  }
 0x17a   : > { %11854 = vmatmul.mubr.bf16.vlgmr.msra.gmra.mrb[40].mxu0 %v3010_v41  ;;  %15959 = vmatprep.subr.bf16.mxu1 %v17574_v47  ;;  %v17617_v41 = vld [vmem:[%s18555_s6 + $0xc58] sm:$0xff]   ;;  %v17622_v47 = vld [vmem:[%s18555_s6 + $0xc20] sm:$0xff]  }
 0x17b   : > { %15938 = vmatpush3.bf16.msra.mxu0 %v17573_v45  ;;  %11933 = vmatprep.mubr.bf16.mxu0 %v3031_v46  ;;  %v17620_v45 = vld [vmem:[%s18555_s6 + $0xc98] sm:$0xff]   ;;  %v17621_v46 = vld [vmem:[%s18555_s6 + $0xc60] sm:$0xff]  }
 0x17c   : > { %11894 = vmatmul.mubr.bf16.vlgmr.msra.gmra.mrb[40].mxu1 %v3032_v49  ;;  %15939 = vmatprep.subr.bf16.mxu0 %v17576_v50  ;;  %v17624_v49 = vld [vmem:[%s18555_s6 + $0xca0] sm:$0xff]   ;;  %v17625_v50 = vld [vmem:[%s18555_s6 + $0xc68] sm:$0xff]  }
 0x17d   : > { %15960 = vmatpush3.bf16.msra.mxu1 %v17575_v48  ;;  %11973 = vmatprep.mubr.bf16.mxu1 %v3035_v53  ;;  %v17623_v48 = vld [vmem:[%s18555_s6 + $0xce0] sm:$0xff]   ;;  %v17627_v53 = vld [vmem:[%s18555_s6 + $0xce8] sm:$0xff]  }
 0x17e   : > { %15961 = vmatprep.subr.bf16.mxu1 %v17578_v54  ;;  %v17628_v54 = vld [vmem:[%s18555_s6 + $0xca8] sm:$0xff]  }
 0x17f   : > { %15940 = vmatpush3.bf16.msra.mxu0 %v17577_v52  ;;  %v17626_v52 = vld [vmem:[%s18555_s6 + $0xc28] sm:$0xff]  }
 0x180   : > { %15941 = vmatprep.subr.bf16.mxu0 %v17580_v56 }
 0x181   : > { %15962 = vmatpush3.bf16.msra.mxu1 %v17579_v55  ;;  %v17629_v55 = vld [vmem:[%s18555_s6 + $0xc70] sm:$0xff]  }
 0x182   : > { %15963 = vmatprep.subr.bf16.mxu1 %v17582_v58 }
 0x183   : > { %15942 = vmatpush3.bf16.msra.mxu0 %v17581_v57  ;;  %v17630_v57 = vld [vmem:[%s18555_s6 + $0xc30] sm:$0xff]  }
 0x184   : > { %15943 = vmatprep.subr.bf16.mxu0 %v17584_v60  ;;  %v310_v60 = vld [vmem:[%s18550_s27 + $0x30] sm:$0xff] }
 0x185   : > { %15964 = vmatpush3.bf16.msra.mxu1 %v17583_v59  ;;  %v17631_v59 = vld [vmem:[%s18555_s6 + $0xcf0] sm:$0xff]  }
 0x186   : > { %15965 = vmatprep.subr.bf16.mxu1 %v17586_v61 }
 0x187   : > { %15944 = vmatpush3.bf16.msra.mxu0 %v17585_v51 }
 0x188   : > { %15945 = vmatprep.subr.bf16.mxu0 %v17588_v63  ;;  %v3043_v63 = vrot.slane %v310_v60, %v18593_v42 }
 0x189   : > { %15966 = vmatpush3.bf16.msra.mxu1 %v17587_v62 }
 0x18a   : > { %15967 = vmatprep.subr.bf16.mxu1 %v17590_v1 }
 0x18b   : > { %15946 = vmatpush3.bf16.msra.mxu0 %v17589_v0  ;;  %v3036_v0 = vcombine.high %v310_v60, %v310_v60 }
 0x18c   : > { %15947 = vmatprep.subr.bf16.mxu0 %v17592_v3  ;;  %v17632_v3 = vld [vmem:[%s18555_s6 + $0xcb0] sm:$0xff]  }
 0x18d   : > { %v15645_v8 = vpop.f32.mrb[16].mxu0  ;;  %15968 = vmatpush3.bf16.msra.mxu1 %v17591_v2 }
 0x18e   : > { %v15646_v10 = vpop.f32.mrb[17].mxu0  ;;  %15969 = vmatprep.subr.bf16.mxu1 %v17594_v5 }
 0x18f   : > { %v15647_v12 = vadd.f32 %v15646_v10, %v15645_v8  ;;  %v15648_v13 = vpop.f32.mrb[18].mxu0  ;;  %v15667_v14 = vpop.f32.mrb[16].mxu1  ;;  %15948 = vmatpush3.bf16.msra.mxu0 %v17593_v4  ;;  %v17633_v4 = vld [vmem:[%s18555_s6 + $0xc78] sm:$0xff]   ;;  %v3051_v8 = vcombine.high %v3043_v63, %v3043_v63 }
 0x190   : > { %v15649_v17 = vpop.f32.mrb[19].mxu0  ;;  %v15668_v18 = vpop.f32.mrb[17].mxu1  ;;  %15949 = vmatprep.subr.bf16.mxu0 %v17596_v7  ;;  %v17634_v7 = vld [vmem:[%s18555_s6 + $0xc38] sm:$0xff]  }
 0x191   : > { %v11376_v19 = vadd.f32 %v15647_v12, %v18988_v38  ;;  %v15669_v20 = vadd.f32 %v15668_v18, %v15667_v14  ;;  %15970 = vmatpush3.bf16.msra.mxu1 %v17595_v6  ;;  %v15670_v22 = vpop.f32.mrb[18].mxu1  ;;  %v17614_v38 = vld [vmem:[%s18555_s6 + $0xc10] sm:$0xff]   ;;  %v3073_v13 = vrot.slane %v3051_v8, %v18593_v42  ;;  %v17636_v14 = vld [vmem:[%s18555_s6 + $0xcb8] sm:$0xff]   ;;  %v17637_v17 = vld [vmem:[%s18555_s6 + $0xd40] sm:$0xff]  }
 0x192   : > { %15971 = vmatprep.subr.bf16.mxu1 %v17598_v11  ;;  %v15671_v24 = vpop.f32.mrb[19].mxu1  ;;  %v19065_v11 = vrot.slane %v3036_v0, %v18593_v42 }
 0x193   : > { %v19025_v25 = vadd.f32 %v15669_v20, %v11376_v19  ;;  %15950 = vmatpush3.bf16.msra.mxu0 %v17597_v9  ;;  %v17635_v9 = vld [vmem:[%s18555_s6 + $0xcf8] sm:$0xff]   ;;  %v3083_v19 = vcombine.high %v3073_v13, %v3073_v13  ;;  %v17638_v20 = vld [vmem:[%s18555_s6 + $0xd00] sm:$0xff]  }
 0x194   : > { %15951 = vmatprep.subr.bf16.mxu0 %v17600_v16  ;;  %v3059_v16 = vrot.slane %v3043_v63, %v18593_v42  ;;  %v3052_v18 = vcombine.high %v19065_v11, %v19065_v11  ;;  %v17667_v63 = vld [vmem:[%s18555_s6 + $0xdf8] sm:$0xff]  }
 0x195   : > { %15972 = vmatpush3.bf16.msra.mxu1 %v17599_v15 }
 0x196   : > { %15973 = vmatprep.subr.bf16.mxu1 %v17602_v23  ;;  %v3080_v22 = vrot.slane %v3052_v18, %v18593_v42  ;;  %v17640_v23 = vld [vmem:[%s18555_s6 + $0xd80] sm:$0xff]   ;;  %v3081_v24 = vcombine.high %v3059_v16, %v3059_v16  ;;  %v17683_v18 = vld [vmem:[%s18555_s6 + $0xe18] sm:$0xff]  }
 0x197   : > { %15952 = vmatpush3.bf16.msra.mxu0 %v17601_v21  ;;  %v17639_v21 = vld [vmem:[%s18555_s6 + $0xdc0] sm:$0xff]  }
 0x198   : > { %15981 = vmatprep.subr.bf16.mxu0 %v17605_v28  ;;  %v17643_v28 = vld [vmem:[%s18555_s6 + $0xdc8] sm:$0xff]  }
 0x199   : > { %15974 = vmatpush3.bf16.msra.mxu1 %v17604_v26  ;;  %v17642_v26 = vld [vmem:[%s18555_s6 + $0xd08] sm:$0xff]  }
 0x19a   : > { %11934 = vmatmul.mubr.bf16.vlgmr.msra.gmra.mrb[44].mxu0 %v3017_v27  ;;  %16003 = vmatprep.subr.bf16.mxu1 %v17607_v31  ;;  %v3084_v27 = vcombine.high %v3080_v22, %v3080_v22  ;;  %v17645_v31 = vld [vmem:[%s18555_s6 + $0xd50] sm:$0xff]  }
 0x19b   : > { %15982 = vmatpush3.bf16.msra.mxu0 %v17606_v29  ;;  %12013 = vmatprep.mubr.bf16.mxu0 %v3073_v13  ;;  %v17644_v29 = vld [vmem:[%s18555_s6 + $0xd88] sm:$0xff]   ;;  %v17678_v13 = vld [vmem:[%s18555_s6 + $0xe50] sm:$0xff]  }
 0x19c   : > { %11974 = vmatmul.mubr.bf16.vlgmr.msra.gmra.mrb[44].mxu1 %v3033_v33  ;;  %15983 = vmatprep.subr.bf16.mxu0 %v17609_v34  ;;  %v17647_v33 = vld [vmem:[%s18555_s6 + $0xdd0] sm:$0xff]  }
 0x19d   : > { %16004 = vmatpush3.bf16.msra.mxu1 %v17608_v32  ;;  %12053 = vmatprep.mubr.bf16.mxu1 %v3083_v19  ;;  %v17646_v32 = vld [vmem:[%s18555_s6 + $0xd10] sm:$0xff]   ;;  %v17684_v19 = vld [vmem:[%s18555_s6 + $0xed8] sm:$0xff]  }
 0x19e   : > { %16005 = vmatprep.subr.bf16.mxu1 %v17611_v30  ;;  %v17648_v34 = vld [vmem:[%s18555_s6 + $0xd90] sm:$0xff]   ;;  %v17650_v30 = vld [vmem:[%s18555_s6 + $0xd18] sm:$0xff]  }
 0x19f   : > { %15984 = vmatpush3.bf16.msra.mxu0 %v17610_v35  ;;  %v17649_v35 = vld [vmem:[%s18555_s6 + $0xd58] sm:$0xff]  }
 0x1a0   : > { %15985 = vmatprep.subr.bf16.mxu0 %v17613_v37  ;;  %v17652_v37 = vld [vmem:[%s18555_s6 + $0xd98] sm:$0xff]  }
 0x1a1   : > { %16006 = vmatpush3.bf16.msra.mxu1 %v17612_v36  ;;  %v17651_v36 = vld [vmem:[%s18555_s6 + $0xdd8] sm:$0xff]  }
 0x1a2   : > { %16007 = vmatprep.subr.bf16.mxu1 %v17615_v39  ;;  %v17654_v39 = vld [vmem:[%s18555_s6 + $0xd20] sm:$0xff]  }
 0x1a3   : > { %15986 = vmatpush3.bf16.msra.mxu0 %v17614_v38  ;;  %v17653_v38 = vld [vmem:[%s18555_s6 + $0xd60] sm:$0xff]  }
 0x1a4   : > { %15987 = vmatprep.subr.bf16.mxu0 %v17617_v41  ;;  %v17656_v41 = vld [vmem:[%s18555_s6 + $0xda0] sm:$0xff]  }
 0x1a5   : > { %16008 = vmatpush3.bf16.msra.mxu1 %v17616_v40  ;;  %v17655_v40 = vld [vmem:[%s18555_s6 + $0xde0] sm:$0xff]  }
 0x1a6   : > { %16009 = vmatprep.subr.bf16.mxu1 %v17619_v44  ;;  %v17658_v44 = vld [vmem:[%s18555_s6 + $0xd28] sm:$0xff]  }
 0x1a7   : > { %15988 = vmatpush3.bf16.msra.mxu0 %v17618_v43  ;;  %v17657_v43 = vld [vmem:[%s18555_s6 + $0xd68] sm:$0xff]  }
 0x1a8   : > { %15989 = vmatprep.subr.bf16.mxu0 %v17621_v46  ;;  %v17660_v46 = vld [vmem:[%s18555_s6 + $0xda8] sm:$0xff]  }
 0x1a9   : > { %16010 = vmatpush3.bf16.msra.mxu1 %v17620_v45  ;;  %v17659_v45 = vld [vmem:[%s18555_s6 + $0xde8] sm:$0xff]  }
 0x1aa   : > { %16011 = vmatprep.subr.bf16.mxu1 %v17623_v48 }
 0x1ab   : > { %15990 = vmatpush3.bf16.msra.mxu0 %v17622_v47  ;;  %v17661_v47 = vld [vmem:[%s18555_s6 + $0xd70] sm:$0xff]  }
 0x1ac   : > { %15991 = vmatprep.subr.bf16.mxu0 %v17625_v50 }
 0x1ad   : > { %v15689_v56 = vpop.f32.mrb[20].mxu0  ;;  %16012 = vmatpush3.bf16.msra.mxu1 %v17624_v49  ;;  %v17662_v49 = vld [vmem:[%s18555_s6 + $0xd30] sm:$0xff]  }
 0x1ae   : > { %v15690_v58 = vpop.f32.mrb[21].mxu0  ;;  %16013 = vmatprep.subr.bf16.mxu1 %v17627_v53 }
 0x1af   : > { %v15691_v51 = vadd.f32 %v15690_v58, %v15689_v56  ;;  %v15692_v61 = vpop.f32.mrb[22].mxu0  ;;  %v15711_v62 = vpop.f32.mrb[20].mxu1  ;;  %15992 = vmatpush3.bf16.msra.mxu0 %v17626_v52  ;;  %v17663_v52 = vld [vmem:[%s18555_s6 + $0xdf0] sm:$0xff]  }
 0x1b0   : > { %v15693_v1 = vpop.f32.mrb[23].mxu0  ;;  %v15712_v2 = vpop.f32.mrb[21].mxu1  ;;  %15993 = vmatprep.subr.bf16.mxu0 %v17629_v55  ;;  %v17664_v56 = vld [vmem:[%s18555_s6 + $0xdb0] sm:$0xff]   ;;  %v17666_v61 = vld [vmem:[%s18555_s6 + $0xd38] sm:$0xff]  }
 0x1b1   : > { %v11456_v5 = vadd.f32 %v15691_v51, %v19025_v25  ;;  %v15713_v6 = vadd.f32 %v15712_v2, %v15711_v62  ;;  %16014 = vmatpush3.bf16.msra.mxu1 %v17628_v54  ;;  %v15714_v10 = vpop.f32.mrb[22].mxu1  ;;  %v17641_v25 = vld [vmem:[%s18555_s6 + $0xd48] sm:$0xff]   ;;  %v17669_v2 = vld [vmem:[%s18555_s6 + $0xdb8] sm:$0xff]  }
 0x1b2   : > { %16015 = vmatprep.subr.bf16.mxu1 %v17631_v59  ;;  %v15715_v15 = vpop.f32.mrb[23].mxu1  ;;  %v17675_v10 = vld [vmem:[%s18555_s6 + $0xe08] sm:$0xff]  }
 0x1b3   : > { %v19067_v12 = vadd.f32 %v15713_v6, %v11456_v5  ;;  %15994 = vmatpush3.bf16.msra.mxu0 %v17630_v57  ;;  %v17665_v57 = vld [vmem:[%s18555_s6 + $0xd78] sm:$0xff]   ;;  %v17671_v5 = vld [vmem:[%s18555_s6 + $0xe00] sm:$0xff]   ;;  %v17680_v15 = vld [vmem:[%s18555_s6 + $0xed0] sm:$0xff]  }
 0x1b4   : > { %15995 = vmatprep.subr.bf16.mxu0 %v17633_v4  ;;  %v17670_v4 = vld [vmem:[%s18555_s6 + $0xe40] sm:$0xff]  }
 0x1b5   : > { %16016 = vmatpush3.bf16.msra.mxu1 %v17632_v3  ;;  %v3066_v3 = vrot.slane %v19065_v11, %v18593_v42  ;;  %v17672_v6 = vld [vmem:[%s18555_s6 + $0xec0] sm:$0xff]   ;;  %v17676_v11 = vld [vmem:[%s18555_s6 + $0xec8] sm:$0xff]  }
 0x1b6   : > { %16017 = vmatprep.subr.bf16.mxu1 %v17635_v9  ;;  %v17674_v9 = vld [vmem:[%s18555_s6 + $0xe48] sm:$0xff]  }
 0x1b7   : > { %15996 = vmatpush3.bf16.msra.mxu0 %v17634_v7  ;;  %v17673_v7 = vld [vmem:[%s18555_s6 + $0xe80] sm:$0xff]   ;;  %v3082_v8 = vcombine.high %v3066_v3, %v3066_v3 }
 0x1b8   : > { %16025 = vmatprep.subr.bf16.mxu0 %v17637_v17  ;;  %v17682_v17 = vld [vmem:[%s18555_s6 + $0xe58] sm:$0xff]  }
 0x1b9   : > { %16018 = vmatpush3.bf16.msra.mxu1 %v17636_v14  ;;  %v17679_v14 = vld [vmem:[%s18555_s6 + $0xe10] sm:$0xff]  }
 0x1ba   : > { %12014 = vmatmul.mubr.bf16.vlgmr.msra.gmra.mrb[48].mxu0 %v3059_v16  ;;  %16047 = vmatprep.subr.bf16.mxu1 %v17639_v21  ;;  %v17681_v16 = vld [vmem:[%s18555_s6 + $0xe90] sm:$0xff]   ;;  %v17686_v21 = vld [vmem:[%s18555_s6 + $0xe60] sm:$0xff]  }
 0x1bb   : > { %16026 = vmatpush3.bf16.msra.mxu0 %v17638_v20  ;;  %12093 = vmatprep.mubr.bf16.mxu0 %v3080_v22  ;;  %v17685_v20 = vld [vmem:[%s18555_s6 + $0xe98] sm:$0xff]   ;;  %v17687_v22 = vld [vmem:[%s18555_s6 + $0xe20] sm:$0xff]  }
 0x1bc   : > { %12054 = vmatmul.mubr.bf16.vlgmr.msra.gmra.mrb[48].mxu1 %v3081_v24  ;;  %16027 = vmatprep.subr.bf16.mxu0 %v17641_v25  ;;  %v17689_v24 = vld [vmem:[%s18555_s6 + $0xea0] sm:$0xff]   ;;  %v17690_v25 = vld [vmem:[%s18555_s6 + $0xe68] sm:$0xff]  }
 0x1bd   : > { %16048 = vmatpush3.bf16.msra.mxu1 %v17640_v23  ;;  %12133 = vmatprep.mubr.bf16.mxu1 %v3084_v27  ;;  %v17688_v23 = vld [vmem:[%s18555_s6 + $0xee0] sm:$0xff]   ;;  %v17692_v27 = vld [vmem:[%s18555_s6 + $0xee8] sm:$0xff]  }
 0x1be   : > { %16049 = vmatprep.subr.bf16.mxu1 %v17643_v28  ;;  %v17693_v28 = vld [vmem:[%s18555_s6 + $0xea8] sm:$0xff]  }
 0x1bf   : > { %16028 = vmatpush3.bf16.msra.mxu0 %v17642_v26  ;;  %v17691_v26 = vld [vmem:[%s18555_s6 + $0xe28] sm:$0xff]  }
 0x1c0   : > { %16029 = vmatprep.subr.bf16.mxu0 %v17645_v31 }
 0x1c1   : > { %16050 = vmatpush3.bf16.msra.mxu1 %v17644_v29  ;;  %v17694_v29 = vld [vmem:[%s18555_s6 + $0xe70] sm:$0xff]  }
 0x1c2   : > { %16051 = vmatprep.subr.bf16.mxu1 %v17647_v33 }
 0x1c3   : > { %16030 = vmatpush3.bf16.msra.mxu0 %v17646_v32  ;;  %v17695_v32 = vld [vmem:[%s18555_s6 + $0xe30] sm:$0xff]  }
 0x1c4   : > { %16031 = vmatprep.subr.bf16.mxu0 %v17649_v35 }
 0x1c5   : > { %16052 = vmatpush3.bf16.msra.mxu1 %v17648_v34  ;;  %v17696_v34 = vld [vmem:[%s18555_s6 + $0xef0] sm:$0xff]  }
 0x1c6   : > { %16053 = vmatprep.subr.bf16.mxu1 %v17651_v36 }
 0x1c7   : > { %16032 = vmatpush3.bf16.msra.mxu0 %v17650_v30 }
 0x1c8   : > { %16033 = vmatprep.subr.bf16.mxu0 %v17653_v38  ;;  %v17698_v38 = vld [vmem:[%s18555_s6 + $0xe78] sm:$0xff]  }
 0x1c9   : > { %16054 = vmatpush3.bf16.msra.mxu1 %v17652_v37  ;;  %v17697_v37 = vld [vmem:[%s18555_s6 + $0xeb0] sm:$0xff]  }
 0x1ca   : > { %16055 = vmatprep.subr.bf16.mxu1 %v17655_v40 }
 0x1cb   : > { %16034 = vmatpush3.bf16.msra.mxu0 %v17654_v39  ;;  %v311_v39 = vld [vmem:[%s18550_s27 + $0x38] sm:$0xff] }
 0x1cc   : > { %16035 = vmatprep.subr.bf16.mxu0 %v17657_v43  ;;  %v3092_v43 = vrot.slane %v311_v39, %v18593_v42 }
 0x1cd   : > { %v15733_v48 = vpop.f32.mrb[24].mxu0  ;;  %16056 = vmatpush3.bf16.msra.mxu1 %v17656_v41 }
 0x1ce   : > { %v15734_v50 = vpop.f32.mrb[25].mxu0  ;;  %16057 = vmatprep.subr.bf16.mxu1 %v17659_v45 }
 0x1cf   : > { %v15735_v53 = vadd.f32 %v15734_v50, %v15733_v48  ;;  %v15736_v54 = vpop.f32.mrb[26].mxu0  ;;  %v15755_v55 = vpop.f32.mrb[24].mxu1  ;;  %16036 = vmatpush3.bf16.msra.mxu0 %v17658_v44  ;;  %v3085_v44 = vcombine.high %v311_v39, %v311_v39  ;;  %v3100_v50 = vcombine.high %v3092_v43, %v3092_v43 }
 0x1d0   : > { %v15737_v58 = vpop.f32.mrb[27].mxu0  ;;  %v15756_v59 = vpop.f32.mrb[25].mxu1  ;;  %16037 = vmatprep.subr.bf16.mxu0 %v17661_v47  ;;  %v17699_v47 = vld [vmem:[%s18555_s6 + $0xe38] sm:$0xff]  }
 0x1d1   : > { %v11536_v60 = vadd.f32 %v15735_v53, %v19067_v12  ;;  %v15757_v51 = vadd.f32 %v15756_v59, %v15755_v55  ;;  %16058 = vmatpush3.bf16.msra.mxu1 %v17660_v46  ;;  %v15758_v62 = vpop.f32.mrb[26].mxu1  ;;  %v17677_v12 = vld [vmem:[%s18555_s6 + $0xe88] sm:$0xff]   ;;  %v19147_v53 = vrot.slane %v3085_v44, %v18593_v42  ;;  %v17701_v55 = vld [vmem:[%s18555_s6 + $0xeb8] sm:$0xff]   ;;  %v17702_v58 = vld [vmem:[%s18555_s6 + $0xf40] sm:$0xff]  }
 0x1d2   : > { %16059 = vmatprep.subr.bf16.mxu1 %v17663_v52  ;;  %v15759_v0 = vpop.f32.mrb[27].mxu1  ;;  %v17735_v44 = vld [vmem:[%s18555_s6 + $0x1040] sm:$0xff]  }
 0x1d3   : > { %v19107_v1 = vadd.f32 %v15757_v51, %v11536_v60  ;;  %16038 = vmatpush3.bf16.msra.mxu0 %v17662_v49  ;;  %v17700_v49 = vld [vmem:[%s18555_s6 + $0xef8] sm:$0xff]   ;;  %v3101_v59 = vcombine.high %v19147_v53, %v19147_v53  ;;  %v17703_v60 = vld [vmem:[%s18555_s6 + $0xf00] sm:$0xff]  }
 0x1d4   : > { %16039 = vmatprep.subr.bf16.mxu0 %v17665_v57  ;;  %v3108_v57 = vrot.slane %v3092_v43, %v18593_v42  ;;  %v3115_v43 = vrot.slane %v19147_v53, %v18593_v42  ;;  %v17742_v53 = vld [vmem:[%s18555_s6 + $0x1088] sm:$0xff]  }
 0x1d5   : > { %16060 = vmatpush3.bf16.msra.mxu1 %v17664_v56  ;;  %v3122_v56 = vrot.slane %v3100_v50, %v18593_v42  ;;  %v3129_v62 = vrot.slane %v3101_v59, %v18593_v42  ;;  %v17740_v50 = vld [vmem:[%s18555_s6 + $0x1008] sm:$0xff]   ;;  %v17748_v59 = vld [vmem:[%s18555_s6 + $0x1018] sm:$0xff]  }
 0x1d6   : > { %16061 = vmatprep.subr.bf16.mxu1 %v17667_v63  ;;  %v17705_v63 = vld [vmem:[%s18555_s6 + $0xf80] sm:$0xff]   ;;  %v3130_v0 = vcombine.high %v3108_v57, %v3108_v57 }
 0x1d7   : > { %16040 = vmatpush3.bf16.msra.mxu0 %v17666_v61  ;;  %v3132_v51 = vcombine.high %v3122_v56, %v3122_v56  ;;  %v17704_v61 = vld [vmem:[%s18555_s6 + $0xfc0] sm:$0xff]  }
 0x1d8   : > { %16069 = vmatprep.subr.bf16.mxu0 %v17670_v4  ;;  %v17708_v4 = vld [vmem:[%s18555_s6 + $0xfc8] sm:$0xff]  }
 0x1d9   : > { %16062 = vmatpush3.bf16.msra.mxu1 %v17669_v2  ;;  %v17707_v2 = vld [vmem:[%s18555_s6 + $0xf08] sm:$0xff]  }
 0x1da   : > { %12094 = vmatmul.mubr.bf16.vlgmr.msra.gmra.mrb[52].mxu0 %v3066_v3  ;;  %16091 = vmatprep.subr.bf16.mxu1 %v17672_v6  ;;  %v3133_v3 = vcombine.high %v3129_v62, %v3129_v62  ;;  %v17710_v6 = vld [vmem:[%s18555_s6 + $0xf50] sm:$0xff]  }
 0x1db   : > { %16070 = vmatpush3.bf16.msra.mxu0 %v17671_v5  ;;  %12173 = vmatprep.mubr.bf16.mxu0 %v3122_v56  ;;  %v17709_v5 = vld [vmem:[%s18555_s6 + $0xf88] sm:$0xff]   ;;  %v17745_v56 = vld [vmem:[%s18555_s6 + $0x10d0] sm:$0xff]  }
 0x1dc   : > { %12134 = vmatmul.mubr.bf16.vlgmr.msra.gmra.mrb[52].mxu1 %v3082_v8  ;;  %16071 = vmatprep.subr.bf16.mxu0 %v17674_v9  ;;  %v17712_v8 = vld [vmem:[%s18555_s6 + $0xfd0] sm:$0xff]  }
 0x1dd   : > { %16092 = vmatpush3.bf16.msra.mxu1 %v17673_v7  ;;  %12213 = vmatprep.mubr.bf16.mxu1 %v3132_v51  ;;  %v17711_v7 = vld [vmem:[%s18555_s6 + $0xf10] sm:$0xff]   ;;  %v17750_v51 = vld [vmem:[%s18555_s6 + $0x1098] sm:$0xff]  }
 0x1de   : > { %16093 = vmatprep.subr.bf16.mxu1 %v17676_v11  ;;  %v17713_v9 = vld [vmem:[%s18555_s6 + $0xf90] sm:$0xff]   ;;  %v17715_v11 = vld [vmem:[%s18555_s6 + $0xf18] sm:$0xff]  }
 0x1df   : > { %16072 = vmatpush3.bf16.msra.mxu0 %v17675_v10  ;;  %v17714_v10 = vld [vmem:[%s18555_s6 + $0xf58] sm:$0xff]  }
 0x1e0   : > { %16073 = vmatprep.subr.bf16.mxu0 %v17678_v13  ;;  %v17717_v13 = vld [vmem:[%s18555_s6 + $0xf98] sm:$0xff]  }
 0x1e1   : > { %16094 = vmatpush3.bf16.msra.mxu1 %v17677_v12  ;;  %v17716_v12 = vld [vmem:[%s18555_s6 + $0xfd8] sm:$0xff]  }
 0x1e2   : > { %16095 = vmatprep.subr.bf16.mxu1 %v17680_v15  ;;  %v17719_v15 = vld [vmem:[%s18555_s6 + $0xf20] sm:$0xff]  }
 0x1e3   : > { %16074 = vmatpush3.bf16.msra.mxu0 %v17679_v14  ;;  %v17718_v14 = vld [vmem:[%s18555_s6 + $0xf60] sm:$0xff]  }
 0x1e4   : > { %16075 = vmatprep.subr.bf16.mxu0 %v17682_v17  ;;  %v17721_v17 = vld [vmem:[%s18555_s6 + $0xfa0] sm:$0xff]  }
 0x1e5   : > { %16096 = vmatpush3.bf16.msra.mxu1 %v17681_v16  ;;  %v17720_v16 = vld [vmem:[%s18555_s6 + $0xfe0] sm:$0xff]  }
 0x1e6   : > { %16097 = vmatprep.subr.bf16.mxu1 %v17684_v19  ;;  %v17723_v19 = vld [vmem:[%s18555_s6 + $0xf28] sm:$0xff]  }
 0x1e7   : > { %16076 = vmatpush3.bf16.msra.mxu0 %v17683_v18  ;;  %v17722_v18 = vld [vmem:[%s18555_s6 + $0xf68] sm:$0xff]  }
 0x1e8   : > { %16077 = vmatprep.subr.bf16.mxu0 %v17686_v21  ;;  %v17725_v21 = vld [vmem:[%s18555_s6 + $0xfa8] sm:$0xff]  }
 0x1e9   : > { %16098 = vmatpush3.bf16.msra.mxu1 %v17685_v20  ;;  %v17724_v20 = vld [vmem:[%s18555_s6 + $0xfe8] sm:$0xff]  }
 0x1ea   : > { %16099 = vmatprep.subr.bf16.mxu1 %v17688_v23 }
 0x1eb   : > { %16078 = vmatpush3.bf16.msra.mxu0 %v17687_v22  ;;  %v17726_v22 = vld [vmem:[%s18555_s6 + $0xf70] sm:$0xff]  }
 0x1ec   : > { %16079 = vmatprep.subr.bf16.mxu0 %v17690_v25 }
 0x1ed   : > { %v15777_v31 = vpop.f32.mrb[28].mxu0  ;;  %16100 = vmatpush3.bf16.msra.mxu1 %v17689_v24  ;;  %v17727_v24 = vld [vmem:[%s18555_s6 + $0xf30] sm:$0xff]  }
 0x1ee   : > { %v15778_v33 = vpop.f32.mrb[29].mxu0  ;;  %16101 = vmatprep.subr.bf16.mxu1 %v17692_v27 }
 0x1ef   : > { %v15779_v35 = vadd.f32 %v15778_v33, %v15777_v31  ;;  %v15780_v30 = vpop.f32.mrb[30].mxu0  ;;  %v15799_v36 = vpop.f32.mrb[28].mxu1  ;;  %16080 = vmatpush3.bf16.msra.mxu0 %v17691_v26  ;;  %v17728_v26 = vld [vmem:[%s18555_s6 + $0xff0] sm:$0xff]  }
 0x1f0   : > { %v15781_v40 = vpop.f32.mrb[31].mxu0  ;;  %v15800_v41 = vpop.f32.mrb[29].mxu1  ;;  %16081 = vmatprep.subr.bf16.mxu0 %v17694_v29  ;;  %v17729_v31 = vld [vmem:[%s18555_s6 + $0xfb0] sm:$0xff]  }
 0x1f1   : > { %v11616_v45 = vadd.f32 %v15779_v35, %v19107_v1  ;;  %v15801_v46 = vadd.f32 %v15800_v41, %v15799_v36  ;;  %16102 = vmatpush3.bf16.msra.mxu1 %v17693_v28  ;;  %v15802_v48 = vpop.f32.mrb[30].mxu1  ;;  %v17706_v1 = vld [vmem:[%s18555_s6 + $0xf48] sm:$0xff]   ;;  %v17731_v36 = vld [vmem:[%s18555_s6 + $0xf38] sm:$0xff]  }
 0x1f2   : > { %16103 = vmatprep.subr.bf16.mxu1 %v17696_v34  ;;  %v15803_v52 = vpop.f32.mrb[31].mxu1  ;;  %v17734_v41 = vld [vmem:[%s18555_s6 + $0xfb8] sm:$0xff]   ;;  %v3131_v48 = vcombine.high %v3115_v43, %v3115_v43 }
 0x1f3   : > { %v19149_v54 = vadd.f32 %v15801_v46, %v11616_v45  ;;  %16082 = vmatpush3.bf16.msra.mxu0 %v17695_v32  ;;  %v17730_v32 = vld [vmem:[%s18555_s6 + $0xf78] sm:$0xff]   ;;  %v17736_v45 = vld [vmem:[%s18555_s6 + $0x1000] sm:$0xff]   ;;  %v17741_v52 = vld [vmem:[%s18555_s6 + $0x10c8] sm:$0xff]  }
 0x1f4   : > { %16083 = vmatprep.subr.bf16.mxu0 %v17698_v38  ;;  %v17732_v38 = vld [vmem:[%s18555_s6 + $0xff8] sm:$0xff]   ;;  %v17737_v46 = vld [vmem:[%s18555_s6 + $0x10c0] sm:$0xff]  }
 0x1f5   : > { %16104 = vmatpush3.bf16.msra.mxu1 %v17697_v37 }
 0x1f6   : > { %16105 = vmatprep.subr.bf16.mxu1 %v17700_v49  ;;  %v17739_v49 = vld [vmem:[%s18555_s6 + $0x1048] sm:$0xff]  }
 0x1f7   : > { %16084 = vmatpush3.bf16.msra.mxu0 %v17699_v47  ;;  %v17738_v47 = vld [vmem:[%s18555_s6 + $0x1080] sm:$0xff]  }
 0x1f8   : > { %16113 = vmatprep.subr.bf16.mxu0 %v17702_v58  ;;  %v17747_v58 = vld [vmem:[%s18555_s6 + $0x1058] sm:$0xff]  }
 0x1f9   : > { %16106 = vmatpush3.bf16.msra.mxu1 %v17701_v55  ;;  %v17744_v55 = vld [vmem:[%s18555_s6 + $0x1010] sm:$0xff]  }
 0x1fa   : > { %12174 = vmatmul.mubr.bf16.vlgmr.msra.gmra.mrb[56].mxu0 %v3108_v57  ;;  %16135 = vmatprep.subr.bf16.mxu1 %v17704_v61  ;;  %v17746_v57 = vld [vmem:[%s18555_s6 + $0x1090] sm:$0xff]   ;;  %v17751_v61 = vld [vmem:[%s18555_s6 + $0x1060] sm:$0xff]  }
 0x1fb   : > { %16114 = vmatpush3.bf16.msra.mxu0 %v17703_v60  ;;  %12253 = vmatprep.mubr.bf16.mxu0 %v3129_v62  ;;  %v17749_v60 = vld [vmem:[%s18555_s6 + $0x10d8] sm:$0xff]   ;;  %v17752_v62 = vld [vmem:[%s18555_s6 + $0x1020] sm:$0xff]  }
 0x1fc   : > { %12214 = vmatmul.mubr.bf16.vlgmr.msra.gmra.mrb[56].mxu1 %v3130_v0  ;;  %16115 = vmatprep.subr.bf16.mxu0 %v17706_v1  ;;  %v17754_v0 = vld [vmem:[%s18555_s6 + $0x10a0] sm:$0xff]   ;;  %v17755_v1 = vld [vmem:[%s18555_s6 + $0x1068] sm:$0xff]  }
 0x1fd   : > { %16136 = vmatpush3.bf16.msra.mxu1 %v17705_v63  ;;  %12293 = vmatprep.mubr.bf16.mxu1 %v3133_v3  ;;  %v17753_v63 = vld [vmem:[%s18555_s6 + $0x10e0] sm:$0xff]   ;;  %v17757_v3 = vld [vmem:[%s18555_s6 + $0x10e8] sm:$0xff]  }
 0x1fe   : > { %16137 = vmatprep.subr.bf16.mxu1 %v17708_v4  ;;  %v17758_v4 = vld [vmem:[%s18555_s6 + $0x10a8] sm:$0xff]  }
 0x1ff   : > { %16116 = vmatpush3.bf16.msra.mxu0 %v17707_v2  ;;  %v17756_v2 = vld [vmem:[%s18555_s6 + $0x1028] sm:$0xff]  }
 0x200   : > { %16117 = vmatprep.subr.bf16.mxu0 %v17710_v6 }
 0x201   : > { %16138 = vmatpush3.bf16.msra.mxu1 %v17709_v5  ;;  %v17759_v5 = vld [vmem:[%s18555_s6 + $0x1070] sm:$0xff]  }
 0x202   : > { %16139 = vmatprep.subr.bf16.mxu1 %v17712_v8 }
 0x203   : > { %16118 = vmatpush3.bf16.msra.mxu0 %v17711_v7  ;;  %v17760_v7 = vld [vmem:[%s18555_s6 + $0x1030] sm:$0xff]  }
 0x204   : > { %16119 = vmatprep.subr.bf16.mxu0 %v17714_v10 }
 0x205   : > { %16140 = vmatpush3.bf16.msra.mxu1 %v17713_v9  ;;  %v17761_v9 = vld [vmem:[%s18555_s6 + $0x10f0] sm:$0xff]  }
 0x206   : > { %16141 = vmatprep.subr.bf16.mxu1 %v17716_v12 }
 0x207   : > { %16120 = vmatpush3.bf16.msra.mxu0 %v17715_v11 }
 0x208   : > { %16121 = vmatprep.subr.bf16.mxu0 %v17718_v14  ;;  %v17763_v14 = vld [vmem:[%s18555_s6 + $0x1078] sm:$0xff]  }
 0x209   : > { %16142 = vmatpush3.bf16.msra.mxu1 %v17717_v13  ;;  %v17762_v13 = vld [vmem:[%s18555_s6 + $0x10b0] sm:$0xff]  }
 0x20a   : > { %16143 = vmatprep.subr.bf16.mxu1 %v17720_v16 }
 0x20b   : > { %16122 = vmatpush3.bf16.msra.mxu0 %v17719_v15 }
 0x20c   : > { %16123 = vmatprep.subr.bf16.mxu0 %v17722_v18 }
 0x20d   : > { %v15821_v23 = vpop.f32.mrb[32].mxu0  ;;  %16144 = vmatpush3.bf16.msra.mxu1 %v17721_v17 }
 0x20e   : > { %v15822_v25 = vpop.f32.mrb[33].mxu0  ;;  %16145 = vmatprep.subr.bf16.mxu1 %v17724_v20  ;;  %v312_v20 = vld [vmem:[%s18550_s27 + $0x40] sm:$0xff] }
 0x20f   : > { %v15823_v27 = vadd.f32 %v15822_v25, %v15821_v23  ;;  %v15824_v28 = vpop.f32.mrb[34].mxu0  ;;  %v15843_v29 = vpop.f32.mrb[32].mxu1  ;;  %16124 = vmatpush3.bf16.msra.mxu0 %v17723_v19  ;;  %v17764_v19 = vld [vmem:[%s18555_s6 + $0x1038] sm:$0xff]   ;;  %v3141_v23 = vrot.slane %v312_v20, %v18593_v42  ;;  %v3134_v25 = vcombine.high %v312_v20, %v312_v20  ;;  %v17801_v20 = vld [vmem:[%s18555_s6 + $0x1200] sm:$0xff]  }
 0x210   : > { %v15825_v33 = vpop.f32.mrb[35].mxu0  ;;  %v15844_v34 = vpop.f32.mrb[33].mxu1  ;;  %16125 = vmatprep.subr.bf16.mxu0 %v17726_v22  ;;  %v17765_v22 = vld [vmem:[%s18555_s6 + $0x10f8] sm:$0xff]  }
 0x211   : > { %v11696_v35 = vadd.f32 %v15823_v27, %v19149_v54  ;;  %v15845_v30 = vadd.f32 %v15844_v34, %v15843_v29  ;;  %16146 = vmatpush3.bf16.msra.mxu1 %v17725_v21  ;;  %v15846_v37 = vpop.f32.mrb[34].mxu1  ;;  %v17743_v54 = vld [vmem:[%s18555_s6 + $0x1050] sm:$0xff]   ;;  %v17766_v27 = vld [vmem:[%s18555_s6 + $0x10b8] sm:$0xff]   ;;  %v3149_v28 = vcombine.high %v3141_v23, %v3141_v23  ;;  %v3157_v29 = vrot.slane %v3141_v23, %v18593_v42  ;;  %v17768_v33 = vld [vmem:[%s18555_s6 + $0x1100] sm:$0xff]  }
 0x212   : > { %16147 = vmatprep.subr.bf16.mxu1 %v17728_v26  ;;  %v15847_v39 = vpop.f32.mrb[35].mxu1 }
 0x213   : > { %v19189_v40 = vadd.f32 %v15845_v30, %v11696_v35  ;;  %16126 = vmatpush3.bf16.msra.mxu0 %v17727_v24  ;;  %v3171_v34 = vrot.slane %v3149_v28, %v18593_v42  ;;  %v17769_v35 = vld [vmem:[%s18555_s6 + $0x11c0] sm:$0xff]   ;;  %v17771_v39 = vld [vmem:[%s18555_s6 + $0x1148] sm:$0xff]   ;;  %v17808_v28 = vld [vmem:[%s18555_s6 + $0x1250] sm:$0xff]  }
 0x214   : > { %16127 = vmatprep.subr.bf16.mxu0 %v17730_v32  ;;  %v19234_v32 = vrot.slane %v3134_v25, %v18593_v42  ;;  %v17805_v25 = vld [vmem:[%s18555_s6 + $0x1208] sm:$0xff]  }
 0x215   : > { %16148 = vmatpush3.bf16.msra.mxu1 %v17729_v31  ;;  %v17767_v31 = vld [vmem:[%s18555_s6 + $0x1140] sm:$0xff]   ;;  %v3181_v37 = vcombine.high %v3171_v34, %v3171_v34 }
 0x216   : > { %16149 = vmatprep.subr.bf16.mxu1 %v17732_v38  ;;  %v3150_v30 = vcombine.high %v19234_v32, %v19234_v32  ;;  %v3179_v38 = vcombine.high %v3157_v29, %v3157_v29 }
 0x217   : > { %16128 = vmatpush3.bf16.msra.mxu0 %v17731_v36  ;;  %v17770_v36 = vld [vmem:[%s18555_s6 + $0x1180] sm:$0xff]  }
 0x218   : > { %16157 = vmatprep.subr.bf16.mxu0 %v17735_v44 }
 0x219   : > { %16150 = vmatpush3.bf16.msra.mxu1 %v17734_v41  ;;  %v17772_v41 = vld [vmem:[%s18555_s6 + $0x1108] sm:$0xff]  }
 0x21a   : > { %12254 = vmatmul.mubr.bf16.vlgmr.msra.gmra.mrb[60].mxu0 %v3115_v43  ;;  %16179 = vmatprep.subr.bf16.mxu1 %v17737_v46  ;;  %v17773_v43 = vld [vmem:[%s18555_s6 + $0x11c8] sm:$0xff]   ;;  %v17775_v46 = vld [vmem:[%s18555_s6 + $0x1150] sm:$0xff]  }
 0x21b   : > { %16158 = vmatpush3.bf16.msra.mxu0 %v17736_v45  ;;  %12333 = vmatprep.mubr.bf16.mxu0 %v3171_v34  ;;  %v17774_v45 = vld [vmem:[%s18555_s6 + $0x1188] sm:$0xff]   ;;  %v17813_v34 = vld [vmem:[%s18555_s6 + $0x1218] sm:$0xff]  }
 0x21c   : > { %12294 = vmatmul.mubr.bf16.vlgmr.msra.gmra.mrb[60].mxu1 %v3131_v48  ;;  %16159 = vmatprep.subr.bf16.mxu0 %v17739_v49  ;;  %v17777_v48 = vld [vmem:[%s18555_s6 + $0x11d0] sm:$0xff]  }
 0x21d   : > { %16180 = vmatpush3.bf16.msra.mxu1 %v17738_v47  ;;  %12373 = vmatprep.mubr.bf16.mxu1 %v3181_v37  ;;  %v17776_v47 = vld [vmem:[%s18555_s6 + $0x1110] sm:$0xff]   ;;  %v17817_v37 = vld [vmem:[%s18555_s6 + $0x1220] sm:$0xff]  }
 0x21e   : > { %16181 = vmatprep.subr.bf16.mxu1 %v17741_v52  ;;  %v17778_v49 = vld [vmem:[%s18555_s6 + $0x1190] sm:$0xff]   ;;  %v17780_v52 = vld [vmem:[%s18555_s6 + $0x1118] sm:$0xff]  }
 0x21f   : > { %16160 = vmatpush3.bf16.msra.mxu0 %v17740_v50  ;;  %v17779_v50 = vld [vmem:[%s18555_s6 + $0x1158] sm:$0xff]  }
 0x220   : > { %16161 = vmatprep.subr.bf16.mxu0 %v17743_v54  ;;  %v17782_v54 = vld [vmem:[%s18555_s6 + $0x1198] sm:$0xff]  }
 0x221   : > { %16182 = vmatpush3.bf16.msra.mxu1 %v17742_v53  ;;  %v17781_v53 = vld [vmem:[%s18555_s6 + $0x11d8] sm:$0xff]  }
 0x222   : > { %16183 = vmatprep.subr.bf16.mxu1 %v17745_v56  ;;  %v17784_v56 = vld [vmem:[%s18555_s6 + $0x1120] sm:$0xff]  }
 0x223   : > { %16162 = vmatpush3.bf16.msra.mxu0 %v17744_v55  ;;  %v17783_v55 = vld [vmem:[%s18555_s6 + $0x1160] sm:$0xff]  }
 0x224   : > { %16163 = vmatprep.subr.bf16.mxu0 %v17747_v58  ;;  %v17786_v58 = vld [vmem:[%s18555_s6 + $0x11a0] sm:$0xff]  }
 0x225   : > { %16184 = vmatpush3.bf16.msra.mxu1 %v17746_v57  ;;  %v17785_v57 = vld [vmem:[%s18555_s6 + $0x11e0] sm:$0xff]  }
 0x226   : > { %16185 = vmatprep.subr.bf16.mxu1 %v17749_v60  ;;  %v17788_v60 = vld [vmem:[%s18555_s6 + $0x1128] sm:$0xff]  }
 0x227   : > { %16164 = vmatpush3.bf16.msra.mxu0 %v17748_v59  ;;  %v17787_v59 = vld [vmem:[%s18555_s6 + $0x1168] sm:$0xff]  }
 0x228   : > { %16165 = vmatprep.subr.bf16.mxu0 %v17751_v61  ;;  %v17790_v61 = vld [vmem:[%s18555_s6 + $0x11a8] sm:$0xff]  }
 0x229   : > { %16186 = vmatpush3.bf16.msra.mxu1 %v17750_v51  ;;  %v17789_v51 = vld [vmem:[%s18555_s6 + $0x11e8] sm:$0xff]  }
 0x22a   : > { %16187 = vmatprep.subr.bf16.mxu1 %v17753_v63 }
 0x22b   : > { %16166 = vmatpush3.bf16.msra.mxu0 %v17752_v62  ;;  %v17791_v62 = vld [vmem:[%s18555_s6 + $0x1170] sm:$0xff]  }
 0x22c   : > { %16167 = vmatprep.subr.bf16.mxu0 %v17755_v1 }
 0x22d   : > { %v15865_v6 = vpop.f32.mrb[36].mxu0  ;;  %16188 = vmatpush3.bf16.msra.mxu1 %v17754_v0  ;;  %v17792_v0 = vld [vmem:[%s18555_s6 + $0x1130] sm:$0xff]  }
 0x22e   : > { %v15866_v8 = vpop.f32.mrb[37].mxu0  ;;  %16189 = vmatprep.subr.bf16.mxu1 %v17757_v3 }
 0x22f   : > { %v15867_v10 = vadd.f32 %v15866_v8, %v15865_v6  ;;  %v15868_v11 = vpop.f32.mrb[38].mxu0  ;;  %v15887_v12 = vpop.f32.mrb[36].mxu1  ;;  %16168 = vmatpush3.bf16.msra.mxu0 %v17756_v2  ;;  %v17793_v2 = vld [vmem:[%s18555_s6 + $0x11f0] sm:$0xff]  }
 0x230   : > { %v15869_v15 = vpop.f32.mrb[39].mxu0  ;;  %v15888_v16 = vpop.f32.mrb[37].mxu1  ;;  %16169 = vmatprep.subr.bf16.mxu0 %v17759_v5  ;;  %v17794_v6 = vld [vmem:[%s18555_s6 + $0x11b0] sm:$0xff]  }
 0x231   : > { %v11776_v17 = vadd.f32 %v15867_v10, %v19189_v40  ;;  %v15889_v18 = vadd.f32 %v15888_v16, %v15887_v12  ;;  %16190 = vmatpush3.bf16.msra.mxu1 %v17758_v4  ;;  %v15890_v21 = vpop.f32.mrb[38].mxu1  ;;  %v3178_v40 = vrot.slane %v3150_v30, %v18593_v42  ;;  %v17796_v12 = vld [vmem:[%s18555_s6 + $0x1138] sm:$0xff]  }
 0x232   : > { %16191 = vmatprep.subr.bf16.mxu1 %v17761_v9  ;;  %v15891_v24 = vpop.f32.mrb[39].mxu1  ;;  %v17802_v21 = vld [vmem:[%s18555_s6 + $0x12c0] sm:$0xff]   ;;  %v17815_v30 = vld [vmem:[%s18555_s6 + $0x1298] sm:$0xff]  }
 0x233   : > { %v19228_v26 = vadd.f32 %v15889_v18, %v11776_v17  ;;  %16170 = vmatpush3.bf16.msra.mxu0 %v17760_v7  ;;  %v3182_v44 = vcombine.high %v3178_v40, %v3178_v40  ;;  %v17795_v7 = vld [vmem:[%s18555_s6 + $0x1178] sm:$0xff]   ;;  %v3164_v18 = vrot.slane %v19234_v32, %v18593_v42  ;;  %v17804_v24 = vld [vmem:[%s18555_s6 + $0x1248] sm:$0xff]   ;;  %v17811_v32 = vld [vmem:[%s18555_s6 + $0x1290] sm:$0xff]  }
 0x234   : > { %16171 = vmatprep.subr.bf16.mxu0 %v17763_v14  ;;  %v17797_v14 = vld [vmem:[%s18555_s6 + $0x11f8] sm:$0xff]  }
 0x235   : > { %16192 = vmatpush3.bf16.msra.mxu1 %v17762_v13  ;;  %v17799_v17 = vld [vmem:[%s18555_s6 + $0x11b8] sm:$0xff]   ;;  %v3180_v23 = vcombine.high %v3164_v18, %v3164_v18 }
 0x236   : > { %16193 = vmatprep.subr.bf16.mxu1 %v17765_v22  ;;  %v17803_v22 = vld [vmem:[%s18555_s6 + $0x1280] sm:$0xff]  }
 0x237   : > { %16172 = vmatpush3.bf16.msra.mxu0 %v17764_v19  ;;  %v17800_v19 = vld [vmem:[%s18555_s6 + $0x1240] sm:$0xff]  }
 0x238   : > { %16201 = vmatprep.subr.bf16.mxu0 %v17767_v31  ;;  %v17810_v31 = vld [vmem:[%s18555_s6 + $0x12d0] sm:$0xff]  }
 0x239   : > { %16194 = vmatpush3.bf16.msra.mxu1 %v17766_v27  ;;  %v17807_v27 = vld [vmem:[%s18555_s6 + $0x1288] sm:$0xff]  }
 0x23a   : > { %12334 = vmatmul.mubr.bf16.vlgmr.msra.gmra.mrb[64].mxu0 %v3157_v29  ;;  %16223 = vmatprep.subr.bf16.mxu1 %v17769_v35  ;;  %v17809_v29 = vld [vmem:[%s18555_s6 + $0x1210] sm:$0xff]   ;;  %v17814_v35 = vld [vmem:[%s18555_s6 + $0x12d8] sm:$0xff]  }
 0x23b   : > { %16202 = vmatpush3.bf16.msra.mxu0 %v17768_v33  ;;  %12413 = vmatprep.mubr.bf16.mxu0 %v3178_v40  ;;  %v17812_v33 = vld [vmem:[%s18555_s6 + $0x1258] sm:$0xff]   ;;  %v17820_v40 = vld [vmem:[%s18555_s6 + $0x1268] sm:$0xff]  }
 0x23c   : > { %12374 = vmatmul.mubr.bf16.vlgmr.msra.gmra.mrb[64].mxu1 %v3179_v38  ;;  %16203 = vmatprep.subr.bf16.mxu0 %v17771_v39  ;;  %v17818_v38 = vld [vmem:[%s18555_s6 + $0x12e0] sm:$0xff]  }
 0x23d   : > { %16224 = vmatpush3.bf16.msra.mxu1 %v17770_v36  ;;  %12453 = vmatprep.mubr.bf16.mxu1 %v3182_v44  ;;  %v17816_v36 = vld [vmem:[%s18555_s6 + $0x1260] sm:$0xff]   ;;  %v17823_v44 = vld [vmem:[%s18555_s6 + $0x12a8] sm:$0xff]  }
 0x23e   : > { %16225 = vmatprep.subr.bf16.mxu1 %v17773_v43  ;;  %v17819_v39 = vld [vmem:[%s18555_s6 + $0x12a0] sm:$0xff]   ;;  %v17822_v43 = vld [vmem:[%s18555_s6 + $0x12e8] sm:$0xff]  }
 0x23f   : > { %16204 = vmatpush3.bf16.msra.mxu0 %v17772_v41  ;;  %v17821_v41 = vld [vmem:[%s18555_s6 + $0x1228] sm:$0xff]  }
 0x240   : > { %16205 = vmatprep.subr.bf16.mxu0 %v17775_v46 }
 0x241   : > { %16226 = vmatpush3.bf16.msra.mxu1 %v17774_v45  ;;  %v17824_v45 = vld [vmem:[%s18555_s6 + $0x1270] sm:$0xff]  }
 0x242   : > { %16227 = vmatprep.subr.bf16.mxu1 %v17777_v48 }
 0x243   : > { %16206 = vmatpush3.bf16.msra.mxu0 %v17776_v47  ;;  %v17825_v47 = vld [vmem:[%s18555_s6 + $0x1230] sm:$0xff]  }
 0x244   : > { %16207 = vmatprep.subr.bf16.mxu0 %v17779_v50 }
 0x245   : > { %16228 = vmatpush3.bf16.msra.mxu1 %v17778_v49  ;;  %v17826_v49 = vld [vmem:[%s18555_s6 + $0x12f0] sm:$0xff]  }
 0x246   : > { %16229 = vmatprep.subr.bf16.mxu1 %v17781_v53 }
 0x247   : > { %16208 = vmatpush3.bf16.msra.mxu0 %v17780_v52 }
 0x248   : > { %16209 = vmatprep.subr.bf16.mxu0 %v17783_v55  ;;  %v17828_v55 = vld [vmem:[%s18555_s6 + $0x1278] sm:$0xff]  }
 0x249   : > { %16230 = vmatpush3.bf16.msra.mxu1 %v17782_v54  ;;  %v17827_v54 = vld [vmem:[%s18555_s6 + $0x12b0] sm:$0xff]  }
 0x24a   : > { %16231 = vmatprep.subr.bf16.mxu1 %v17785_v57 }
 0x24b   : > { %16210 = vmatpush3.bf16.msra.mxu0 %v17784_v56 }
 0x24c   : > { %16211 = vmatprep.subr.bf16.mxu0 %v17787_v59 }
 0x24d   : > { %v15909_v63 = vpop.f32.mrb[40].mxu0  ;;  %16232 = vmatpush3.bf16.msra.mxu1 %v17786_v58 }
 0x24e   : > { %v15910_v1 = vpop.f32.mrb[41].mxu0  ;;  %16233 = vmatprep.subr.bf16.mxu1 %v17789_v51  ;;  %v17830_v51 = vld [vmem:[%s18555_s6 + $0x12f8] sm:$0xff]  }
 0x24f   : > { %v15911_v3 = vadd.f32 %v15910_v1, %v15909_v63  ;;  %v15912_v4 = vpop.f32.mrb[42].mxu0  ;;  %v15931_v5 = vpop.f32.mrb[40].mxu1  ;;  %16212 = vmatpush3.bf16.msra.mxu0 %v17788_v60  ;;  %v17829_v60 = vld [vmem:[%s18555_s6 + $0x1238] sm:$0xff]  }
 0x250   : > { %v15913_v8 = vpop.f32.mrb[43].mxu0  ;;  %v15932_v9 = vpop.f32.mrb[41].mxu1  ;;  %16213 = vmatprep.subr.bf16.mxu0 %v17791_v62  ;;  %v313_v62 = vld [vmem:[%s18550_s27 + $0x48] sm:$0xff]  ;;  %v17832_v4 = vld [vmem:[%s18555_s6 + $0x1340] sm:$0xff]  }
 0x251   : > { %v11856_v10 = vadd.f32 %v15911_v3, %v19228_v26  ;;  %v15933_v11 = vadd.f32 %v15932_v9, %v15931_v5  ;;  %16234 = vmatpush3.bf16.msra.mxu1 %v17790_v61  ;;  %v15934_v13 = vpop.f32.mrb[42].mxu1  ;;  %v17806_v26 = vld [vmem:[%s18555_s6 + $0x12c8] sm:$0xff]   ;;  %v3190_v1 = vrot.slane %v313_v62, %v18593_v42  ;;  %v3183_v3 = vcombine.high %v313_v62, %v313_v62  ;;  %v17834_v9 = vld [vmem:[%s18555_s6 + $0x13c0] sm:$0xff]  }
 0x252   : > { %16235 = vmatprep.subr.bf16.mxu1 %v17793_v2  ;;  %v15935_v15 = vpop.f32.mrb[43].mxu1  ;;  %v17831_v2 = vld [vmem:[%s18555_s6 + $0x12b8] sm:$0xff]   ;;  %v17868_v62 = vld [vmem:[%s18555_s6 + $0x1480] sm:$0xff]  }
 0x253   : > { %v19271_v16 = vadd.f32 %v15933_v11, %v11856_v10  ;;  %16214 = vmatpush3.bf16.msra.mxu0 %v17792_v0  ;;  %v3198_v5 = vcombine.high %v3190_v1, %v3190_v1  ;;  %v19317_v8 = vrot.slane %v3183_v3, %v18593_v42  ;;  %v17835_v11 = vld [vmem:[%s18555_s6 + $0x1380] sm:$0xff]   ;;  %v17872_v3 = vld [vmem:[%s18555_s6 + $0x1488] sm:$0xff]  }
 0x254   : > { %16215 = vmatprep.subr.bf16.mxu0 %v17795_v7  ;;  %v17833_v7 = vld [vmem:[%s18555_s6 + $0x1300] sm:$0xff]  }
 0x255   : > { %16236 = vmatpush3.bf16.msra.mxu1 %v17794_v6  ;;  %v3206_v6 = vrot.slane %v3190_v1, %v18593_v42  ;;  %v3220_v10 = vrot.slane %v3198_v5, %v18593_v42  ;;  %v17870_v1 = vld [vmem:[%s18555_s6 + $0x1408] sm:$0xff]   ;;  %v17874_v5 = vld [vmem:[%s18555_s6 + $0x1410] sm:$0xff]  }
 0x256   : > { %16237 = vmatprep.subr.bf16.mxu1 %v17797_v14  ;;  %v17836_v14 = vld [vmem:[%s18555_s6 + $0x1348] sm:$0xff]  }
 0x257   : > { %16216 = vmatpush3.bf16.msra.mxu0 %v17796_v12  ;;  %v3199_v12 = vcombine.high %v19317_v8, %v19317_v8  ;;  %v3228_v13 = vcombine.high %v3206_v6, %v3206_v6  ;;  %v3230_v15 = vcombine.high %v3220_v10, %v3220_v10 }
 0x258   : > { %16245 = vmatprep.subr.bf16.mxu0 %v17800_v19  ;;  %v17839_v19 = vld [vmem:[%s18555_s6 + $0x1388] sm:$0xff]  }
 0x259   : > { %16238 = vmatpush3.bf16.msra.mxu1 %v17799_v17  ;;  %v3227_v17 = vrot.slane %v3199_v12, %v18593_v42  ;;  %v17881_v12 = vld [vmem:[%s18555_s6 + $0x1460] sm:$0xff]  }
 0x25a   : > { %12414 = vmatmul.mubr.bf16.vlgmr.msra.gmra.mrb[68].mxu0 %v3164_v18  ;;  %16267 = vmatprep.subr.bf16.mxu1 %v17802_v21  ;;  %v17838_v18 = vld [vmem:[%s18555_s6 + $0x13c8] sm:$0xff]   ;;  %v17840_v21 = vld [vmem:[%s18555_s6 + $0x1350] sm:$0xff]  }
 0x25b   : > { %16246 = vmatpush3.bf16.msra.mxu0 %v17801_v20  ;;  %12493 = vmatprep.mubr.bf16.mxu0 %v3220_v10  ;;  %v3231_v20 = vcombine.high %v3227_v17, %v3227_v17  ;;  %v17879_v10 = vld [vmem:[%s18555_s6 + $0x14d8] sm:$0xff]  }
 0x25c   : > { %12454 = vmatmul.mubr.bf16.vlgmr.msra.gmra.mrb[68].mxu1 %v3180_v23  ;;  %16247 = vmatprep.subr.bf16.mxu0 %v17804_v24  ;;  %v17842_v23 = vld [vmem:[%s18555_s6 + $0x13d0] sm:$0xff]  }
 0x25d   : > { %16268 = vmatpush3.bf16.msra.mxu1 %v17803_v22  ;;  %12533 = vmatprep.mubr.bf16.mxu1 %v3230_v15  ;;  %v17841_v22 = vld [vmem:[%s18555_s6 + $0x1310] sm:$0xff]   ;;  %v17884_v15 = vld [vmem:[%s18555_s6 + $0x14a0] sm:$0xff]  }
 0x25e   : > { %16269 = vmatprep.subr.bf16.mxu1 %v17806_v26  ;;  %v17843_v24 = vld [vmem:[%s18555_s6 + $0x1390] sm:$0xff]   ;;  %v17845_v26 = vld [vmem:[%s18555_s6 + $0x1318] sm:$0xff]  }
 0x25f   : > { %16248 = vmatpush3.bf16.msra.mxu0 %v17805_v25  ;;  %v17844_v25 = vld [vmem:[%s18555_s6 + $0x1358] sm:$0xff]  }
 0x260   : > { %16249 = vmatprep.subr.bf16.mxu0 %v17808_v28  ;;  %v17847_v28 = vld [vmem:[%s18555_s6 + $0x1398] sm:$0xff]  }
 0x261   : > { %16270 = vmatpush3.bf16.msra.mxu1 %v17807_v27  ;;  %v17846_v27 = vld [vmem:[%s18555_s6 + $0x13d8] sm:$0xff]  }
 0x262   : > { %16271 = vmatprep.subr.bf16.mxu1 %v17810_v31  ;;  %v17849_v31 = vld [vmem:[%s18555_s6 + $0x1320] sm:$0xff]  }
 0x263   : > { %16250 = vmatpush3.bf16.msra.mxu0 %v17809_v29  ;;  %v17848_v29 = vld [vmem:[%s18555_s6 + $0x1360] sm:$0xff]  }
 0x264   : > { %16251 = vmatprep.subr.bf16.mxu0 %v17812_v33  ;;  %v17851_v33 = vld [vmem:[%s18555_s6 + $0x13a0] sm:$0xff]  }
 0x265   : > { %16272 = vmatpush3.bf16.msra.mxu1 %v17811_v32  ;;  %v17850_v32 = vld [vmem:[%s18555_s6 + $0x13e0] sm:$0xff]  }
 0x266   : > { %16273 = vmatprep.subr.bf16.mxu1 %v17814_v35  ;;  %v17853_v35 = vld [vmem:[%s18555_s6 + $0x1328] sm:$0xff]  }
 0x267   : > { %16252 = vmatpush3.bf16.msra.mxu0 %v17813_v34  ;;  %v17852_v34 = vld [vmem:[%s18555_s6 + $0x1368] sm:$0xff]  }
 0x268   : > { %16253 = vmatprep.subr.bf16.mxu0 %v17816_v36  ;;  %v17855_v36 = vld [vmem:[%s18555_s6 + $0x13a8] sm:$0xff]  }
 0x269   : > { %16274 = vmatpush3.bf16.msra.mxu1 %v17815_v30  ;;  %v17854_v30 = vld [vmem:[%s18555_s6 + $0x13e8] sm:$0xff]  }
 0x26a   : > { %16275 = vmatprep.subr.bf16.mxu1 %v17818_v38 }
 0x26b   : > { %16254 = vmatpush3.bf16.msra.mxu0 %v17817_v37  ;;  %v17856_v37 = vld [vmem:[%s18555_s6 + $0x1370] sm:$0xff]  }
 0x26c   : > { %16255 = vmatprep.subr.bf16.mxu0 %v17820_v40 }
 0x26d   : > { %v15953_v46 = vpop.f32.mrb[44].mxu0  ;;  %16276 = vmatpush3.bf16.msra.mxu1 %v17819_v39  ;;  %v17857_v39 = vld [vmem:[%s18555_s6 + $0x1330] sm:$0xff]  }
 0x26e   : > { %v15954_v48 = vpop.f32.mrb[45].mxu0  ;;  %16277 = vmatprep.subr.bf16.mxu1 %v17822_v43 }
 0x26f   : > { %v15955_v50 = vadd.f32 %v15954_v48, %v15953_v46  ;;  %v15956_v52 = vpop.f32.mrb[46].mxu0  ;;  %v15975_v53 = vpop.f32.mrb[44].mxu1  ;;  %16256 = vmatpush3.bf16.msra.mxu0 %v17821_v41  ;;  %v17858_v41 = vld [vmem:[%s18555_s6 + $0x13f0] sm:$0xff]  }
 0x270   : > { %v15957_v56 = vpop.f32.mrb[47].mxu0  ;;  %v15976_v57 = vpop.f32.mrb[45].mxu1  ;;  %16257 = vmatprep.subr.bf16.mxu0 %v17824_v45  ;;  %v17859_v46 = vld [vmem:[%s18555_s6 + $0x13b0] sm:$0xff]  }
 0x271   : > { %v11936_v58 = vadd.f32 %v15955_v50, %v19271_v16  ;;  %v15977_v59 = vadd.f32 %v15976_v57, %v15975_v53  ;;  %16278 = vmatpush3.bf16.msra.mxu1 %v17823_v44  ;;  %v15978_v61 = vpop.f32.mrb[46].mxu1  ;;  %v17837_v16 = vld [vmem:[%s18555_s6 + $0x1308] sm:$0xff]   ;;  %v17861_v53 = vld [vmem:[%s18555_s6 + $0x1338] sm:$0xff]  }
 0x272   : > { %16279 = vmatprep.subr.bf16.mxu1 %v17826_v49  ;;  %v15979_v63 = vpop.f32.mrb[47].mxu1  ;;  %v17867_v61 = vld [vmem:[%s18555_s6 + $0x14c0] sm:$0xff]  }
 0x273   : > { %v19309_v0 = vadd.f32 %v15977_v59, %v11936_v58  ;;  %16258 = vmatpush3.bf16.msra.mxu0 %v17825_v47  ;;  %v17860_v47 = vld [vmem:[%s18555_s6 + $0x1378] sm:$0xff]   ;;  %v3213_v59 = vrot.slane %v19317_v8, %v18593_v42 }
 0x274   : > { %16259 = vmatprep.subr.bf16.mxu0 %v17828_v55  ;;  %v17862_v55 = vld [vmem:[%s18555_s6 + $0x13f8] sm:$0xff]  }
 0x275   : > { %16280 = vmatpush3.bf16.msra.mxu1 %v17827_v54  ;;  %v17864_v58 = vld [vmem:[%s18555_s6 + $0x13b8] sm:$0xff]   ;;  %v3229_v63 = vcombine.high %v3213_v59, %v3213_v59 }
 0x276   : > { %16281 = vmatprep.subr.bf16.mxu1 %v17830_v51  ;;  %v17866_v51 = vld [vmem:[%s18555_s6 + $0x1400] sm:$0xff]   ;;  %v17877_v8 = vld [vmem:[%s18555_s6 + $0x1458] sm:$0xff]  }
 0x277   : > { %16260 = vmatpush3.bf16.msra.mxu0 %v17829_v60  ;;  %v17865_v60 = vld [vmem:[%s18555_s6 + $0x1440] sm:$0xff]  }
 0x278   : > { %16289 = vmatprep.subr.bf16.mxu0 %v17832_v4  ;;  %v17873_v4 = vld [vmem:[%s18555_s6 + $0x1450] sm:$0xff]  }
 0x279   : > { %16282 = vmatpush3.bf16.msra.mxu1 %v17831_v2  ;;  %v17871_v2 = vld [vmem:[%s18555_s6 + $0x14c8] sm:$0xff]  }
 0x27a   : > { %12494 = vmatmul.mubr.bf16.vlgmr.msra.gmra.mrb[72].mxu0 %v3206_v6  ;;  %16311 = vmatprep.subr.bf16.mxu1 %v17834_v9  ;;  %v17875_v6 = vld [vmem:[%s18555_s6 + $0x14d0] sm:$0xff]   ;;  %v17878_v9 = vld [vmem:[%s18555_s6 + $0x1418] sm:$0xff]  }
 0x27b   : > { %16290 = vmatpush3.bf16.msra.mxu0 %v17833_v7  ;;  %12573 = vmatprep.mubr.bf16.mxu0 %v3227_v17  ;;  %v17876_v7 = vld [vmem:[%s18555_s6 + $0x1490] sm:$0xff]   ;;  %v17886_v17 = vld [vmem:[%s18555_s6 + $0x1428] sm:$0xff]  }
 0x27c   : > { %12534 = vmatmul.mubr.bf16.vlgmr.msra.gmra.mrb[72].mxu1 %v3228_v13  ;;  %16291 = vmatprep.subr.bf16.mxu0 %v17836_v14  ;;  %v17882_v13 = vld [vmem:[%s18555_s6 + $0x1420] sm:$0xff]  }
 0x27d   : > { %16312 = vmatpush3.bf16.msra.mxu1 %v17835_v11  ;;  %12613 = vmatprep.mubr.bf16.mxu1 %v3231_v20  ;;  %v17880_v11 = vld [vmem:[%s18555_s6 + $0x1498] sm:$0xff]   ;;  %v17883_v14 = vld [vmem:[%s18555_s6 + $0x14e0] sm:$0xff]   ;;  %v17889_v20 = vld [vmem:[%s18555_s6 + $0x1470] sm:$0xff]  }
 0x27e   : > { %16313 = vmatprep.subr.bf16.mxu1 %v17838_v18  ;;  %v17887_v18 = vld [vmem:[%s18555_s6 + $0x14e8] sm:$0xff]  }
 0x27f   : > { %16292 = vmatpush3.bf16.msra.mxu0 %v17837_v16  ;;  %v17885_v16 = vld [vmem:[%s18555_s6 + $0x1468] sm:$0xff]  }
 0x280   : > { %16293 = vmatprep.subr.bf16.mxu0 %v17840_v21 }
 0x281   : > { %16314 = vmatpush3.bf16.msra.mxu1 %v17839_v19  ;;  %v17888_v19 = vld [vmem:[%s18555_s6 + $0x14a8] sm:$0xff]  }
 0x282   : > { %16315 = vmatprep.subr.bf16.mxu1 %v17842_v23 }
 0x283   : > { %16294 = vmatpush3.bf16.msra.mxu0 %v17841_v22  ;;  %v17890_v22 = vld [vmem:[%s18555_s6 + $0x1430] sm:$0xff]  }
 0x284   : > { %16295 = vmatprep.subr.bf16.mxu0 %v17844_v25 }
 0x285   : > { %16316 = vmatpush3.bf16.msra.mxu1 %v17843_v24  ;;  %v17891_v24 = vld [vmem:[%s18555_s6 + $0x14f0] sm:$0xff]  }
 0x286   : > { %16317 = vmatprep.subr.bf16.mxu1 %v17846_v27 }
 0x287   : > { %16296 = vmatpush3.bf16.msra.mxu0 %v17845_v26 }
 0x288   : > { %16297 = vmatprep.subr.bf16.mxu0 %v17848_v29  ;;  %v17893_v29 = vld [vmem:[%s18555_s6 + $0x1478] sm:$0xff]  }
 0x289   : > { %16318 = vmatpush3.bf16.msra.mxu1 %v17847_v28  ;;  %v17892_v28 = vld [vmem:[%s18555_s6 + $0x14b0] sm:$0xff]  }
 0x28a   : > { %16319 = vmatprep.subr.bf16.mxu1 %v17850_v32 }
 0x28b   : > { %16298 = vmatpush3.bf16.msra.mxu0 %v17849_v31 }
 0x28c   : > { %16299 = vmatprep.subr.bf16.mxu0 %v17852_v34 }
 0x28d   : > { %v15997_v38 = vpop.f32.mrb[48].mxu0  ;;  %16320 = vmatpush3.bf16.msra.mxu1 %v17851_v33 }
 0x28e   : > { %v15998_v40 = vpop.f32.mrb[49].mxu0  ;;  %16321 = vmatprep.subr.bf16.mxu1 %v17854_v30 }
 0x28f   : > { %v15999_v43 = vadd.f32 %v15998_v40, %v15997_v38  ;;  %v16000_v44 = vpop.f32.mrb[50].mxu0  ;;  %v16019_v45 = vpop.f32.mrb[48].mxu1  ;;  %16300 = vmatpush3.bf16.msra.mxu0 %v17853_v35  ;;  %v17894_v35 = vld [vmem:[%s18555_s6 + $0x1438] sm:$0xff]  }
 0x290   : > { %v16001_v48 = vpop.f32.mrb[51].mxu0  ;;  %v16020_v49 = vpop.f32.mrb[49].mxu1  ;;  %16301 = vmatprep.subr.bf16.mxu0 %v17856_v37  ;;  %v17897_v44 = vld [vmem:[%s18555_s6 + $0x1540] sm:$0xff]  }
 0x291   : > { %v12016_v50 = vadd.f32 %v15999_v43, %v19309_v0  ;;  %v16021_v52 = vadd.f32 %v16020_v49, %v16019_v45  ;;  %16322 = vmatpush3.bf16.msra.mxu1 %v17855_v36  ;;  %v16022_v54 = vpop.f32.mrb[50].mxu1  ;;  %v17869_v0 = vld [vmem:[%s18555_s6 + $0x1448] sm:$0xff]   ;;  %v17895_v36 = vld [vmem:[%s18555_s6 + $0x14f8] sm:$0xff]   ;;  %v17899_v48 = vld [vmem:[%s18555_s6 + $0x15c0] sm:$0xff]  }
 0x292   : > { %16323 = vmatprep.subr.bf16.mxu1 %v17858_v41  ;;  %v16023_v56 = vpop.f32.mrb[51].mxu1  ;;  %v17896_v41 = vld [vmem:[%s18555_s6 + $0x14b8] sm:$0xff]   ;;  %v17901_v54 = vld [vmem:[%s18555_s6 + $0x1548] sm:$0xff]  }
 0x293   : > { %v19353_v57 = vadd.f32 %v16021_v52, %v12016_v50  ;;  %16302 = vmatpush3.bf16.msra.mxu0 %v17857_v39  ;;  %v314_v39 = vld [vmem:[%s18550_s27 + $0x50] sm:$0xff]  ;;  %v17898_v50 = vld [vmem:[%s18555_s6 + $0x1500] sm:$0xff]  }
 0x294   : > { %16303 = vmatprep.subr.bf16.mxu0 %v17860_v47  ;;  %v3239_v40 = vrot.slane %v314_v39, %v18593_v42  ;;  %v3232_v43 = vcombine.high %v314_v39, %v314_v39  ;;  %v17900_v56 = vld [vmem:[%s18555_s6 + $0x1580] sm:$0xff]  }
 0x295   : > { %16324 = vmatpush3.bf16.msra.mxu1 %v17859_v46  ;;  %v17933_v39 = vld [vmem:[%s18555_s6 + $0x1680] sm:$0xff]  }
 0x296   : > { %16325 = vmatprep.subr.bf16.mxu1 %v17862_v55  ;;  %v3247_v45 = vcombine.high %v3239_v40, %v3239_v40  ;;  %v3255_v46 = vrot.slane %v3239_v40, %v18593_v42  ;;  %v19398_v47 = vrot.slane %v3232_v43, %v18593_v42  ;;  %v17936_v40 = vld [vmem:[%s18555_s6 + $0x16c8] sm:$0xff]   ;;  %v17938_v43 = vld [vmem:[%s18555_s6 + $0x1650] sm:$0xff]  }
 0x297   : > { %16304 = vmatpush3.bf16.msra.mxu0 %v17861_v53 }
 0x298   : > { %16333 = vmatprep.subr.bf16.mxu0 %v17865_v60  ;;  %v3269_v49 = vrot.slane %v3247_v45, %v18593_v42  ;;  %v3248_v52 = vcombine.high %v19398_v47, %v19398_v47  ;;  %v3277_v53 = vcombine.high %v3255_v46, %v3255_v46  ;;  %v17940_v45 = vld [vmem:[%s18555_s6 + $0x16d0] sm:$0xff]  }
 0x299   : > { %16326 = vmatpush3.bf16.msra.mxu1 %v17864_v58  ;;  %v17903_v58 = vld [vmem:[%s18555_s6 + $0x15c8] sm:$0xff]  }
 0x29a   : > { %12574 = vmatmul.mubr.bf16.vlgmr.msra.gmra.mrb[76].mxu0 %v3213_v59  ;;  %16355 = vmatprep.subr.bf16.mxu1 %v17867_v61  ;;  %v3279_v55 = vcombine.high %v3269_v49, %v3269_v49  ;;  %v17902_v59 = vld [vmem:[%s18555_s6 + $0x1508] sm:$0xff]  }
 0x29b   : > { %16334 = vmatpush3.bf16.msra.mxu0 %v17866_v51  ;;  %12653 = vmatprep.mubr.bf16.mxu0 %v3269_v49  ;;  %v17905_v51 = vld [vmem:[%s18555_s6 + $0x1550] sm:$0xff]   ;;  %v17904_v61 = vld [vmem:[%s18555_s6 + $0x1588] sm:$0xff]   ;;  %v17944_v49 = vld [vmem:[%s18555_s6 + $0x16d8] sm:$0xff]  }
 0x29c   : > { %12614 = vmatmul.mubr.bf16.vlgmr.msra.gmra.mrb[76].mxu1 %v3229_v63  ;;  %16335 = vmatprep.subr.bf16.mxu0 %v17869_v0  ;;  %v17906_v63 = vld [vmem:[%s18555_s6 + $0x1510] sm:$0xff]   ;;  %v17909_v0 = vld [vmem:[%s18555_s6 + $0x1558] sm:$0xff]  }
 0x29d   : > { %16356 = vmatpush3.bf16.msra.mxu1 %v17868_v62  ;;  %12693 = vmatprep.mubr.bf16.mxu1 %v3279_v55  ;;  %v17907_v62 = vld [vmem:[%s18555_s6 + $0x15d0] sm:$0xff]   ;;  %v17947_v55 = vld [vmem:[%s18555_s6 + $0x1620] sm:$0xff]  }
 0x29e   : > { %16357 = vmatprep.subr.bf16.mxu1 %v17871_v2  ;;  %v17911_v2 = vld [vmem:[%s18555_s6 + $0x15d8] sm:$0xff]  }
 0x29f   : > { %16336 = vmatpush3.bf16.msra.mxu0 %v17870_v1  ;;  %v17908_v1 = vld [vmem:[%s18555_s6 + $0x1590] sm:$0xff]  }
 0x2a0   : > { %16337 = vmatprep.subr.bf16.mxu0 %v17873_v4  ;;  %v17913_v4 = vld [vmem:[%s18555_s6 + $0x1560] sm:$0xff]  }
 0x2a1   : > { %16358 = vmatpush3.bf16.msra.mxu1 %v17872_v3  ;;  %v17910_v3 = vld [vmem:[%s18555_s6 + $0x1518] sm:$0xff]  }
 0x2a2   : > { %16359 = vmatprep.subr.bf16.mxu1 %v17875_v6  ;;  %v17915_v6 = vld [vmem:[%s18555_s6 + $0x15e0] sm:$0xff]  }
 0x2a3   : > { %16338 = vmatpush3.bf16.msra.mxu0 %v17874_v5  ;;  %v17912_v5 = vld [vmem:[%s18555_s6 + $0x1598] sm:$0xff]  }
 0x2a4   : > { %16339 = vmatprep.subr.bf16.mxu0 %v17877_v8  ;;  %v17917_v8 = vld [vmem:[%s18555_s6 + $0x1568] sm:$0xff]  }
 0x2a5   : > { %16360 = vmatpush3.bf16.msra.mxu1 %v17876_v7  ;;  %v17914_v7 = vld [vmem:[%s18555_s6 + $0x1520] sm:$0xff]  }
 0x2a6   : > { %16361 = vmatprep.subr.bf16.mxu1 %v17879_v10  ;;  %v17919_v10 = vld [vmem:[%s18555_s6 + $0x15e8] sm:$0xff]  }
 0x2a7   : > { %16340 = vmatpush3.bf16.msra.mxu0 %v17878_v9  ;;  %v17916_v9 = vld [vmem:[%s18555_s6 + $0x15a0] sm:$0xff]  }
 0x2a8   : > { %16341 = vmatprep.subr.bf16.mxu0 %v17881_v12 }
 0x2a9   : > { %16362 = vmatpush3.bf16.msra.mxu1 %v17880_v11  ;;  %v17918_v11 = vld [vmem:[%s18555_s6 + $0x1528] sm:$0xff]  }
 0x2aa   : > { %16363 = vmatprep.subr.bf16.mxu1 %v17883_v14 }
 0x2ab   : > { %16342 = vmatpush3.bf16.msra.mxu0 %v17882_v13  ;;  %v17921_v13 = vld [vmem:[%s18555_s6 + $0x1570] sm:$0xff]  }
 0x2ac   : > { %16343 = vmatprep.subr.bf16.mxu0 %v17885_v16 }
 0x2ad   : > { %v16041_v21 = vpop.f32.mrb[52].mxu0  ;;  %16364 = vmatpush3.bf16.msra.mxu1 %v17884_v15  ;;  %v17920_v15 = vld [vmem:[%s18555_s6 + $0x15a8] sm:$0xff]  }
 0x2ae   : > { %v16042_v23 = vpop.f32.mrb[53].mxu0  ;;  %16365 = vmatprep.subr.bf16.mxu1 %v17887_v18 }
 0x2af   : > { %v16043_v25 = vadd.f32 %v16042_v23, %v16041_v21  ;;  %v16044_v26 = vpop.f32.mrb[54].mxu0  ;;  %v16063_v27 = vpop.f32.mrb[52].mxu1  ;;  %16344 = vmatpush3.bf16.msra.mxu0 %v17886_v17 }
 0x2b0   : > { %v16045_v31 = vpop.f32.mrb[55].mxu0  ;;  %v16064_v32 = vpop.f32.mrb[53].mxu1  ;;  %16345 = vmatprep.subr.bf16.mxu0 %v17889_v20  ;;  %v17923_v20 = vld [vmem:[%s18555_s6 + $0x15f0] sm:$0xff]  }
 0x2b1   : > { %v12096_v33 = vadd.f32 %v16043_v25, %v19353_v57  ;;  %v16065_v34 = vadd.f32 %v16064_v32, %v16063_v27  ;;  %16366 = vmatpush3.bf16.msra.mxu1 %v17888_v19  ;;  %v16066_v30 = vpop.f32.mrb[54].mxu1  ;;  %v3276_v57 = vrot.slane %v3248_v52, %v18593_v42  ;;  %v17922_v19 = vld [vmem:[%s18555_s6 + $0x1530] sm:$0xff]   ;;  %v17925_v25 = vld [vmem:[%s18555_s6 + $0x1578] sm:$0xff]   ;;  %v17946_v52 = vld [vmem:[%s18555_s6 + $0x1660] sm:$0xff]  }
 0x2b2   : > { %16367 = vmatprep.subr.bf16.mxu1 %v17891_v24  ;;  %v16067_v37 = vpop.f32.mrb[55].mxu1  ;;  %v17924_v27 = vld [vmem:[%s18555_s6 + $0x15b0] sm:$0xff]   ;;  %v17927_v31 = vld [vmem:[%s18555_s6 + $0x15f8] sm:$0xff]   ;;  %v17932_v30 = vld [vmem:[%s18555_s6 + $0x16c0] sm:$0xff]  }
 0x2b3   : > { %v19390_v38 = vadd.f32 %v16065_v34, %v12096_v33  ;;  %16346 = vmatpush3.bf16.msra.mxu0 %v17890_v22  ;;  %v3280_v60 = vcombine.high %v3276_v57, %v3276_v57  ;;  %v17926_v32 = vld [vmem:[%s18555_s6 + $0x1538] sm:$0xff]   ;;  %v3262_v33 = vrot.slane %v19398_v47, %v18593_v42  ;;  %v17930_v34 = vld [vmem:[%s18555_s6 + $0x1640] sm:$0xff]  }
 0x2b4   : > { %16347 = vmatprep.subr.bf16.mxu0 %v17893_v29  ;;  %v17942_v47 = vld [vmem:[%s18555_s6 + $0x1658] sm:$0xff]  }
 0x2b5   : > { %16368 = vmatpush3.bf16.msra.mxu1 %v17892_v28  ;;  %v3278_v37 = vcombine.high %v3262_v33, %v3262_v33 }
 0x2b6   : > { %16369 = vmatprep.subr.bf16.mxu1 %v17895_v36  ;;  %v17931_v36 = vld [vmem:[%s18555_s6 + $0x1600] sm:$0xff]  }
 0x2b7   : > { %16348 = vmatpush3.bf16.msra.mxu0 %v17894_v35  ;;  %v17929_v35 = vld [vmem:[%s18555_s6 + $0x15b8] sm:$0xff]  }
 0x2b8   : > { %16377 = vmatprep.subr.bf16.mxu0 %v17897_v44  ;;  %v17937_v44 = vld [vmem:[%s18555_s6 + $0x1688] sm:$0xff]  }
 0x2b9   : > { %16370 = vmatpush3.bf16.msra.mxu1 %v17896_v41  ;;  %v17935_v41 = vld [vmem:[%s18555_s6 + $0x1608] sm:$0xff]  }
 0x2ba   : > { %16399 = vmatprep.subr.bf16.mxu1 %v17899_v48  ;;  %12654 = vmatmul.mubr.bf16.vlgmr.msra.gmra.mrb[80].mxu0 %v3255_v46  ;;  %v17939_v46 = vld [vmem:[%s18555_s6 + $0x1610] sm:$0xff]  }
 0x2bb   : > { %16378 = vmatpush3.bf16.msra.mxu0 %v17898_v50  ;;  %12733 = vmatprep.mubr.bf16.mxu0 %v3276_v57  ;;  %v17941_v48 = vld [vmem:[%s18555_s6 + $0x1690] sm:$0xff]   ;;  %v17943_v50 = vld [vmem:[%s18555_s6 + $0x1618] sm:$0xff]   ;;  %v17949_v57 = vld [vmem:[%s18555_s6 + $0x16a0] sm:$0xff]  }
 0x2bc   : > { %12694 = vmatmul.mubr.bf16.vlgmr.msra.gmra.mrb[80].mxu1 %v3277_v53  ;;  %16379 = vmatprep.subr.bf16.mxu0 %v17901_v54  ;;  %v17945_v53 = vld [vmem:[%s18555_s6 + $0x1698] sm:$0xff]   ;;  %v17948_v54 = vld [vmem:[%s18555_s6 + $0x16e0] sm:$0xff]  }
 0x2bd   : > { %16400 = vmatpush3.bf16.msra.mxu1 %v17900_v56  ;;  %12773 = vmatprep.mubr.bf16.mxu1 %v3280_v60  ;;  %v17950_v56 = vld [vmem:[%s18555_s6 + $0x1668] sm:$0xff]  }
 0x2be   : > { %16401 = vmatprep.subr.bf16.mxu1 %v17903_v58  ;;  %v17952_v58 = vld [vmem:[%s18555_s6 + $0x16e8] sm:$0xff]  }
 0x2bf   : > { %16380 = vmatpush3.bf16.msra.mxu0 %v17902_v59  ;;  %v17951_v59 = vld [vmem:[%s18555_s6 + $0x1628] sm:$0xff]  }
 0x2c0   : > { %16381 = vmatprep.subr.bf16.mxu0 %v17905_v51  ;;  %v17954_v51 = vld [vmem:[%s18555_s6 + $0x1670] sm:$0xff]  }
 0x2c1   : > { %16402 = vmatpush3.bf16.msra.mxu1 %v17904_v61 }
 0x2c2   : > { %16403 = vmatprep.subr.bf16.mxu1 %v17907_v62  ;;  %v17953_v62 = vld [vmem:[%s18555_s6 + $0x16a8] sm:$0xff]  }
 0x2c3   : > { %16382 = vmatpush3.bf16.msra.mxu0 %v17906_v63 }
 0x2c4   : > { %16383 = vmatprep.subr.bf16.mxu0 %v17909_v0 }
 0x2c5   : > { %16404 = vmatpush3.bf16.msra.mxu1 %v17908_v1 }
 0x2c6   : > { %16405 = vmatprep.subr.bf16.mxu1 %v17911_v2  ;;  %v17955_v2 = vld [vmem:[%s18555_s6 + $0x1630] sm:$0xff]  }
 0x2c7   : > { %16384 = vmatpush3.bf16.msra.mxu0 %v17910_v3  ;;  %v17956_v3 = vld [vmem:[%s18555_s6 + $0x16f0] sm:$0xff]  }
 0x2c8   : > { %16385 = vmatprep.subr.bf16.mxu0 %v17913_v4 }
 0x2c9   : > { %16406 = vmatpush3.bf16.msra.mxu1 %v17912_v5 }
 0x2ca   : > { %16407 = vmatprep.subr.bf16.mxu1 %v17915_v6  ;;  %v17957_v6 = vld [vmem:[%s18555_s6 + $0x16b0] sm:$0xff]  }
 0x2cb   : > { %16386 = vmatpush3.bf16.msra.mxu0 %v17914_v7 }
 0x2cc   : > { %16387 = vmatprep.subr.bf16.mxu0 %v17917_v8 }
 0x2cd   : > { %v16085_v12 = vpop.f32.mrb[56].mxu0  ;;  %16408 = vmatpush3.bf16.msra.mxu1 %v17916_v9  ;;  %v17958_v9 = vld [vmem:[%s18555_s6 + $0x1678] sm:$0xff]  }
 0x2ce   : > { %v16086_v14 = vpop.f32.mrb[57].mxu0  ;;  %16409 = vmatprep.subr.bf16.mxu1 %v17919_v10 }
 0x2cf   : > { %v16087_v16 = vadd.f32 %v16086_v14, %v16085_v12  ;;  %v16088_v17 = vpop.f32.mrb[58].mxu0  ;;  %v16107_v18 = vpop.f32.mrb[56].mxu1  ;;  %16388 = vmatpush3.bf16.msra.mxu0 %v17918_v11  ;;  %v17959_v11 = vld [vmem:[%s18555_s6 + $0x1638] sm:$0xff]  }
 0x2d0   : > { %v16089_v21 = vpop.f32.mrb[59].mxu0  ;;  %v16108_v22 = vpop.f32.mrb[57].mxu1  ;;  %16389 = vmatprep.subr.bf16.mxu0 %v17921_v13  ;;  %v17960_v14 = vld [vmem:[%s18555_s6 + $0x16f8] sm:$0xff]  }
 0x2d1   : > { %v12176_v23 = vadd.f32 %v16087_v16, %v19390_v38  ;;  %v16109_v24 = vadd.f32 %v16108_v22, %v16107_v18  ;;  %v16110_v26 = vpop.f32.mrb[58].mxu1  ;;  %16410 = vmatpush3.bf16.msra.mxu1 %v17920_v15  ;;  %v17934_v38 = vld [vmem:[%s18555_s6 + $0x1648] sm:$0xff]   ;;  %v315_v15 = vld [vmem:[%s18550_s27 + $0x58] sm:$0xff]  ;;  %v17963_v22 = vld [vmem:[%s18555_s6 + $0x1700] sm:$0xff]  }
 0x2d2   : > { %v16111_v28 = vpop.f32.mrb[59].mxu1  ;;  %16411 = vmatprep.subr.bf16.mxu1 %v17923_v20  ;;  %v3288_v16 = vrot.slane %v315_v15, %v18593_v42  ;;  %v17961_v17 = vld [vmem:[%s18555_s6 + $0x16b8] sm:$0xff]   ;;  %v3281_v18 = vcombine.high %v315_v15, %v315_v15  ;;  %v17965_v26 = vld [vmem:[%s18555_s6 + $0x1780] sm:$0xff]   ;;  %v17999_v15 = vld [vmem:[%s18555_s6 + $0x1848] sm:$0xff]  }
 0x2d3   : > { %v19433_v29 = vadd.f32 %v16109_v24, %v12176_v23  ;;  %16390 = vmatpush3.bf16.msra.mxu0 %v17922_v19  ;;  %v17962_v19 = vld [vmem:[%s18555_s6 + $0x1740] sm:$0xff]  }
 0x2d4   : > { %16391 = vmatprep.subr.bf16.mxu0 %v17925_v25  ;;  %v3296_v20 = vcombine.high %v3288_v16, %v3288_v16  ;;  %v3304_v21 = vrot.slane %v3288_v16, %v18593_v42  ;;  %v19481_v23 = vrot.slane %v3281_v18, %v18593_v42  ;;  %v17964_v24 = vld [vmem:[%s18555_s6 + $0x17c0] sm:$0xff]   ;;  %v18000_v16 = vld [vmem:[%s18555_s6 + $0x1808] sm:$0xff]  }
 0x2d5   : > { %16412 = vmatpush3.bf16.msra.mxu1 %v17924_v27  ;;  %v18002_v18 = vld [vmem:[%s18555_s6 + $0x1888] sm:$0xff]  }
 0x2d6   : > { %16413 = vmatprep.subr.bf16.mxu1 %v17927_v31  ;;  %v3318_v25 = vrot.slane %v3296_v20, %v18593_v42  ;;  %v3297_v27 = vcombine.high %v19481_v23, %v19481_v23  ;;  %v3326_v28 = vcombine.high %v3304_v21, %v3304_v21  ;;  %v18004_v20 = vld [vmem:[%s18555_s6 + $0x1810] sm:$0xff]  }
 0x2d7   : > { %16392 = vmatpush3.bf16.msra.mxu0 %v17926_v32  ;;  %v17967_v32 = vld [vmem:[%s18555_s6 + $0x1708] sm:$0xff]  }
 0x2d8   : > { %16421 = vmatprep.subr.bf16.mxu0 %v17930_v34  ;;  %v3328_v31 = vcombine.high %v3318_v25, %v3318_v25  ;;  %v17968_v34 = vld [vmem:[%s18555_s6 + $0x17c8] sm:$0xff]  }
 0x2d9   : > { %16414 = vmatpush3.bf16.msra.mxu1 %v17929_v35  ;;  %v17969_v35 = vld [vmem:[%s18555_s6 + $0x1788] sm:$0xff]  }
 0x2da   : > { %12734 = vmatmul.mubr.bf16.vlgmr.msra.gmra.mrb[84].mxu0 %v3262_v33  ;;  %16443 = vmatprep.subr.bf16.mxu1 %v17932_v30  ;;  %v3325_v33 = vrot.slane %v3297_v27, %v18593_v42  ;;  %v18011_v27 = vld [vmem:[%s18555_s6 + $0x1860] sm:$0xff]  }
 0x2db   : > { %16422 = vmatpush3.bf16.msra.mxu0 %v17931_v36  ;;  %12813 = vmatprep.mubr.bf16.mxu0 %v3318_v25  ;;  %v17970_v36 = vld [vmem:[%s18555_s6 + $0x1750] sm:$0xff]   ;;  %v18009_v25 = vld [vmem:[%s18555_s6 + $0x18d8] sm:$0xff]  }
 0x2dc   : > { %12774 = vmatmul.mubr.bf16.vlgmr.msra.gmra.mrb[84].mxu1 %v3278_v37  ;;  %16423 = vmatprep.subr.bf16.mxu0 %v17934_v38  ;;  %v3329_v30 = vcombine.high %v3325_v33, %v3325_v33  ;;  %v17971_v37 = vld [vmem:[%s18555_s6 + $0x1710] sm:$0xff]  }
 0x2dd   : > { %16444 = vmatpush3.bf16.msra.mxu1 %v17933_v39  ;;  %12853 = vmatprep.mubr.bf16.mxu1 %v3328_v31  ;;  %v17972_v38 = vld [vmem:[%s18555_s6 + $0x17d0] sm:$0xff]   ;;  %v18014_v31 = vld [vmem:[%s18555_s6 + $0x18a0] sm:$0xff]  }
 0x2de   : > { %16445 = vmatprep.subr.bf16.mxu1 %v17936_v40  ;;  %v17973_v39 = vld [vmem:[%s18555_s6 + $0x1790] sm:$0xff]   ;;  %v17974_v40 = vld [vmem:[%s18555_s6 + $0x1758] sm:$0xff]  }
 0x2df   : > { %16424 = vmatpush3.bf16.msra.mxu0 %v17935_v41  ;;  %v17975_v41 = vld [vmem:[%s18555_s6 + $0x1718] sm:$0xff]  }
 0x2e0   : > { %16425 = vmatprep.subr.bf16.mxu0 %v17938_v43  ;;  %v17976_v43 = vld [vmem:[%s18555_s6 + $0x17d8] sm:$0xff]  }
 0x2e1   : > { %16446 = vmatpush3.bf16.msra.mxu1 %v17937_v44  ;;  %v17977_v44 = vld [vmem:[%s18555_s6 + $0x1798] sm:$0xff]  }
 0x2e2   : > { %16447 = vmatprep.subr.bf16.mxu1 %v17940_v45  ;;  %v17978_v45 = vld [vmem:[%s18555_s6 + $0x1760] sm:$0xff]  }
 0x2e3   : > { %16426 = vmatpush3.bf16.msra.mxu0 %v17939_v46  ;;  %v17979_v46 = vld [vmem:[%s18555_s6 + $0x1720] sm:$0xff]  }
 0x2e4   : > { %16427 = vmatprep.subr.bf16.mxu0 %v17942_v47  ;;  %v17980_v47 = vld [vmem:[%s18555_s6 + $0x17e0] sm:$0xff]  }
 0x2e5   : > { %16448 = vmatpush3.bf16.msra.mxu1 %v17941_v48  ;;  %v17981_v48 = vld [vmem:[%s18555_s6 + $0x17a0] sm:$0xff]  }
 0x2e6   : > { %16449 = vmatprep.subr.bf16.mxu1 %v17944_v49  ;;  %v17982_v49 = vld [vmem:[%s18555_s6 + $0x1768] sm:$0xff]  }
 0x2e7   : > { %16428 = vmatpush3.bf16.msra.mxu0 %v17943_v50  ;;  %v17983_v50 = vld [vmem:[%s18555_s6 + $0x1728] sm:$0xff]  }
 0x2e8   : > { %16429 = vmatprep.subr.bf16.mxu0 %v17946_v52  ;;  %v17984_v52 = vld [vmem:[%s18555_s6 + $0x17e8] sm:$0xff]  }
 0x2e9   : > { %16450 = vmatpush3.bf16.msra.mxu1 %v17945_v53 }
 0x2ea   : > { %16451 = vmatprep.subr.bf16.mxu1 %v17948_v54  ;;  %v17985_v54 = vld [vmem:[%s18555_s6 + $0x17a8] sm:$0xff]  }
 0x2eb   : > { %16430 = vmatpush3.bf16.msra.mxu0 %v17947_v55 }
 0x2ec   : > { %16431 = vmatprep.subr.bf16.mxu0 %v17950_v56  ;;  %v17986_v56 = vld [vmem:[%s18555_s6 + $0x1770] sm:$0xff]  }
 0x2ed   : > { %v16129_v60 = vpop.f32.mrb[60].mxu0  ;;  %16452 = vmatpush3.bf16.msra.mxu1 %v17949_v57 }
 0x2ee   : > { %v16130_v61 = vpop.f32.mrb[61].mxu0  ;;  %16453 = vmatprep.subr.bf16.mxu1 %v17952_v58 }
 0x2ef   : > { %v16131_v63 = vadd.f32 %v16130_v61, %v16129_v60  ;;  %v16132_v0 = vpop.f32.mrb[62].mxu0  ;;  %v16151_v1 = vpop.f32.mrb[60].mxu1  ;;  %16432 = vmatpush3.bf16.msra.mxu0 %v17951_v59  ;;  %v17987_v60 = vld [vmem:[%s18555_s6 + $0x1730] sm:$0xff]  }
 0x2f0   : > { %v16133_v4 = vpop.f32.mrb[63].mxu0  ;;  %v16152_v5 = vpop.f32.mrb[61].mxu1  ;;  %16433 = vmatprep.subr.bf16.mxu0 %v17954_v51  ;;  %v17988_v51 = vld [vmem:[%s18555_s6 + $0x17f0] sm:$0xff]  }
 0x2f1   : > { %v12256_v7 = vadd.f32 %v16131_v63, %v19433_v29  ;;  %v16153_v8 = vadd.f32 %v16152_v5, %v16151_v1  ;;  %v16154_v10 = vpop.f32.mrb[62].mxu1  ;;  %16454 = vmatpush3.bf16.msra.mxu1 %v17953_v62  ;;  %v17966_v29 = vld [vmem:[%s18555_s6 + $0x1748] sm:$0xff]   ;;  %v17989_v1 = vld [vmem:[%s18555_s6 + $0x17b0] sm:$0xff]  }
 0x2f2   : > { %v16155_v12 = vpop.f32.mrb[63].mxu1  ;;  %16455 = vmatprep.subr.bf16.mxu1 %v17956_v3  ;;  %v17990_v3 = vld [vmem:[%s18555_s6 + $0x1778] sm:$0xff]   ;;  %v17995_v10 = vld [vmem:[%s18555_s6 + $0x1840] sm:$0xff]  }
 0x2f3   : > { %v19471_v13 = vadd.f32 %v16153_v8, %v12256_v7  ;;  %16434 = vmatpush3.bf16.msra.mxu0 %v17955_v2  ;;  %v17992_v7 = vld [vmem:[%s18555_s6 + $0x17f8] sm:$0xff]   ;;  %v17997_v12 = vld [vmem:[%s18555_s6 + $0x18c0] sm:$0xff]  }
 0x2f4   : > { %16435 = vmatprep.subr.bf16.mxu0 %v17958_v9  ;;  %v17994_v8 = vld [vmem:[%s18555_s6 + $0x17b8] sm:$0xff]   ;;  %v3311_v9 = vrot.slane %v19481_v23, %v18593_v42 }
 0x2f5   : > { %16456 = vmatpush3.bf16.msra.mxu1 %v17957_v6  ;;  %v17991_v6 = vld [vmem:[%s18555_s6 + $0x1738] sm:$0xff]  }
 0x2f6   : > { %16457 = vmatprep.subr.bf16.mxu1 %v17960_v14  ;;  %v3327_v14 = vcombine.high %v3311_v9, %v3311_v9  ;;  %v18007_v23 = vld [vmem:[%s18555_s6 + $0x1858] sm:$0xff]  }
 0x2f7   : > { %16436 = vmatpush3.bf16.msra.mxu0 %v17959_v11  ;;  %v17996_v11 = vld [vmem:[%s18555_s6 + $0x1800] sm:$0xff]  }
 0x2f8   : > { %16465 = vmatprep.subr.bf16.mxu0 %v17962_v19  ;;  %v18003_v19 = vld [vmem:[%s18555_s6 + $0x1850] sm:$0xff]  }
 0x2f9   : > { %16458 = vmatpush3.bf16.msra.mxu1 %v17961_v17  ;;  %v18001_v17 = vld [vmem:[%s18555_s6 + $0x18c8] sm:$0xff]  }
 0x2fa   : > { %16487 = vmatprep.subr.bf16.mxu1 %v17964_v24  ;;  %12814 = vmatmul.mubr.bf16.vlgmr.msra.gmra.mrb[88].mxu0 %v3304_v21  ;;  %v18005_v21 = vld [vmem:[%s18555_s6 + $0x18d0] sm:$0xff]   ;;  %v18008_v24 = vld [vmem:[%s18555_s6 + $0x1818] sm:$0xff]  }
 0x2fb   : > { %16466 = vmatpush3.bf16.msra.mxu0 %v17963_v22  ;;  %12893 = vmatprep.mubr.bf16.mxu0 %v3325_v33  ;;  %v18006_v22 = vld [vmem:[%s18555_s6 + $0x1890] sm:$0xff]   ;;  %v18016_v33 = vld [vmem:[%s18555_s6 + $0x1828] sm:$0xff]  }
 0x2fc   : > { %12854 = vmatmul.mubr.bf16.vlgmr.msra.gmra.mrb[88].mxu1 %v3326_v28  ;;  %16467 = vmatprep.subr.bf16.mxu0 %v17966_v29  ;;  %v18012_v28 = vld [vmem:[%s18555_s6 + $0x1820] sm:$0xff]  }
 0x2fd   : > { %16488 = vmatpush3.bf16.msra.mxu1 %v17965_v26  ;;  %12933 = vmatprep.mubr.bf16.mxu1 %v3329_v30  ;;  %v18010_v26 = vld [vmem:[%s18555_s6 + $0x1898] sm:$0xff]   ;;  %v18013_v29 = vld [vmem:[%s18555_s6 + $0x18e0] sm:$0xff]   ;;  %v18018_v30 = vld [vmem:[%s18555_s6 + $0x18a8] sm:$0xff]  }
 0x2fe   : > { %16489 = vmatprep.subr.bf16.mxu1 %v17968_v34  ;;  %v18017_v34 = vld [vmem:[%s18555_s6 + $0x18e8] sm:$0xff]  }
 0x2ff   : > { %16468 = vmatpush3.bf16.msra.mxu0 %v17967_v32  ;;  %v18015_v32 = vld [vmem:[%s18555_s6 + $0x1868] sm:$0xff]  }
 0x300   : > { %16469 = vmatprep.subr.bf16.mxu0 %v17970_v36 }
 0x301   : > { %16490 = vmatpush3.bf16.msra.mxu1 %v17969_v35 }
 0x302   : > { %16491 = vmatprep.subr.bf16.mxu1 %v17972_v38 }
 0x303   : > { %16470 = vmatpush3.bf16.msra.mxu0 %v17971_v37  ;;  %v18019_v37 = vld [vmem:[%s18555_s6 + $0x1870] sm:$0xff]  }
 0x304   : > { %16471 = vmatprep.subr.bf16.mxu0 %v17974_v40 }
 0x305   : > { %16492 = vmatpush3.bf16.msra.mxu1 %v17973_v39 }
 0x306   : > { %16493 = vmatprep.subr.bf16.mxu1 %v17976_v43  ;;  %v18021_v43 = vld [vmem:[%s18555_s6 + $0x18f0] sm:$0xff]  }
 0x307   : > { %16472 = vmatpush3.bf16.msra.mxu0 %v17975_v41  ;;  %v18020_v41 = vld [vmem:[%s18555_s6 + $0x1830] sm:$0xff]  }
 0x308   : > { %16473 = vmatprep.subr.bf16.mxu0 %v17978_v45 }
 0x309   : > { %16494 = vmatpush3.bf16.msra.mxu1 %v17977_v44 }
 0x30a   : > { %16495 = vmatprep.subr.bf16.mxu1 %v17980_v47 }
 0x30b   : > { %16474 = vmatpush3.bf16.msra.mxu0 %v17979_v46 }
 0x30c   : > { %16475 = vmatprep.subr.bf16.mxu0 %v17982_v49 }
 0x30d   : > { %v16173_v53 = vpop.f32.mrb[64].mxu0  ;;  %16496 = vmatpush3.bf16.msra.mxu1 %v17981_v48  ;;  %v18022_v48 = vld [vmem:[%s18555_s6 + $0x18b0] sm:$0xff]  }
 0x30e   : > { %v16174_v55 = vpop.f32.mrb[65].mxu0  ;;  %16497 = vmatprep.subr.bf16.mxu1 %v17984_v52 }
 0x30f   : > { %v16175_v57 = vadd.f32 %v16174_v55, %v16173_v53  ;;  %v16176_v58 = vpop.f32.mrb[66].mxu0  ;;  %v16195_v59 = vpop.f32.mrb[64].mxu1  ;;  %16476 = vmatpush3.bf16.msra.mxu0 %v17983_v50  ;;  %v18023_v50 = vld [vmem:[%s18555_s6 + $0x1878] sm:$0xff]  }
 0x310   : > { %v16177_v61 = vpop.f32.mrb[67].mxu0  ;;  %v16196_v62 = vpop.f32.mrb[65].mxu1  ;;  %16477 = vmatprep.subr.bf16.mxu0 %v17986_v56  ;;  %v18025_v55 = vld [vmem:[%s18555_s6 + $0x18f8] sm:$0xff]   ;;  %v316_v56 = vld [vmem:[%s18550_s27 + $0x60] sm:$0xff] }
 0x311   : > { %v12336_v63 = vadd.f32 %v16175_v57, %v19471_v13  ;;  %v16197_v0 = vadd.f32 %v16196_v62, %v16195_v59  ;;  %v16198_v2 = vpop.f32.mrb[66].mxu1  ;;  %16498 = vmatpush3.bf16.msra.mxu1 %v17985_v54  ;;  %v17998_v13 = vld [vmem:[%s18555_s6 + $0x1880] sm:$0xff]   ;;  %v18024_v54 = vld [vmem:[%s18555_s6 + $0x1838] sm:$0xff]   ;;  %v3337_v57 = vrot.slane %v316_v56, %v18593_v42  ;;  %v3330_v59 = vcombine.high %v316_v56, %v316_v56 }
 0x312   : > { %v16199_v4 = vpop.f32.mrb[67].mxu1  ;;  %16499 = vmatprep.subr.bf16.mxu1 %v17988_v51  ;;  %v18026_v58 = vld [vmem:[%s18555_s6 + $0x18b8] sm:$0xff]   ;;  %v18063_v56 = vld [vmem:[%s18555_s6 + $0x1a80] sm:$0xff]  }
 0x313   : > { %v19515_v5 = vadd.f32 %v16197_v0, %v12336_v63  ;;  %16478 = vmatpush3.bf16.msra.mxu0 %v17987_v60  ;;  %v18027_v60 = vld [vmem:[%s18555_s6 + $0x1940] sm:$0xff]   ;;  %v3345_v51 = vcombine.high %v3337_v57, %v3337_v57  ;;  %v3353_v61 = vrot.slane %v3337_v57, %v18593_v42  ;;  %v19562_v62 = vrot.slane %v3330_v59, %v18593_v42  ;;  %v18031_v4 = vld [vmem:[%s18555_s6 + $0x1948] sm:$0xff]   ;;  %v18068_v59 = vld [vmem:[%s18555_s6 + $0x1a50] sm:$0xff]  }
 0x314   : > { %16479 = vmatprep.subr.bf16.mxu0 %v17990_v3  ;;  %v18029_v63 = vld [vmem:[%s18555_s6 + $0x19c0] sm:$0xff]   ;;  %v18066_v57 = vld [vmem:[%s18555_s6 + $0x1ac8] sm:$0xff]  }
 0x315   : > { %16500 = vmatpush3.bf16.msra.mxu1 %v17989_v1  ;;  %v3367_v0 = vrot.slane %v3345_v51, %v18593_v42  ;;  %v18028_v1 = vld [vmem:[%s18555_s6 + $0x1900] sm:$0xff]   ;;  %v3346_v2 = vcombine.high %v19562_v62, %v19562_v62  ;;  %v3375_v3 = vcombine.high %v3353_v61, %v3353_v61  ;;  %v18070_v51 = vld [vmem:[%s18555_s6 + $0x1ad0] sm:$0xff]  }
 0x316   : > { %16501 = vmatprep.subr.bf16.mxu1 %v17992_v7 }
 0x317   : > { %16480 = vmatpush3.bf16.msra.mxu0 %v17991_v6  ;;  %v18030_v6 = vld [vmem:[%s18555_s6 + $0x1980] sm:$0xff]   ;;  %v3374_v7 = vrot.slane %v3346_v2, %v18593_v42 }
 0x318   : > { %16509 = vmatprep.subr.bf16.mxu0 %v17995_v10  ;;  %v18076_v2 = vld [vmem:[%s18555_s6 + $0x1a60] sm:$0xff]  }
 0x319   : > { %16502 = vmatpush3.bf16.msra.mxu1 %v17994_v8  ;;  %v18033_v8 = vld [vmem:[%s18555_s6 + $0x19c8] sm:$0xff]   ;;  %v3378_v10 = vcombine.high %v3374_v7, %v3374_v7 }
 0x31a   : > { %12894 = vmatmul.mubr.bf16.vlgmr.msra.gmra.mrb[92].mxu0 %v3311_v9  ;;  %16531 = vmatprep.subr.bf16.mxu1 %v17997_v12  ;;  %v18032_v9 = vld [vmem:[%s18555_s6 + $0x1908] sm:$0xff]  }
 0x31b   : > { %16510 = vmatpush3.bf16.msra.mxu0 %v17996_v11  ;;  %12973 = vmatprep.mubr.bf16.mxu0 %v3367_v0  ;;  %v18035_v11 = vld [vmem:[%s18555_s6 + $0x1950] sm:$0xff]   ;;  %v18034_v12 = vld [vmem:[%s18555_s6 + $0x1988] sm:$0xff]  }
 0x31c   : > { %12934 = vmatmul.mubr.bf16.vlgmr.msra.gmra.mrb[92].mxu1 %v3327_v14  ;;  %16511 = vmatprep.subr.bf16.mxu0 %v17999_v15  ;;  %v18036_v14 = vld [vmem:[%s18555_s6 + $0x1910] sm:$0xff]   ;;  %v18039_v15 = vld [vmem:[%s18555_s6 + $0x1958] sm:$0xff]  }
 0x31d   : > { %16532 = vmatpush3.bf16.msra.mxu1 %v17998_v13  ;;  %v18037_v13 = vld [vmem:[%s18555_s6 + $0x19d0] sm:$0xff]  }
 0x31e   : > { %16533 = vmatprep.subr.bf16.mxu1 %v18001_v17  ;;  %v18041_v17 = vld [vmem:[%s18555_s6 + $0x19d8] sm:$0xff]  }
 0x31f   : > { %16512 = vmatpush3.bf16.msra.mxu0 %v18000_v16  ;;  %v18038_v16 = vld [vmem:[%s18555_s6 + $0x1990] sm:$0xff]  }
 0x320   : > { %16513 = vmatprep.subr.bf16.mxu0 %v18003_v19  ;;  %v18043_v19 = vld [vmem:[%s18555_s6 + $0x1960] sm:$0xff]  }
 0x321   : > { %16534 = vmatpush3.bf16.msra.mxu1 %v18002_v18  ;;  %v18040_v18 = vld [vmem:[%s18555_s6 + $0x1918] sm:$0xff]  }
 0x322   : > { %16535 = vmatprep.subr.bf16.mxu1 %v18005_v21  ;;  %v18045_v21 = vld [vmem:[%s18555_s6 + $0x19e0] sm:$0xff]  }
 0x323   : > { %16514 = vmatpush3.bf16.msra.mxu0 %v18004_v20  ;;  %v18042_v20 = vld [vmem:[%s18555_s6 + $0x1998] sm:$0xff]  }
 0x324   : > { %16515 = vmatprep.subr.bf16.mxu0 %v18007_v23  ;;  %v18047_v23 = vld [vmem:[%s18555_s6 + $0x1968] sm:$0xff]  }
 0x325   : > { %16536 = vmatpush3.bf16.msra.mxu1 %v18006_v22  ;;  %v18044_v22 = vld [vmem:[%s18555_s6 + $0x1920] sm:$0xff]  }
 0x326   : > { %16537 = vmatprep.subr.bf16.mxu1 %v18009_v25 }
 0x327   : > { %16516 = vmatpush3.bf16.msra.mxu0 %v18008_v24  ;;  %v18046_v24 = vld [vmem:[%s18555_s6 + $0x19a0] sm:$0xff]  }
 0x328   : > { %16517 = vmatprep.subr.bf16.mxu0 %v18011_v27 }
 0x329   : > { %16538 = vmatpush3.bf16.msra.mxu1 %v18010_v26  ;;  %v18049_v26 = vld [vmem:[%s18555_s6 + $0x19e8] sm:$0xff]  }
 0x32a   : > { %16539 = vmatprep.subr.bf16.mxu1 %v18013_v29 }
 0x32b   : > { %16518 = vmatpush3.bf16.msra.mxu0 %v18012_v28  ;;  %v18048_v28 = vld [vmem:[%s18555_s6 + $0x1928] sm:$0xff]  }
 0x32c   : > { %16519 = vmatprep.subr.bf16.mxu0 %v18015_v32 }
 0x32d   : > { %v16217_v35 = vpop.f32.mrb[68].mxu0  ;;  %16540 = vmatpush3.bf16.msra.mxu1 %v18014_v31 }
 0x32e   : > { %v16218_v36 = vpop.f32.mrb[69].mxu0  ;;  %16541 = vmatprep.subr.bf16.mxu1 %v18017_v34  ;;  %v18051_v34 = vld [vmem:[%s18555_s6 + $0x1970] sm:$0xff]  }
 0x32f   : > { %v16219_v38 = vadd.f32 %v16218_v36, %v16217_v35  ;;  %v16220_v39 = vpop.f32.mrb[70].mxu0  ;;  %v16239_v40 = vpop.f32.mrb[68].mxu1  ;;  %16520 = vmatpush3.bf16.msra.mxu0 %v18016_v33  ;;  %v18050_v33 = vld [vmem:[%s18555_s6 + $0x19a8] sm:$0xff]  }
 0x330   : > { %v16221_v44 = vpop.f32.mrb[71].mxu0  ;;  %v16240_v45 = vpop.f32.mrb[69].mxu1  ;;  %16521 = vmatprep.subr.bf16.mxu0 %v18019_v37 }
 0x331   : > { %v12416_v46 = vadd.f32 %v16219_v38, %v19515_v5  ;;  %v16241_v47 = vadd.f32 %v16240_v45, %v16239_v40  ;;  %v16242_v49 = vpop.f32.mrb[70].mxu1  ;;  %16542 = vmatpush3.bf16.msra.mxu1 %v18018_v30  ;;  %v3377_v5 = vcombine.high %v3367_v0, %v3367_v0  ;;  %v18053_v38 = vld [vmem:[%s18555_s6 + $0x19f0] sm:$0xff]   ;;  %v18055_v44 = vld [vmem:[%s18555_s6 + $0x1978] sm:$0xff]  }
 0x332   : > { %v16243_v52 = vpop.f32.mrb[71].mxu1  ;;  %16543 = vmatprep.subr.bf16.mxu1 %v18021_v43  ;;  %v18052_v40 = vld [vmem:[%s18555_s6 + $0x1930] sm:$0xff]   ;;  %v18060_v49 = vld [vmem:[%s18555_s6 + $0x1a40] sm:$0xff]   ;;  %v18074_v0 = vld [vmem:[%s18555_s6 + $0x1ad8] sm:$0xff]  }
 0x333   : > { %v19552_v53 = vadd.f32 %v16241_v47, %v12416_v46  ;;  %16522 = vmatpush3.bf16.msra.mxu0 %v18020_v41  ;;  %13013 = vmatprep.mubr.bf16.mxu1 %v3377_v5  ;;  %v18054_v45 = vld [vmem:[%s18555_s6 + $0x19b0] sm:$0xff]   ;;  %v18057_v46 = vld [vmem:[%s18555_s6 + $0x19f8] sm:$0xff]   ;;  %v18062_v52 = vld [vmem:[%s18555_s6 + $0x1ac0] sm:$0xff]  }
 0x334   : > { %16523 = vmatprep.subr.bf16.mxu0 %v18023_v50  ;;  %v18056_v47 = vld [vmem:[%s18555_s6 + $0x1938] sm:$0xff]   ;;  %v18077_v5 = vld [vmem:[%s18555_s6 + $0x1a20] sm:$0xff]  }
 0x335   : > { %16544 = vmatpush3.bf16.msra.mxu1 %v18022_v48  ;;  %v3360_v48 = vrot.slane %v19562_v62, %v18593_v42  ;;  %v18059_v50 = vld [vmem:[%s18555_s6 + $0x19b8] sm:$0xff]  }
 0x336   : > { %16545 = vmatprep.subr.bf16.mxu1 %v18025_v55  ;;  %v18064_v55 = vld [vmem:[%s18555_s6 + $0x1a48] sm:$0xff]   ;;  %v18072_v62 = vld [vmem:[%s18555_s6 + $0x1a58] sm:$0xff]  }
 0x337   : > { %16524 = vmatpush3.bf16.msra.mxu0 %v18024_v54  ;;  %v3376_v54 = vcombine.high %v3360_v48, %v3360_v48 }
 0x338   : > { %16553 = vmatprep.subr.bf16.mxu0 %v18027_v60  ;;  %v18067_v60 = vld [vmem:[%s18555_s6 + $0x1a88] sm:$0xff]  }
 0x339   : > { %16546 = vmatpush3.bf16.msra.mxu1 %v18026_v58  ;;  %v18065_v58 = vld [vmem:[%s18555_s6 + $0x1a08] sm:$0xff]  }
 0x33a   : > { %16575 = vmatprep.subr.bf16.mxu1 %v18029_v63  ;;  %12974 = vmatmul.mubr.bf16.vlgmr.msra.gmra.mrb[96].mxu0 %v3353_v61  ;;  %v18069_v61 = vld [vmem:[%s18555_s6 + $0x1a10] sm:$0xff]  }
 0x33b   : > { %16554 = vmatpush3.bf16.msra.mxu0 %v18028_v1  ;;  %13053 = vmatprep.mubr.bf16.mxu0 %v3374_v7  ;;  %v18071_v63 = vld [vmem:[%s18555_s6 + $0x1a90] sm:$0xff]   ;;  %v18073_v1 = vld [vmem:[%s18555_s6 + $0x1a18] sm:$0xff]   ;;  %v18079_v7 = vld [vmem:[%s18555_s6 + $0x1aa0] sm:$0xff]  }
 0x33c   : > { %13014 = vmatmul.mubr.bf16.vlgmr.msra.gmra.mrb[96].mxu1 %v3375_v3  ;;  %16555 = vmatprep.subr.bf16.mxu0 %v18031_v4  ;;  %v18075_v3 = vld [vmem:[%s18555_s6 + $0x1a98] sm:$0xff]   ;;  %v18078_v4 = vld [vmem:[%s18555_s6 + $0x1ae0] sm:$0xff]  }
 0x33d   : > { %16576 = vmatpush3.bf16.msra.mxu1 %v18030_v6  ;;  %13093 = vmatprep.mubr.bf16.mxu1 %v3378_v10  ;;  %v18080_v6 = vld [vmem:[%s18555_s6 + $0x1a68] sm:$0xff]  }
 0x33e   : > { %16577 = vmatprep.subr.bf16.mxu1 %v18033_v8 }
 0x33f   : > { %16556 = vmatpush3.bf16.msra.mxu0 %v18032_v9  ;;  %v18082_v9 = vld [vmem:[%s18555_s6 + $0x1ae8] sm:$0xff]  }
 0x340   : > { %16557 = vmatprep.subr.bf16.mxu0 %v18035_v11  ;;  %v18081_v11 = vld [vmem:[%s18555_s6 + $0x1a28] sm:$0xff]  }
 0x341   : > { %16578 = vmatpush3.bf16.msra.mxu1 %v18034_v12 }
 0x342   : > { %16579 = vmatprep.subr.bf16.mxu1 %v18037_v13 }
 0x343   : > { %16558 = vmatpush3.bf16.msra.mxu0 %v18036_v14 }
 0x344   : > { %16559 = vmatprep.subr.bf16.mxu0 %v18039_v15  ;;  %v18083_v15 = vld [vmem:[%s18555_s6 + $0x1aa8] sm:$0xff]  }
 0x345   : > { %16580 = vmatpush3.bf16.msra.mxu1 %v18038_v16  ;;  %v18084_v16 = vld [vmem:[%s18555_s6 + $0x1a70] sm:$0xff]  }
 0x346   : > { %16581 = vmatprep.subr.bf16.mxu1 %v18041_v17 }
 0x347   : > { %16560 = vmatpush3.bf16.msra.mxu0 %v18040_v18 }
 0x348   : > { %16561 = vmatprep.subr.bf16.mxu0 %v18043_v19  ;;  %v18085_v19 = vld [vmem:[%s18555_s6 + $0x1a30] sm:$0xff]  }
 0x349   : > { %16582 = vmatpush3.bf16.msra.mxu1 %v18042_v20 }
 0x34a   : > { %16583 = vmatprep.subr.bf16.mxu1 %v18045_v21 }
 0x34b   : > { %16562 = vmatpush3.bf16.msra.mxu0 %v18044_v22  ;;  %v18086_v22 = vld [vmem:[%s18555_s6 + $0x1af0] sm:$0xff]  }
 0x34c   : > { %16563 = vmatprep.subr.bf16.mxu0 %v18047_v23 }
 0x34d   : > { %v16261_v25 = vpop.f32.mrb[72].mxu0  ;;  %16584 = vmatpush3.bf16.msra.mxu1 %v18046_v24  ;;  %v18087_v24 = vld [vmem:[%s18555_s6 + $0x1ab0] sm:$0xff]  }
 0x34e   : > { %v16262_v27 = vpop.f32.mrb[73].mxu0  ;;  %16585 = vmatprep.subr.bf16.mxu1 %v18049_v26 }
 0x34f   : > { %v16263_v29 = vadd.f32 %v16262_v27, %v16261_v25  ;;  %v16264_v31 = vpop.f32.mrb[74].mxu0  ;;  %v16283_v32 = vpop.f32.mrb[72].mxu1  ;;  %16564 = vmatpush3.bf16.msra.mxu0 %v18048_v28  ;;  %v18088_v27 = vld [vmem:[%s18555_s6 + $0x1a78] sm:$0xff]  }
 0x350   : > { %v16265_v35 = vpop.f32.mrb[75].mxu0  ;;  %v16284_v30 = vpop.f32.mrb[73].mxu1  ;;  %16565 = vmatprep.subr.bf16.mxu0 %v18051_v34  ;;  %v18089_v28 = vld [vmem:[%s18555_s6 + $0x1a38] sm:$0xff]   ;;  %v317_v31 = vld [vmem:[%s18550_s27 + $0x68] sm:$0xff] }
 0x351   : > { %v12496_v36 = vadd.f32 %v16263_v29, %v19552_v53  ;;  %v16285_v37 = vadd.f32 %v16284_v30, %v16283_v32  ;;  %v16286_v39 = vpop.f32.mrb[74].mxu1  ;;  %16586 = vmatpush3.bf16.msra.mxu1 %v18050_v33  ;;  %v18061_v53 = vld [vmem:[%s18555_s6 + $0x1a00] sm:$0xff]   ;;  %v18090_v29 = vld [vmem:[%s18555_s6 + $0x1af8] sm:$0xff]   ;;  %v3386_v32 = vrot.slane %v317_v31, %v18593_v42  ;;  %v3379_v34 = vcombine.high %v317_v31, %v317_v31 }
 0x352   : > { %v16287_v41 = vpop.f32.mrb[75].mxu1  ;;  %16587 = vmatprep.subr.bf16.mxu1 %v18053_v38  ;;  %v18091_v33 = vld [vmem:[%s18555_s6 + $0x1ab8] sm:$0xff]   ;;  %v18092_v35 = vld [vmem:[%s18555_s6 + $0x1b40] sm:$0xff]  }
 0x353   : > { %v19595_v43 = vadd.f32 %v16285_v37, %v12496_v36  ;;  %16566 = vmatpush3.bf16.msra.mxu0 %v18052_v40  ;;  %v3394_v30 = vcombine.high %v3386_v32, %v3386_v32  ;;  %v3402_v36 = vrot.slane %v3386_v32, %v18593_v42  ;;  %v19644_v37 = vrot.slane %v3379_v34, %v18593_v42  ;;  %v18094_v38 = vld [vmem:[%s18555_s6 + $0x1bc0] sm:$0xff]   ;;  %v18131_v32 = vld [vmem:[%s18555_s6 + $0x1cc8] sm:$0xff]   ;;  %v18133_v34 = vld [vmem:[%s18555_s6 + $0x1c50] sm:$0xff]  }
 0x354   : > { %16567 = vmatprep.subr.bf16.mxu0 %v18055_v44  ;;  %v18093_v40 = vld [vmem:[%s18555_s6 + $0x1b00] sm:$0xff]   ;;  %v18096_v44 = vld [vmem:[%s18555_s6 + $0x1b48] sm:$0xff]  }
 0x355   : > { %16588 = vmatpush3.bf16.msra.mxu1 %v18054_v45  ;;  %v3416_v39 = vrot.slane %v3394_v30, %v18593_v42  ;;  %v3395_v41 = vcombine.high %v19644_v37, %v19644_v37  ;;  %v18128_v31 = vld [vmem:[%s18555_s6 + $0x1c80] sm:$0xff]   ;;  %v18135_v30 = vld [vmem:[%s18555_s6 + $0x1cd0] sm:$0xff]  }
 0x356   : > { %16589 = vmatprep.subr.bf16.mxu1 %v18057_v46  ;;  %v18095_v46 = vld [vmem:[%s18555_s6 + $0x1b80] sm:$0xff]  }
 0x357   : > { %16568 = vmatpush3.bf16.msra.mxu0 %v18056_v47  ;;  %v3426_v45 = vcombine.high %v3416_v39, %v3416_v39  ;;  %v3423_v47 = vrot.slane %v3395_v41, %v18593_v42  ;;  %v18141_v41 = vld [vmem:[%s18555_s6 + $0x1c60] sm:$0xff]  }
 0x358   : > { %16597 = vmatprep.subr.bf16.mxu0 %v18060_v49  ;;  %v18097_v49 = vld [vmem:[%s18555_s6 + $0x1b08] sm:$0xff]  }
 0x359   : > { %16590 = vmatpush3.bf16.msra.mxu1 %v18059_v50  ;;  %v3427_v50 = vcombine.high %v3423_v47, %v3423_v47 }
 0x35a   : > { %13054 = vmatmul.mubr.bf16.vlgmr.msra.gmra.mrb[100].mxu0 %v3360_v48  ;;  %16619 = vmatprep.subr.bf16.mxu1 %v18062_v52  ;;  %v18098_v48 = vld [vmem:[%s18555_s6 + $0x1bc8] sm:$0xff]   ;;  %v18100_v52 = vld [vmem:[%s18555_s6 + $0x1b50] sm:$0xff]  }
 0x35b   : > { %16598 = vmatpush3.bf16.msra.mxu0 %v18061_v53  ;;  %13133 = vmatprep.mubr.bf16.mxu0 %v3416_v39  ;;  %v18099_v53 = vld [vmem:[%s18555_s6 + $0x1b88] sm:$0xff]   ;;  %v18139_v39 = vld [vmem:[%s18555_s6 + $0x1cd8] sm:$0xff]  }
 0x35c   : > { %13094 = vmatmul.mubr.bf16.vlgmr.msra.gmra.mrb[100].mxu1 %v3376_v54  ;;  %16599 = vmatprep.subr.bf16.mxu0 %v18064_v55  ;;  %v18102_v54 = vld [vmem:[%s18555_s6 + $0x1bd0] sm:$0xff]  }
 0x35d   : > { %16620 = vmatpush3.bf16.msra.mxu1 %v18063_v56  ;;  %13173 = vmatprep.mubr.bf16.mxu1 %v3426_v45  ;;  %v18101_v55 = vld [vmem:[%s18555_s6 + $0x1b10] sm:$0xff]   ;;  %v18104_v56 = vld [vmem:[%s18555_s6 + $0x1b58] sm:$0xff]   ;;  %v18142_v45 = vld [vmem:[%s18555_s6 + $0x1c20] sm:$0xff]  }
 0x35e   : > { %16621 = vmatprep.subr.bf16.mxu1 %v18066_v57  ;;  %v18103_v57 = vld [vmem:[%s18555_s6 + $0x1b90] sm:$0xff]  }
 0x35f   : > { %16600 = vmatpush3.bf16.msra.mxu0 %v18065_v58  ;;  %v18106_v58 = vld [vmem:[%s18555_s6 + $0x1bd8] sm:$0xff]  }
 0x360   : > { %16601 = vmatprep.subr.bf16.mxu0 %v18068_v59  ;;  %v18105_v59 = vld [vmem:[%s18555_s6 + $0x1b18] sm:$0xff]  }
 0x361   : > { %16622 = vmatpush3.bf16.msra.mxu1 %v18067_v60  ;;  %v18108_v60 = vld [vmem:[%s18555_s6 + $0x1b60] sm:$0xff]  }
 0x362   : > { %16623 = vmatprep.subr.bf16.mxu1 %v18070_v51  ;;  %v18107_v51 = vld [vmem:[%s18555_s6 + $0x1b98] sm:$0xff]  }
 0x363   : > { %16602 = vmatpush3.bf16.msra.mxu0 %v18069_v61  ;;  %v18110_v61 = vld [vmem:[%s18555_s6 + $0x1be0] sm:$0xff]  }
 0x364   : > { %16603 = vmatprep.subr.bf16.mxu0 %v18072_v62  ;;  %v18109_v62 = vld [vmem:[%s18555_s6 + $0x1b20] sm:$0xff]  }
 0x365   : > { %16624 = vmatpush3.bf16.msra.mxu1 %v18071_v63  ;;  %v18112_v63 = vld [vmem:[%s18555_s6 + $0x1b68] sm:$0xff]  }
 0x366   : > { %16625 = vmatprep.subr.bf16.mxu1 %v18074_v0  ;;  %v18111_v0 = vld [vmem:[%s18555_s6 + $0x1ba0] sm:$0xff]  }
 0x367   : > { %16604 = vmatpush3.bf16.msra.mxu0 %v18073_v1 }
 0x368   : > { %16605 = vmatprep.subr.bf16.mxu0 %v18076_v2  ;;  %v18114_v2 = vld [vmem:[%s18555_s6 + $0x1be8] sm:$0xff]  }
 0x369   : > { %16626 = vmatpush3.bf16.msra.mxu1 %v18075_v3 }
 0x36a   : > { %16627 = vmatprep.subr.bf16.mxu1 %v18078_v4  ;;  %v18113_v4 = vld [vmem:[%s18555_s6 + $0x1b28] sm:$0xff]  }
 0x36b   : > { %16606 = vmatpush3.bf16.msra.mxu0 %v18077_v5 }
 0x36c   : > { %16607 = vmatprep.subr.bf16.mxu0 %v18080_v6 }
 0x36d   : > { %v16305_v8 = vpop.f32.mrb[76].mxu0  ;;  %16628 = vmatpush3.bf16.msra.mxu1 %v18079_v7 }
 0x36e   : > { %v16306_v10 = vpop.f32.mrb[77].mxu0  ;;  %16629 = vmatprep.subr.bf16.mxu1 %v18082_v9  ;;  %v18116_v9 = vld [vmem:[%s18555_s6 + $0x1b70] sm:$0xff]  }
 0x36f   : > { %v16307_v12 = vadd.f32 %v16306_v10, %v16305_v8  ;;  %v16308_v13 = vpop.f32.mrb[78].mxu0  ;;  %v16327_v14 = vpop.f32.mrb[76].mxu1  ;;  %16608 = vmatpush3.bf16.msra.mxu0 %v18081_v11  ;;  %v18115_v8 = vld [vmem:[%s18555_s6 + $0x1ba8] sm:$0xff]  }
 0x370   : > { %v16309_v17 = vpop.f32.mrb[79].mxu0  ;;  %v16328_v18 = vpop.f32.mrb[77].mxu1  ;;  %16609 = vmatprep.subr.bf16.mxu0 %v18084_v16  ;;  %v18117_v16 = vld [vmem:[%s18555_s6 + $0x1b30] sm:$0xff]  }
 0x371   : > { %v12576_v20 = vadd.f32 %v16307_v12, %v19595_v43  ;;  %v16329_v21 = vadd.f32 %v16328_v18, %v16327_v14  ;;  %v16330_v23 = vpop.f32.mrb[78].mxu1  ;;  %16630 = vmatpush3.bf16.msra.mxu1 %v18083_v15  ;;  %v3424_v43 = vcombine.high %v3402_v36, %v3402_v36  ;;  %v18118_v14 = vld [vmem:[%s18555_s6 + $0x1bf0] sm:$0xff]  }
 0x372   : > { %v16331_v25 = vpop.f32.mrb[79].mxu1  ;;  %16631 = vmatprep.subr.bf16.mxu1 %v18086_v22  ;;  %v18121_v22 = vld [vmem:[%s18555_s6 + $0x1b38] sm:$0xff]   ;;  %v3409_v23 = vrot.slane %v19644_v37, %v18593_v42 }
 0x373   : > { %v19633_v26 = vadd.f32 %v16329_v21, %v12576_v20  ;;  %16610 = vmatpush3.bf16.msra.mxu0 %v18085_v19  ;;  %v18120_v19 = vld [vmem:[%s18555_s6 + $0x1b78] sm:$0xff]   ;;  %v18119_v20 = vld [vmem:[%s18555_s6 + $0x1bb0] sm:$0xff]  }
 0x374   : > { %16611 = vmatprep.subr.bf16.mxu0 %v18088_v27  ;;  %v18122_v21 = vld [vmem:[%s18555_s6 + $0x1bf8] sm:$0xff]   ;;  %v18126_v27 = vld [vmem:[%s18555_s6 + $0x1c00] sm:$0xff]  }
 0x375   : > { %16632 = vmatpush3.bf16.msra.mxu1 %v18087_v24  ;;  %v18125_v24 = vld [vmem:[%s18555_s6 + $0x1c40] sm:$0xff]   ;;  %v18124_v25 = vld [vmem:[%s18555_s6 + $0x1bb8] sm:$0xff]  }
 0x376   : > { %16633 = vmatprep.subr.bf16.mxu1 %v18090_v29  ;;  %v18129_v29 = vld [vmem:[%s18555_s6 + $0x1c48] sm:$0xff]   ;;  %v18137_v37 = vld [vmem:[%s18555_s6 + $0x1c58] sm:$0xff]  }
 0x377   : > { %16612 = vmatpush3.bf16.msra.mxu0 %v18089_v28  ;;  %v3425_v28 = vcombine.high %v3409_v23, %v3409_v23 }
 0x378   : > { %16641 = vmatprep.subr.bf16.mxu0 %v18092_v35  ;;  %v18132_v35 = vld [vmem:[%s18555_s6 + $0x1c88] sm:$0xff]  }
 0x379   : > { %16634 = vmatpush3.bf16.msra.mxu1 %v18091_v33  ;;  %v18130_v33 = vld [vmem:[%s18555_s6 + $0x1c08] sm:$0xff]  }
 0x37a   : > { %16663 = vmatprep.subr.bf16.mxu1 %v18094_v38  ;;  %13134 = vmatmul.mubr.bf16.vlgmr.msra.gmra.mrb[104].mxu0 %v3402_v36  ;;  %v18134_v36 = vld [vmem:[%s18555_s6 + $0x1c10] sm:$0xff]  }
 0x37b   : > { %16642 = vmatpush3.bf16.msra.mxu0 %v18093_v40  ;;  %13213 = vmatprep.mubr.bf16.mxu0 %v3423_v47  ;;  %v18136_v38 = vld [vmem:[%s18555_s6 + $0x1c90] sm:$0xff]   ;;  %v18138_v40 = vld [vmem:[%s18555_s6 + $0x1c18] sm:$0xff]   ;;  %v18144_v47 = vld [vmem:[%s18555_s6 + $0x1ca0] sm:$0xff]  }
 0x37c   : > { %13174 = vmatmul.mubr.bf16.vlgmr.msra.gmra.mrb[104].mxu1 %v3424_v43  ;;  %16643 = vmatprep.subr.bf16.mxu0 %v18096_v44  ;;  %v18140_v43 = vld [vmem:[%s18555_s6 + $0x1c98] sm:$0xff]   ;;  %v18143_v44 = vld [vmem:[%s18555_s6 + $0x1ce0] sm:$0xff]  }
 0x37d   : > { %16664 = vmatpush3.bf16.msra.mxu1 %v18095_v46  ;;  %13253 = vmatprep.mubr.bf16.mxu1 %v3427_v50  ;;  %v18145_v46 = vld [vmem:[%s18555_s6 + $0x1c68] sm:$0xff]  }
 0x37e   : > { %16665 = vmatprep.subr.bf16.mxu1 %v18098_v48 }
 0x37f   : > { %16644 = vmatpush3.bf16.msra.mxu0 %v18097_v49  ;;  %v18147_v49 = vld [vmem:[%s18555_s6 + $0x1ce8] sm:$0xff]  }
 0x380   : > { %16645 = vmatprep.subr.bf16.mxu0 %v18100_v52  ;;  %v18146_v52 = vld [vmem:[%s18555_s6 + $0x1c28] sm:$0xff]  }
 0x381   : > { %16666 = vmatpush3.bf16.msra.mxu1 %v18099_v53 }
 0x382   : > { %16667 = vmatprep.subr.bf16.mxu1 %v18102_v54 }
 0x383   : > { %16646 = vmatpush3.bf16.msra.mxu0 %v18101_v55 }
 0x384   : > { %16647 = vmatprep.subr.bf16.mxu0 %v18104_v56  ;;  %v18148_v56 = vld [vmem:[%s18555_s6 + $0x1ca8] sm:$0xff]  }
 0x385   : > { %16668 = vmatpush3.bf16.msra.mxu1 %v18103_v57  ;;  %v18149_v57 = vld [vmem:[%s18555_s6 + $0x1c70] sm:$0xff]  }
 0x386   : > { %16669 = vmatprep.subr.bf16.mxu1 %v18106_v58 }
 0x387   : > { %16648 = vmatpush3.bf16.msra.mxu0 %v18105_v59 }
 0x388   : > { %16649 = vmatprep.subr.bf16.mxu0 %v18108_v60  ;;  %v18150_v60 = vld [vmem:[%s18555_s6 + $0x1c30] sm:$0xff]  }
 0x389   : > { %16670 = vmatpush3.bf16.msra.mxu1 %v18107_v51 }
 0x38a   : > { %16671 = vmatprep.subr.bf16.mxu1 %v18110_v61 }
 0x38b   : > { %16650 = vmatpush3.bf16.msra.mxu0 %v18109_v62  ;;  %v18151_v62 = vld [vmem:[%s18555_s6 + $0x1cf0] sm:$0xff]  }
 0x38c   : > { %16651 = vmatprep.subr.bf16.mxu0 %v18112_v63 }
 0x38d   : > { %v16349_v1 = vpop.f32.mrb[80].mxu0  ;;  %16672 = vmatpush3.bf16.msra.mxu1 %v18111_v0  ;;  %v18152_v0 = vld [vmem:[%s18555_s6 + $0x1cb0] sm:$0xff]  }
 0x38e   : > { %v16350_v3 = vpop.f32.mrb[81].mxu0  ;;  %16673 = vmatprep.subr.bf16.mxu1 %v18114_v2 }
 0x38f   : > { %v16351_v5 = vadd.f32 %v16350_v3, %v16349_v1  ;;  %v16352_v6 = vpop.f32.mrb[82].mxu0  ;;  %v16371_v7 = vpop.f32.mrb[80].mxu1  ;;  %16652 = vmatpush3.bf16.msra.mxu0 %v18113_v4  ;;  %v18153_v3 = vld [vmem:[%s18555_s6 + $0x1c78] sm:$0xff]  }
 0x390   : > { %v16353_v10 = vpop.f32.mrb[83].mxu0  ;;  %v16372_v11 = vpop.f32.mrb[81].mxu1  ;;  %16653 = vmatprep.subr.bf16.mxu0 %v18116_v9  ;;  %v18154_v4 = vld [vmem:[%s18555_s6 + $0x1c38] sm:$0xff]   ;;  %v318_v6 = vld [vmem:[%s18550_s27 + $0x70] sm:$0xff] }
 0x391   : > { %v12656_v12 = vadd.f32 %v16351_v5, %v19633_v26  ;;  %v16373_v13 = vadd.f32 %v16372_v11, %v16371_v7  ;;  %v16374_v15 = vpop.f32.mrb[82].mxu1  ;;  %16674 = vmatpush3.bf16.msra.mxu1 %v18115_v8  ;;  %v18127_v26 = vld [vmem:[%s18555_s6 + $0x1cc0] sm:$0xff]   ;;  %v18155_v5 = vld [vmem:[%s18555_s6 + $0x1cf8] sm:$0xff]   ;;  %v3435_v7 = vrot.slane %v318_v6, %v18593_v42  ;;  %v3428_v9 = vcombine.high %v318_v6, %v318_v6 }
 0x392   : > { %v16375_v17 = vpop.f32.mrb[83].mxu1  ;;  %16675 = vmatprep.subr.bf16.mxu1 %v18118_v14  ;;  %v18156_v8 = vld [vmem:[%s18555_s6 + $0x1cb8] sm:$0xff]   ;;  %v18157_v10 = vld [vmem:[%s18555_s6 + $0x1d40] sm:$0xff]  }
 0x393   : > { %v19677_v18 = vadd.f32 %v16373_v13, %v12656_v12  ;;  %16654 = vmatpush3.bf16.msra.mxu0 %v18117_v16  ;;  %v3443_v11 = vcombine.high %v3435_v7, %v3435_v7  ;;  %v3451_v12 = vrot.slane %v3435_v7, %v18593_v42  ;;  %v19726_v13 = vrot.slane %v3428_v9, %v18593_v42  ;;  %v18159_v14 = vld [vmem:[%s18555_s6 + $0x1dc0] sm:$0xff]   ;;  %v18196_v7 = vld [vmem:[%s18555_s6 + $0x1ec8] sm:$0xff]   ;;  %v18198_v9 = vld [vmem:[%s18555_s6 + $0x1e50] sm:$0xff]  }
 0x394   : > { %16655 = vmatprep.subr.bf16.mxu0 %v18120_v19  ;;  %v18158_v16 = vld [vmem:[%s18555_s6 + $0x1d00] sm:$0xff]   ;;  %v18161_v19 = vld [vmem:[%s18555_s6 + $0x1d48] sm:$0xff]  }
 0x395   : > { %16676 = vmatpush3.bf16.msra.mxu1 %v18119_v20  ;;  %v3465_v15 = vrot.slane %v3443_v11, %v18593_v42  ;;  %v3444_v17 = vcombine.high %v19726_v13, %v19726_v13  ;;  %v18193_v6 = vld [vmem:[%s18555_s6 + $0x1e80] sm:$0xff]   ;;  %v18200_v11 = vld [vmem:[%s18555_s6 + $0x1ed0] sm:$0xff]  }
 0x396   : > { %16677 = vmatprep.subr.bf16.mxu1 %v18122_v21  ;;  %v18160_v21 = vld [vmem:[%s18555_s6 + $0x1d80] sm:$0xff]  }
 0x397   : > { %16656 = vmatpush3.bf16.msra.mxu0 %v18121_v22  ;;  %v3475_v20 = vcombine.high %v3465_v15, %v3465_v15  ;;  %v3472_v22 = vrot.slane %v3444_v17, %v18593_v42  ;;  %v18206_v17 = vld [vmem:[%s18555_s6 + $0x1e60] sm:$0xff]  }
 0x398   : > { %16685 = vmatprep.subr.bf16.mxu0 %v18125_v24  ;;  %v18162_v24 = vld [vmem:[%s18555_s6 + $0x1d08] sm:$0xff]  }
 0x399   : > { %16678 = vmatpush3.bf16.msra.mxu1 %v18124_v25  ;;  %v3476_v25 = vcombine.high %v3472_v22, %v3472_v22 }
 0x39a   : > { %13214 = vmatmul.mubr.bf16.vlgmr.msra.gmra.mrb[108].mxu0 %v3409_v23  ;;  %16707 = vmatprep.subr.bf16.mxu1 %v18127_v26  ;;  %v18163_v23 = vld [vmem:[%s18555_s6 + $0x1dc8] sm:$0xff]   ;;  %v18165_v26 = vld [vmem:[%s18555_s6 + $0x1d50] sm:$0xff]  }
 0x39b   : > { %16686 = vmatpush3.bf16.msra.mxu0 %v18126_v27  ;;  %13293 = vmatprep.mubr.bf16.mxu0 %v3465_v15  ;;  %v18164_v27 = vld [vmem:[%s18555_s6 + $0x1d88] sm:$0xff]   ;;  %v18204_v15 = vld [vmem:[%s18555_s6 + $0x1ed8] sm:$0xff]  }
 0x39c   : > { %13254 = vmatmul.mubr.bf16.vlgmr.msra.gmra.mrb[108].mxu1 %v3425_v28  ;;  %16687 = vmatprep.subr.bf16.mxu0 %v18129_v29  ;;  %v18167_v28 = vld [vmem:[%s18555_s6 + $0x1dd0] sm:$0xff]  }
 0x39d   : > { %16708 = vmatpush3.bf16.msra.mxu1 %v18128_v31  ;;  %13333 = vmatprep.mubr.bf16.mxu1 %v3475_v20  ;;  %v18166_v29 = vld [vmem:[%s18555_s6 + $0x1d10] sm:$0xff]   ;;  %v18169_v31 = vld [vmem:[%s18555_s6 + $0x1d58] sm:$0xff]   ;;  %v18207_v20 = vld [vmem:[%s18555_s6 + $0x1e20] sm:$0xff]  }
 0x39e   : > { %16709 = vmatprep.subr.bf16.mxu1 %v18131_v32  ;;  %v18168_v32 = vld [vmem:[%s18555_s6 + $0x1d90] sm:$0xff]  }
 0x39f   : > { %16688 = vmatpush3.bf16.msra.mxu0 %v18130_v33  ;;  %v18171_v33 = vld [vmem:[%s18555_s6 + $0x1dd8] sm:$0xff]  }
 0x3a0   : > { %16689 = vmatprep.subr.bf16.mxu0 %v18133_v34  ;;  %v18170_v34 = vld [vmem:[%s18555_s6 + $0x1d18] sm:$0xff]  }
 0x3a1   : > { %16710 = vmatpush3.bf16.msra.mxu1 %v18132_v35  ;;  %v18173_v35 = vld [vmem:[%s18555_s6 + $0x1d60] sm:$0xff]  }
 0x3a2   : > { %16711 = vmatprep.subr.bf16.mxu1 %v18135_v30  ;;  %v18172_v30 = vld [vmem:[%s18555_s6 + $0x1d98] sm:$0xff]  }
 0x3a3   : > { %16690 = vmatpush3.bf16.msra.mxu0 %v18134_v36  ;;  %v18175_v36 = vld [vmem:[%s18555_s6 + $0x1de0] sm:$0xff]  }
 0x3a4   : > { %16691 = vmatprep.subr.bf16.mxu0 %v18137_v37  ;;  %v18174_v37 = vld [vmem:[%s18555_s6 + $0x1d20] sm:$0xff]  }
 0x3a5   : > { %16712 = vmatpush3.bf16.msra.mxu1 %v18136_v38  ;;  %v18177_v38 = vld [vmem:[%s18555_s6 + $0x1d68] sm:$0xff]  }
 0x3a6   : > { %16713 = vmatprep.subr.bf16.mxu1 %v18139_v39  ;;  %v18176_v39 = vld [vmem:[%s18555_s6 + $0x1da0] sm:$0xff]  }
 0x3a7   : > { %16692 = vmatpush3.bf16.msra.mxu0 %v18138_v40 }
 0x3a8   : > { %16693 = vmatprep.subr.bf16.mxu0 %v18141_v41  ;;  %v18179_v41 = vld [vmem:[%s18555_s6 + $0x1de8] sm:$0xff]  }
 0x3a9   : > { %16714 = vmatpush3.bf16.msra.mxu1 %v18140_v43 }
 0x3aa   : > { %16715 = vmatprep.subr.bf16.mxu1 %v18143_v44  ;;  %v18178_v44 = vld [vmem:[%s18555_s6 + $0x1d28] sm:$0xff]  }
 0x3ab   : > { %16694 = vmatpush3.bf16.msra.mxu0 %v18142_v45 }
 0x3ac   : > { %16695 = vmatprep.subr.bf16.mxu0 %v18145_v46 }
 0x3ad   : > { %v16393_v48 = vpop.f32.mrb[84].mxu0  ;;  %16716 = vmatpush3.bf16.msra.mxu1 %v18144_v47 }
 0x3ae   : > { %v16394_v50 = vpop.f32.mrb[85].mxu0  ;;  %16717 = vmatprep.subr.bf16.mxu1 %v18147_v49  ;;  %v18181_v49 = vld [vmem:[%s18555_s6 + $0x1d70] sm:$0xff]  }
 0x3af   : > { %v16395_v53 = vadd.f32 %v16394_v50, %v16393_v48  ;;  %v16396_v54 = vpop.f32.mrb[86].mxu0  ;;  %v16415_v55 = vpop.f32.mrb[84].mxu1  ;;  %16696 = vmatpush3.bf16.msra.mxu0 %v18146_v52  ;;  %v18180_v48 = vld [vmem:[%s18555_s6 + $0x1da8] sm:$0xff]  }
 0x3b0   : > { %v16397_v58 = vpop.f32.mrb[87].mxu0  ;;  %v16416_v59 = vpop.f32.mrb[85].mxu1  ;;  %16697 = vmatprep.subr.bf16.mxu0 %v18149_v57  ;;  %v18182_v57 = vld [vmem:[%s18555_s6 + $0x1d30] sm:$0xff]  }
 0x3b1   : > { %v12736_v51 = vadd.f32 %v16395_v53, %v19677_v18  ;;  %v16417_v61 = vadd.f32 %v16416_v59, %v16415_v55  ;;  %v16418_v63 = vpop.f32.mrb[86].mxu1  ;;  %16718 = vmatpush3.bf16.msra.mxu1 %v18148_v56  ;;  %v3473_v18 = vcombine.high %v3451_v12, %v3451_v12  ;;  %v18183_v55 = vld [vmem:[%s18555_s6 + $0x1df0] sm:$0xff]  }
 0x3b2   : > { %v16419_v1 = vpop.f32.mrb[87].mxu1  ;;  %16719 = vmatprep.subr.bf16.mxu1 %v18151_v62  ;;  %v18186_v62 = vld [vmem:[%s18555_s6 + $0x1d38] sm:$0xff]   ;;  %v3458_v63 = vrot.slane %v19726_v13, %v18593_v42 }
 0x3b3   : > { %v19715_v2 = vadd.f32 %v16417_v61, %v12736_v51  ;;  %16698 = vmatpush3.bf16.msra.mxu0 %v18150_v60  ;;  %v18185_v60 = vld [vmem:[%s18555_s6 + $0x1d78] sm:$0xff]   ;;  %v18184_v51 = vld [vmem:[%s18555_s6 + $0x1db0] sm:$0xff]  }
 0x3b4   : > { %16699 = vmatprep.subr.bf16.mxu0 %v18153_v3  ;;  %v18187_v61 = vld [vmem:[%s18555_s6 + $0x1df8] sm:$0xff]   ;;  %v18191_v3 = vld [vmem:[%s18555_s6 + $0x1e00] sm:$0xff]  }
 0x3b5   : > { %16720 = vmatpush3.bf16.msra.mxu1 %v18152_v0  ;;  %v18190_v0 = vld [vmem:[%s18555_s6 + $0x1e40] sm:$0xff]   ;;  %v18189_v1 = vld [vmem:[%s18555_s6 + $0x1db8] sm:$0xff]  }
 0x3b6   : > { %16721 = vmatprep.subr.bf16.mxu1 %v18155_v5  ;;  %v18194_v5 = vld [vmem:[%s18555_s6 + $0x1e48] sm:$0xff]   ;;  %v18202_v13 = vld [vmem:[%s18555_s6 + $0x1e58] sm:$0xff]  }
 0x3b7   : > { %16700 = vmatpush3.bf16.msra.mxu0 %v18154_v4  ;;  %v3474_v4 = vcombine.high %v3458_v63, %v3458_v63 }
 0x3b8   : > { %16729 = vmatprep.subr.bf16.mxu0 %v18157_v10  ;;  %v18197_v10 = vld [vmem:[%s18555_s6 + $0x1e88] sm:$0xff]  }
 0x3b9   : > { %16722 = vmatpush3.bf16.msra.mxu1 %v18156_v8  ;;  %v18195_v8 = vld [vmem:[%s18555_s6 + $0x1e08] sm:$0xff]  }
 0x3ba   : > { %16751 = vmatprep.subr.bf16.mxu1 %v18159_v14  ;;  %13294 = vmatmul.mubr.bf16.vlgmr.msra.gmra.mrb[112].mxu0 %v3451_v12  ;;  %v18199_v12 = vld [vmem:[%s18555_s6 + $0x1e10] sm:$0xff]  }
 0x3bb   : > { %16730 = vmatpush3.bf16.msra.mxu0 %v18158_v16  ;;  %13373 = vmatprep.mubr.bf16.mxu0 %v3472_v22  ;;  %v18201_v14 = vld [vmem:[%s18555_s6 + $0x1e90] sm:$0xff]   ;;  %v18203_v16 = vld [vmem:[%s18555_s6 + $0x1e18] sm:$0xff]   ;;  %v18209_v22 = vld [vmem:[%s18555_s6 + $0x1ea0] sm:$0xff]  }
 0x3bc   : > { %13334 = vmatmul.mubr.bf16.vlgmr.msra.gmra.mrb[112].mxu1 %v3473_v18  ;;  %16731 = vmatprep.subr.bf16.mxu0 %v18161_v19  ;;  %v18205_v18 = vld [vmem:[%s18555_s6 + $0x1e98] sm:$0xff]   ;;  %v18208_v19 = vld [vmem:[%s18555_s6 + $0x1ee0] sm:$0xff]  }
 0x3bd   : > { %16752 = vmatpush3.bf16.msra.mxu1 %v18160_v21  ;;  %13413 = vmatprep.mubr.bf16.mxu1 %v3476_v25  ;;  %v18210_v21 = vld [vmem:[%s18555_s6 + $0x1e68] sm:$0xff]  }
 0x3be   : > { %16753 = vmatprep.subr.bf16.mxu1 %v18163_v23 }
 0x3bf   : > { %16732 = vmatpush3.bf16.msra.mxu0 %v18162_v24  ;;  %v18212_v24 = vld [vmem:[%s18555_s6 + $0x1ee8] sm:$0xff]  }
 0x3c0   : > { %16733 = vmatprep.subr.bf16.mxu0 %v18165_v26  ;;  %v18211_v26 = vld [vmem:[%s18555_s6 + $0x1e28] sm:$0xff]  }
 0x3c1   : > { %16754 = vmatpush3.bf16.msra.mxu1 %v18164_v27 }
 0x3c2   : > { %16755 = vmatprep.subr.bf16.mxu1 %v18167_v28 }
 0x3c3   : > { %16734 = vmatpush3.bf16.msra.mxu0 %v18166_v29 }
 0x3c4   : > { %16735 = vmatprep.subr.bf16.mxu0 %v18169_v31  ;;  %v18213_v31 = vld [vmem:[%s18555_s6 + $0x1ea8] sm:$0xff]  }
 0x3c5   : > { %16756 = vmatpush3.bf16.msra.mxu1 %v18168_v32  ;;  %v18214_v32 = vld [vmem:[%s18555_s6 + $0x1e70] sm:$0xff]  }
 0x3c6   : > { %16757 = vmatprep.subr.bf16.mxu1 %v18171_v33 }
 0x3c7   : > { %16736 = vmatpush3.bf16.msra.mxu0 %v18170_v34 }
 0x3c8   : > { %16737 = vmatprep.subr.bf16.mxu0 %v18173_v35  ;;  %v18215_v35 = vld [vmem:[%s18555_s6 + $0x1e30] sm:$0xff]  }
 0x3c9   : > { %16758 = vmatpush3.bf16.msra.mxu1 %v18172_v30 }
 0x3ca   : > { %16759 = vmatprep.subr.bf16.mxu1 %v18175_v36 }
 0x3cb   : > { %16738 = vmatpush3.bf16.msra.mxu0 %v18174_v37  ;;  %v18216_v37 = vld [vmem:[%s18555_s6 + $0x1ef0] sm:$0xff]  }
 0x3cc   : > { %16739 = vmatprep.subr.bf16.mxu0 %v18177_v38 }
 0x3cd   : > { %v16437_v40 = vpop.f32.mrb[88].mxu0  ;;  %16760 = vmatpush3.bf16.msra.mxu1 %v18176_v39  ;;  %v18217_v39 = vld [vmem:[%s18555_s6 + $0x1eb0] sm:$0xff]  }
 0x3ce   : > { %v16438_v43 = vpop.f32.mrb[89].mxu0  ;;  %16761 = vmatprep.subr.bf16.mxu1 %v18179_v41 }
 0x3cf   : > { %v16439_v45 = vadd.f32 %v16438_v43, %v16437_v40  ;;  %v16440_v46 = vpop.f32.mrb[90].mxu0  ;;  %v16459_v47 = vpop.f32.mrb[88].mxu1  ;;  %16740 = vmatpush3.bf16.msra.mxu0 %v18178_v44  ;;  %v18218_v43 = vld [vmem:[%s18555_s6 + $0x1e78] sm:$0xff]  }
 0x3d0   : > { %v16441_v50 = vpop.f32.mrb[91].mxu0  ;;  %v16460_v52 = vpop.f32.mrb[89].mxu1  ;;  %16741 = vmatprep.subr.bf16.mxu0 %v18181_v49  ;;  %v18219_v44 = vld [vmem:[%s18555_s6 + $0x1e38] sm:$0xff]  }
 0x3d1   : > { %v12816_v53 = vadd.f32 %v16439_v45, %v19715_v2  ;;  %v16461_v54 = vadd.f32 %v16460_v52, %v16459_v47  ;;  %v16462_v56 = vpop.f32.mrb[90].mxu1  ;;  %16762 = vmatpush3.bf16.msra.mxu1 %v18180_v48  ;;  %v18192_v2 = vld [vmem:[%s18555_s6 + $0x1ec0] sm:$0xff]   ;;  %v18220_v45 = vld [vmem:[%s18555_s6 + $0x1ef8] sm:$0xff]  }
 0x3d2   : > { %v16463_v58 = vpop.f32.mrb[91].mxu1  ;;  %16763 = vmatprep.subr.bf16.mxu1 %v18183_v55  ;;  %v319_v46 = vld [vmem:[%s18550_s27 + $0x78] sm:$0xff]  ;;  %v18222_v50 = vld [vmem:[%s18555_s6 + $0x1f40] sm:$0xff]  }
 0x3d3   : > { %v19759_v59 = vadd.f32 %v16461_v54, %v12816_v53  ;;  %16742 = vmatpush3.bf16.msra.mxu0 %v18182_v57  ;;  %v3484_v47 = vrot.slane %v319_v46, %v18593_v42  ;;  %v18221_v48 = vld [vmem:[%s18555_s6 + $0x1eb8] sm:$0xff]   ;;  %v3477_v49 = vcombine.high %v319_v46, %v319_v46  ;;  %v18224_v55 = vld [vmem:[%s18555_s6 + $0x1fc0] sm:$0xff]  }
 0x3d4   : > { %16743 = vmatprep.subr.bf16.mxu0 %v18185_v60  ;;  %v18223_v57 = vld [vmem:[%s18555_s6 + $0x1f00] sm:$0xff]   ;;  %v18226_v60 = vld [vmem:[%s18555_s6 + $0x1f48] sm:$0xff]  }
 0x3d5   : > { %16764 = vmatpush3.bf16.msra.mxu1 %v18184_v51  ;;  %v3492_v52 = vcombine.high %v3484_v47, %v3484_v47  ;;  %v3500_v53 = vrot.slane %v3484_v47, %v18593_v42  ;;  %v19808_v54 = vrot.slane %v3477_v49, %v18593_v42  ;;  %v18258_v46 = vld [vmem:[%s18555_s6 + $0x2080] sm:$0xff]   ;;  %v18261_v47 = vld [vmem:[%s18555_s6 + $0x20c8] sm:$0xff]   ;;  %v18263_v49 = vld [vmem:[%s18555_s6 + $0x2050] sm:$0xff]  }
 0x3d6   : > { %16765 = vmatprep.subr.bf16.mxu1 %v18187_v61  ;;  %v18225_v61 = vld [vmem:[%s18555_s6 + $0x1f80] sm:$0xff]  }
 0x3d7   : > { %16744 = vmatpush3.bf16.msra.mxu0 %v18186_v62  ;;  %v3514_v56 = vrot.slane %v3492_v52, %v18593_v42  ;;  %v3493_v58 = vcombine.high %v19808_v54, %v19808_v54  ;;  %v18265_v52 = vld [vmem:[%s18555_s6 + $0x20d0] sm:$0xff]  }
 0x3d8   : > { %16773 = vmatprep.subr.bf16.mxu0 %v18190_v0  ;;  %v18227_v0 = vld [vmem:[%s18555_s6 + $0x1f08] sm:$0xff]  }
 0x3d9   : > { %16766 = vmatpush3.bf16.msra.mxu1 %v18189_v1  ;;  %v3524_v51 = vcombine.high %v3514_v56, %v3514_v56  ;;  %v3521_v62 = vrot.slane %v3493_v58, %v18593_v42  ;;  %v18271_v58 = vld [vmem:[%s18555_s6 + $0x2060] sm:$0xff]  }
 0x3da   : > { %13374 = vmatmul.mubr.bf16.vlgmr.msra.gmra.mrb[116].mxu0 %v3458_v63  ;;  %16795 = vmatprep.subr.bf16.mxu1 %v18192_v2  ;;  %v18228_v63 = vld [vmem:[%s18555_s6 + $0x1fc8] sm:$0xff]   ;;  %v18230_v2 = vld [vmem:[%s18555_s6 + $0x1f50] sm:$0xff]  }
 0x3db   : > { %16774 = vmatpush3.bf16.msra.mxu0 %v18191_v3  ;;  %13453 = vmatprep.mubr.bf16.mxu0 %v3514_v56  ;;  %v3525_v1 = vcombine.high %v3521_v62, %v3521_v62  ;;  %v18229_v3 = vld [vmem:[%s18555_s6 + $0x1f88] sm:$0xff]   ;;  %v18269_v56 = vld [vmem:[%s18555_s6 + $0x20d8] sm:$0xff]  }
 0x3dc   : > { %13414 = vmatmul.mubr.bf16.vlgmr.msra.gmra.mrb[116].mxu1 %v3474_v4  ;;  %16775 = vmatprep.subr.bf16.mxu0 %v18194_v5  ;;  %v18232_v4 = vld [vmem:[%s18555_s6 + $0x1fd0] sm:$0xff]  }
 0x3dd   : > { %16796 = vmatpush3.bf16.msra.mxu1 %v18193_v6  ;;  %13493 = vmatprep.mubr.bf16.mxu1 %v3524_v51  ;;  %v18231_v5 = vld [vmem:[%s18555_s6 + $0x1f10] sm:$0xff]   ;;  %v18234_v6 = vld [vmem:[%s18555_s6 + $0x1f58] sm:$0xff]   ;;  %v18272_v51 = vld [vmem:[%s18555_s6 + $0x2020] sm:$0xff]  }
 0x3de   : > { %16797 = vmatprep.subr.bf16.mxu1 %v18196_v7  ;;  %v18233_v7 = vld [vmem:[%s18555_s6 + $0x1f90] sm:$0xff]  }
 0x3df   : > { %16776 = vmatpush3.bf16.msra.mxu0 %v18195_v8  ;;  %v18236_v8 = vld [vmem:[%s18555_s6 + $0x1fd8] sm:$0xff]  }
 0x3e0   : > { %16777 = vmatprep.subr.bf16.mxu0 %v18198_v9  ;;  %v18235_v9 = vld [vmem:[%s18555_s6 + $0x1f18] sm:$0xff]  }
 0x3e1   : > { %16798 = vmatpush3.bf16.msra.mxu1 %v18197_v10  ;;  %v18238_v10 = vld [vmem:[%s18555_s6 + $0x1f60] sm:$0xff]  }
 0x3e2   : > { %16799 = vmatprep.subr.bf16.mxu1 %v18200_v11  ;;  %v18237_v11 = vld [vmem:[%s18555_s6 + $0x1f98] sm:$0xff]  }
 0x3e3   : > { %16778 = vmatpush3.bf16.msra.mxu0 %v18199_v12  ;;  %v18240_v12 = vld [vmem:[%s18555_s6 + $0x1fe0] sm:$0xff]  }
 0x3e4   : > { %16779 = vmatprep.subr.bf16.mxu0 %v18202_v13  ;;  %v18239_v13 = vld [vmem:[%s18555_s6 + $0x1f20] sm:$0xff]  }
 0x3e5   : > { %16800 = vmatpush3.bf16.msra.mxu1 %v18201_v14  ;;  %v18242_v14 = vld [vmem:[%s18555_s6 + $0x1f68] sm:$0xff]  }
 0x3e6   : > { %16801 = vmatprep.subr.bf16.mxu1 %v18204_v15  ;;  %v18241_v15 = vld [vmem:[%s18555_s6 + $0x1fa0] sm:$0xff]  }
 0x3e7   : > { %16780 = vmatpush3.bf16.msra.mxu0 %v18203_v16 }
 0x3e8   : > { %16781 = vmatprep.subr.bf16.mxu0 %v18206_v17  ;;  %v18244_v17 = vld [vmem:[%s18555_s6 + $0x1fe8] sm:$0xff]  }
 0x3e9   : > { %16802 = vmatpush3.bf16.msra.mxu1 %v18205_v18 }
 0x3ea   : > { %16803 = vmatprep.subr.bf16.mxu1 %v18208_v19  ;;  %v18243_v19 = vld [vmem:[%s18555_s6 + $0x1f28] sm:$0xff]  }
 0x3eb   : > { %16782 = vmatpush3.bf16.msra.mxu0 %v18207_v20 }
 0x3ec   : > { %16783 = vmatprep.subr.bf16.mxu0 %v18210_v21 }
 0x3ed   : > { %v16481_v23 = vpop.f32.mrb[92].mxu0  ;;  %16804 = vmatpush3.bf16.msra.mxu1 %v18209_v22 }
 0x3ee   : > { %v16482_v25 = vpop.f32.mrb[93].mxu0  ;;  %16805 = vmatprep.subr.bf16.mxu1 %v18212_v24  ;;  %v18246_v24 = vld [vmem:[%s18555_s6 + $0x1f70] sm:$0xff]  }
 0x3ef   : > { %v16483_v27 = vadd.f32 %v16482_v25, %v16481_v23  ;;  %v16484_v28 = vpop.f32.mrb[94].mxu0  ;;  %v16503_v29 = vpop.f32.mrb[92].mxu1  ;;  %16784 = vmatpush3.bf16.msra.mxu0 %v18211_v26  ;;  %v18245_v23 = vld [vmem:[%s18555_s6 + $0x1fa8] sm:$0xff]  }
 0x3f0   : > { %v16485_v33 = vpop.f32.mrb[95].mxu0  ;;  %v16504_v34 = vpop.f32.mrb[93].mxu1  ;;  %16785 = vmatprep.subr.bf16.mxu0 %v18214_v32  ;;  %v18247_v32 = vld [vmem:[%s18555_s6 + $0x1f30] sm:$0xff]  }
 0x3f1   : > { %v12896_v30 = vadd.f32 %v16483_v27, %v19759_v59  ;;  %v16505_v36 = vadd.f32 %v16504_v34, %v16503_v29  ;;  %v16506_v38 = vpop.f32.mrb[94].mxu1  ;;  %16806 = vmatpush3.bf16.msra.mxu1 %v18213_v31  ;;  %v3522_v59 = vcombine.high %v3500_v53, %v3500_v53  ;;  %v18248_v29 = vld [vmem:[%s18555_s6 + $0x1ff0] sm:$0xff]  }
 0x3f2   : > { %v16507_v40 = vpop.f32.mrb[95].mxu1  ;;  %16807 = vmatprep.subr.bf16.mxu1 %v18216_v37  ;;  %v18251_v37 = vld [vmem:[%s18555_s6 + $0x1f38] sm:$0xff]   ;;  %v3507_v38 = vrot.slane %v19808_v54, %v18593_v42 }
 0x3f3   : > { %v19797_v41 = vadd.f32 %v16505_v36, %v12896_v30  ;;  %16786 = vmatpush3.bf16.msra.mxu0 %v18215_v35  ;;  %v18250_v35 = vld [vmem:[%s18555_s6 + $0x1f78] sm:$0xff]   ;;  %v18249_v30 = vld [vmem:[%s18555_s6 + $0x1fb0] sm:$0xff]  }
 0x3f4   : > { %16787 = vmatprep.subr.bf16.mxu0 %v18218_v43  ;;  %v18252_v36 = vld [vmem:[%s18555_s6 + $0x1ff8] sm:$0xff]   ;;  %v18256_v43 = vld [vmem:[%s18555_s6 + $0x2000] sm:$0xff]  }
 0x3f5   : > { %16808 = vmatpush3.bf16.msra.mxu1 %v18217_v39  ;;  %v18255_v39 = vld [vmem:[%s18555_s6 + $0x2040] sm:$0xff]   ;;  %v18254_v40 = vld [vmem:[%s18555_s6 + $0x1fb8] sm:$0xff]  }
 0x3f6   : > { %16809 = vmatprep.subr.bf16.mxu1 %v18220_v45  ;;  %v18259_v45 = vld [vmem:[%s18555_s6 + $0x2048] sm:$0xff]   ;;  %v18267_v54 = vld [vmem:[%s18555_s6 + $0x2058] sm:$0xff]  }
 0x3f7   : > { %16788 = vmatpush3.bf16.msra.mxu0 %v18219_v44  ;;  %v3523_v44 = vcombine.high %v3507_v38, %v3507_v38 }
 0x3f8   : > { %16817 = vmatprep.subr.bf16.mxu0 %v18222_v50  ;;  %v18262_v50 = vld [vmem:[%s18555_s6 + $0x2088] sm:$0xff]  }
 0x3f9   : > { %16810 = vmatpush3.bf16.msra.mxu1 %v18221_v48  ;;  %v18260_v48 = vld [vmem:[%s18555_s6 + $0x2008] sm:$0xff]  }
 0x3fa   : > { %16839 = vmatprep.subr.bf16.mxu1 %v18224_v55  ;;  %13454 = vmatmul.mubr.bf16.vlgmr.msra.gmra.mrb[120].mxu0 %v3500_v53  ;;  %v18264_v53 = vld [vmem:[%s18555_s6 + $0x2010] sm:$0xff]  }
 0x3fb   : > { %16818 = vmatpush3.bf16.msra.mxu0 %v18223_v57  ;;  %13533 = vmatprep.mubr.bf16.mxu0 %v3521_v62  ;;  %v18266_v55 = vld [vmem:[%s18555_s6 + $0x2090] sm:$0xff]   ;;  %v18268_v57 = vld [vmem:[%s18555_s6 + $0x2018] sm:$0xff]   ;;  %v18274_v62 = vld [vmem:[%s18555_s6 + $0x20a0] sm:$0xff]  }
 0x3fc   : > { %13494 = vmatmul.mubr.bf16.vlgmr.msra.gmra.mrb[120].mxu1 %v3522_v59  ;;  %16819 = vmatprep.subr.bf16.mxu0 %v18226_v60  ;;  %v18270_v59 = vld [vmem:[%s18555_s6 + $0x2098] sm:$0xff]   ;;  %v18273_v60 = vld [vmem:[%s18555_s6 + $0x20e0] sm:$0xff]  }
 0x3fd   : > { %16840 = vmatpush3.bf16.msra.mxu1 %v18225_v61  ;;  %13573 = vmatprep.mubr.bf16.mxu1 %v3525_v1  ;;  %v18275_v61 = vld [vmem:[%s18555_s6 + $0x2068] sm:$0xff]  }
 0x3fe   : > { %16841 = vmatprep.subr.bf16.mxu1 %v18228_v63 }
 0x3ff   : > { %16820 = vmatpush3.bf16.msra.mxu0 %v18227_v0  ;;  %v18277_v0 = vld [vmem:[%s18555_s6 + $0x20e8] sm:$0xff]  }
 0x400   : > { %16821 = vmatprep.subr.bf16.mxu0 %v18230_v2  ;;  %v18276_v2 = vld [vmem:[%s18555_s6 + $0x2028] sm:$0xff]  }
 0x401   : > { %16842 = vmatpush3.bf16.msra.mxu1 %v18229_v3 }
 0x402   : > { %16843 = vmatprep.subr.bf16.mxu1 %v18232_v4 }
 0x403   : > { %16822 = vmatpush3.bf16.msra.mxu0 %v18231_v5 }
 0x404   : > { %16823 = vmatprep.subr.bf16.mxu0 %v18234_v6  ;;  %v18278_v6 = vld [vmem:[%s18555_s6 + $0x20a8] sm:$0xff]  }
 0x405   : > { %16844 = vmatpush3.bf16.msra.mxu1 %v18233_v7  ;;  %v18279_v7 = vld [vmem:[%s18555_s6 + $0x2070] sm:$0xff]  }
 0x406   : > { %16845 = vmatprep.subr.bf16.mxu1 %v18236_v8 }
 0x407   : > { %16824 = vmatpush3.bf16.msra.mxu0 %v18235_v9 }
 0x408   : > { %16825 = vmatprep.subr.bf16.mxu0 %v18238_v10  ;;  %v18280_v10 = vld [vmem:[%s18555_s6 + $0x2030] sm:$0xff]  }
 0x409   : > { %16846 = vmatpush3.bf16.msra.mxu1 %v18237_v11 }
 0x40a   : > { %16847 = vmatprep.subr.bf16.mxu1 %v18240_v12 }
 0x40b   : > { %16826 = vmatpush3.bf16.msra.mxu0 %v18239_v13  ;;  %v18281_v13 = vld [vmem:[%s18555_s6 + $0x20f0] sm:$0xff]  }
 0x40c   : > { %16827 = vmatprep.subr.bf16.mxu0 %v18242_v14 }
 0x40d   : > { %v16525_v16 = vpop.f32.mrb[96].mxu0  ;;  %16848 = vmatpush3.bf16.msra.mxu1 %v18241_v15  ;;  %v18282_v15 = vld [vmem:[%s18555_s6 + $0x20b0] sm:$0xff]  }
 0x40e   : > { %v16526_v18 = vpop.f32.mrb[97].mxu0  ;;  %16849 = vmatprep.subr.bf16.mxu1 %v18244_v17 }
 0x40f   : > { %v16527_v20 = vadd.f32 %v16526_v18, %v16525_v16  ;;  %v16528_v21 = vpop.f32.mrb[98].mxu0  ;;  %v16547_v22 = vpop.f32.mrb[96].mxu1  ;;  %16828 = vmatpush3.bf16.msra.mxu0 %v18243_v19  ;;  %v18283_v18 = vld [vmem:[%s18555_s6 + $0x2078] sm:$0xff]  }
 0x410   : > { %v16529_v25 = vpop.f32.mrb[99].mxu0  ;;  %v16548_v26 = vpop.f32.mrb[97].mxu1  ;;  %16829 = vmatprep.subr.bf16.mxu0 %v18246_v24  ;;  %v18284_v19 = vld [vmem:[%s18555_s6 + $0x2038] sm:$0xff]   ;;  %v320_v21 = vld [vmem:[%s18550_s27 + $0x80] sm:$0xff] }
 0x411   : > { %v12976_v27 = vadd.f32 %v16527_v20, %v19797_v41  ;;  %v16549_v28 = vadd.f32 %v16548_v26, %v16547_v22  ;;  %v16550_v31 = vpop.f32.mrb[98].mxu1  ;;  %16850 = vmatpush3.bf16.msra.mxu1 %v18245_v23  ;;  %v18257_v41 = vld [vmem:[%s18555_s6 + $0x20c0] sm:$0xff]   ;;  %v18285_v20 = vld [vmem:[%s18555_s6 + $0x20f8] sm:$0xff]   ;;  %v3533_v22 = vrot.slane %v320_v21, %v18593_v42  ;;  %v3526_v24 = vcombine.high %v320_v21, %v320_v21 }
 0x412   : > { %v16551_v33 = vpop.f32.mrb[99].mxu1  ;;  %16851 = vmatprep.subr.bf16.mxu1 %v18248_v29  ;;  %v18286_v23 = vld [vmem:[%s18555_s6 + $0x20b8] sm:$0xff]   ;;  %v18287_v25 = vld [vmem:[%s18555_s6 + $0x2140] sm:$0xff]  }
 0x413   : > { %v19841_v34 = vadd.f32 %v16549_v28, %v12976_v27  ;;  %16830 = vmatpush3.bf16.msra.mxu0 %v18247_v32  ;;  %v3541_v26 = vcombine.high %v3533_v22, %v3533_v22  ;;  %v3549_v27 = vrot.slane %v3533_v22, %v18593_v42  ;;  %v19890_v28 = vrot.slane %v3526_v24, %v18593_v42  ;;  %v18289_v29 = vld [vmem:[%s18555_s6 + $0x21c0] sm:$0xff]   ;;  %v18326_v22 = vld [vmem:[%s18555_s6 + $0x22c8] sm:$0xff]   ;;  %v18328_v24 = vld [vmem:[%s18555_s6 + $0x2250] sm:$0xff]  }
 0x414   : > { %16831 = vmatprep.subr.bf16.mxu0 %v18250_v35  ;;  %v18288_v32 = vld [vmem:[%s18555_s6 + $0x2100] sm:$0xff]   ;;  %v18291_v35 = vld [vmem:[%s18555_s6 + $0x2148] sm:$0xff]  }
 0x415   : > { %16852 = vmatpush3.bf16.msra.mxu1 %v18249_v30  ;;  %v3563_v31 = vrot.slane %v3541_v26, %v18593_v42  ;;  %v3542_v33 = vcombine.high %v19890_v28, %v19890_v28  ;;  %v18323_v21 = vld [vmem:[%s18555_s6 + $0x2280] sm:$0xff]   ;;  %v18330_v26 = vld [vmem:[%s18555_s6 + $0x22d0] sm:$0xff]  }
 0x416   : > { %16853 = vmatprep.subr.bf16.mxu1 %v18252_v36  ;;  %v18290_v36 = vld [vmem:[%s18555_s6 + $0x2180] sm:$0xff]  }
 0x417   : > { %16832 = vmatpush3.bf16.msra.mxu0 %v18251_v37  ;;  %v3573_v30 = vcombine.high %v3563_v31, %v3563_v31  ;;  %v3570_v37 = vrot.slane %v3542_v33, %v18593_v42  ;;  %v18336_v33 = vld [vmem:[%s18555_s6 + $0x2260] sm:$0xff]  }
 0x418   : > { %16861 = vmatprep.subr.bf16.mxu0 %v18255_v39  ;;  %v18292_v39 = vld [vmem:[%s18555_s6 + $0x2108] sm:$0xff]  }
 0x419   : > { %16854 = vmatpush3.bf16.msra.mxu1 %v18254_v40  ;;  %v3574_v40 = vcombine.high %v3570_v37, %v3570_v37 }
 0x41a   : > { %13534 = vmatmul.mubr.bf16.vlgmr.msra.gmra.mrb[124].mxu0 %v3507_v38  ;;  %16883 = vmatprep.subr.bf16.mxu1 %v18257_v41  ;;  %v18293_v38 = vld [vmem:[%s18555_s6 + $0x21c8] sm:$0xff]   ;;  %v18295_v41 = vld [vmem:[%s18555_s6 + $0x2150] sm:$0xff]  }
 0x41b   : > { %16862 = vmatpush3.bf16.msra.mxu0 %v18256_v43  ;;  %13613 = vmatprep.mubr.bf16.mxu0 %v3563_v31  ;;  %v18294_v43 = vld [vmem:[%s18555_s6 + $0x2188] sm:$0xff]   ;;  %v18334_v31 = vld [vmem:[%s18555_s6 + $0x22d8] sm:$0xff]  }
 0x41c   : > { %13574 = vmatmul.mubr.bf16.vlgmr.msra.gmra.mrb[124].mxu1 %v3523_v44  ;;  %16863 = vmatprep.subr.bf16.mxu0 %v18259_v45  ;;  %v18297_v44 = vld [vmem:[%s18555_s6 + $0x21d0] sm:$0xff]  }
 0x41d   : > { %16884 = vmatpush3.bf16.msra.mxu1 %v18258_v46  ;;  %13653 = vmatprep.mubr.bf16.mxu1 %v3573_v30  ;;  %v18296_v45 = vld [vmem:[%s18555_s6 + $0x2110] sm:$0xff]   ;;  %v18299_v46 = vld [vmem:[%s18555_s6 + $0x2158] sm:$0xff]   ;;  %v18337_v30 = vld [vmem:[%s18555_s6 + $0x2220] sm:$0xff]  }
 0x41e   : > { %16885 = vmatprep.subr.bf16.mxu1 %v18261_v47  ;;  %v18298_v47 = vld [vmem:[%s18555_s6 + $0x2190] sm:$0xff]  }
 0x41f   : > { %16864 = vmatpush3.bf16.msra.mxu0 %v18260_v48  ;;  %v18301_v48 = vld [vmem:[%s18555_s6 + $0x21d8] sm:$0xff]  }
 0x420   : > { %16865 = vmatprep.subr.bf16.mxu0 %v18263_v49  ;;  %v18300_v49 = vld [vmem:[%s18555_s6 + $0x2118] sm:$0xff]  }
 0x421   : > { %16886 = vmatpush3.bf16.msra.mxu1 %v18262_v50  ;;  %v18303_v50 = vld [vmem:[%s18555_s6 + $0x2160] sm:$0xff]  }
 0x422   : > { %16887 = vmatprep.subr.bf16.mxu1 %v18265_v52  ;;  %v18302_v52 = vld [vmem:[%s18555_s6 + $0x2198] sm:$0xff]  }
 0x423   : > { %16866 = vmatpush3.bf16.msra.mxu0 %v18264_v53  ;;  %v18305_v53 = vld [vmem:[%s18555_s6 + $0x21e0] sm:$0xff]  }
 0x424   : > { %16867 = vmatprep.subr.bf16.mxu0 %v18267_v54  ;;  %v18304_v54 = vld [vmem:[%s18555_s6 + $0x2120] sm:$0xff]  }
 0x425   : > { %16888 = vmatpush3.bf16.msra.mxu1 %v18266_v55  ;;  %v18307_v55 = vld [vmem:[%s18555_s6 + $0x2168] sm:$0xff]  }
 0x426   : > { %16889 = vmatprep.subr.bf16.mxu1 %v18269_v56  ;;  %v18306_v56 = vld [vmem:[%s18555_s6 + $0x21a0] sm:$0xff]  }
 0x427   : > { %16868 = vmatpush3.bf16.msra.mxu0 %v18268_v57 }
 0x428   : > { %16869 = vmatprep.subr.bf16.mxu0 %v18271_v58  ;;  %v18309_v58 = vld [vmem:[%s18555_s6 + $0x21e8] sm:$0xff]  }
 0x429   : > { %16890 = vmatpush3.bf16.msra.mxu1 %v18270_v59 }
 0x42a   : > { %16891 = vmatprep.subr.bf16.mxu1 %v18273_v60  ;;  %v18308_v60 = vld [vmem:[%s18555_s6 + $0x2128] sm:$0xff]  }
 0x42b   : > { %16870 = vmatpush3.bf16.msra.mxu0 %v18272_v51 }
 0x42c   : > { %16871 = vmatprep.subr.bf16.mxu0 %v18275_v61 }
 0x42d   : > { %v16569_v63 = vpop.f32.mrb[100].mxu0  ;;  %16892 = vmatpush3.bf16.msra.mxu1 %v18274_v62 }
 0x42e   : > { %v16570_v1 = vpop.f32.mrb[101].mxu0  ;;  %16893 = vmatprep.subr.bf16.mxu1 %v18277_v0  ;;  %v18311_v0 = vld [vmem:[%s18555_s6 + $0x2170] sm:$0xff]  }
 0x42f   : > { %v16571_v3 = vadd.f32 %v16570_v1, %v16569_v63  ;;  %v16572_v4 = vpop.f32.mrb[102].mxu0  ;;  %v16591_v5 = vpop.f32.mrb[100].mxu1  ;;  %16872 = vmatpush3.bf16.msra.mxu0 %v18276_v2  ;;  %v18310_v63 = vld [vmem:[%s18555_s6 + $0x21a8] sm:$0xff]  }
 0x430   : > { %v16573_v8 = vpop.f32.mrb[103].mxu0  ;;  %v16592_v9 = vpop.f32.mrb[101].mxu1  ;;  %16873 = vmatprep.subr.bf16.mxu0 %v18279_v7  ;;  %v18312_v7 = vld [vmem:[%s18555_s6 + $0x2130] sm:$0xff]  }
 0x431   : > { %v13056_v11 = vadd.f32 %v16571_v3, %v19841_v34  ;;  %v16593_v12 = vadd.f32 %v16592_v9, %v16591_v5  ;;  %v16594_v14 = vpop.f32.mrb[102].mxu1  ;;  %16894 = vmatpush3.bf16.msra.mxu1 %v18278_v6  ;;  %v3571_v34 = vcombine.high %v3549_v27, %v3549_v27  ;;  %v18313_v5 = vld [vmem:[%s18555_s6 + $0x21f0] sm:$0xff]  }
 0x432   : > { %v16595_v16 = vpop.f32.mrb[103].mxu1  ;;  %16895 = vmatprep.subr.bf16.mxu1 %v18281_v13  ;;  %v18316_v13 = vld [vmem:[%s18555_s6 + $0x2138] sm:$0xff]   ;;  %v3556_v14 = vrot.slane %v19890_v28, %v18593_v42 }
 0x433   : > { %v19879_v17 = vadd.f32 %v16593_v12, %v13056_v11  ;;  %16874 = vmatpush3.bf16.msra.mxu0 %v18280_v10  ;;  %v18315_v10 = vld [vmem:[%s18555_s6 + $0x2178] sm:$0xff]   ;;  %v18314_v11 = vld [vmem:[%s18555_s6 + $0x21b0] sm:$0xff]  }
 0x434   : > { %16875 = vmatprep.subr.bf16.mxu0 %v18283_v18  ;;  %v18317_v12 = vld [vmem:[%s18555_s6 + $0x21f8] sm:$0xff]   ;;  %v18321_v18 = vld [vmem:[%s18555_s6 + $0x2200] sm:$0xff]  }
 0x435   : > { %16896 = vmatpush3.bf16.msra.mxu1 %v18282_v15  ;;  %v18320_v15 = vld [vmem:[%s18555_s6 + $0x2240] sm:$0xff]   ;;  %v18319_v16 = vld [vmem:[%s18555_s6 + $0x21b8] sm:$0xff]  }
 0x436   : > { %16897 = vmatprep.subr.bf16.mxu1 %v18285_v20  ;;  %v18324_v20 = vld [vmem:[%s18555_s6 + $0x2248] sm:$0xff]   ;;  %v18332_v28 = vld [vmem:[%s18555_s6 + $0x2258] sm:$0xff]  }
 0x437   : > { %16876 = vmatpush3.bf16.msra.mxu0 %v18284_v19  ;;  %v3572_v19 = vcombine.high %v3556_v14, %v3556_v14 }
 0x438   : > { %16905 = vmatprep.subr.bf16.mxu0 %v18287_v25  ;;  %v18327_v25 = vld [vmem:[%s18555_s6 + $0x2288] sm:$0xff]  }
 0x439   : > { %16898 = vmatpush3.bf16.msra.mxu1 %v18286_v23  ;;  %v18325_v23 = vld [vmem:[%s18555_s6 + $0x2208] sm:$0xff]  }
 0x43a   : > { %16927 = vmatprep.subr.bf16.mxu1 %v18289_v29  ;;  %13614 = vmatmul.mubr.bf16.vlgmr.msra.gmra.mrb[128].mxu0 %v3549_v27  ;;  %v18329_v27 = vld [vmem:[%s18555_s6 + $0x2210] sm:$0xff]  }
 0x43b   : > { %16906 = vmatpush3.bf16.msra.mxu0 %v18288_v32  ;;  %13693 = vmatprep.mubr.bf16.mxu0 %v3570_v37  ;;  %v18331_v29 = vld [vmem:[%s18555_s6 + $0x2290] sm:$0xff]   ;;  %v18333_v32 = vld [vmem:[%s18555_s6 + $0x2218] sm:$0xff]   ;;  %v18339_v37 = vld [vmem:[%s18555_s6 + $0x22a0] sm:$0xff]  }
 0x43c   : > { %13654 = vmatmul.mubr.bf16.vlgmr.msra.gmra.mrb[128].mxu1 %v3571_v34  ;;  %16907 = vmatprep.subr.bf16.mxu0 %v18291_v35  ;;  %v18335_v34 = vld [vmem:[%s18555_s6 + $0x2298] sm:$0xff]   ;;  %v18338_v35 = vld [vmem:[%s18555_s6 + $0x22e0] sm:$0xff]  }
 0x43d   : > { %16928 = vmatpush3.bf16.msra.mxu1 %v18290_v36  ;;  %13733 = vmatprep.mubr.bf16.mxu1 %v3574_v40  ;;  %v18340_v36 = vld [vmem:[%s18555_s6 + $0x2268] sm:$0xff]  }
 0x43e   : > { %16929 = vmatprep.subr.bf16.mxu1 %v18293_v38 }
 0x43f   : > { %16908 = vmatpush3.bf16.msra.mxu0 %v18292_v39  ;;  %v18342_v39 = vld [vmem:[%s18555_s6 + $0x22e8] sm:$0xff]  }
 0x440   : > { %16909 = vmatprep.subr.bf16.mxu0 %v18295_v41  ;;  %v18341_v41 = vld [vmem:[%s18555_s6 + $0x2228] sm:$0xff]  }
 0x441   : > { %16930 = vmatpush3.bf16.msra.mxu1 %v18294_v43 }
 0x442   : > { %16931 = vmatprep.subr.bf16.mxu1 %v18297_v44 }
 0x443   : > { %16910 = vmatpush3.bf16.msra.mxu0 %v18296_v45 }
 0x444   : > { %16911 = vmatprep.subr.bf16.mxu0 %v18299_v46  ;;  %v18343_v46 = vld [vmem:[%s18555_s6 + $0x22a8] sm:$0xff]  }
 0x445   : > { %16932 = vmatpush3.bf16.msra.mxu1 %v18298_v47  ;;  %v18344_v47 = vld [vmem:[%s18555_s6 + $0x2270] sm:$0xff]  }
 0x446   : > { %16933 = vmatprep.subr.bf16.mxu1 %v18301_v48 }
 0x447   : > { %16912 = vmatpush3.bf16.msra.mxu0 %v18300_v49 }
 0x448   : > { %16913 = vmatprep.subr.bf16.mxu0 %v18303_v50  ;;  %v18345_v50 = vld [vmem:[%s18555_s6 + $0x2230] sm:$0xff]  }
 0x449   : > { %16934 = vmatpush3.bf16.msra.mxu1 %v18302_v52 }
 0x44a   : > { %16935 = vmatprep.subr.bf16.mxu1 %v18305_v53 }
 0x44b   : > { %16914 = vmatpush3.bf16.msra.mxu0 %v18304_v54  ;;  %v18346_v54 = vld [vmem:[%s18555_s6 + $0x22f0] sm:$0xff]  }
 0x44c   : > { %16915 = vmatprep.subr.bf16.mxu0 %v18307_v55 }
 0x44d   : > { %v16613_v57 = vpop.f32.mrb[104].mxu0  ;;  %16936 = vmatpush3.bf16.msra.mxu1 %v18306_v56  ;;  %v18347_v56 = vld [vmem:[%s18555_s6 + $0x22b0] sm:$0xff]  }
 0x44e   : > { %v16614_v59 = vpop.f32.mrb[105].mxu0  ;;  %16937 = vmatprep.subr.bf16.mxu1 %v18309_v58 }
 0x44f   : > { %v16615_v51 = vadd.f32 %v16614_v59, %v16613_v57  ;;  %v16616_v61 = vpop.f32.mrb[106].mxu0  ;;  %v16635_v62 = vpop.f32.mrb[104].mxu1  ;;  %16916 = vmatpush3.bf16.msra.mxu0 %v18308_v60  ;;  %v18348_v59 = vld [vmem:[%s18555_s6 + $0x2278] sm:$0xff]  }
 0x450   : > { %v16617_v1 = vpop.f32.mrb[107].mxu0  ;;  %v16636_v2 = vpop.f32.mrb[105].mxu1  ;;  %16917 = vmatprep.subr.bf16.mxu0 %v18311_v0  ;;  %v18349_v60 = vld [vmem:[%s18555_s6 + $0x2238] sm:$0xff]   ;;  %v321_v61 = vld [vmem:[%s18550_s27 + $0x88] sm:$0xff] }
 0x451   : > { %v13136_v3 = vadd.f32 %v16615_v51, %v19879_v17  ;;  %v16637_v4 = vadd.f32 %v16636_v2, %v16635_v62  ;;  %v16638_v6 = vpop.f32.mrb[106].mxu1  ;;  %16938 = vmatpush3.bf16.msra.mxu1 %v18310_v63  ;;  %v18322_v17 = vld [vmem:[%s18555_s6 + $0x22c0] sm:$0xff]   ;;  %v18350_v51 = vld [vmem:[%s18555_s6 + $0x22f8] sm:$0xff]   ;;  %v3582_v62 = vrot.slane %v321_v61, %v18593_v42  ;;  %v3575_v0 = vcombine.high %v321_v61, %v321_v61 }
 0x452   : > { %v16639_v8 = vpop.f32.mrb[107].mxu1  ;;  %16939 = vmatprep.subr.bf16.mxu1 %v18313_v5  ;;  %v18351_v63 = vld [vmem:[%s18555_s6 + $0x22b8] sm:$0xff]   ;;  %v18352_v1 = vld [vmem:[%s18555_s6 + $0x2340] sm:$0xff]  }
 0x453   : > { %v19923_v9 = vadd.f32 %v16637_v4, %v13136_v3  ;;  %16918 = vmatpush3.bf16.msra.mxu0 %v18312_v7  ;;  %v3590_v2 = vcombine.high %v3582_v62, %v3582_v62  ;;  %v3598_v3 = vrot.slane %v3582_v62, %v18593_v42  ;;  %v19972_v4 = vrot.slane %v3575_v0, %v18593_v42  ;;  %v18354_v5 = vld [vmem:[%s18555_s6 + $0x23c0] sm:$0xff]   ;;  %v18391_v62 = vld [vmem:[%s18555_s6 + $0x24c8] sm:$0xff]   ;;  %v18393_v0 = vld [vmem:[%s18555_s6 + $0x2450] sm:$0xff]  }
 0x454   : > { %16919 = vmatprep.subr.bf16.mxu0 %v18315_v10  ;;  %v18353_v7 = vld [vmem:[%s18555_s6 + $0x2300] sm:$0xff]   ;;  %v18356_v10 = vld [vmem:[%s18555_s6 + $0x2348] sm:$0xff]  }
 0x455   : > { %16940 = vmatpush3.bf16.msra.mxu1 %v18314_v11  ;;  %v3612_v6 = vrot.slane %v3590_v2, %v18593_v42  ;;  %v3591_v8 = vcombine.high %v19972_v4, %v19972_v4  ;;  %v18388_v61 = vld [vmem:[%s18555_s6 + $0x2480] sm:$0xff]   ;;  %v18395_v2 = vld [vmem:[%s18555_s6 + $0x24d0] sm:$0xff]  }
 0x456   : > { %16941 = vmatprep.subr.bf16.mxu1 %v18317_v12  ;;  %v18355_v12 = vld [vmem:[%s18555_s6 + $0x2380] sm:$0xff]  }
 0x457   : > { %16920 = vmatpush3.bf16.msra.mxu0 %v18316_v13  ;;  %v3622_v11 = vcombine.high %v3612_v6, %v3612_v6  ;;  %v3619_v13 = vrot.slane %v3591_v8, %v18593_v42  ;;  %v18401_v8 = vld [vmem:[%s18555_s6 + $0x2460] sm:$0xff]  }
 0x458   : > { %16949 = vmatprep.subr.bf16.mxu0 %v18320_v15  ;;  %v18357_v15 = vld [vmem:[%s18555_s6 + $0x2308] sm:$0xff]  }
 0x459   : > { %16942 = vmatpush3.bf16.msra.mxu1 %v18319_v16  ;;  %v3623_v16 = vcombine.high %v3619_v13, %v3619_v13 }
 0x45a   : > { %13694 = vmatmul.mubr.bf16.vlgmr.msra.gmra.mrb[132].mxu0 %v3556_v14  ;;  %16971 = vmatprep.subr.bf16.mxu1 %v18322_v17  ;;  %v18358_v14 = vld [vmem:[%s18555_s6 + $0x23c8] sm:$0xff]   ;;  %v18360_v17 = vld [vmem:[%s18555_s6 + $0x2350] sm:$0xff]  }
 0x45b   : > { %16950 = vmatpush3.bf16.msra.mxu0 %v18321_v18  ;;  %13773 = vmatprep.mubr.bf16.mxu0 %v3612_v6  ;;  %v18359_v18 = vld [vmem:[%s18555_s6 + $0x2388] sm:$0xff]   ;;  %v18399_v6 = vld [vmem:[%s18555_s6 + $0x24d8] sm:$0xff]  }
 0x45c   : > { %13734 = vmatmul.mubr.bf16.vlgmr.msra.gmra.mrb[132].mxu1 %v3572_v19  ;;  %16951 = vmatprep.subr.bf16.mxu0 %v18324_v20  ;;  %v18362_v19 = vld [vmem:[%s18555_s6 + $0x23d0] sm:$0xff]  }
 0x45d   : > { %16972 = vmatpush3.bf16.msra.mxu1 %v18323_v21  ;;  %13813 = vmatprep.mubr.bf16.mxu1 %v3622_v11  ;;  %v18361_v20 = vld [vmem:[%s18555_s6 + $0x2310] sm:$0xff]   ;;  %v18364_v21 = vld [vmem:[%s18555_s6 + $0x2358] sm:$0xff]   ;;  %v18402_v11 = vld [vmem:[%s18555_s6 + $0x2420] sm:$0xff]  }
 0x45e   : > { %16973 = vmatprep.subr.bf16.mxu1 %v18326_v22  ;;  %v18363_v22 = vld [vmem:[%s18555_s6 + $0x2390] sm:$0xff]  }
 0x45f   : > { %16952 = vmatpush3.bf16.msra.mxu0 %v18325_v23  ;;  %v18366_v23 = vld [vmem:[%s18555_s6 + $0x23d8] sm:$0xff]  }
 0x460   : > { %16953 = vmatprep.subr.bf16.mxu0 %v18328_v24  ;;  %v18365_v24 = vld [vmem:[%s18555_s6 + $0x2318] sm:$0xff]  }
 0x461   : > { %16974 = vmatpush3.bf16.msra.mxu1 %v18327_v25  ;;  %v18368_v25 = vld [vmem:[%s18555_s6 + $0x2360] sm:$0xff]  }
 0x462   : > { %16975 = vmatprep.subr.bf16.mxu1 %v18330_v26  ;;  %v18367_v26 = vld [vmem:[%s18555_s6 + $0x2398] sm:$0xff]  }
 0x463   : > { %16954 = vmatpush3.bf16.msra.mxu0 %v18329_v27  ;;  %v18370_v27 = vld [vmem:[%s18555_s6 + $0x23e0] sm:$0xff]  }
 0x464   : > { %16955 = vmatprep.subr.bf16.mxu0 %v18332_v28  ;;  %v18369_v28 = vld [vmem:[%s18555_s6 + $0x2320] sm:$0xff]  }
 0x465   : > { %16976 = vmatpush3.bf16.msra.mxu1 %v18331_v29  ;;  %v18372_v29 = vld [vmem:[%s18555_s6 + $0x2368] sm:$0xff]  }
 0x466   : > { %16977 = vmatprep.subr.bf16.mxu1 %v18334_v31  ;;  %v18371_v31 = vld [vmem:[%s18555_s6 + $0x23a0] sm:$0xff]  }
 0x467   : > { %16956 = vmatpush3.bf16.msra.mxu0 %v18333_v32 }
 0x468   : > { %16957 = vmatprep.subr.bf16.mxu0 %v18336_v33  ;;  %v18374_v33 = vld [vmem:[%s18555_s6 + $0x23e8] sm:$0xff]  }
 0x469   : > { %16978 = vmatpush3.bf16.msra.mxu1 %v18335_v34 }
 0x46a   : > { %16979 = vmatprep.subr.bf16.mxu1 %v18338_v35  ;;  %v18373_v35 = vld [vmem:[%s18555_s6 + $0x2328] sm:$0xff]  }
 0x46b   : > { %16958 = vmatpush3.bf16.msra.mxu0 %v18337_v30 }
 0x46c   : > { %16959 = vmatprep.subr.bf16.mxu0 %v18340_v36 }
 0x46d   : > { %v16657_v38 = vpop.f32.mrb[108].mxu0  ;;  %16980 = vmatpush3.bf16.msra.mxu1 %v18339_v37 }
 0x46e   : > { %v16658_v40 = vpop.f32.mrb[109].mxu0  ;;  %16981 = vmatprep.subr.bf16.mxu1 %v18342_v39  ;;  %v18376_v39 = vld [vmem:[%s18555_s6 + $0x2370] sm:$0xff]  }
 0x46f   : > { %v16659_v43 = vadd.f32 %v16658_v40, %v16657_v38  ;;  %v16660_v44 = vpop.f32.mrb[110].mxu0  ;;  %v16679_v45 = vpop.f32.mrb[108].mxu1  ;;  %16960 = vmatpush3.bf16.msra.mxu0 %v18341_v41  ;;  %v18375_v38 = vld [vmem:[%s18555_s6 + $0x23a8] sm:$0xff]  }
 0x470   : > { %v16661_v48 = vpop.f32.mrb[111].mxu0  ;;  %v16680_v49 = vpop.f32.mrb[109].mxu1  ;;  %16961 = vmatprep.subr.bf16.mxu0 %v18344_v47  ;;  %v18377_v47 = vld [vmem:[%s18555_s6 + $0x2330] sm:$0xff]  }
 0x471   : > { %v13216_v52 = vadd.f32 %v16659_v43, %v19923_v9  ;;  %v16681_v53 = vadd.f32 %v16680_v49, %v16679_v45  ;;  %v16682_v55 = vpop.f32.mrb[110].mxu1  ;;  %16982 = vmatpush3.bf16.msra.mxu1 %v18343_v46  ;;  %v3620_v9 = vcombine.high %v3598_v3, %v3598_v3  ;;  %v18378_v45 = vld [vmem:[%s18555_s6 + $0x23f0] sm:$0xff]  }
 0x472   : > { %v16683_v57 = vpop.f32.mrb[111].mxu1  ;;  %16983 = vmatprep.subr.bf16.mxu1 %v18346_v54  ;;  %v18381_v54 = vld [vmem:[%s18555_s6 + $0x2338] sm:$0xff]   ;;  %v3605_v55 = vrot.slane %v19972_v4, %v18593_v42 }
 0x473   : > { %v19961_v58 = vadd.f32 %v16681_v53, %v13216_v52  ;;  %16962 = vmatpush3.bf16.msra.mxu0 %v18345_v50  ;;  %v18380_v50 = vld [vmem:[%s18555_s6 + $0x2378] sm:$0xff]   ;;  %v18379_v52 = vld [vmem:[%s18555_s6 + $0x23b0] sm:$0xff]  }
 0x474   : > { %16963 = vmatprep.subr.bf16.mxu0 %v18348_v59  ;;  %v18382_v53 = vld [vmem:[%s18555_s6 + $0x23f8] sm:$0xff]   ;;  %v18386_v59 = vld [vmem:[%s18555_s6 + $0x2400] sm:$0xff]  }
 0x475   : > { %16984 = vmatpush3.bf16.msra.mxu1 %v18347_v56  ;;  %v18385_v56 = vld [vmem:[%s18555_s6 + $0x2440] sm:$0xff]   ;;  %v18384_v57 = vld [vmem:[%s18555_s6 + $0x23b8] sm:$0xff]  }
 0x476   : > { %16985 = vmatprep.subr.bf16.mxu1 %v18350_v51  ;;  %v18389_v51 = vld [vmem:[%s18555_s6 + $0x2448] sm:$0xff]   ;;  %v18397_v4 = vld [vmem:[%s18555_s6 + $0x2458] sm:$0xff]  }
 0x477   : > { %16964 = vmatpush3.bf16.msra.mxu0 %v18349_v60  ;;  %v3621_v60 = vcombine.high %v3605_v55, %v3605_v55 }
 0x478   : > { %16993 = vmatprep.subr.bf16.mxu0 %v18352_v1  ;;  %v18392_v1 = vld [vmem:[%s18555_s6 + $0x2488] sm:$0xff]  }
 0x479   : > { %16986 = vmatpush3.bf16.msra.mxu1 %v18351_v63  ;;  %v18390_v63 = vld [vmem:[%s18555_s6 + $0x2408] sm:$0xff]  }
 0x47a   : > { %17015 = vmatprep.subr.bf16.mxu1 %v18354_v5  ;;  %13774 = vmatmul.mubr.bf16.vlgmr.msra.gmra.mrb[136].mxu0 %v3598_v3  ;;  %v18394_v3 = vld [vmem:[%s18555_s6 + $0x2410] sm:$0xff]  }
 0x47b   : > { %16994 = vmatpush3.bf16.msra.mxu0 %v18353_v7  ;;  %13853 = vmatprep.mubr.bf16.mxu0 %v3619_v13  ;;  %v18396_v5 = vld [vmem:[%s18555_s6 + $0x2490] sm:$0xff]   ;;  %v18398_v7 = vld [vmem:[%s18555_s6 + $0x2418] sm:$0xff]   ;;  %v18404_v13 = vld [vmem:[%s18555_s6 + $0x24a0] sm:$0xff]  }
 0x47c   : > { %13814 = vmatmul.mubr.bf16.vlgmr.msra.gmra.mrb[136].mxu1 %v3620_v9  ;;  %16995 = vmatprep.subr.bf16.mxu0 %v18356_v10  ;;  %v18400_v9 = vld [vmem:[%s18555_s6 + $0x2498] sm:$0xff]   ;;  %v18403_v10 = vld [vmem:[%s18555_s6 + $0x24e0] sm:$0xff]  }
 0x47d   : > { %17016 = vmatpush3.bf16.msra.mxu1 %v18355_v12  ;;  %13893 = vmatprep.mubr.bf16.mxu1 %v3623_v16  ;;  %v18405_v12 = vld [vmem:[%s18555_s6 + $0x2468] sm:$0xff]  }
 0x47e   : > { %17017 = vmatprep.subr.bf16.mxu1 %v18358_v14 }
 0x47f   : > { %16996 = vmatpush3.bf16.msra.mxu0 %v18357_v15  ;;  %v18407_v15 = vld [vmem:[%s18555_s6 + $0x24e8] sm:$0xff]  }
 0x480   : > { %16997 = vmatprep.subr.bf16.mxu0 %v18360_v17  ;;  %v18406_v17 = vld [vmem:[%s18555_s6 + $0x2428] sm:$0xff]  }
 0x481   : > { %17018 = vmatpush3.bf16.msra.mxu1 %v18359_v18 }
 0x482   : > { %17019 = vmatprep.subr.bf16.mxu1 %v18362_v19 }
 0x483   : > { %16998 = vmatpush3.bf16.msra.mxu0 %v18361_v20 }
 0x484   : > { %16999 = vmatprep.subr.bf16.mxu0 %v18364_v21  ;;  %v18408_v21 = vld [vmem:[%s18555_s6 + $0x24a8] sm:$0xff]  }
 0x485   : > { %17020 = vmatpush3.bf16.msra.mxu1 %v18363_v22  ;;  %v18409_v22 = vld [vmem:[%s18555_s6 + $0x2470] sm:$0xff]  }
 0x486   : > { %17021 = vmatprep.subr.bf16.mxu1 %v18366_v23 }
 0x487   : > { %17000 = vmatpush3.bf16.msra.mxu0 %v18365_v24 }
 0x488   : > { %17001 = vmatprep.subr.bf16.mxu0 %v18368_v25  ;;  %v18410_v25 = vld [vmem:[%s18555_s6 + $0x2430] sm:$0xff]  }
 0x489   : > { %17022 = vmatpush3.bf16.msra.mxu1 %v18367_v26 }
 0x48a   : > { %17023 = vmatprep.subr.bf16.mxu1 %v18370_v27 }
 0x48b   : > { %17002 = vmatpush3.bf16.msra.mxu0 %v18369_v28  ;;  %v18411_v28 = vld [vmem:[%s18555_s6 + $0x24f0] sm:$0xff]  }
 0x48c   : > { %17003 = vmatprep.subr.bf16.mxu0 %v18372_v29 }
 0x48d   : > { %v16701_v32 = vpop.f32.mrb[112].mxu0  ;;  %17024 = vmatpush3.bf16.msra.mxu1 %v18371_v31  ;;  %v18412_v31 = vld [vmem:[%s18555_s6 + $0x24b0] sm:$0xff]  }
 0x48e   : > { %v16702_v34 = vpop.f32.mrb[113].mxu0  ;;  %17025 = vmatprep.subr.bf16.mxu1 %v18374_v33 }
 0x48f   : > { %v16703_v30 = vadd.f32 %v16702_v34, %v16701_v32  ;;  %v16704_v36 = vpop.f32.mrb[114].mxu0  ;;  %v16723_v37 = vpop.f32.mrb[112].mxu1  ;;  %17004 = vmatpush3.bf16.msra.mxu0 %v18373_v35  ;;  %v18413_v34 = vld [vmem:[%s18555_s6 + $0x2478] sm:$0xff]  }
 0x490   : > { %v16705_v40 = vpop.f32.mrb[115].mxu0  ;;  %v16724_v41 = vpop.f32.mrb[113].mxu1  ;;  %17005 = vmatprep.subr.bf16.mxu0 %v18376_v39  ;;  %v18414_v35 = vld [vmem:[%s18555_s6 + $0x2438] sm:$0xff]   ;;  %v322_v36 = vld [vmem:[%s18550_s27 + $0x90] sm:$0x3f] }
 0x491   : > { %v13296_v43 = vadd.f32 %v16703_v30, %v19961_v58  ;;  %v16725_v44 = vadd.f32 %v16724_v41, %v16723_v37  ;;  %v16726_v46 = vpop.f32.mrb[114].mxu1  ;;  %17026 = vmatpush3.bf16.msra.mxu1 %v18375_v38  ;;  %v18387_v58 = vld [vmem:[%s18555_s6 + $0x24c0] sm:$0xff]   ;;  %v18415_v30 = vld [vmem:[%s18555_s6 + $0x24f8] sm:$0xff]   ;;  %v3631_v37 = vrot.slane %v322_v36, %v18593_v42  ;;  %v3624_v39 = vcombine.high %v322_v36, %v322_v36 }
 0x492   : > { %v16727_v48 = vpop.f32.mrb[115].mxu1  ;;  %17027 = vmatprep.subr.bf16.mxu1 %v18378_v45  ;;  %v18416_v38 = vld [vmem:[%s18555_s6 + $0x24b8] sm:$0xff]   ;;  %v18417_v40 = vld [vmem:[%s18555_s6 + $0x2540] sm:$0xff]  }
 0x493   : > { %v20005_v49 = vadd.f32 %v16725_v44, %v13296_v43  ;;  %17006 = vmatpush3.bf16.msra.mxu0 %v18377_v47  ;;  %v3639_v41 = vcombine.high %v3631_v37, %v3631_v37  ;;  %v3647_v43 = vrot.slane %v3631_v37, %v18593_v42  ;;  %v3638_v44 = vrot.slane %v3624_v39, %v18593_v42  ;;  %v18418_v46 = vld [vmem:[%s18555_s6 + $0x2500] sm:$0xff]  }
 0x494   : > { %17007 = vmatprep.subr.bf16.mxu0 %v18380_v50 }
 0x495   : > { %17028 = vmatpush3.bf16.msra.mxu1 %v18379_v52  ;;  %v3661_v45 = vrot.slane %v3639_v41, %v18593_v42  ;;  %v3640_v47 = vcombine.high %v3638_v44, %v3638_v44  ;;  %v3669_v48 = vcombine.high %v3647_v43, %v3647_v43 }
 0x496   : > { %17029 = vmatprep.subr.bf16.mxu1 %v18382_v53  ;;  %v18420_v53 = vld [vmem:[%s18555_s6 + $0x2508] sm:$0xff]  }
 0x497   : > { %17008 = vmatpush3.bf16.msra.mxu0 %v18381_v54  ;;  %v3670_v50 = vcombine.high %v3661_v45, %v3661_v45  ;;  %v3668_v52 = vrot.slane %v3640_v47, %v18593_v42  ;;  %v18421_v54 = vld [vmem:[%s18555_s6 + $0x2550] sm:$0xff]  }
 0x498   : > { %17037 = vmatprep.subr.bf16.mxu0 %v18385_v56  ;;  %v18423_v56 = vld [vmem:[%s18555_s6 + $0x2558] sm:$0xff]  }
 0x499   : > { %17030 = vmatpush3.bf16.msra.mxu1 %v18384_v57  ;;  %v18424_v57 = vld [vmem:[%s18555_s6 + $0x2518] sm:$0xff]  }
 0x49a   : > { %13854 = vmatmul.mubr.bf16.vlgmr.msra.gmra.mrb[140].mxu0 %v3605_v55  ;;  %17059 = vmatprep.subr.bf16.mxu1 %v18387_v58  ;;  %v18422_v55 = vld [vmem:[%s18555_s6 + $0x2510] sm:$0xff]   ;;  %v18425_v58 = vld [vmem:[%s18555_s6 + $0x2560] sm:$0xff]  }
 0x49b   : > { %17038 = vmatpush3.bf16.msra.mxu0 %v18386_v59  ;;  %13933 = vmatprep.mubr.bf16.mxu0 %v3661_v45  ;;  %v18426_v59 = vld [vmem:[%s18555_s6 + $0x2520] sm:$0xff]  }
 0x49c   : > { %13894 = vmatmul.mubr.bf16.vlgmr.msra.gmra.mrb[140].mxu1 %v3621_v60  ;;  %17039 = vmatprep.subr.bf16.mxu0 %v18389_v51  ;;  %v18427_v60 = vld [vmem:[%s18555_s6 + $0x2568] sm:$0xff]  }
 0x49d   : > { %17060 = vmatpush3.bf16.msra.mxu1 %v18388_v61  ;;  %13973 = vmatprep.mubr.bf16.mxu1 %v3670_v50 }
 0x49e   : > { %17061 = vmatprep.subr.bf16.mxu1 %v18391_v62  ;;  %v18428_v62 = vld [vmem:[%s18555_s6 + $0x2528] sm:$0xff]  }
 0x49f   : > { %17040 = vmatpush3.bf16.msra.mxu0 %v18390_v63 }
 0x4a0   : > { %17041 = vmatprep.subr.bf16.mxu0 %v18393_v0 }
 0x4a1   : > { %17062 = vmatpush3.bf16.msra.mxu1 %v18392_v1 }
 0x4a2   : > { %17063 = vmatprep.subr.bf16.mxu1 %v18395_v2  ;;  %v18429_v2 = vld [vmem:[%s18555_s6 + $0x2570] sm:$0xff]  }
 0x4a3   : > { %17042 = vmatpush3.bf16.msra.mxu0 %v18394_v3 }
 0x4a4   : > { %17043 = vmatprep.subr.bf16.mxu0 %v18397_v4 }
 0x4a5   : > { %17064 = vmatpush3.bf16.msra.mxu1 %v18396_v5 }
 0x4a6   : > { %17065 = vmatprep.subr.bf16.mxu1 %v18399_v6 }
 0x4a7   : > { %17044 = vmatpush3.bf16.msra.mxu0 %v18398_v7 }
 0x4a8   : > { %17045 = vmatprep.subr.bf16.mxu0 %v18401_v8  ;;  %v18430_v8 = vld [vmem:[%s18555_s6 + $0x2530] sm:$0xff]  }
 0x4a9   : > { %17066 = vmatpush3.bf16.msra.mxu1 %v18400_v9 }
 0x4aa   : > { %17067 = vmatprep.subr.bf16.mxu1 %v18403_v10 }
 0x4ab   : > { %17046 = vmatpush3.bf16.msra.mxu0 %v18402_v11  ;;  %v18431_v11 = vld [vmem:[%s18555_s6 + $0x2578] sm:$0xff]  }
 0x4ac   : > { %17047 = vmatprep.subr.bf16.mxu0 %v18405_v12  ;;  %v18432_v12 = vld [vmem:[%s18555_s6 + $0x2538] sm:$0xff]  }
 0x4ad   : > { %v16745_v14 = vpop.f32.mrb[116].mxu0  ;;  %17068 = vmatpush3.bf16.msra.mxu1 %v18404_v13  ;;  %v3654_v13 = vrot.slane %v3638_v44, %v18593_v42 }
 0x4ae   : > { %v16746_v16 = vpop.f32.mrb[117].mxu0  ;;  %17069 = vmatprep.subr.bf16.mxu1 %v18407_v15 }
 0x4af   : > { %v16747_v18 = vadd.f32 %v16746_v16, %v16745_v14  ;;  %v16748_v19 = vpop.f32.mrb[118].mxu0  ;;  %v16767_v20 = vpop.f32.mrb[116].mxu1  ;;  %17048 = vmatpush3.bf16.msra.mxu0 %v18406_v17 }
 0x4b0   : > { %v16749_v23 = vpop.f32.mrb[119].mxu0  ;;  %v16768_v24 = vpop.f32.mrb[117].mxu1  ;;  %17049 = vmatprep.subr.bf16.mxu0 %v18409_v22 }
 0x4b1   : > { %v13376_v26 = vadd.f32 %v16747_v18, %v20005_v49  ;;  %v16769_v27 = vadd.f32 %v16768_v24, %v16767_v20  ;;  %v16770_v29 = vpop.f32.mrb[118].mxu1  ;;  %17070 = vmatpush3.bf16.msra.mxu1 %v18408_v21  ;;  %v18419_v49 = vld [vmem:[%s18555_s6 + $0x2548] sm:$0xff]  }
 0x4b2   : > { %v16771_v32 = vpop.f32.mrb[119].mxu1  ;;  %17071 = vmatprep.subr.bf16.mxu1 %v18411_v28 }
 0x4b3   : > { %v13416_v33 = vadd.f32 %v16769_v27, %v13376_v26  ;;  %17050 = vmatpush3.bf16.msra.mxu0 %v18410_v25 }
 0x4b4   : > { %17051 = vmatprep.subr.bf16.mxu0 %v18413_v34 }
 0x4b5   : > { %17072 = vmatpush3.bf16.msra.mxu1 %v18412_v31 }
 0x4b6   : > { %17073 = vmatprep.subr.bf16.mxu1 %v18415_v30 }
 0x4b7   : > { %17052 = vmatpush3.bf16.msra.mxu0 %v18414_v35 }
 0x4b8   : > { %17081 = vmatprep.subr.bf16.mxu0 %v18417_v40 }
 0x4b9   : > { %17074 = vmatpush3.bf16.msra.mxu1 %v18416_v38 }
 0x4ba   : > { %13934 = vmatmul.mubr.bf16.vlgmr.msra.gmra.mrb[144].mxu0 %v3647_v43 }
 0x4bb   : > { %17082 = vmatpush3.bf16.msra.mxu0 %v18418_v46  ;;  %14013 = vmatprep.mubr.bf16.mxu0 %v3668_v52 }
 0x4bc   : > { %13974 = vmatmul.mubr.bf16.vlgmr.msra.gmra.mrb[144].mxu1 %v3669_v48  ;;  %17083 = vmatprep.subr.bf16.mxu0 %v18419_v49 }
 0x4bf   : > { %17084 = vmatpush3.bf16.msra.mxu0 %v18420_v53 }
 0x4c0   : > { %17085 = vmatprep.subr.bf16.mxu0 %v18421_v54 }
 0x4c3   : > { %17086 = vmatpush3.bf16.msra.mxu0 %v18422_v55 }
 0x4c4   : > { %17087 = vmatprep.subr.bf16.mxu0 %v18423_v56 }
 0x4c7   : > { %17088 = vmatpush3.bf16.msra.mxu0 %v18424_v57 }
 0x4c8   : > { %17089 = vmatprep.subr.bf16.mxu0 %v18425_v58 }
 0x4cb   : > { %17090 = vmatpush3.bf16.msra.mxu0 %v18426_v59 }
 0x4cc   : > { %17091 = vmatprep.subr.bf16.mxu0 %v18427_v60 }
 0x4cd   : > { %v16789_v51 = vpop.f32.mrb[120].mxu0 }
 0x4ce   : > { %v16790_v61 = vpop.f32.mrb[121].mxu0 }
 0x4cf   : > { %v16791_v63 = vadd.f32 %v16790_v61, %v16789_v51  ;;  %v16792_v0 = vpop.f32.mrb[122].mxu0  ;;  %v16811_v1 = vpop.f32.mrb[120].mxu1  ;;  %17092 = vmatpush3.bf16.msra.mxu0 %v18428_v62 }
 0x4d0   : > { %v16793_v3 = vpop.f32.mrb[123].mxu0  ;;  %v16812_v4 = vpop.f32.mrb[121].mxu1  ;;  %17093 = vmatprep.subr.bf16.mxu0 %v18429_v2 }
 0x4d1   : > { %v13456_v5 = vadd.f32 %v16791_v63, %v13416_v33  ;;  %v16813_v6 = vadd.f32 %v16812_v4, %v16811_v1  ;;  %v16814_v7 = vpop.f32.mrb[122].mxu1 }
 0x4d2   : > { %v16815_v9 = vpop.f32.mrb[123].mxu1 }
 0x4d3   : > { %v13496_v10 = vadd.f32 %v16813_v6, %v13456_v5  ;;  %17094 = vmatpush3.bf16.msra.mxu0 %v18430_v8 }
 0x4d4   : > { %17095 = vmatprep.subr.bf16.mxu0 %v18431_v11 }
 0x4d7   : > { %17096 = vmatpush3.bf16.msra.mxu0 %v18432_v12 }
 0x4da   : > { %14014 = vmatmul.mubr.bf16.vlgmr.msra.gmra.mrb[148].mxu0 %v3654_v13 }
 0x4ed   : > { %v16833_v14 = vpop.f32.mrb[124].mxu0 }
 0x4ee   : > { %v16834_v15 = vpop.f32.mrb[125].mxu0 }
 0x4ef   : > { %v16835_v16 = vadd.f32 %v16834_v15, %v16833_v14  ;;  %v16836_v17 = vpop.f32.mrb[126].mxu0  ;;  %v16855_v18 = vpop.f32.mrb[124].mxu1 }
 0x4f0   : > { %v16837_v19 = vpop.f32.mrb[127].mxu0  ;;  %v16856_v20 = vpop.f32.mrb[125].mxu1 }
 0x4f1   : > { %v13536_v21 = vadd.f32 %v16835_v16, %v13496_v10  ;;  %v16857_v22 = vadd.f32 %v16856_v20, %v16855_v18  ;;  %v16858_v23 = vpop.f32.mrb[126].mxu1 }
 0x4f2   : > { %v16859_v24 = vpop.f32.mrb[127].mxu1 }
 0x4f3   : > { %v13576_v25 = vadd.f32 %v16857_v22, %v13536_v21 }
 0x50d   : > { %v16877_v26 = vpop.f32.mrb[128].mxu0 }
 0x50e   : > { %v16878_v27 = vpop.f32.mrb[129].mxu0 }
 0x50f   : > { %v16879_v28 = vadd.f32 %v16878_v27, %v16877_v26  ;;  %v16880_v29 = vpop.f32.mrb[130].mxu0  ;;  %v16899_v31 = vpop.f32.mrb[128].mxu1  ;;  %v303_v26 = vld [vmem:[#allocation2] sm:$0x3] }
 0x510   : > { %v16881_v42 = vpop.f32.mrb[131].mxu0  ;;  %v16900_v32 = vpop.f32.mrb[129].mxu1 }
 0x511   : > { %v13616_v33 = vadd.f32 %v16879_v28, %v13576_v25  ;;  %v16901_v34 = vadd.f32 %v16900_v32, %v16899_v31  ;;  %v16902_v35 = vpop.f32.mrb[130].mxu1  ;;  %v14037_v31 = vld [vmem:[%s20165_s3] sm:$0xff] (!%p15446_p7)  ;;  %v14038_v42 = vld [vmem:[%s20165_s3 + $0x8] sm:$0xff] (!%p15446_p7)  ;;  %v14039_v32 = vld [vmem:[%s20165_s3 + $0x10] sm:$0xff] (!%p15446_p7) }
 0x512   : > { %v16903_v30 = vpop.f32.mrb[131].mxu1  ;;  %v14040_v35 = vld [vmem:[%s20165_s3 + $0x18] sm:$0xff] (!%p15446_p7) }
 0x513   : > { %v13656_v36 = vadd.f32 %v16901_v34, %v13616_v33  ;;  %v18490_v33 = vmov (!%p15446_p7), 0.0|0.0   ;;  %v17156_v34 = vpack.c.bf16 (!%p15446_p7), %v14038_v42, %v14037_v31  ;;  %v18492_v30 = vmov (!%p15446_p7), 0.0  }
 0x514   : > { %17155 = vmatprep.subr.bf16.mxu0 (!%p15446_p7), %v18490_v33  ;;  %17152 = vmatprep.mubr.msk.f32.mxu0 (!%p15446_p7), %vm18491_vm0, %v18492_v30 }
 0x515   : > { %17157 = vmatpush3.bf16.msra.mxu0 (!%p15446_p7), %v17156_v34 }
 0x516   : > { %17158 = vmatprep.subr.bf16.mxu0 (!%p15446_p7), %v18490_v33 }
 0x52d   : > { %v16921_v37 = vpop.f32.mrb[132].mxu0 }
 0x52e   : > { %v16922_v38 = vpop.f32.mrb[133].mxu0 }
 0x52f   : > { %v16923_v39 = vadd.f32 %v16922_v38, %v16921_v37  ;;  %v16924_v40 = vpop.f32.mrb[134].mxu0  ;;  %v16943_v41 = vpop.f32.mrb[132].mxu1  ;;  %v14041_v37 = vld [vmem:[%s20165_s3 + $0x20] sm:$0xff] (!%p15446_p7)  ;;  %v14042_v38 = vld [vmem:[%s20165_s3 + $0x28] sm:$0xff] (!%p15446_p7) }
 0x530   : > { %v16925_v43 = vpop.f32.mrb[135].mxu0  ;;  %v16944_v44 = vpop.f32.mrb[133].mxu1  ;;  %v14043_v40 = vld [vmem:[%s20165_s3 + $0x30] sm:$0xff] (!%p15446_p7) }
 0x531   : > { %v13696_v45 = vadd.f32 %v16923_v39, %v13656_v36  ;;  %v16945_v46 = vadd.f32 %v16944_v44, %v16943_v41  ;;  %v16946_v47 = vpop.f32.mrb[134].mxu1  ;;  %v17159_v36 = vpack.c.bf16 (!%p15446_p7), %v14040_v35, %v14039_v32  ;;  %v17162_v39 = vpack.c.bf16 (!%p15446_p7), %v14042_v38, %v14041_v37  ;;  %v14044_v41 = vld [vmem:[%s20165_s3 + $0x38] sm:$0xff] (!%p15446_p7)  ;;  %v14045_v44 = vld [vmem:[%s20165_s3 + $0x40] sm:$0xff] (!%p15446_p7) }
 0x532   : > { %v16947_v48 = vpop.f32.mrb[135].mxu1  ;;  %v17165_v43 = vpack.c.bf16 (!%p15446_p7), %v14044_v41, %v14043_v40  ;;  %v14047_v47 = vld [vmem:[%s20165_s3 + $0x50] sm:$0xff] (!%p15446_p7) }
 0x533   : > { %v13736_v49 = vadd.f32 %v16945_v46, %v13696_v45  ;;  %17160 = vmatpush3.bf16.msra.mxu0 (!%p15446_p7), %v17159_v36  ;;  %v14046_v45 = vld [vmem:[%s20165_s3 + $0x48] sm:$0xff] (!%p15446_p7)  ;;  %v14048_v48 = vld [vmem:[%s20165_s3 + $0x58] sm:$0xff] (!%p15446_p7) }
 0x534   : > { %17161 = vmatprep.subr.bf16.mxu0 (!%p15446_p7), %v18490_v33  ;;  %v17168_v46 = vpack.c.bf16 (!%p15446_p7), %v14046_v45, %v14045_v44 }
 0x537   : > { %17163 = vmatpush3.bf16.msra.mxu0 (!%p15446_p7), %v17162_v39 }
 0x538   : > { %17164 = vmatprep.subr.bf16.mxu0 (!%p15446_p7), %v18490_v33 }
 0x53b   : > { %17166 = vmatpush3.bf16.msra.mxu0 (!%p15446_p7), %v17165_v43 }
 0x53c   : > { %17167 = vmatprep.subr.bf16.mxu0 (!%p15446_p7), %v18490_v33 }
 0x53f   : > { %17169 = vmatpush3.bf16.msra.mxu0 (!%p15446_p7), %v17168_v46 }
 0x540   : > { %17170 = vmatprep.subr.bf16.mxu0 (!%p15446_p7), %v18490_v33 }
 0x54d   : > { %v16965_v50 = vpop.f32.mrb[136].mxu0 }
 0x54e   : > { %v16966_v52 = vpop.f32.mrb[137].mxu0 }
 0x54f   : > { %v16967_v53 = vadd.f32 %v16966_v52, %v16965_v50  ;;  %v16968_v54 = vpop.f32.mrb[138].mxu0  ;;  %v16987_v55 = vpop.f32.mrb[136].mxu1  ;;  %v14049_v50 = vld [vmem:[%s20165_s3 + $0x60] sm:$0xff] (!%p15446_p7)  ;;  %v14050_v52 = vld [vmem:[%s20165_s3 + $0x68] sm:$0xff] (!%p15446_p7) }
 0x550   : > { %v16969_v56 = vpop.f32.mrb[139].mxu0  ;;  %v16988_v57 = vpop.f32.mrb[137].mxu1 }
 0x551   : > { %v13776_v58 = vadd.f32 %v16967_v53, %v13736_v49  ;;  %v16989_v59 = vadd.f32 %v16988_v57, %v16987_v55  ;;  %v16990_v60 = vpop.f32.mrb[138].mxu1  ;;  %v17171_v49 = vpack.c.bf16 (!%p15446_p7), %v14048_v48, %v14047_v47  ;;  %v17174_v53 = vpack.c.bf16 (!%p15446_p7), %v14050_v52, %v14049_v50  ;;  %v15447_v55 = vld [vmem:[%s20164_s2] ss:$0 sm:$0xff] (!%p15446_p7)  ;;  %v14051_v56 = vld [vmem:[%s20165_s3 + $0x70] sm:$0xff] (!%p15446_p7)  ;;  %v14052_v57 = vld [vmem:[%s20165_s3 + $0x78] sm:$0xff] (!%p15446_p7) }
 0x552   : > { %v16991_v51 = vpop.f32.mrb[139].mxu1 }
 0x553   : > { %v13816_v61 = vadd.f32 %v16989_v59, %v13776_v58  ;;  %17172 = vmatpush3.bf16.msra.mxu0 (!%p15446_p7), %v17171_v49  ;;  %v17177_v59 = vpack.c.bf16 (!%p15446_p7), %v14052_v57, %v14051_v56  ;;  %v15448_v51 = vld [vmem:[%s20166_s4] ss:$0 sm:$0xff] (!%p15446_p7) }
 0x554   : > { %17173 = vmatprep.subr.bf16.mxu0 (!%p15446_p7), %v18490_v33 }
 0x557   : > { %17175 = vmatpush3.bf16.msra.mxu0 (!%p15446_p7), %v17174_v53 }
 0x558   : > { %17176 = vmatprep.subr.bf16.mxu0 (!%p15446_p7), %v18490_v33 }
 0x55b   : > { %17178 = vmatpush3.bf16.msra.mxu0 (!%p15446_p7), %v17177_v59 }
 0x56d   : > { %v17009_v62 = vpop.f32.mrb[140].mxu0 }
 0x56e   : > { %v17010_v63 = vpop.f32.mrb[141].mxu0 }
 0x56f   : > { %v17011_v0 = vadd.f32 %v17010_v63, %v17009_v62  ;;  %v17012_v1 = vpop.f32.mrb[142].mxu0  ;;  %v17031_v2 = vpop.f32.mrb[140].mxu1 }
 0x570   : > { %v17013_v3 = vpop.f32.mrb[143].mxu0  ;;  %v17032_v4 = vpop.f32.mrb[141].mxu1 }
 0x571   : > { %v13856_v5 = vadd.f32 %v17011_v0, %v13816_v61  ;;  %v17033_v6 = vadd.f32 %v17032_v4, %v17031_v2  ;;  %v17034_v7 = vpop.f32.mrb[142].mxu1 }
 0x572   : > { %v17035_v8 = vpop.f32.mrb[143].mxu1 }
 0x573   : > { %v13896_v9 = vadd.f32 %v17033_v6, %v13856_v5 }
 0x58d   : > { %v17053_v10 = vpop.f32.mrb[144].mxu0 }
 0x58e   : > { %v17054_v11 = vpop.f32.mrb[145].mxu0 }
 0x58f   : > { %v17055_v12 = vadd.f32 %v17054_v11, %v17053_v10  ;;  %v17056_v13 = vpop.f32.mrb[146].mxu0  ;;  %v17075_v14 = vpop.f32.mrb[144].mxu1 }
 0x590   : > { %v17057_v15 = vpop.f32.mrb[147].mxu0  ;;  %v17076_v16 = vpop.f32.mrb[145].mxu1 }
 0x591   : > { %v13936_v17 = vadd.f32 %v17055_v12, %v13896_v9  ;;  %v17077_v18 = vadd.f32 %v17076_v16, %v17075_v14  ;;  %v17078_v19 = vpop.f32.mrb[146].mxu1 }
 0x592   : > { %v17079_v20 = vpop.f32.mrb[147].mxu1 }
 0x593   : > { %v13976_v21 = vadd.f32 %v17077_v18, %v13936_v17 }
 0x5ad   : > { %v17097_v22 = vpop.f32.mrb[148].mxu0 }
 0x5ae   : > { %v17098_v23 = vpop.f32.mrb[149].mxu0 }
 0x5af   : > { %v17099_v24 = vadd.f32 %v17098_v23, %v17097_v22  ;;  %v17100_v25 = vpop.f32.mrb[150].mxu0  ;;  %14026 = sbr.rel (%p15446_p7) target bundleno = 1688 (0x698), region = 48 }
 0x5b0   : > { %v17101_v27 = vpop.f32.mrb[151].mxu0 }
 0x5b1   : > { %v14016_v28 = vadd.f32 %v17099_v24, %v13976_v21 }
 0x5b3   : > { %v14021_v29 = vadd.f32 %v14016_v28, %v303_v26 }
 0x5b5   : > { %14022 = vst [vmem:[#allocation2] sm:$0x3] %v14021_v29 }
 0x5bc   : > { %v14027_v54 = vld [vmem:[#allocation2] sm:$0x3] }
 0x5bd   : > { %v14035_v58 = vadd.f32 %v15447_v55, %v14027_v54 }
 0x5bf   : > { %v14036_v60 = vmax.f32 %v14035_v58, 0.0 }
 0x5c1   : > { %17153 = vmatmul.mubr.f32.vlgmr.msra.gmra.mrb[0].mxu0 %v14036_v60 }
 0x694   : > { %v14131_v61 = vpop.f32.mrb[0].mxu0 }
 0x695   : > { %v14132_v62 = vadd.f32 %v15448_v51, %v14131_v61  ;;  %v17154_v63 = vpop.f32.mrb[1].mxu0 }
 0x697   : > { %14136 = vst.msk [vmem:[#allocation3] sm:$0x3] %vm14135_vm1, %v14132_v62 }
 0x698 PF: > { %p20127_p8 = scmp.eq.s32.totalorder %s14238_s21, 1  ;;  %s18493_s27 = smov [#allocation3]  }
 0x699   : > { %s14146_s28 = sshll.u32 %s18493_s27, 4  ;;  %s14147_s28 = int_to_ptr.vmem [resolvable:$true] %s14146_s28 }
 0x69a   : > { %s18434_s29 = scalar_lea.vmem %s14147_s28, 32  ;;  %p18441_p12 = scmp.lt.s32.totalorder %s14147_s28, %s14147_s28 }
 0x69b   : > { %p18435_p9 = scmp.ne.s32.totalorder %s14147_s28, %s18434_s29  ;;  %p18442_p13 = scmp.lt.s32.totalorder %s18434_s29, %s18434_s29 }
 0x69d   : > { %p18436_p10 = pnand %p18435_p9, %p20127_p8  ;;  %p18443_p0 = por %p18442_p13, %p18441_p12 }
 0x69f   : > { %p18437_p11 = pneg %p18436_p10 }
 0x6a1   : > { %p18444_p1 = pnand %p18443_p0, %p18437_p11 }
 0x6a3   : > { %18447 = shalt.err (!%p18444_p1)
}
 0x6a4   : > { %s18448_s21 = scalar_lea.hbm %s20167_s5, 32 }
 0x6a5   : > { %p18449_p2 = scmp.ne.s32.totalorder %s20167_s5, %s18448_s21  ;;  %p18454_p5 = scmp.lt.u32.totalorder %s18448_s21, %s20167_s5 }
 0x6a7   : > { %p18450_p3 = pnand %p18449_p2, %p20127_p8 }
 0x6a9   : > { %p18451_p4 = pneg %p18450_p3 }
 0x6ab   : > { %p18456_p6 = pnand %p18454_p5, %p18451_p4 }
 0x6ad   : > { %18459 = shalt.err (!%p18456_p6)
}
 0x6ae   : > { %17180 = dma.vmem_to_hbm [thread:$0]  (%p20127_p8), %s14147_s28, 32, %s20167_s5, [#allocation4]  }
 0x6af   : > { %18473 = dma.done.wait (%p20127_p8), [#allocation4], 32  }
 0x6b0   : > { %18475 = vsyncadd (%p20127_p8), [#allocation4], 4294967264 }
 0x6b1 PF: > { %s16_s20 = sadd.s32 1, %s18486_s20   ;;  %s20169_s18 = smov %s18482_s19 }
 0x6b2   : > { %p13_p7 = scmp.ge.s32.totalorder %s16_s20, 4   ;;  %s20170_s19 = smov %s20172_s22 }
 0x6b4   :  { %15 = sbr.rel (!%p13_p7) target bundleno = 2 (0x2), region = 85 }
 0x6bb   :  { %14159 = vsyncpa [#allocation4], 1 }
 0x6bc   :  { %14161 = vsyncpa [#allocation4 + $0x1], 1 }

</bundles_post_ra>
